<compile_context>
chip_gen: v5e
topology: v5e:2x2
jax: 0.10.0
libtpu: 0.0.40
codegen_flags: <defaults>
</compile_context>

<pallas_src>
import functools

import jax
import jax.numpy as jnp
from jax.experimental import pallas as pl
from jax.experimental.pallas import tpu as pltpu


_VSPEC = pl.BlockSpec(memory_space=pltpu.MemorySpace.VMEM)
_VMEM_LIMIT = 32 * 1024 * 1024   # conservative: leaves headroom on v7x (64 MiB)


def _round_up(x, m):
    return (x + m - 1) // m * m


# ----------------------------------------------------------------------------
# Kernel 1: stem conv (7x7 / stride 2) as (M, K) @ (K, Cout_pad) matmul
# ----------------------------------------------------------------------------
def _stem_kernel(p_ref, w_ref, b_ref, o_ref):
    acc = jnp.dot(p_ref[...], w_ref[...], preferred_element_type=jnp.float32)
    o_ref[...] = jnp.maximum(acc + b_ref[...], 0.0).astype(o_ref.dtype)


def _pick_tile_m(m):
    """Prefer >=2 grid steps (v7x megacore / pipeline); never pad M on host."""
    for t in (256, 128):
        if m % t == 0 and m // t >= 2:
            return t
    if m % 128 == 0:
        return 128
    return m   # ragged or tiny M: single full block, no host-side jnp.pad


def _im2col(x_nchw, kh, kw, stride, pad):
    """(B,C,H,W) f32 -> patches (B*Ho*Wo, kh*kw*C) bf16 (M on sublanes)."""
    b, c, h, w = x_nchw.shape
    xp = jnp.pad(x_nchw, ((0, 0), (0, 0), (pad, pad), (pad, pad)))
    ho = (h + 2 * pad - kh) // stride + 1
    wo = (w + 2 * pad - kw) // stride + 1
    cols = []
    for i in range(kh):
        for j in range(kw):
            cols.append(xp[:, :, i:i + stride * ho:stride,
                           j:j + stride * wo:stride])
    p = jnp.stack(cols, axis=0)                  # (kh*kw, B, C, Ho, Wo)
    p = p.transpose(1, 3, 4, 0, 2)               # (B, Ho, Wo, kh*kw, C)
    return p.reshape(b * ho * wo, kh * kw * c).astype(jnp.bfloat16), ho, wo


def stem_conv_bn_relu(x_nchw, stem):
    patches, ho, wo = _im2col(x_nchw, stem['kh'], stem['kw'],
                              stem['stride'], stem['pad'])
    m, k = patches.shape
    n_pad = stem['w'].shape[1]
    tm = _pick_tile_m(m)
    cost = pl.CostEstimate(
        flops=2 * m * k * n_pad, transcendentals=0,
        bytes_accessed=int(patches.size * 2 + stem['w'].size * 2
                           + stem['b'].size * 4 + m * n_pad * 2))
    out = pl.pallas_call(
        _stem_kernel,
        out_shape=jax.ShapeDtypeStruct((m, n_pad), jnp.bfloat16),
        grid=(m // tm,),
        in_specs=[pl.BlockSpec((tm, k), lambda i: (i, 0)),       # streamed M
                  pl.BlockSpec((k, n_pad), lambda i: (0, 0)),    # VMEM-resident
                  pl.BlockSpec((1, n_pad), lambda i: (0, 0))],
        out_specs=pl.BlockSpec((tm, n_pad), lambda i: (i, 0)),   # lane-dense
        compiler_params=pltpu.CompilerParams(
            dimension_semantics=("parallel",),
            allow_input_fusion=[True, False, False],
            vmem_limit_bytes=_VMEM_LIMIT),
        cost_estimate=cost,
    )(patches, stem['w'], stem['b'])
    return out, ho, wo


def maxpool_3x3_s2(x_nchw):
    """PyTorch MaxPool2d(kernel_size=3, stride=2, padding=1) on (B,C,H,W)."""
    init = jnp.array(-jnp.inf, dtype=x_nchw.dtype)
    return jax.lax.reduce_window(
        x_nchw, init, jax.lax.max,
        window_dimensions=(1, 1, 3, 3), window_strides=(1, 1, 2, 2),
        padding=[(0, 0), (0, 0), (1, 1), (1, 1)])


# ----------------------------------------------------------------------------
# Kernel 2: entire post-stem trunk (layers 1-4 + avgpool + fc), one invocation
# ----------------------------------------------------------------------------
def _trunk_kernel(*refs, block_plan):
    x_ref, out_ref = refs[0], refs[-1]
    prm = refs[1:-1]
    pos = [0]

    def nxt():
        r = prm[pos[0]]
        pos[0] += 1
        return r[...]

    x = x_ref[...]                                       # (B, C*H*W) bf16
    for has_down in block_plan:                          # BasicBlock chain
        t1, b1, t2, b2 = nxt(), nxt(), nxt(), nxt()
        if has_down:
            td, bd = nxt(), nxt()
        h = jnp.dot(x, t1, preferred_element_type=jnp.float32) + b1
        h = jnp.maximum(h, 0.0).astype(jnp.bfloat16)     # conv1+bn1+relu
        y = jnp.dot(h, t2, preferred_element_type=jnp.float32) + b2
        if has_down:                                     # downsample path
            idn = jnp.dot(x, td, preferred_element_type=jnp.float32) + bd
        else:
            idn = x.astype(jnp.float32)
        x = jnp.maximum(y + idn, 0.0).astype(jnp.bfloat16)
    pool, fcw, fcb = nxt(), nxt(), nxt()
    pooled = jnp.dot(x, pool, preferred_element_type=jnp.float32)   # avgpool
    logits = jnp.dot(pooled.astype(jnp.bfloat16), fcw,
                     preferred_element_type=jnp.float32) + fcb      # fc
    out_ref[...] = logits                                # (B, 128) lane-dense


def trunk_forward(xflat, prep):
    ops = prep['trunk_ops']
    b = xflat.shape[0]
    n_out = prep['fc_pad']
    mats = [a for a in ops if a.shape[0] > 1]            # matmul operands
    flops = 2 * b * sum(int(a.shape[0]) * int(a.shape[1]) for a in mats)
    bytes_acc = int(xflat.size * 2 + b * n_out * 4
                    + sum(int(a.size) * a.dtype.itemsize for a in ops))
    kernel = functools.partial(_trunk_kernel, block_plan=prep['block_plan'])
    return pl.pallas_call(
        kernel,
        out_shape=jax.ShapeDtypeStruct((b, n_out), jnp.float32),
        in_specs=[_VSPEC] * (1 + len(ops)),
        out_specs=_VSPEC,
        compiler_params=pltpu.CompilerParams(vmem_limit_bytes=_VMEM_LIMIT),
        cost_estimate=pl.CostEstimate(flops=flops, transcendentals=0,
                                      bytes_accessed=bytes_acc),
    )(xflat, *ops)


# ----------------------------------------------------------------------------
# Parameters: PyTorch-layout init + one-time kernel-ready preparation
# ----------------------------------------------------------------------------
def init_bn(c):
    # PyTorch BatchNorm2d defaults: gamma=1, beta=0, running_mean=0, var=1
    return (jnp.ones((c,), jnp.float32), jnp.zeros((c,), jnp.float32),
            jnp.zeros((c,), jnp.float32), jnp.ones((c,), jnp.float32))


def init_conv(key, cout, cin, k):
    fan_in = cin * k * k
    std = (2.0 / fan_in) ** 0.5
    return jax.random.normal(key, (cout, cin, k, k), jnp.float32) * std


def make_params(key, in_ch=3, base=8, planes=(8, 16, 32, 64),
                blocks=(2, 2, 2, 2), num_classes=10):
    keys = iter(jax.random.split(key, 64))
    params = {'conv1_w': init_conv(next(keys), base, in_ch, 7),
              'bn1': init_bn(base)}
    inplanes = base
    for li, (pl_, nb) in enumerate(zip(planes, blocks)):
        layer = []
        for bi in range(nb):
            stride = 2 if (bi == 0 and li > 0) else 1
            blk = {'stride': stride,
                   'conv1_w': init_conv(next(keys), pl_, inplanes, 3),
                   'bn1': init_bn(pl_),
                   'conv2_w': init_conv(next(keys), pl_, pl_, 3),
                   'bn2': init_bn(pl_)}
            if stride != 1 or inplanes != pl_:
                blk['down_w'] = init_conv(next(keys), pl_, inplanes, 1)
                blk['down_bn'] = init_bn(pl_)
            layer.append(blk)
            inplanes = pl_
        params[f'layer{li + 1}'] = layer
    bound = 1.0 / (inplanes ** 0.5)
    params['fc_w'] = jax.random.uniform(next(keys), (num_classes, inplanes),
                                        jnp.float32, -bound, bound)
    params['fc_b'] = jax.random.uniform(next(keys), (num_classes,),
                                        jnp.float32, -bound, bound)
    return params


def fold_bn(bn, eps=1e-5):
    gamma, beta, mean, var = bn
    scale = gamma / jnp.sqrt(var + eps)
    return scale, beta - mean * scale


def prep_conv_matrix(w, bn, stride, pad, hin, win):
    """conv(Cout,Cin,kh,kw)+BN -> block-Toeplitz T (Cin*Hi*Wi, Cout*Ho*Wo) bf16
    and spatially-broadcast bias (1, Cout*Ho*Wo) f32 (NCHW flatten order)."""
    cout, cin, _, _ = w.shape
    scale, bias = fold_bn(bn)
    wf = (w * scale[:, None, None, None]).astype(jnp.float32)
    k = cin * hin * win
    eye = jnp.eye(k, dtype=jnp.float32).reshape(k, cin, hin, win)
    y = jax.lax.conv_general_dilated(
        eye, wf, (stride, stride), [(pad, pad), (pad, pad)],
        dimension_numbers=('NCHW', 'OIHW', 'NCHW'))
    _, _, ho, wo = y.shape
    t = y.reshape(k, cout * ho * wo).astype(jnp.bfloat16)
    b = jnp.repeat(bias, ho * wo).reshape(1, -1).astype(jnp.float32)
    return t, b, ho, wo


def prepare_params(params, image_hw=(32, 32), lane_pad=128):
    """One-time prep: stem weight (K, 128-lane-padded Cout), trunk Toeplitz
    operators per conv, avgpool matrix, padded fc — all kernel-ready."""
    prep = {}
    # --- stem (im2col matmul orientation: (M,K)@(K,Cout_pad)) ---
    w = params['conv1_w']
    scale, bias = fold_bn(params['bn1'])
    cout = w.shape[0]
    wf = w * scale[:, None, None, None]
    wmat = jnp.transpose(wf, (2, 3, 1, 0)).reshape(-1, cout)   # (kh*kw*Cin,Cout)
    k = wmat.shape[0]
    n_pad = _round_up(cout, lane_pad)
    w_pad = jnp.zeros((k, n_pad), jnp.bfloat16).at[:, :cout].set(
        wmat.astype(jnp.bfloat16))
    b_pad = jnp.zeros((1, n_pad), jnp.float32).at[:, :cout].set(bias)
    prep['stem'] = {'w': w_pad, 'b': b_pad, 'cout': cout,
                    'kh': 7, 'kw': 7, 'stride': 2, 'pad': 3}
    # --- spatial bookkeeping: stem conv then maxpool ---
    h, w_sp = image_hw
    h, w_sp = (h + 6 - 7) // 2 + 1, (w_sp + 6 - 7) // 2 + 1
    h, w_sp = (h + 2 - 3) // 2 + 1, (w_sp + 2 - 3) // 2 + 1
    # --- trunk: per-conv Toeplitz operators + biases ---
    ops, plan = [], []
    for lname in ('layer1', 'layer2', 'layer3', 'layer4'):
        for blk in params[lname]:
            stride = blk['stride']
            t1, b1, ho, wo = prep_conv_matrix(blk['conv1_w'], blk['bn1'],
                                              stride, 1, h, w_sp)
            t2, b2, _, _ = prep_conv_matrix(blk['conv2_w'], blk['bn2'],
                                            1, 1, ho, wo)
            has_down = 'down_w' in blk
            ops += [t1, b1, t2, b2]
            if has_down:
                td, bd, _, _ = prep_conv_matrix(blk['down_w'], blk['down_bn'],
                                                stride, 0, h, w_sp)
                ops += [td, bd]
            plan.append(has_down)
            h, w_sp = ho, wo
    # --- avgpool (C*H*W -> C) matrix and padded fc ---
    c_final = params['fc_w'].shape[1]
    hw = h * w_sp
    pool = jnp.kron(jnp.eye(c_final, dtype=jnp.float32),
                    jnp.full((hw, 1), 1.0 / hw, jnp.float32))
    ops.append(pool.astype(jnp.bfloat16))
    num_classes = params['fc_w'].shape[0]
    nc_pad = _round_up(num_classes, lane_pad)
    fcw = jnp.zeros((c_final, nc_pad), jnp.bfloat16).at[:, :num_classes].set(
        params['fc_w'].T.astype(jnp.bfloat16))
    fcb = jnp.zeros((1, nc_pad), jnp.float32).at[:, :num_classes].set(
        params['fc_b'])
    ops += [fcw, fcb]
    prep['trunk_ops'] = ops
    prep['block_plan'] = tuple(plan)
    prep['num_classes'] = num_classes
    prep['fc_pad'] = nc_pad
    return prep


# ----------------------------------------------------------------------------
# Forward pass (mirrors ResNet_BFP.forward)
# ----------------------------------------------------------------------------
def resnet_bfp_forward(x_nchw, prep):
    b = x_nchw.shape[0]
    stem = prep['stem']
    y, ho, wo = stem_conv_bn_relu(x_nchw, stem)        # conv1 + bn1 + relu
    y = y[:, :stem['cout']].reshape(b, ho, wo, stem['cout'])
    y = y.transpose(0, 3, 1, 2)                        # (B, C, H, W) bf16
    y = maxpool_3x3_s2(y)                              # maxpool
    xflat = y.reshape(b, -1)                           # NCHW flatten (B, C*H*W)
    logits = trunk_forward(xflat, prep)                # layers1-4 + avgpool + fc
    return logits[:, :prep['num_classes']]             # (B, num_classes) f32


# ----------------------------------------------------------------------------
if __name__ == "__main__":
    key = jax.random.PRNGKey(0)
    kx, kp = jax.random.split(key)
    x = jax.random.normal(kx, (2, 3, 32, 32), jnp.float32)   # NCHW input
    params = make_params(kp)
    prep = prepare_params(params, image_hw=(32, 32))         # one-time prep

    fwd = jax.jit(lambda xin: resnet_bfp_forward(xin, prep))
    out = jax.block_until_ready(fwd(x))
    assert out.shape == (2, 10) and out.dtype == jnp.float32
    assert bool(jnp.all(jnp.isfinite(out)))
    print("KERNEL_OK")
</pallas_src>

<mosaic_0001>
module attributes {stable_mosaic.version = 11 : i64} {
  func.func @_stem_kernel(%arg0: i32, %arg1: memref<256x147xbf16, #tpu.memory_space<vmem>>, %arg2: memref<147x128xbf16, #tpu.memory_space<vmem>>, %arg3: memref<1x128xf32, #tpu.memory_space<vmem>>, %arg4: memref<256x128xbf16, #tpu.memory_space<vmem>>) attributes {dimension_semantics = [#tpu.dimension_semantics<parallel>], iteration_bounds = array<i64: 2>, scalar_prefetch = 0 : i64, scratch_operands = 0 : i64, tpu.core_type = #tpu.core_type<tc>, window_params = [{transform_indices = @transform_0, window_bounds = array<i64: 256, 147>}, {pipeline_mode = #tpu.pipeline_mode<synchronous>, transform_indices = @transform_1, window_bounds = array<i64: 147, 128>}, {pipeline_mode = #tpu.pipeline_mode<synchronous>, transform_indices = @transform_2, window_bounds = array<i64: 1, 128>}, {transform_indices = @transform_3, window_bounds = array<i64: 256, 128>}]} {
    %c0 = arith.constant 0 : index
    %c0_0 = arith.constant 0 : index
    %0 = vector.load %arg1[%c0, %c0_0] : memref<256x147xbf16, #tpu.memory_space<vmem>>, vector<256x147xbf16>
    %c0_1 = arith.constant 0 : index
    %c0_2 = arith.constant 0 : index
    %1 = vector.load %arg2[%c0_1, %c0_2] : memref<147x128xbf16, #tpu.memory_space<vmem>>, vector<147x128xbf16>
    %cst = arith.constant dense<0.000000e+00> : vector<256x128xf32>
    %2 = tpu.matmul %0, %1, %cst {dimension_numbers = #tpu.dot_dimension_numbers<[1], [0], [0], [1], [0, 0, 1, 1], [], []>} : vector<256x147xbf16>, vector<147x128xbf16>, vector<256x128xf32> -> vector<256x128xf32>
    %c0_3 = arith.constant 0 : index
    %c0_4 = arith.constant 0 : index
    %3 = vector.load %arg3[%c0_3, %c0_4] : memref<1x128xf32, #tpu.memory_space<vmem>>, vector<1x128xf32>
    %4 = vector.broadcast %3 : vector<1x128xf32> to vector<256x128xf32>
    %5 = arith.addf %2, %4 : vector<256x128xf32>
    %cst_5 = arith.constant 0.000000e+00 : f32
    %6 = vector.broadcast %cst_5 : f32 to vector<256x128xf32>
    %7 = arith.maximumf %5, %6 : vector<256x128xf32>
    %8 = arith.truncf %7 : vector<256x128xf32> to vector<256x128xbf16>
    %c0_6 = arith.constant 0 : index
    %c0_7 = arith.constant 0 : index
    %9 = vector.load %arg4[%c0_6, %c0_7] : memref<256x128xbf16, #tpu.memory_space<vmem>>, vector<256x128xbf16>
    tpu.vector_store %arg4[%c0_6, %c0_7], %8 {strides = array<i32>} : memref<256x128xbf16, #tpu.memory_space<vmem>>, vector<256x128xbf16>,
    return
  }
  func.func @transform_0(%arg0: i32) -> (i32, i32) {
    %c0_i32 = arith.constant 0 : i32
    %c0_i32_0 = arith.constant 0 : i32
    return %arg0, %c0_i32 : i32, i32
  }
  func.func @transform_1(%arg0: i32) -> (i32, i32) {
    %c0_i32 = arith.constant 0 : i32
    %c0_i32_0 = arith.constant 0 : i32
    %c0_i32_1 = arith.constant 0 : i32
    return %c0_i32, %c0_i32_0 : i32, i32
  }
  func.func @transform_2(%arg0: i32) -> (i32, i32) {
    %c0_i32 = arith.constant 0 : i32
    %c0_i32_0 = arith.constant 0 : i32
    %c0_i32_1 = arith.constant 0 : i32
    return %c0_i32, %c0_i32_0 : i32, i32
  }
  func.func @transform_3(%arg0: i32) -> (i32, i32) {
    %c0_i32 = arith.constant 0 : i32
    %c0_i32_0 = arith.constant 0 : i32
    return %arg0, %c0_i32 : i32, i32
  }
}

module attributes {stable_mosaic.version = 11 : i64} {
  func.func @_trunk_kernel(%arg0: memref<2x512xbf16, #tpu.memory_space<vmem>>, %arg1: memref<512x512xbf16, #tpu.memory_space<vmem>>, %arg2: memref<1x512xf32, #tpu.memory_space<vmem>>, %arg3: memref<512x512xbf16, #tpu.memory_space<vmem>>, %arg4: memref<1x512xf32, #tpu.memory_space<vmem>>, %arg5: memref<512x512xbf16, #tpu.memory_space<vmem>>, %arg6: memref<1x512xf32, #tpu.memory_space<vmem>>, %arg7: memref<512x512xbf16, #tpu.memory_space<vmem>>, %arg8: memref<1x512xf32, #tpu.memory_space<vmem>>, %arg9: memref<512x256xbf16, #tpu.memory_space<vmem>>, %arg10: memref<1x256xf32, #tpu.memory_space<vmem>>, %arg11: memref<256x256xbf16, #tpu.memory_space<vmem>>, %arg12: memref<1x256xf32, #tpu.memory_space<vmem>>, %arg13: memref<512x256xbf16, #tpu.memory_space<vmem>>, %arg14: memref<1x256xf32, #tpu.memory_space<vmem>>, %arg15: memref<256x256xbf16, #tpu.memory_space<vmem>>, %arg16: memref<1x256xf32, #tpu.memory_space<vmem>>, %arg17: memref<256x256xbf16, #tpu.memory_space<vmem>>, %arg18: memref<1x256xf32, #tpu.memory_space<vmem>>, %arg19: memref<256x128xbf16, #tpu.memory_space<vmem>>, %arg20: memref<1x128xf32, #tpu.memory_space<vmem>>, %arg21: memref<128x128xbf16, #tpu.memory_space<vmem>>, %arg22: memref<1x128xf32, #tpu.memory_space<vmem>>, %arg23: memref<256x128xbf16, #tpu.memory_space<vmem>>, %arg24: memref<1x128xf32, #tpu.memory_space<vmem>>, %arg25: memref<128x128xbf16, #tpu.memory_space<vmem>>, %arg26: memref<1x128xf32, #tpu.memory_space<vmem>>, %arg27: memref<128x128xbf16, #tpu.memory_space<vmem>>, %arg28: memref<1x128xf32, #tpu.memory_space<vmem>>, %arg29: memref<128x64xbf16, #tpu.memory_space<vmem>>, %arg30: memref<1x64xf32, #tpu.memory_space<vmem>>, %arg31: memref<64x64xbf16, #tpu.memory_space<vmem>>, %arg32: memref<1x64xf32, #tpu.memory_space<vmem>>, %arg33: memref<128x64xbf16, #tpu.memory_space<vmem>>, %arg34: memref<1x64xf32, #tpu.memory_space<vmem>>, %arg35: memref<64x64xbf16, #tpu.memory_space<vmem>>, %arg36: memref<1x64xf32, #tpu.memory_space<vmem>>, %arg37: memref<64x64xbf16, #tpu.memory_space<vmem>>, %arg38: memref<1x64xf32, #tpu.memory_space<vmem>>, %arg39: memref<64x64xbf16, #tpu.memory_space<vmem>>, %arg40: memref<64x128xbf16, #tpu.memory_space<vmem>>, %arg41: memref<1x128xf32, #tpu.memory_space<vmem>>, %arg42: memref<2x128xf32, #tpu.memory_space<vmem>>) attributes {dimension_semantics = [], scalar_prefetch = 0 : i64, scratch_operands = 0 : i64, tpu.core_type = #tpu.core_type<tc>} {
    %c0 = arith.constant 0 : index
    %c0_0 = arith.constant 0 : index
    %0 = vector.load %arg0[%c0, %c0_0] : memref<2x512xbf16, #tpu.memory_space<vmem>>, vector<2x512xbf16>
    %c0_1 = arith.constant 0 : index
    %c0_2 = arith.constant 0 : index
    %1 = vector.load %arg1[%c0_1, %c0_2] : memref<512x512xbf16, #tpu.memory_space<vmem>>, vector<512x512xbf16>
    %c0_3 = arith.constant 0 : index
    %c0_4 = arith.constant 0 : index
    %2 = vector.load %arg2[%c0_3, %c0_4] : memref<1x512xf32, #tpu.memory_space<vmem>>, vector<1x512xf32>
    %c0_5 = arith.constant 0 : index
    %c0_6 = arith.constant 0 : index
    %3 = vector.load %arg3[%c0_5, %c0_6] : memref<512x512xbf16, #tpu.memory_space<vmem>>, vector<512x512xbf16>
    %c0_7 = arith.constant 0 : index
    %c0_8 = arith.constant 0 : index
    %4 = vector.load %arg4[%c0_7, %c0_8] : memref<1x512xf32, #tpu.memory_space<vmem>>, vector<1x512xf32>
    %cst = arith.constant dense<0.000000e+00> : vector<2x512xf32>
    %5 = tpu.matmul %0, %1, %cst {dimension_numbers = #tpu.dot_dimension_numbers<[1], [0], [0], [1], [0, 0, 1, 1], [], []>} : vector<2x512xbf16>, vector<512x512xbf16>, vector<2x512xf32> -> vector<2x512xf32>
    %6 = vector.broadcast %2 : vector<1x512xf32> to vector<2x512xf32>
    %7 = arith.addf %5, %6 : vector<2x512xf32>
    %cst_9 = arith.constant 0.000000e+00 : f32
    %8 = vector.broadcast %cst_9 : f32 to vector<2x512xf32>
    %9 = arith.maximumf %7, %8 : vector<2x512xf32>
    %10 = arith.truncf %9 : vector<2x512xf32> to vector<2x512xbf16>
    %cst_10 = arith.constant dense<0.000000e+00> : vector<2x512xf32>
    %11 = tpu.matmul %10, %3, %cst_10 {dimension_numbers = #tpu.dot_dimension_numbers<[1], [0], [0], [1], [0, 0, 1, 1], [], []>} : vector<2x512xbf16>, vector<512x512xbf16>, vector<2x512xf32> -> vector<2x512xf32>
    %12 = vector.broadcast %4 : vector<1x512xf32> to vector<2x512xf32>
    %13 = arith.addf %11, %12 : vector<2x512xf32>
    %14 = arith.extf %0 : vector<2x512xbf16> to vector<2x512xf32>
    %15 = arith.addf %13, %14 : vector<2x512xf32>
    %cst_11 = arith.constant 0.000000e+00 : f32
    %16 = vector.broadcast %cst_11 : f32 to vector<2x512xf32>
    %17 = arith.maximumf %15, %16 : vector<2x512xf32>
    %18 = arith.truncf %17 : vector<2x512xf32> to vector<2x512xbf16>
    %c0_12 = arith.constant 0 : index
    %c0_13 = arith.constant 0 : index
    %19 = vector.load %arg5[%c0_12, %c0_13] : memref<512x512xbf16, #tpu.memory_space<vmem>>, vector<512x512xbf16>
    %c0_14 = arith.constant 0 : index
    %c0_15 = arith.constant 0 : index
    %20 = vector.load %arg6[%c0_14, %c0_15] : memref<1x512xf32, #tpu.memory_space<vmem>>, vector<1x512xf32>
    %c0_16 = arith.constant 0 : index
    %c0_17 = arith.constant 0 : index
    %21 = vector.load %arg7[%c0_16, %c0_17] : memref<512x512xbf16, #tpu.memory_space<vmem>>, vector<512x512xbf16>
    %c0_18 = arith.constant 0 : index
    %c0_19 = arith.constant 0 : index
    %22 = vector.load %arg8[%c0_18, %c0_19] : memref<1x512xf32, #tpu.memory_space<vmem>>, vector<1x512xf32>
    %cst_20 = arith.constant dense<0.000000e+00> : vector<2x512xf32>
    %23 = tpu.matmul %18, %19, %cst_20 {dimension_numbers = #tpu.dot_dimension_numbers<[1], [0], [0], [1], [0, 0, 1, 1], [], []>} : vector<2x512xbf16>, vector<512x512xbf16>, vector<2x512xf32> -> vector<2x512xf32>
    %24 = vector.broadcast %20 : vector<1x512xf32> to vector<2x512xf32>
    %25 = arith.addf %23, %24 : vector<2x512xf32>
    %cst_21 = arith.constant 0.000000e+00 : f32
    %26 = vector.broadcast %cst_21 : f32 to vector<2x512xf32>
    %27 = arith.maximumf %25, %26 : vector<2x512xf32>
    %28 = arith.truncf %27 : vector<2x512xf32> to vector<2x512xbf16>
    %cst_22 = arith.constant dense<0.000000e+00> : vector<2x512xf32>
    %29 = tpu.matmul %28, %21, %cst_22 {dimension_numbers = #tpu.dot_dimension_numbers<[1], [0], [0], [1], [0, 0, 1, 1], [], []>} : vector<2x512xbf16>, vector<512x512xbf16>, vector<2x512xf32> -> vector<2x512xf32>
    %30 = vector.broadcast %22 : vector<1x512xf32> to vector<2x512xf32>
    %31 = arith.addf %29, %30 : vector<2x512xf32>
    %32 = arith.extf %18 : vector<2x512xbf16> to vector<2x512xf32>
    %33 = arith.addf %31, %32 : vector<2x512xf32>
    %cst_23 = arith.constant 0.000000e+00 : f32
    %34 = vector.broadcast %cst_23 : f32 to vector<2x512xf32>
    %35 = arith.maximumf %33, %34 : vector<2x512xf32>
    %36 = arith.truncf %35 : vector<2x512xf32> to vector<2x512xbf16>
    %c0_24 = arith.constant 0 : index
    %c0_25 = arith.constant 0 : index
    %37 = vector.load %arg9[%c0_24, %c0_25] : memref<512x256xbf16, #tpu.memory_space<vmem>>, vector<512x256xbf16>
    %c0_26 = arith.constant 0 : index
    %c0_27 = arith.constant 0 : index
    %38 = vector.load %arg10[%c0_26, %c0_27] : memref<1x256xf32, #tpu.memory_space<vmem>>, vector<1x256xf32>
    %c0_28 = arith.constant 0 : index
    %c0_29 = arith.constant 0 : index
    %39 = vector.load %arg11[%c0_28, %c0_29] : memref<256x256xbf16, #tpu.memory_space<vmem>>, vector<256x256xbf16>
    %c0_30 = arith.constant 0 : index
    %c0_31 = arith.constant 0 : index
    %40 = vector.load %arg12[%c0_30, %c0_31] : memref<1x256xf32, #tpu.memory_space<vmem>>, vector<1x256xf32>
    %c0_32 = arith.constant 0 : index
    %c0_33 = arith.constant 0 : index
    %41 = vector.load %arg13[%c0_32, %c0_33] : memref<512x256xbf16, #tpu.memory_space<vmem>>, vector<512x256xbf16>
    %c0_34 = arith.constant 0 : index
    %c0_35 = arith.constant 0 : index
    %42 = vector.load %arg14[%c0_34, %c0_35] : memref<1x256xf32, #tpu.memory_space<vmem>>, vector<1x256xf32>
    %cst_36 = arith.constant dense<0.000000e+00> : vector<2x256xf32>
    %43 = tpu.matmul %36, %37, %cst_36 {dimension_numbers = #tpu.dot_dimension_numbers<[1], [0], [0], [1], [0, 0, 1, 1], [], []>} : vector<2x512xbf16>, vector<512x256xbf16>, vector<2x256xf32> -> vector<2x256xf32>
    %44 = vector.broadcast %38 : vector<1x256xf32> to vector<2x256xf32>
    %45 = arith.addf %43, %44 : vector<2x256xf32>
    %cst_37 = arith.constant 0.000000e+00 : f32
    %46 = vector.broadcast %cst_37 : f32 to vector<2x256xf32>
    %47 = arith.maximumf %45, %46 : vector<2x256xf32>
    %48 = arith.truncf %47 : vector<2x256xf32> to vector<2x256xbf16>
    %cst_38 = arith.constant dense<0.000000e+00> : vector<2x256xf32>
    %49 = tpu.matmul %48, %39, %cst_38 {dimension_numbers = #tpu.dot_dimension_numbers<[1], [0], [0], [1], [0, 0, 1, 1], [], []>} : vector<2x256xbf16>, vector<256x256xbf16>, vector<2x256xf32> -> vector<2x256xf32>
    %50 = vector.broadcast %40 : vector<1x256xf32> to vector<2x256xf32>
    %51 = arith.addf %49, %50 : vector<2x256xf32>
    %cst_39 = arith.constant dense<0.000000e+00> : vector<2x256xf32>
    %52 = tpu.matmul %36, %41, %cst_39 {dimension_numbers = #tpu.dot_dimension_numbers<[1], [0], [0], [1], [0, 0, 1, 1], [], []>} : vector<2x512xbf16>, vector<512x256xbf16>, vector<2x256xf32> -> vector<2x256xf32>
    %53 = vector.broadcast %42 : vector<1x256xf32> to vector<2x256xf32>
    %54 = arith.addf %52, %53 : vector<2x256xf32>
    %55 = arith.addf %51, %54 : vector<2x256xf32>
    %cst_40 = arith.constant 0.000000e+00 : f32
    %56 = vector.broadcast %cst_40 : f32 to vector<2x256xf32>
    %57 = arith.maximumf %55, %56 : vector<2x256xf32>
    %58 = arith.truncf %57 : vector<2x256xf32> to vector<2x256xbf16>
    %c0_41 = arith.constant 0 : index
    %c0_42 = arith.constant 0 : index
    %59 = vector.load %arg15[%c0_41, %c0_42] : memref<256x256xbf16, #tpu.memory_space<vmem>>, vector<256x256xbf16>
    %c0_43 = arith.constant 0 : index
    %c0_44 = arith.constant 0 : index
    %60 = vector.load %arg16[%c0_43, %c0_44] : memref<1x256xf32, #tpu.memory_space<vmem>>, vector<1x256xf32>
    %c0_45 = arith.constant 0 : index
    %c0_46 = arith.constant 0 : index
    %61 = vector.load %arg17[%c0_45, %c0_46] : memref<256x256xbf16, #tpu.memory_space<vmem>>, vector<256x256xbf16>
    %c0_47 = arith.constant 0 : index
    %c0_48 = arith.constant 0 : index
    %62 = vector.load %arg18[%c0_47, %c0_48] : memref<1x256xf32, #tpu.memory_space<vmem>>, vector<1x256xf32>
    %cst_49 = arith.constant dense<0.000000e+00> : vector<2x256xf32>
    %63 = tpu.matmul %58, %59, %cst_49 {dimension_numbers = #tpu.dot_dimension_numbers<[1], [0], [0], [1], [0, 0, 1, 1], [], []>} : vector<2x256xbf16>, vector<256x256xbf16>, vector<2x256xf32> -> vector<2x256xf32>
    %64 = vector.broadcast %60 : vector<1x256xf32> to vector<2x256xf32>
    %65 = arith.addf %63, %64 : vector<2x256xf32>
    %cst_50 = arith.constant 0.000000e+00 : f32
    %66 = vector.broadcast %cst_50 : f32 to vector<2x256xf32>
    %67 = arith.maximumf %65, %66 : vector<2x256xf32>
    %68 = arith.truncf %67 : vector<2x256xf32> to vector<2x256xbf16>
    %cst_51 = arith.constant dense<0.000000e+00> : vector<2x256xf32>
    %69 = tpu.matmul %68, %61, %cst_51 {dimension_numbers = #tpu.dot_dimension_numbers<[1], [0], [0], [1], [0, 0, 1, 1], [], []>} : vector<2x256xbf16>, vector<256x256xbf16>, vector<2x256xf32> -> vector<2x256xf32>
    %70 = vector.broadcast %62 : vector<1x256xf32> to vector<2x256xf32>
    %71 = arith.addf %69, %70 : vector<2x256xf32>
    %72 = arith.extf %58 : vector<2x256xbf16> to vector<2x256xf32>
    %73 = arith.addf %71, %72 : vector<2x256xf32>
    %cst_52 = arith.constant 0.000000e+00 : f32
    %74 = vector.broadcast %cst_52 : f32 to vector<2x256xf32>
    %75 = arith.maximumf %73, %74 : vector<2x256xf32>
    %76 = arith.truncf %75 : vector<2x256xf32> to vector<2x256xbf16>
    %c0_53 = arith.constant 0 : index
    %c0_54 = arith.constant 0 : index
    %77 = vector.load %arg19[%c0_53, %c0_54] : memref<256x128xbf16, #tpu.memory_space<vmem>>, vector<256x128xbf16>
    %c0_55 = arith.constant 0 : index
    %c0_56 = arith.constant 0 : index
    %78 = vector.load %arg20[%c0_55, %c0_56] : memref<1x128xf32, #tpu.memory_space<vmem>>, vector<1x128xf32>
    %c0_57 = arith.constant 0 : index
    %c0_58 = arith.constant 0 : index
    %79 = vector.load %arg21[%c0_57, %c0_58] : memref<128x128xbf16, #tpu.memory_space<vmem>>, vector<128x128xbf16>
    %c0_59 = arith.constant 0 : index
    %c0_60 = arith.constant 0 : index
    %80 = vector.load %arg22[%c0_59, %c0_60] : memref<1x128xf32, #tpu.memory_space<vmem>>, vector<1x128xf32>
    %c0_61 = arith.constant 0 : index
    %c0_62 = arith.constant 0 : index
    %81 = vector.load %arg23[%c0_61, %c0_62] : memref<256x128xbf16, #tpu.memory_space<vmem>>, vector<256x128xbf16>
    %c0_63 = arith.constant 0 : index
    %c0_64 = arith.constant 0 : index
    %82 = vector.load %arg24[%c0_63, %c0_64] : memref<1x128xf32, #tpu.memory_space<vmem>>, vector<1x128xf32>
    %cst_65 = arith.constant dense<0.000000e+00> : vector<2x128xf32>
    %83 = tpu.matmul %76, %77, %cst_65 {dimension_numbers = #tpu.dot_dimension_numbers<[1], [0], [0], [1], [0, 0, 1, 1], [], []>} : vector<2x256xbf16>, vector<256x128xbf16>, vector<2x128xf32> -> vector<2x128xf32>
    %84 = vector.broadcast %78 : vector<1x128xf32> to vector<2x128xf32>
    %85 = arith.addf %83, %84 : vector<2x128xf32>
    %cst_66 = arith.constant 0.000000e+00 : f32
    %86 = vector.broadcast %cst_66 : f32 to vector<2x128xf32>
    %87 = arith.maximumf %85, %86 : vector<2x128xf32>
    %88 = arith.truncf %87 : vector<2x128xf32> to vector<2x128xbf16>
    %cst_67 = arith.constant dense<0.000000e+00> : vector<2x128xf32>
    %89 = tpu.matmul %88, %79, %cst_67 {dimension_numbers = #tpu.dot_dimension_numbers<[1], [0], [0], [1], [0, 0, 1, 1], [], []>} : vector<2x128xbf16>, vector<128x128xbf16>, vector<2x128xf32> -> vector<2x128xf32>
    %90 = vector.broadcast %80 : vector<1x128xf32> to vector<2x128xf32>
    %91 = arith.addf %89, %90 : vector<2x128xf32>
    %cst_68 = arith.constant dense<0.000000e+00> : vector<2x128xf32>
    %92 = tpu.matmul %76, %81, %cst_68 {dimension_numbers = #tpu.dot_dimension_numbers<[1], [0], [0], [1], [0, 0, 1, 1], [], []>} : vector<2x256xbf16>, vector<256x128xbf16>, vector<2x128xf32> -> vector<2x128xf32>
    %93 = vector.broadcast %82 : vector<1x128xf32> to vector<2x128xf32>
    %94 = arith.addf %92, %93 : vector<2x128xf32>
    %95 = arith.addf %91, %94 : vector<2x128xf32>
    %cst_69 = arith.constant 0.000000e+00 : f32
    %96 = vector.broadcast %cst_69 : f32 to vector<2x128xf32>
    %97 = arith.maximumf %95, %96 : vector<2x128xf32>
    %98 = arith.truncf %97 : vector<2x128xf32> to vector<2x128xbf16>
    %c0_70 = arith.constant 0 : index
    %c0_71 = arith.constant 0 : index
    %99 = vector.load %arg25[%c0_70, %c0_71] : memref<128x128xbf16, #tpu.memory_space<vmem>>, vector<128x128xbf16>
    %c0_72 = arith.constant 0 : index
    %c0_73 = arith.constant 0 : index
    %100 = vector.load %arg26[%c0_72, %c0_73] : memref<1x128xf32, #tpu.memory_space<vmem>>, vector<1x128xf32>
    %c0_74 = arith.constant 0 : index
    %c0_75 = arith.constant 0 : index
    %101 = vector.load %arg27[%c0_74, %c0_75] : memref<128x128xbf16, #tpu.memory_space<vmem>>, vector<128x128xbf16>
    %c0_76 = arith.constant 0 : index
    %c0_77 = arith.constant 0 : index
    %102 = vector.load %arg28[%c0_76, %c0_77] : memref<1x128xf32, #tpu.memory_space<vmem>>, vector<1x128xf32>
    %cst_78 = arith.constant dense<0.000000e+00> : vector<2x128xf32>
    %103 = tpu.matmul %98, %99, %cst_78 {dimension_numbers = #tpu.dot_dimension_numbers<[1], [0], [0], [1], [0, 0, 1, 1], [], []>} : vector<2x128xbf16>, vector<128x128xbf16>, vector<2x128xf32> -> vector<2x128xf32>
    %104 = vector.broadcast %100 : vector<1x128xf32> to vector<2x128xf32>
    %105 = arith.addf %103, %104 : vector<2x128xf32>
    %cst_79 = arith.constant 0.000000e+00 : f32
    %106 = vector.broadcast %cst_79 : f32 to vector<2x128xf32>
    %107 = arith.maximumf %105, %106 : vector<2x128xf32>
    %108 = arith.truncf %107 : vector<2x128xf32> to vector<2x128xbf16>
    %cst_80 = arith.constant dense<0.000000e+00> : vector<2x128xf32>
    %109 = tpu.matmul %108, %101, %cst_80 {dimension_numbers = #tpu.dot_dimension_numbers<[1], [0], [0], [1], [0, 0, 1, 1], [], []>} : vector<2x128xbf16>, vector<128x128xbf16>, vector<2x128xf32> -> vector<2x128xf32>
    %110 = vector.broadcast %102 : vector<1x128xf32> to vector<2x128xf32>
    %111 = arith.addf %109, %110 : vector<2x128xf32>
    %112 = arith.extf %98 : vector<2x128xbf16> to vector<2x128xf32>
    %113 = arith.addf %111, %112 : vector<2x128xf32>
    %cst_81 = arith.constant 0.000000e+00 : f32
    %114 = vector.broadcast %cst_81 : f32 to vector<2x128xf32>
    %115 = arith.maximumf %113, %114 : vector<2x128xf32>
    %116 = arith.truncf %115 : vector<2x128xf32> to vector<2x128xbf16>
    %c0_82 = arith.constant 0 : index
    %c0_83 = arith.constant 0 : index
    %117 = vector.load %arg29[%c0_82, %c0_83] : memref<128x64xbf16, #tpu.memory_space<vmem>>, vector<128x64xbf16>
    %c0_84 = arith.constant 0 : index
    %c0_85 = arith.constant 0 : index
    %118 = vector.load %arg30[%c0_84, %c0_85] : memref<1x64xf32, #tpu.memory_space<vmem>>, vector<1x64xf32>
    %c0_86 = arith.constant 0 : index
    %c0_87 = arith.constant 0 : index
    %119 = vector.load %arg31[%c0_86, %c0_87] : memref<64x64xbf16, #tpu.memory_space<vmem>>, vector<64x64xbf16>
    %c0_88 = arith.constant 0 : index
    %c0_89 = arith.constant 0 : index
    %120 = vector.load %arg32[%c0_88, %c0_89] : memref<1x64xf32, #tpu.memory_space<vmem>>, vector<1x64xf32>
    %c0_90 = arith.constant 0 : index
    %c0_91 = arith.constant 0 : index
    %121 = vector.load %arg33[%c0_90, %c0_91] : memref<128x64xbf16, #tpu.memory_space<vmem>>, vector<128x64xbf16>
    %c0_92 = arith.constant 0 : index
    %c0_93 = arith.constant 0 : index
    %122 = vector.load %arg34[%c0_92, %c0_93] : memref<1x64xf32, #tpu.memory_space<vmem>>, vector<1x64xf32>
    %cst_94 = arith.constant dense<0.000000e+00> : vector<2x64xf32>
    %123 = tpu.matmul %116, %117, %cst_94 {dimension_numbers = #tpu.dot_dimension_numbers<[1], [0], [0], [1], [0, 0, 1, 1], [], []>} : vector<2x128xbf16>, vector<128x64xbf16>, vector<2x64xf32> -> vector<2x64xf32>
    %124 = vector.broadcast %118 : vector<1x64xf32> to vector<2x64xf32>
    %125 = arith.addf %123, %124 : vector<2x64xf32>
    %cst_95 = arith.constant 0.000000e+00 : f32
    %126 = vector.broadcast %cst_95 : f32 to vector<2x64xf32>
    %127 = arith.maximumf %125, %126 : vector<2x64xf32>
    %128 = arith.truncf %127 : vector<2x64xf32> to vector<2x64xbf16>
    %cst_96 = arith.constant dense<0.000000e+00> : vector<2x64xf32>
    %129 = tpu.matmul %128, %119, %cst_96 {dimension_numbers = #tpu.dot_dimension_numbers<[1], [0], [0], [1], [0, 0, 1, 1], [], []>} : vector<2x64xbf16>, vector<64x64xbf16>, vector<2x64xf32> -> vector<2x64xf32>
    %130 = vector.broadcast %120 : vector<1x64xf32> to vector<2x64xf32>
    %131 = arith.addf %129, %130 : vector<2x64xf32>
    %cst_97 = arith.constant dense<0.000000e+00> : vector<2x64xf32>
    %132 = tpu.matmul %116, %121, %cst_97 {dimension_numbers = #tpu.dot_dimension_numbers<[1], [0], [0], [1], [0, 0, 1, 1], [], []>} : vector<2x128xbf16>, vector<128x64xbf16>, vector<2x64xf32> -> vector<2x64xf32>
    %133 = vector.broadcast %122 : vector<1x64xf32> to vector<2x64xf32>
    %134 = arith.addf %132, %133 : vector<2x64xf32>
    %135 = arith.addf %131, %134 : vector<2x64xf32>
    %cst_98 = arith.constant 0.000000e+00 : f32
    %136 = vector.broadcast %cst_98 : f32 to vector<2x64xf32>
    %137 = arith.maximumf %135, %136 : vector<2x64xf32>
    %138 = arith.truncf %137 : vector<2x64xf32> to vector<2x64xbf16>
    %c0_99 = arith.constant 0 : index
    %c0_100 = arith.constant 0 : index
    %139 = vector.load %arg35[%c0_99, %c0_100] : memref<64x64xbf16, #tpu.memory_space<vmem>>, vector<64x64xbf16>
    %c0_101 = arith.constant 0 : index
    %c0_102 = arith.constant 0 : index
    %140 = vector.load %arg36[%c0_101, %c0_102] : memref<1x64xf32, #tpu.memory_space<vmem>>, vector<1x64xf32>
    %c0_103 = arith.constant 0 : index
    %c0_104 = arith.constant 0 : index
    %141 = vector.load %arg37[%c0_103, %c0_104] : memref<64x64xbf16, #tpu.memory_space<vmem>>, vector<64x64xbf16>
    %c0_105 = arith.constant 0 : index
    %c0_106 = arith.constant 0 : index
    %142 = vector.load %arg38[%c0_105, %c0_106] : memref<1x64xf32, #tpu.memory_space<vmem>>, vector<1x64xf32>
    %cst_107 = arith.constant dense<0.000000e+00> : vector<2x64xf32>
    %143 = tpu.matmul %138, %139, %cst_107 {dimension_numbers = #tpu.dot_dimension_numbers<[1], [0], [0], [1], [0, 0, 1, 1], [], []>} : vector<2x64xbf16>, vector<64x64xbf16>, vector<2x64xf32> -> vector<2x64xf32>
    %144 = vector.broadcast %140 : vector<1x64xf32> to vector<2x64xf32>
    %145 = arith.addf %143, %144 : vector<2x64xf32>
    %cst_108 = arith.constant 0.000000e+00 : f32
    %146 = vector.broadcast %cst_108 : f32 to vector<2x64xf32>
    %147 = arith.maximumf %145, %146 : vector<2x64xf32>
    %148 = arith.truncf %147 : vector<2x64xf32> to vector<2x64xbf16>
    %cst_109 = arith.constant dense<0.000000e+00> : vector<2x64xf32>
    %149 = tpu.matmul %148, %141, %cst_109 {dimension_numbers = #tpu.dot_dimension_numbers<[1], [0], [0], [1], [0, 0, 1, 1], [], []>} : vector<2x64xbf16>, vector<64x64xbf16>, vector<2x64xf32> -> vector<2x64xf32>
    %150 = vector.broadcast %142 : vector<1x64xf32> to vector<2x64xf32>
    %151 = arith.addf %149, %150 : vector<2x64xf32>
    %152 = arith.extf %138 : vector<2x64xbf16> to vector<2x64xf32>
    %153 = arith.addf %151, %152 : vector<2x64xf32>
    %cst_110 = arith.constant 0.000000e+00 : f32
    %154 = vector.broadcast %cst_110 : f32 to vector<2x64xf32>
    %155 = arith.maximumf %153, %154 : vector<2x64xf32>
    %156 = arith.truncf %155 : vector<2x64xf32> to vector<2x64xbf16>
    %c0_111 = arith.constant 0 : index
    %c0_112 = arith.constant 0 : index
    %157 = vector.load %arg39[%c0_111, %c0_112] : memref<64x64xbf16, #tpu.memory_space<vmem>>, vector<64x64xbf16>
    %c0_113 = arith.constant 0 : index
    %c0_114 = arith.constant 0 : index
    %158 = vector.load %arg40[%c0_113, %c0_114] : memref<64x128xbf16, #tpu.memory_space<vmem>>, vector<64x128xbf16>
    %c0_115 = arith.constant 0 : index
    %c0_116 = arith.constant 0 : index
    %159 = vector.load %arg41[%c0_115, %c0_116] : memref<1x128xf32, #tpu.memory_space<vmem>>, vector<1x128xf32>
    %cst_117 = arith.constant dense<0.000000e+00> : vector<2x64xf32>
    %160 = tpu.matmul %156, %157, %cst_117 {dimension_numbers = #tpu.dot_dimension_numbers<[1], [0], [0], [1], [0, 0, 1, 1], [], []>} : vector<2x64xbf16>, vector<64x64xbf16>, vector<2x64xf32> -> vector<2x64xf32>
    %161 = arith.truncf %160 : vector<2x64xf32> to vector<2x64xbf16>
    %cst_118 = arith.constant dense<0.000000e+00> : vector<2x128xf32>
    %162 = tpu.matmul %161, %158, %cst_118 {dimension_numbers = #tpu.dot_dimension_numbers<[1], [0], [0], [1], [0, 0, 1, 1], [], []>} : vector<2x64xbf16>, vector<64x128xbf16>, vector<2x128xf32> -> vector<2x128xf32>
    %163 = vector.broadcast %159 : vector<1x128xf32> to vector<2x128xf32>
    %164 = arith.addf %162, %163 : vector<2x128xf32>
    %c0_119 = arith.constant 0 : index
    %c0_120 = arith.constant 0 : index
    %165 = vector.load %arg42[%c0_119, %c0_120] : memref<2x128xf32, #tpu.memory_space<vmem>>, vector<2x128xf32>
    tpu.vector_store %arg42[%c0_119, %c0_120], %164 {strides = array<i32>} : memref<2x128xf32, #tpu.memory_space<vmem>>, vector<2x128xf32>,
    return
  }
}

</mosaic_0001>

<bundles_post_ra>
// kernel: _lambda_.2
= control target key start
LH: loop header
LB: loop body
LE: loop exit
PB: predicated region body
PF: predicated region fallthrough
CT: control target
= control target key end

     0   :  { %s1198_s12 = smov 0   ;;  %s1392_s0 = inlined_call_operand.vmem [shape: bf16[512,147], index: 0, kind: input, shape index: {}]   ;;  %s1393_s1 = inlined_call_operand.vmem [shape: bf16[147,128], index: 1, kind: input, shape index: {}]   ;;  %s1394_s2 = inlined_call_operand.vmem [shape: f32[1,128], index: 2, kind: input, shape index: {}]   ;;  %s1395_s3 = inlined_call_operand.vmem [shape: bf16[512,128], index: 3, kind: output, shape index: {}]  }
   0x1 LB: > { %s820_s13 = sadd.s32 4294967295, %s1175_s12   ;;  %p824_p0 = scmp.ge.s32.totalorder %s1175_s12, 1  ;;  %s1175_s12 = sphi %s1198_s12, %s13_s12  }
   0x2   : > { %p139_p1 = scmp.lt.s32.totalorder %s1175_s12, 3 }
   0x4   : > { %p140_p2 = pnand %p824_p0, %p139_p1 }
   0x5   : > { %s825_s18 = sshll.u32 (!%p140_p2), %s820_s13, 5 }
   0x6   : > { %143 = sbr.rel (%p140_p2) target bundleno = 304 (0x130), region = 32  ;;  %p165_p3 = scmp.lt.s32.totalorder (!%p140_p2), %s825_s18, 63 }
   0xb   : > { %v1052_v0 = vld [vmem:[%s1393_s1 + $0x38] sm:$0xff]  ;;  %v228_v1 = vld [vmem:[%s1393_s1 + $0x48] sm:$0x3]  ;;  %vm483_vm0 = vcmask 1040384   ;;  %vm484_vm1 = vcmask 1041408   ;;  %v1051_v3 = vld [vmem:[%s1393_s1 + $0x30] sm:$0xff] }
   0xc   : > { %v414_v2 = vunpack.c.l.b16 %v228_v1  ;;  %490 = vmatpush.bf16.msra.mxu0 %v1052_v0  ;;  %1149 = vmatpush.bf16.msra.mxu2 %v1052_v0  ;;  %v1177_v4 = vmov 65535   ;;  %s1397_s18 = smov (!%p165_p3, %s825_s18), 63  ;;  %v1050_v9 = vld [vmem:[%s1393_s1 + $0x28] sm:$0xff]  ;;  %v1053_v10 = vld [vmem:[%s1393_s1 + $0x40] sm:$0xff]  ;;  %vm434_vm2 = vcmask 154624   ;;  %v1048_v18 = vld [vmem:[%s1393_s1 + $0x18] sm:$0xff] }
   0xd   : > { %v485_v5 = vsel %vm483_vm0, 4294967295, %v1177_v4  ;;  %s1012_s23 = sshll.u32 %s1397_s18, 3  ;;  %v1049_v14 = vld [vmem:[%s1393_s1 + $0x20] sm:$0xff]  ;;  %v1047_v19 = vld [vmem:[%s1393_s1 + $0x10] sm:$0xff]  ;;  %v1046_v20 = vld [vmem:[%s1393_s1 + $0x8] sm:$0xff]  ;;  %s829_s15 = sshll.u32 %s1397_s18, 2 }
   0xe   : > { %v424_v6 = vpack.c.b16 %v414_v2, %v414_v2  ;;  %v486_v7 = vsel %vm484_vm1, %v485_v5, 0  ;;  %s1227_s28 = scalar_lea.vmem %s1392_s0, %s1012_s23  ;;  %v1045_v26 = vld [vmem:[%s1393_s1] sm:$0xff]  ;;  %s1337_s19 = scalar_lea.vmem %s1395_s3, %s829_s15 }
   0xf   : > { %v1013_v11 = vld [vmem:[%s1227_s28 + $0x4] sm:$0xf]  ;;  %v834_v12 = vld [vmem:[%s1227_s28 + $0x8] sm:$0xf0]  ;;  %v1031_v15 = vld [vmem:[%s1227_s28 + $0x94] sm:$0xf] }
  0x10   : > { %v488_v8 = vand.u32 %v486_v7, %v424_v6  ;;  %491 = vmatpush.bf16.msra.mxu0 %v1051_v3  ;;  %1150 = vmatpush.bf16.msra.mxu2 %v1051_v3  ;;  %v837_v13 = vor.u32 %v1013_v11, %v834_v12  ;;  %v906_v16 = vld [vmem:[%s1227_s28 + $0x98] sm:$0xf0]  ;;  %v1015_v21 = vld [vmem:[%s1227_s28 + $0x14] sm:$0xf]  ;;  %v1033_v23 = vld [vmem:[%s1227_s28 + $0xa4] sm:$0xf] }
  0x11   : > { %v909_v17 = vor.u32 %v1031_v15, %v906_v16  ;;  %v842_v22 = vld [vmem:[%s1227_s28 + $0x18] sm:$0xf0]  ;;  %v914_v24 = vld [vmem:[%s1227_s28 + $0xa8] sm:$0xf0]  ;;  %v832_v27 = vld [vmem:[%s1227_s28] sm:$0xf] }
  0x12   : > { %585 = vmatpush.bf16.msra.mxu1 %v488_v8  ;;  %1157 = vmatpush.bf16.msra.mxu3 %v488_v8  ;;  %v845_v25 = vor.u32 %v1015_v21, %v842_v22  ;;  %v1014_v28 = vld [vmem:[%s1227_s28 + $0x4] sm:$0xf0]  ;;  %v896_v29 = vld [vmem:[%s1227_s28 + $0x80] sm:$0xf]  ;;  %v917_v31 = vor.u32 %v1033_v23, %v914_v24  ;;  %v1017_v34 = vld [vmem:[%s1227_s28 + $0x24] sm:$0xf] }
  0x13   : > { %v1030_v30 = vld [vmem:[%s1227_s28 + $0x84] sm:$0xf0]  ;;  %v833_v32 = vor.u32 %v1014_v28, %v832_v27  ;;  %v850_v35 = vld [vmem:[%s1227_s28 + $0x28] sm:$0xf0]  ;;  %v1035_v36 = vld [vmem:[%s1227_s28 + $0xb4] sm:$0xf] }
  0x14   : > { %492 = vmatpush.bf16.msra.mxu0 %v1050_v9  ;;  %1151 = vmatpush.bf16.msra.mxu2 %v1050_v9  ;;  %v897_v33 = vor.u32 %v1030_v30, %v896_v29  ;;  %v922_v37 = vld [vmem:[%s1227_s28 + $0xb8] sm:$0xf0]  ;;  %v853_v38 = vor.u32 %v1017_v34, %v850_v35  ;;  %v840_v39 = vld [vmem:[%s1227_s28 + $0x10] sm:$0xf]  ;;  %v1016_v40 = vld [vmem:[%s1227_s28 + $0x14] sm:$0xf0] }
  0x15   : > { %v904_v41 = vld [vmem:[%s1227_s28 + $0x90] sm:$0xf]  ;;  %v1032_v42 = vld [vmem:[%s1227_s28 + $0x94] sm:$0xf0]  ;;  %v925_v43 = vor.u32 %v1035_v36, %v922_v37  ;;  %v841_v44 = vor.u32 %v1016_v40, %v840_v39  ;;  %v1019_v46 = vld [vmem:[%s1227_s28 + $0x34] sm:$0xf] }
  0x16   : > { %586 = vmatpush.bf16.msra.mxu1 %v1053_v10  ;;  %1158 = vmatpush.bf16.msra.mxu3 %v1053_v10  ;;  %v905_v45 = vor.u32 %v1032_v42, %v904_v41  ;;  %v858_v47 = vld [vmem:[%s1227_s28 + $0x38] sm:$0xf0]  ;;  %v1037_v48 = vld [vmem:[%s1227_s28 + $0xc4] sm:$0xf]  ;;  %v930_v49 = vld [vmem:[%s1227_s28 + $0xc8] sm:$0xf0] }
  0x17   : > { %v861_v50 = vor.u32 %v1019_v46, %v858_v47  ;;  %v848_v51 = vld [vmem:[%s1227_s28 + $0x20] sm:$0xf]  ;;  %v1018_v52 = vld [vmem:[%s1227_s28 + $0x24] sm:$0xf0]  ;;  %v933_v55 = vor.u32 %v1037_v48, %v930_v49  ;;  %v1021_v58 = vld [vmem:[%s1227_s28 + $0x44] sm:$0xf] }
  0x18   : > { %493 = vmatpush.bf16.msra.mxu0 %v1049_v14  ;;  %1152 = vmatpush.bf16.msra.mxu2 %v1049_v14  ;;  %v912_v53 = vld [vmem:[%s1227_s28 + $0xa0] sm:$0xf]  ;;  %v1034_v54 = vld [vmem:[%s1227_s28 + $0xa4] sm:$0xf0]  ;;  %v849_v56 = vor.u32 %v1018_v52, %v848_v51  ;;  %v866_v59 = vld [vmem:[%s1227_s28 + $0x48] sm:$0xf0] }
  0x19   : > { %994 = vmatmul.msk.bf16.vlgmr.msra.gmra.mxu1 %vm434_vm2, %v837_v13  ;;  %1003 = vmatmul.msk.bf16.vlgmr.msra.gmra.mxu3 %vm434_vm2, %v909_v17  ;;  %v913_v57 = vor.u32 %v1034_v54, %v912_v53  ;;  %v1039_v60 = vld [vmem:[%s1227_s28 + $0xd4] sm:$0xf]  ;;  %v938_v61 = vld [vmem:[%s1227_s28 + $0xd8] sm:$0xf0]  ;;  %v869_v62 = vor.u32 %v1021_v58, %v866_v59  ;;  %v856_v63 = vld [vmem:[%s1227_s28 + $0x30] sm:$0xf] }
  0x1a   : > { %v1020_v0 = vld [vmem:[%s1227_s28 + $0x34] sm:$0xf0]  ;;  %v920_v1 = vld [vmem:[%s1227_s28 + $0xb0] sm:$0xf]  ;;  %v941_v3 = vor.u32 %v1039_v60, %v938_v61  ;;  %v1023_v6 = vld [vmem:[%s1227_s28 + $0x54] sm:$0xf] }
  0x1b   : > { %v1036_v2 = vld [vmem:[%s1227_s28 + $0xb4] sm:$0xf0]  ;;  %v857_v4 = vor.u32 %v1020_v0, %v856_v63  ;;  %v874_v7 = vld [vmem:[%s1227_s28 + $0x58] sm:$0xf0]  ;;  %v1041_v8 = vld [vmem:[%s1227_s28 + $0xe4] sm:$0xf] }
  0x1c   : > { %494 = vmatpush.bf16.msra.mxu0 %v1048_v18  ;;  %1153 = vmatpush.bf16.msra.mxu2 %v1048_v18  ;;  %v921_v5 = vor.u32 %v1036_v2, %v920_v1  ;;  %v946_v9 = vld [vmem:[%s1227_s28 + $0xe8] sm:$0xf0]  ;;  %v877_v10 = vor.u32 %v1023_v6, %v874_v7  ;;  %v864_v11 = vld [vmem:[%s1227_s28 + $0x40] sm:$0xf]  ;;  %v1022_v12 = vld [vmem:[%s1227_s28 + $0x44] sm:$0xf0] }
  0x1d   : > { %v928_v13 = vld [vmem:[%s1227_s28 + $0xc0] sm:$0xf]  ;;  %v1038_v14 = vld [vmem:[%s1227_s28 + $0xc4] sm:$0xf0]  ;;  %v949_v15 = vor.u32 %v1041_v8, %v946_v9  ;;  %v865_v16 = vor.u32 %v1022_v12, %v864_v11  ;;  %v1025_v18 = vld [vmem:[%s1227_s28 + $0x64] sm:$0xf] }
  0x1e   : > { %v929_v17 = vor.u32 %v1038_v14, %v928_v13  ;;  %v954_v21 = vld [vmem:[%s1227_s28 + $0xf8] sm:$0xf0]  ;;  %v872_v23 = vld [vmem:[%s1227_s28 + $0x50] sm:$0xf]  ;;  %v1024_v24 = vld [vmem:[%s1227_s28 + $0x54] sm:$0xf0] }
  0x1f   : > { %v873_v28 = vor.u32 %v1024_v24, %v872_v23  ;;  %v1027_v30 = vld [vmem:[%s1227_s28 + $0x74] sm:$0xf]  ;;  %v1026_v34 = vld [vmem:[%s1227_s28 + $0x64] sm:$0xf0]  ;;  %v944_v35 = vld [vmem:[%s1227_s28 + $0xe0] sm:$0xf] }
  0x20   : > { %495 = vmatpush.bf16.msra.mxu0 %v1047_v19  ;;  %1154 = vmatpush.bf16.msra.mxu2 %v1047_v19  ;;  %v882_v19 = vld [vmem:[%s1227_s28 + $0x68] sm:$0xf0]  ;;  %v1042_v36 = vld [vmem:[%s1227_s28 + $0xe4] sm:$0xf0]  ;;  %v1029_v39 = vld [vmem:[%s1227_s28 + $0x84] sm:$0xf] }
  0x21   : > { %v885_v22 = vor.u32 %v1025_v18, %v882_v19  ;;  %v898_v40 = vld [vmem:[%s1227_s28 + $0x88] sm:$0xf0]  ;;  %v888_v42 = vld [vmem:[%s1227_s28 + $0x70] sm:$0xf]  ;;  %v1044_v46 = vld [vmem:[%s1227_s28 + $0xf4] sm:$0xf0] }
  0x22   : > { %v901_v41 = vor.u32 %v1029_v39, %v898_v40  ;;  %v1327_v53 = vld [vmem:[%s1394_s2] ss:$0 sm:$0xff] }
  0x24   : > { %496 = vmatpush.bf16.msra.mxu0 %v1046_v20  ;;  %1155 = vmatpush.bf16.msra.mxu2 %v1046_v20  ;;  %v1043_v20 = vld [vmem:[%s1227_s28 + $0xf4] sm:$0xf] }
  0x25   : > { %v957_v27 = vor.u32 %v1043_v20, %v954_v21 }
  0x28   : > { %497 = vmatpush.bf16.msra.mxu0 %v1045_v26  ;;  %1156 = vmatpush.bf16.msra.mxu2 %v1045_v26  ;;  %v1040_v26 = vld [vmem:[%s1227_s28 + $0xd4] sm:$0xf0] }
  0x29   : > { %995 = vmatmul.msk.bf16.gmra.mxu1 %vm434_vm2, %v845_v25  ;;  %1004 = vmatmul.msk.bf16.gmra.mxu3 %vm434_vm2, %v917_v31  ;;  %v936_v25 = vld [vmem:[%s1227_s28 + $0xd0] sm:$0xf]  ;;  %v890_v31 = vld [vmem:[%s1227_s28 + $0x78] sm:$0xf0] }
  0x2a   : > { %v937_v29 = vor.u32 %v1040_v26, %v936_v25 }
  0x2b   : > { %498 = vmatmul.bf16.vlgmr.msra.gmra.mxu0 %v833_v32  ;;  %538 = vmatmul.bf16.vlgmr.msra.gmra.mxu2 %v897_v33  ;;  %v893_v32 = vor.u32 %v1027_v30, %v890_v31  ;;  %v880_v33 = vld [vmem:[%s1227_s28 + $0x60] sm:$0xf] }
  0x2c   : > { %v881_v37 = vor.u32 %v1026_v34, %v880_v33 }
  0x39   : > { %996 = vmatmul.msk.bf16.gmra.mxu1 %vm434_vm2, %v853_v38  ;;  %1005 = vmatmul.msk.bf16.gmra.mxu3 %vm434_vm2, %v925_v43  ;;  %v945_v38 = vor.u32 %v1042_v36, %v944_v35  ;;  %v1028_v43 = vld [vmem:[%s1227_s28 + $0x74] sm:$0xf0] }
  0x3a   : > { %v889_v47 = vor.u32 %v1028_v43, %v888_v42 }
  0x3b   : > { %503 = vmatmul.bf16.gmra.mxu0 %v841_v44  ;;  %543 = vmatmul.bf16.gmra.mxu2 %v905_v45  ;;  %v952_v45 = vld [vmem:[%s1227_s28 + $0xf0] sm:$0xf] }
  0x3c   : > { %v953_v48 = vor.u32 %v1044_v46, %v952_v45 }
  0x49   : > { %997 = vmatmul.msk.bf16.gmra.mxu1 %vm434_vm2, %v861_v50  ;;  %1006 = vmatmul.msk.bf16.gmra.mxu3 %vm434_vm2, %v933_v55 }
  0x4b   : > { %508 = vmatmul.bf16.gmra.mxu0 %v849_v56  ;;  %548 = vmatmul.bf16.gmra.mxu2 %v913_v57 }
  0x59   : > { %998 = vmatmul.msk.bf16.gmra.mxu1 %vm434_vm2, %v869_v62  ;;  %1007 = vmatmul.msk.bf16.gmra.mxu3 %vm434_vm2, %v941_v3 }
  0x5b   : > { %513 = vmatmul.bf16.gmra.mxu0 %v857_v4  ;;  %553 = vmatmul.bf16.gmra.mxu2 %v921_v5 }
  0x69   : > { %999 = vmatmul.msk.bf16.gmra.mxu1 %vm434_vm2, %v877_v10  ;;  %1008 = vmatmul.msk.bf16.gmra.mxu3 %vm434_vm2, %v949_v15 }
  0x6b   : > { %518 = vmatmul.bf16.gmra.mxu0 %v865_v16  ;;  %558 = vmatmul.bf16.gmra.mxu2 %v929_v17 }
  0x79   : > { %1000 = vmatmul.msk.bf16.gmra.mxu1 %vm434_vm2, %v885_v22  ;;  %1009 = vmatmul.msk.bf16.gmra.mxu3 %vm434_vm2, %v957_v27 }
  0x7b   : > { %523 = vmatmul.bf16.gmra.mxu0 %v873_v28  ;;  %563 = vmatmul.bf16.gmra.mxu2 %v937_v29 }
  0x89   : > { %1001 = vmatmul.msk.bf16.gmra.mxu1 %vm434_vm2, %v893_v32 }
  0x8b   : > { %528 = vmatmul.bf16.gmra.mxu0 %v881_v37  ;;  %568 = vmatmul.bf16.gmra.mxu2 %v945_v38 }
  0x96   : > { %v588_v44 = vpop.f32.mrf.mxu1 }
  0x99   : > { %1002 = vmatmul.msk.bf16.gmra.mxu1 %vm434_vm2, %v901_v41 }
  0x9b   : > { %533 = vmatmul.bf16.gmra.mxu0 %v889_v47  ;;  %573 = vmatmul.bf16.gmra.mxu2 %v953_v48 }
  0x9c   : > { %v633_v51 = vpop.f32.mrf.mxu3 }
  0x9e   : > { %v590_v49 = vpop.f32.mrf.mxu1 }
  0xa4   : > { %v635_v60 = vpop.f32.mrf.mxu3 }
  0xa6   : > { %v593_v50 = vpop.f32.mrf.mxu1 }
  0xa8   : > { %v499_v52 = vpop.f32.mrf.mxu0 }
  0xa9   : > { %v500_v54 = vadd.f32 %v1327_v53, %v499_v52 }
  0xab   : > { %v589_v58 = vadd.f32 %v588_v44, %v500_v54 }
  0xac   : > { %v638_v4 = vpop.f32.mrf.mxu3 }
  0xad   : > { %v668_v62 = vmax.f32 %v589_v58, 0.0 }
  0xae   : > { %v595_v55 = vpop.f32.mrf.mxu1  ;;  %v1330_v56 = vpop.f32.mrf.mxu2 }
  0xb0   : > { %v501_v57 = vpop.f32.mrf.mxu0 }
  0xb1   : > { %v502_v59 = vadd.f32 %v1327_v53, %v501_v57 }
  0xb3   : > { %v591_v61 = vadd.f32 %v590_v49, %v502_v59 }
  0xb4   : > { %v640_v16 = vpop.f32.mrf.mxu3 }
  0xb5   : > { %v669_v63 = vmax.f32 %v591_v61, 0.0 }
  0xb6   : > { %v598_v0 = vpop.f32.mrf.mxu1  ;;  %v1339_v2 = vpop.f32.mrf.mxu2 }
  0xb7   : > { %v1057_v1 = vpack.c.bf16 %v669_v63, %v668_v62 }
  0xb8   : > { %v504_v3 = vpop.f32.mrf.mxu0 }
  0xb9   : > { %1058 = vst [vmem:[%s1337_s19] sm:$0xff] %v1057_v1   ;;  %v505_v5 = vadd.f32 %v1327_v53, %v504_v3 }
  0xbb   : > { %v594_v9 = vadd.f32 %v593_v50, %v505_v5 }
  0xbc   : > { %v643_v29 = vpop.f32.mrf.mxu3 }
  0xbd   : > { %v670_v13 = vmax.f32 %v594_v9, 0.0 }
  0xbe   : > { %v600_v6 = vpop.f32.mrf.mxu1  ;;  %v544_v7 = vpop.f32.mrf.mxu2 }
  0xbf   : > { %v545_v12 = vadd.f32 %v1327_v53, %v544_v7 }
  0xc0   : > { %v506_v8 = vpop.f32.mrf.mxu0 }
  0xc1   : > { %v507_v10 = vadd.f32 %v1327_v53, %v506_v8  ;;  %v634_v19 = vadd.f32 %v633_v51, %v545_v12 }
  0xc3   : > { %v596_v11 = vadd.f32 %v595_v55, %v507_v10  ;;  %v686_v23 = vmax.f32 %v634_v19, 0.0 }
  0xc4   : > { %v645_v43 = vpop.f32.mrf.mxu3 }
  0xc5   : > { %v671_v14 = vmax.f32 %v596_v11, 0.0 }
  0xc6   : > { %v603_v15 = vpop.f32.mrf.mxu1  ;;  %v546_v18 = vpop.f32.mrf.mxu2 }
  0xc7   : > { %v1062_v17 = vpack.c.bf16 %v671_v14, %v670_v13  ;;  %v547_v20 = vadd.f32 %v1327_v53, %v546_v18 }
  0xc8   : > { %v509_v21 = vpop.f32.mrf.mxu0 }
  0xc9   : > { %1134 = vst [vmem:[%s1337_s19 + $0x8] sm:$0xff] %v1062_v17   ;;  %v636_v22 = vadd.f32 %v635_v60, %v547_v20  ;;  %v510_v25 = vadd.f32 %v1327_v53, %v509_v21 }
  0xcb   : > { %v687_v24 = vmax.f32 %v636_v22, 0.0  ;;  %v599_v31 = vadd.f32 %v598_v0, %v510_v25 }
  0xcc   : > { %v648_v57 = vpop.f32.mrf.mxu3 }
  0xcd   : > { %v1102_v27 = vpack.c.bf16 %v687_v24, %v686_v23  ;;  %v672_v35 = vmax.f32 %v599_v31, 0.0 }
  0xce   : > { %v605_v26 = vpop.f32.mrf.mxu1  ;;  %v549_v28 = vpop.f32.mrf.mxu2 }
  0xcf   : > { %1142 = vst [vmem:[%s1337_s19 + $0x48] sm:$0xff] %v1102_v27   ;;  %v550_v34 = vadd.f32 %v1327_v53, %v549_v28 }
  0xd0   : > { %v511_v30 = vpop.f32.mrf.mxu0 }
  0xd1   : > { %v512_v32 = vadd.f32 %v1327_v53, %v511_v30  ;;  %v639_v40 = vadd.f32 %v638_v4, %v550_v34 }
  0xd3   : > { %v601_v33 = vadd.f32 %v600_v6, %v512_v32  ;;  %v688_v45 = vmax.f32 %v639_v40, 0.0 }
  0xd4   : > { %v650_v9 = vpop.f32.mrf.mxu3 }
  0xd5   : > { %v673_v36 = vmax.f32 %v601_v33, 0.0 }
  0xd6   : > { %v608_v37 = vpop.f32.mrf.mxu1  ;;  %v551_v39 = vpop.f32.mrf.mxu2 }
  0xd7   : > { %v1067_v38 = vpack.c.bf16 %v673_v36, %v672_v35  ;;  %v552_v41 = vadd.f32 %v1327_v53, %v551_v39 }
  0xd8   : > { %v514_v42 = vpop.f32.mrf.mxu0 }
  0xd9   : > { %1135 = vst [vmem:[%s1337_s19 + $0x10] sm:$0xff] %v1067_v38   ;;  %v641_v44 = vadd.f32 %v640_v16, %v552_v41  ;;  %v515_v47 = vadd.f32 %v1327_v53, %v514_v42 }
  0xdb   : > { %v689_v46 = vmax.f32 %v641_v44, 0.0  ;;  %v604_v52 = vadd.f32 %v603_v15, %v515_v47 }
  0xdc   : > { %v653_v22 = vpop.f32.mrf.mxu3 }
  0xdd   : > { %v1107_v49 = vpack.c.bf16 %v689_v46, %v688_v45  ;;  %v674_v59 = vmax.f32 %v604_v52, 0.0 }
  0xde   : > { %v610_v48 = vpop.f32.mrf.mxu1  ;;  %v554_v50 = vpop.f32.mrf.mxu2 }
  0xdf   : > { %1143 = vst [vmem:[%s1337_s19 + $0x50] sm:$0xff] %v1107_v49   ;;  %v555_v58 = vadd.f32 %v1327_v53, %v554_v50 }
  0xe0   : > { %v516_v51 = vpop.f32.mrf.mxu0 }
  0xe1   : > { %v517_v54 = vadd.f32 %v1327_v53, %v516_v51  ;;  %v644_v0 = vadd.f32 %v643_v29, %v555_v58 }
  0xe3   : > { %v606_v55 = vadd.f32 %v605_v26, %v517_v54  ;;  %v690_v5 = vmax.f32 %v644_v0, 0.0 }
  0xe4   : > { %v655_v36 = vpop.f32.mrf.mxu3 }
  0xe5   : > { %v675_v60 = vmax.f32 %v606_v55, 0.0 }
  0xe6   : > { %v613_v61 = vpop.f32.mrf.mxu1  ;;  %v556_v63 = vpop.f32.mrf.mxu2 }
  0xe7   : > { %v1072_v62 = vpack.c.bf16 %v675_v60, %v674_v59  ;;  %v557_v1 = vadd.f32 %v1327_v53, %v556_v63 }
  0xe8   : > { %v519_v3 = vpop.f32.mrf.mxu0 }
  0xe9   : > { %1136 = vst [vmem:[%s1337_s19 + $0x18] sm:$0xff] %v1072_v62   ;;  %v646_v4 = vadd.f32 %v645_v43, %v557_v1  ;;  %v520_v7 = vadd.f32 %v1327_v53, %v519_v3 }
  0xeb   : > { %v691_v6 = vmax.f32 %v646_v4, 0.0  ;;  %v609_v13 = vadd.f32 %v608_v37, %v520_v7 }
  0xed   : > { %v1112_v10 = vpack.c.bf16 %v691_v6, %v690_v5  ;;  %v676_v17 = vmax.f32 %v609_v13, 0.0 }
  0xee   : > { %v615_v8 = vpop.f32.mrf.mxu1  ;;  %v559_v11 = vpop.f32.mrf.mxu2 }
  0xef   : > { %1144 = vst [vmem:[%s1337_s19 + $0x58] sm:$0xff] %v1112_v10   ;;  %v560_v16 = vadd.f32 %v1327_v53, %v559_v11  ;;  %v542_v10 = vadd.f32 %v1327_v53, %v1339_v2 }
  0xf0   : > { %v521_v12 = vpop.f32.mrf.mxu0 }
  0xf1   : > { %v522_v14 = vadd.f32 %v1327_v53, %v521_v12  ;;  %v649_v23 = vadd.f32 %v648_v57, %v560_v16 }
  0xf3   : > { %v611_v15 = vadd.f32 %v610_v48, %v522_v14  ;;  %v692_v27 = vmax.f32 %v649_v23, 0.0  ;;  %v658_v48 = vpop.f32.mrf.mxu3 }
  0xf5   : > { %v677_v18 = vmax.f32 %v611_v15, 0.0 }
  0xf6   : > { %v618_v19 = vpop.f32.mrf.mxu1  ;;  %v561_v21 = vpop.f32.mrf.mxu2 }
  0xf7   : > { %v1077_v20 = vpack.c.bf16 %v677_v18, %v676_v17  ;;  %v562_v24 = vadd.f32 %v1327_v53, %v561_v21 }
  0xf8   : > { %v524_v25 = vpop.f32.mrf.mxu0 }
  0xf9   : > { %1137 = vst [vmem:[%s1337_s19 + $0x20] sm:$0xff] %v1077_v20   ;;  %v651_v26 = vadd.f32 %v650_v9, %v562_v24  ;;  %v525_v29 = vadd.f32 %v1327_v53, %v524_v25 }
  0xfb   : > { %v693_v28 = vmax.f32 %v651_v26, 0.0  ;;  %v614_v34 = vadd.f32 %v613_v61, %v525_v29  ;;  %v660_v0 = vpop.f32.mrf.mxu3 }
  0xfd   : > { %v1117_v31 = vpack.c.bf16 %v693_v28, %v692_v27  ;;  %v678_v39 = vmax.f32 %v614_v34, 0.0 }
  0xfe   : > { %v620_v30 = vpop.f32.mrf.mxu1  ;;  %v564_v32 = vpop.f32.mrf.mxu2 }
  0xff   : > { %1145 = vst [vmem:[%s1337_s19 + $0x60] sm:$0xff] %v1117_v31   ;;  %v565_v38 = vadd.f32 %v1327_v53, %v564_v32 }
 0x100   : > { %v526_v33 = vpop.f32.mrf.mxu0 }
 0x101   : > { %v527_v35 = vadd.f32 %v1327_v53, %v526_v33  ;;  %v654_v44 = vadd.f32 %v653_v22, %v565_v38 }
 0x103   : > { %v616_v37 = vadd.f32 %v615_v8, %v527_v35  ;;  %v694_v49 = vmax.f32 %v654_v44, 0.0  ;;  %v540_v8 = vadd.f32 %v1327_v53, %v1330_v56  ;;  %v663_v18 = vpop.f32.mrf.mxu3 }
 0x105   : > { %v679_v40 = vmax.f32 %v616_v37, 0.0 }
 0x106   : > { %v623_v41 = vpop.f32.mrf.mxu1  ;;  %v566_v43 = vpop.f32.mrf.mxu2 }
 0x107   : > { %v1082_v42 = vpack.c.bf16 %v679_v40, %v678_v39  ;;  %v567_v45 = vadd.f32 %v1327_v53, %v566_v43 }
 0x108   : > { %v529_v46 = vpop.f32.mrf.mxu0 }
 0x109   : > { %1138 = vst [vmem:[%s1337_s19 + $0x28] sm:$0xff] %v1082_v42   ;;  %v656_v47 = vadd.f32 %v655_v36, %v567_v45  ;;  %v530_v51 = vadd.f32 %v1327_v53, %v529_v46 }
 0x10b   : > { %v695_v50 = vmax.f32 %v656_v47, 0.0  ;;  %v619_v58 = vadd.f32 %v618_v19, %v530_v51  ;;  %v665_v32 = vpop.f32.mrf.mxu3 }
 0x10d   : > { %v1122_v54 = vpack.c.bf16 %v695_v50, %v694_v49  ;;  %v680_v62 = vmax.f32 %v619_v58, 0.0 }
 0x10e   : > { %v625_v52 = vpop.f32.mrf.mxu1  ;;  %v569_v55 = vpop.f32.mrf.mxu2 }
 0x10f   : > { %1146 = vst [vmem:[%s1337_s19 + $0x68] sm:$0xff] %v1122_v54   ;;  %v570_v61 = vadd.f32 %v1327_v53, %v569_v55 }
 0x110   : > { %v531_v57 = vpop.f32.mrf.mxu0 }
 0x111   : > { %v532_v59 = vadd.f32 %v1327_v53, %v531_v57  ;;  %v659_v5 = vadd.f32 %v658_v48, %v570_v61 }
 0x113   : > { %v621_v60 = vadd.f32 %v620_v30, %v532_v59  ;;  %v696_v11 = vmax.f32 %v659_v5, 0.0 }
 0x115   : > { %v681_v63 = vmax.f32 %v621_v60, 0.0 }
 0x116   : > { %v628_v1 = vpop.f32.mrf.mxu1  ;;  %v571_v4 = vpop.f32.mrf.mxu2 }
 0x117   : > { %v1087_v3 = vpack.c.bf16 %v681_v63, %v680_v62  ;;  %v572_v6 = vadd.f32 %v1327_v53, %v571_v4  ;;  %v629_v12 = vadd.f32 %v628_v1, %v540_v8 }
 0x118   : > { %v534_v7 = vpop.f32.mrf.mxu0 }
 0x119   : > { %1139 = vst [vmem:[%s1337_s19 + $0x30] sm:$0xff] %v1087_v3   ;;  %v661_v9 = vadd.f32 %v660_v0, %v572_v6  ;;  %v535_v14 = vadd.f32 %v1327_v53, %v534_v7  ;;  %v684_v20 = vmax.f32 %v629_v12, 0.0 }
 0x11b   : > { %v697_v13 = vmax.f32 %v661_v9, 0.0  ;;  %v624_v22 = vadd.f32 %v623_v41, %v535_v14 }
 0x11d   : > { %v1127_v16 = vpack.c.bf16 %v697_v13, %v696_v11  ;;  %v682_v26 = vmax.f32 %v624_v22, 0.0 }
 0x11e   : > { %v630_v15 = vpop.f32.mrf.mxu1  ;;  %v574_v19 = vpop.f32.mrf.mxu2 }
 0x11f   : > { %v631_v17 = vadd.f32 %v630_v15, %v542_v10  ;;  %1147 = vst [vmem:[%s1337_s19 + $0x70] sm:$0xff] %v1127_v16   ;;  %v575_v25 = vadd.f32 %v1327_v53, %v574_v19 }
 0x120   : > { %v536_v56 = vpop.f32.mrf.mxu0 }
 0x121   : > { %v685_v21 = vmax.f32 %v631_v17, 0.0  ;;  %v537_v23 = vadd.f32 %v1327_v53, %v536_v56  ;;  %v664_v30 = vadd.f32 %v663_v18, %v575_v25 }
 0x123   : > { %v1097_v2 = vpack.c.bf16 %v685_v21, %v684_v20  ;;  %v626_v24 = vadd.f32 %v625_v52, %v537_v23  ;;  %v698_v34 = vmax.f32 %v664_v30, 0.0 }
 0x125   : > { %1141 = vst [vmem:[%s1337_s19 + $0x40] sm:$0xff] %v1097_v2   ;;  %v683_v27 = vmax.f32 %v626_v24, 0.0 }
 0x126   : > { %v576_v29 = vpop.f32.mrf.mxu2 }
 0x127   : > { %v1092_v28 = vpack.c.bf16 %v683_v27, %v682_v26  ;;  %v577_v31 = vadd.f32 %v1327_v53, %v576_v29 }
 0x129   : > { %1140 = vst [vmem:[%s1337_s19 + $0x38] sm:$0xff] %v1092_v28   ;;  %v666_v33 = vadd.f32 %v665_v32, %v577_v31 }
 0x12b   : > { %v699_v35 = vmax.f32 %v666_v33, 0.0 }
 0x12d   : > { %v1132_v36 = vpack.c.bf16 %v699_v35, %v698_v34 }
 0x12f   : > { %1148 = vst [vmem:[%s1337_s19 + $0x78] sm:$0xff] %v1132_v36  }
 0x130 PF: > { %s13_s12 = sadd.s32 1, %s1175_s12  }
 0x131   : > { %p10_p4 = scmp.ge.s32.totalorder %s13_s12, 4  }
 0x133   :  { %12 = sbr.rel (!%p10_p4) target bundleno = 1 (0x1), region = 62 }

// kernel: _lambda_.3
= control target key start
LH: loop header
LB: loop body
LE: loop exit
PB: predicated region body
PF: predicated region fallthrough
CT: control target
= control target key end

     0   :  { %s11249_s6 = smov 1   ;;  %s11250_s10 = smov 2   ;;  %s13403_s0 = inlined_call_operand.smem [shape: u32[43], index: -1, kind: input, shape index: {}] }
   0x1   :  { %s11300_s5 = sld [smem:[%s13403_s0]]   ;;  %s11251_s14 = smov 3  }
   0x2   :  { %s11305_s9 = sld [smem:[%s13403_s0 + %s11249_s6]]   ;;  %s11252_s18 = smov 4  }
   0x3   :  { %s11310_s13 = sld [smem:[%s13403_s0 + %s11250_s10]]   ;;  %s11253_s22 = smov 5  }
   0x4   :  { %s11315_s17 = sld [smem:[%s13403_s0 + %s11251_s14]]   ;;  %s11254_s26 = smov 6  }
   0x5   :  { %s11320_s21 = sld [smem:[%s13403_s0 + %s11252_s18]]   ;;  %s11255_s30 = smov 7  }
   0x6   :  { %s11325_s25 = sld [smem:[%s13403_s0 + %s11253_s22]]   ;;  %s11256_s4 = smov 8  }
   0x7   :  { %s11330_s29 = sld [smem:[%s13403_s0 + %s11254_s26]]   ;;  %s11257_s10 = smov 9  }
   0x8   :  { %s11335_s3 = sld [smem:[%s13403_s0 + %s11255_s30]]   ;;  %s11258_s15 = smov 10  }
   0x9   :  { %s11340_s8 = sld [smem:[%s13403_s0 + %s11256_s4]]   ;;  %s11259_s20 = smov 11  }
   0xa   :  { %s11345_s14 = sld [smem:[%s13403_s0 + %s11257_s10]]   ;;  %s11260_s26 = smov 12  }
   0xb   :  { %s11350_s19 = sld [smem:[%s13403_s0 + %s11258_s15]]   ;;  %s11261_s1 = smov 13  }
   0xc   :  { %s11355_s24 = sld [smem:[%s13403_s0 + %s11259_s20]]   ;;  %s11262_s7 = smov 14  }
   0xd   :  { %s11360_s30 = sld [smem:[%s13403_s0 + %s11260_s26]]   ;;  %s11263_s15 = smov 15  }
   0xe   :  { %s11365_s6 = sld [smem:[%s13403_s0 + %s11261_s1]]   ;;  %s11264_s22 = smov 16  }
   0xf   :  { %s11370_s12 = sld [smem:[%s13403_s0 + %s11262_s7]]   ;;  %s11265_s28 = smov 17  }
  0x10   :  { %s11375_s20 = sld [smem:[%s13403_s0 + %s11263_s15]]   ;;  %s11266_s7 = smov 18  }
  0x11   :  { %s11380_s27 = sld [smem:[%s13403_s0 + %s11264_s22]]   ;;  %s11267_s15 = smov 19  }
  0x12   :  { %s11385_s4 = sld [smem:[%s13403_s0 + %s11265_s28]]   ;;  %s11268_s22 = smov 20  }
  0x13   :  { %13415 = sst [smem:[#allocation5_spill]] %s11360_s30  ;;  %s11269_s28 = smov 21  }
  0x14   :  { %s11390_s30 = sld [smem:[%s13403_s0 + %s11266_s7]]   ;;  %s11270_s7 = smov 22  }
  0x15   :  { %13416 = sst [smem:[#allocation6_spill]] %s11370_s12 }
  0x16   :  { %s11395_s12 = sld [smem:[%s13403_s0 + %s11267_s15]]   ;;  %s11271_s15 = smov 23  }
  0x17   :  { %13417 = sst [smem:[#allocation7_spill]] %s11380_s27 }
  0x18   :  { %13418 = sst [smem:[#allocation8_spill]] %s11385_s4 }
  0x19   :  { %s11400_s27 = sld [smem:[%s13403_s0 + %s11268_s22]]   ;;  %s11272_s22 = smov 24  }
  0x1a   :  { %13419 = sst [smem:[#allocation9_spill]] %s11390_s30 }
  0x1b   :  { %s11405_s4 = sld [smem:[%s13403_s0 + %s11269_s28]]   ;;  %s11273_s28 = smov 25  }
  0x1c   :  { %13420 = sst [smem:[#allocation10_spill]] %s11395_s12 }
  0x1d   :  { %s11410_s30 = sld [smem:[%s13403_s0 + %s11270_s7]]   ;;  %s11274_s7 = smov 26  }
  0x1e   :  { %s11415_s12 = sld [smem:[%s13403_s0 + %s11271_s15]]   ;;  %s11275_s15 = smov 27  }
  0x1f   :  { %13421 = sst [smem:[#allocation11_spill]] %s11400_s27 }
  0x20   :  { %s11420_s27 = sld [smem:[%s13403_s0 + %s11272_s22]]   ;;  %s11276_s22 = smov 28  }
  0x21   :  { %13422 = sst [smem:[#allocation12_spill]] %s11405_s4 }
  0x22   :  { %s11425_s4 = sld [smem:[%s13403_s0 + %s11273_s28]]   ;;  %s11277_s28 = smov 29  }
  0x23   :  { %13423 = sst [smem:[#allocation13_spill]] %s11410_s30 }
  0x24   :  { %13424 = sst [smem:[#allocation14_spill]] %s11415_s12 }
  0x25   :  { %s11430_s30 = sld [smem:[%s13403_s0 + %s11274_s7]]   ;;  %s11278_s7 = smov 30  }
  0x26   :  { %13425 = sst [smem:[#allocation15_spill]] %s11420_s27 }
  0x27   :  { %s11435_s12 = sld [smem:[%s13403_s0 + %s11275_s15]]   ;;  %s11279_s15 = smov 31  }
  0x28   :  { %13426 = sst [smem:[#allocation16_spill]] %s11425_s4 }
  0x29   :  { %s11440_s27 = sld [smem:[%s13403_s0 + %s11276_s22]]   ;;  %s11280_s22 = smov 32  }
  0x2a   :  { %s11445_s4 = sld [smem:[%s13403_s0 + %s11277_s28]]   ;;  %s11281_s28 = smov 33  }
  0x2b   :  { %13427 = sst [smem:[#allocation17_spill]] %s11430_s30 }
  0x2c   :  { %s11450_s30 = sld [smem:[%s13403_s0 + %s11278_s7]]   ;;  %s11282_s7 = smov 34  }
  0x2d   :  { %13428 = sst [smem:[#allocation18_spill]] %s11435_s12 }
  0x2e   :  { %s11455_s12 = sld [smem:[%s13403_s0 + %s11279_s15]]   ;;  %s11283_s15 = smov 35  }
  0x2f   :  { %13429 = sst [smem:[#allocation19_spill]] %s11440_s27 }
  0x30   :  { %13430 = sst [smem:[#allocation20_spill]] %s11445_s4 }
  0x31   :  { %s11460_s27 = sld [smem:[%s13403_s0 + %s11280_s22]]   ;;  %s11284_s22 = smov 36  }
  0x32   :  { %13431 = sst [smem:[#allocation21_spill]] %s11450_s30 }
  0x33   :  { %s11465_s4 = sld [smem:[%s13403_s0 + %s11281_s28]]   ;;  %s11285_s28 = smov 37  }
  0x34   :  { %13432 = sst [smem:[#allocation22_spill]] %s11455_s12 }
  0x35   :  { %s11470_s30 = sld [smem:[%s13403_s0 + %s11282_s7]]   ;;  %s11286_s7 = smov 38  }
  0x36   :  { %s11475_s12 = sld [smem:[%s13403_s0 + %s11283_s15]]   ;;  %s11287_s15 = smov 39  }
  0x37   :  { %13433 = sst [smem:[#allocation23_spill]] %s11460_s27 }
  0x38   :  { %s11480_s27 = sld [smem:[%s13403_s0 + %s11284_s22]]   ;;  %s11288_s22 = smov 40  }
  0x39   :  { %13434 = sst [smem:[#allocation24_spill]] %s11465_s4 }
  0x3a   :  { %s11485_s4 = sld [smem:[%s13403_s0 + %s11285_s28]]   ;;  %s11289_s28 = smov 41  }
  0x3b   :  { %13435 = sst [smem:[#allocation25_spill]] %s11470_s30 }
  0x3c   :  { %13436 = sst [smem:[#allocation26_spill]] %s11475_s12 }
  0x3d   :  { %s11490_s30 = sld [smem:[%s13403_s0 + %s11286_s7]]   ;;  %s11290_s7 = smov 42  }
  0x3e   :  { %13437 = sst [smem:[#allocation27_spill]] %s11480_s27 }
  0x3f   :  { %s11495_s12 = sld [smem:[%s13403_s0 + %s11287_s15]]  }
  0x40   :  { %13438 = sst [smem:[#allocation28_spill]] %s11485_s4 }
  0x41   :  { %s11500_s27 = sld [smem:[%s13403_s0 + %s11288_s22]]  }
  0x42   :  { %s11505_s4 = sld [smem:[%s13403_s0 + %s11289_s28]]  }
  0x43   :  { %13439 = sst [smem:[#allocation29_spill]] %s11490_s30 }
  0x44   :  { %s11510_s30 = sld [smem:[%s13403_s0 + %s11290_s7]]  }
  0x45   :  { %v7138_v0 = vld [vmem:[%s11305_s9 + $0xe0] sm:$0xf]  ;;  %v10371_v1 = vld [vmem:[%s11305_s9 + $0xec] sm:$0xf0] }
  0x46   :  { %v7266_v2 = vld [vmem:[%s11305_s9 + $0x1e0] sm:$0xf]  ;;  %v7139_v3 = vor.u32 %v10371_v1, %v7138_v0  ;;  %v10403_v4 = vld [vmem:[%s11305_s9 + $0x1ec] sm:$0xf0] }
  0x47   :  { %v7394_v5 = vld [vmem:[%s11305_s9 + $0x2e0] sm:$0xf]  ;;  %v10435_v6 = vld [vmem:[%s11305_s9 + $0x2ec] sm:$0xf0]  ;;  %v7267_v7 = vor.u32 %v10403_v4, %v7266_v2 }
  0x48   :  { %v7395_v8 = vor.u32 %v10435_v6, %v7394_v5  ;;  %v7522_v9 = vld [vmem:[%s11305_s9 + $0x3e0] sm:$0xf]  ;;  %v10467_v10 = vld [vmem:[%s11305_s9 + $0x3ec] sm:$0xf0]  ;;  %1094 = vmatpush.bf16.msra.mxu0 %v7139_v3 }
  0x49   :  { %v7122_v11 = vld [vmem:[%s11305_s9 + $0xc0] sm:$0xf]  ;;  %v7523_v12 = vor.u32 %v10467_v10, %v7522_v9  ;;  %v10367_v13 = vld [vmem:[%s11305_s9 + $0xcc] sm:$0xf0]  ;;  %1107 = vmatpush.bf16.msra.mxu1 %v7267_v7 }
  0x4a   :  { %v7250_v14 = vld [vmem:[%s11305_s9 + $0x1c0] sm:$0xf]  ;;  %v10399_v15 = vld [vmem:[%s11305_s9 + $0x1cc] sm:$0xf0]  ;;  %1120 = vmatpush.bf16.msra.mxu2 %v7395_v8  ;;  %v7123_v16 = vor.u32 %v10367_v13, %v7122_v11 }
  0x4b   :  { %v7251_v17 = vor.u32 %v10399_v15, %v7250_v14  ;;  %v7378_v18 = vld [vmem:[%s11305_s9 + $0x2c0] sm:$0xf]  ;;  %v10431_v19 = vld [vmem:[%s11305_s9 + $0x2cc] sm:$0xf0]  ;;  %1133 = vmatpush.bf16.msra.mxu3 %v7523_v12 }
  0x4c   :  { %v7506_v20 = vld [vmem:[%s11305_s9 + $0x3c0] sm:$0xf]  ;;  %v7379_v21 = vor.u32 %v10431_v19, %v7378_v18  ;;  %v10463_v22 = vld [vmem:[%s11305_s9 + $0x3cc] sm:$0xf0]  ;;  %1095 = vmatpush.bf16.msra.mxu0 %v7123_v16 }
  0x4d   :  { %v7106_v23 = vld [vmem:[%s11305_s9 + $0xa0] sm:$0xf]  ;;  %v10363_v24 = vld [vmem:[%s11305_s9 + $0xac] sm:$0xf0]  ;;  %v7507_v25 = vor.u32 %v10463_v22, %v7506_v20  ;;  %1108 = vmatpush.bf16.msra.mxu1 %v7251_v17 }
  0x4e   :  { %v7234_v26 = vld [vmem:[%s11305_s9 + $0x1a0] sm:$0xf]  ;;  %v10395_v27 = vld [vmem:[%s11305_s9 + $0x1ac] sm:$0xf0]  ;;  %v7107_v29 = vor.u32 %v10363_v24, %v7106_v23  ;;  %1121 = vmatpush.bf16.msra.mxu2 %v7379_v21 }
  0x4f   :  { %v7362_v28 = vld [vmem:[%s11305_s9 + $0x2a0] sm:$0xf]  ;;  %v10427_v30 = vld [vmem:[%s11305_s9 + $0x2ac] sm:$0xf0]  ;;  %v7235_v33 = vor.u32 %v10395_v27, %v7234_v26  ;;  %1134 = vmatpush.bf16.msra.mxu3 %v7507_v25 }
  0x50   :  { %v7490_v31 = vld [vmem:[%s11305_s9 + $0x3a0] sm:$0xf]  ;;  %v10459_v32 = vld [vmem:[%s11305_s9 + $0x3ac] sm:$0xf0]  ;;  %v7363_v34 = vor.u32 %v10427_v30, %v7362_v28  ;;  %1096 = vmatpush.bf16.msra.mxu0 %v7107_v29  ;;  %v10369_v29 = vld [vmem:[%s11305_s9 + $0xe4] sm:$0xf] }
  0x51   :  { %v7090_v35 = vld [vmem:[%s11305_s9 + $0x80] sm:$0xf]  ;;  %v10359_v36 = vld [vmem:[%s11305_s9 + $0x8c] sm:$0xf0]  ;;  %v7491_v38 = vor.u32 %v10459_v32, %v7490_v31  ;;  %1109 = vmatpush.bf16.msra.mxu1 %v7235_v33  ;;  %v7140_v30 = vld [vmem:[%s11305_s9 + $0xf0] sm:$0xf0] }
  0x52   :  { %v7218_v37 = vld [vmem:[%s11305_s9 + $0x180] sm:$0xf]  ;;  %v10391_v39 = vld [vmem:[%s11305_s9 + $0x18c] sm:$0xf0]  ;;  %v7091_v44 = vor.u32 %v10359_v36, %v7090_v35  ;;  %1122 = vmatpush.bf16.msra.mxu2 %v7363_v34  ;;  %v10401_v31 = vld [vmem:[%s11305_s9 + $0x1e4] sm:$0xf] }
  0x53   :  { %v7346_v40 = vld [vmem:[%s11305_s9 + $0x280] sm:$0xf]  ;;  %v10423_v41 = vld [vmem:[%s11305_s9 + $0x28c] sm:$0xf0]  ;;  %v7219_v45 = vor.u32 %v10391_v39, %v7218_v37  ;;  %1135 = vmatpush.bf16.msra.mxu3 %v7491_v38  ;;  %v7268_v33 = vld [vmem:[%s11305_s9 + $0x1f0] sm:$0xf0] }
  0x54   :  { %v7474_v42 = vld [vmem:[%s11305_s9 + $0x380] sm:$0xf]  ;;  %v10455_v43 = vld [vmem:[%s11305_s9 + $0x38c] sm:$0xf0]  ;;  %v7347_v46 = vor.u32 %v10423_v41, %v7346_v40  ;;  %1097 = vmatpush.bf16.msra.mxu0 %v7091_v44  ;;  %v10433_v34 = vld [vmem:[%s11305_s9 + $0x2e4] sm:$0xf]  ;;  %v7143_v41 = vor.u32 %v10369_v29, %v7140_v30 }
  0x55   :  { %v7074_v47 = vld [vmem:[%s11305_s9 + $0x60] sm:$0xf]  ;;  %v10355_v48 = vld [vmem:[%s11305_s9 + $0x6c] sm:$0xf0]  ;;  %v7475_v50 = vor.u32 %v10455_v43, %v7474_v42  ;;  %1110 = vmatpush.bf16.msra.mxu1 %v7219_v45  ;;  %v7396_v35 = vld [vmem:[%s11305_s9 + $0x2f0] sm:$0xf0]  ;;  %v7271_v43 = vor.u32 %v10401_v31, %v7268_v33 }
  0x56   :  { %v7202_v49 = vld [vmem:[%s11305_s9 + $0x160] sm:$0xf]  ;;  %v10387_v51 = vld [vmem:[%s11305_s9 + $0x16c] sm:$0xf0]  ;;  %v7075_v56 = vor.u32 %v10355_v48, %v7074_v47  ;;  %1123 = vmatpush.bf16.msra.mxu2 %v7347_v46  ;;  %v10465_v38 = vld [vmem:[%s11305_s9 + $0x3e4] sm:$0xf]  ;;  %v7399_v44 = vor.u32 %v10433_v34, %v7396_v35 }
  0x57   :  { %v7330_v52 = vld [vmem:[%s11305_s9 + $0x260] sm:$0xf]  ;;  %v10419_v53 = vld [vmem:[%s11305_s9 + $0x26c] sm:$0xf0]  ;;  %v7203_v57 = vor.u32 %v10387_v51, %v7202_v49  ;;  %1136 = vmatpush.bf16.msra.mxu3 %v7475_v50  ;;  %v7524_v39 = vld [vmem:[%s11305_s9 + $0x3f0] sm:$0xf0] }
  0x58   :  { %v7458_v54 = vld [vmem:[%s11305_s9 + $0x360] sm:$0xf]  ;;  %v10451_v55 = vld [vmem:[%s11305_s9 + $0x36c] sm:$0xf0]  ;;  %v7331_v58 = vor.u32 %v10419_v53, %v7330_v52  ;;  %1098 = vmatpush.bf16.msra.mxu0 %v7075_v56  ;;  %v10365_v42 = vld [vmem:[%s11305_s9 + $0xc4] sm:$0xf]  ;;  %v7527_v49 = vor.u32 %v10465_v38, %v7524_v39 }
  0x59   :  { %v7058_v59 = vld [vmem:[%s11305_s9 + $0x40] sm:$0xf]  ;;  %v10351_v60 = vld [vmem:[%s11305_s9 + $0x4c] sm:$0xf0]  ;;  %v7459_v62 = vor.u32 %v10451_v55, %v7458_v54  ;;  %1111 = vmatpush.bf16.msra.mxu1 %v7203_v57  ;;  %v7124_v45 = vld [vmem:[%s11305_s9 + $0xd0] sm:$0xf0] }
  0x5a   :  { %v7186_v61 = vld [vmem:[%s11305_s9 + $0x140] sm:$0xf]  ;;  %v10383_v63 = vld [vmem:[%s11305_s9 + $0x14c] sm:$0xf0]  ;;  %v7059_v4 = vor.u32 %v10351_v60, %v7058_v59  ;;  %1124 = vmatpush.bf16.msra.mxu2 %v7331_v58  ;;  %v10397_v46 = vld [vmem:[%s11305_s9 + $0x1c4] sm:$0xf]  ;;  %v7127_v56 = vor.u32 %v10365_v42, %v7124_v45 }
  0x5b   :  { %v7314_v0 = vld [vmem:[%s11305_s9 + $0x240] sm:$0xf]  ;;  %v10415_v1 = vld [vmem:[%s11305_s9 + $0x24c] sm:$0xf0]  ;;  %v7187_v5 = vor.u32 %v10383_v63, %v7186_v61  ;;  %1137 = vmatpush.bf16.msra.mxu3 %v7459_v62  ;;  %v7252_v47 = vld [vmem:[%s11305_s9 + $0x1d0] sm:$0xf0] }
  0x5c   :  { %v7442_v2 = vld [vmem:[%s11305_s9 + $0x340] sm:$0xf]  ;;  %v10447_v3 = vld [vmem:[%s11305_s9 + $0x34c] sm:$0xf0]  ;;  %v7315_v6 = vor.u32 %v10415_v1, %v7314_v0  ;;  %1099 = vmatpush.bf16.msra.mxu0 %v7059_v4  ;;  %v10429_v50 = vld [vmem:[%s11305_s9 + $0x2c4] sm:$0xf]  ;;  %v7255_v60 = vor.u32 %v10397_v46, %v7252_v47 }
  0x5d   :  { %v7042_v7 = vld [vmem:[%s11305_s9 + $0x20] sm:$0xf]  ;;  %v10347_v8 = vld [vmem:[%s11305_s9 + $0x2c] sm:$0xf0]  ;;  %v7443_v10 = vor.u32 %v10447_v3, %v7442_v2  ;;  %1112 = vmatpush.bf16.msra.mxu1 %v7187_v5  ;;  %v7380_v51 = vld [vmem:[%s11305_s9 + $0x2d0] sm:$0xf0] }
  0x5e   :  { %v7170_v9 = vld [vmem:[%s11305_s9 + $0x120] sm:$0xf]  ;;  %v10379_v11 = vld [vmem:[%s11305_s9 + $0x12c] sm:$0xf0]  ;;  %v7043_v17 = vor.u32 %v10347_v8, %v7042_v7  ;;  %1125 = vmatpush.bf16.msra.mxu2 %v7315_v6  ;;  %v10461_v52 = vld [vmem:[%s11305_s9 + $0x3c4] sm:$0xf]  ;;  %v7383_v61 = vor.u32 %v10429_v50, %v7380_v51 }
  0x5f   :  { %v7298_v12 = vld [vmem:[%s11305_s9 + $0x220] sm:$0xf]  ;;  %v10411_v13 = vld [vmem:[%s11305_s9 + $0x22c] sm:$0xf0]  ;;  %v7171_v21 = vor.u32 %v10379_v11, %v7170_v9  ;;  %1138 = vmatpush.bf16.msra.mxu3 %v7443_v10  ;;  %v7508_v54 = vld [vmem:[%s11305_s9 + $0x3d0] sm:$0xf0] }
  0x60   :  { %v7426_v14 = vld [vmem:[%s11305_s9 + $0x320] sm:$0xf]  ;;  %v10443_v15 = vld [vmem:[%s11305_s9 + $0x32c] sm:$0xf0]  ;;  %v7299_v22 = vor.u32 %v10411_v13, %v7298_v12  ;;  %1100 = vmatpush.bf16.msra.mxu0 %v7043_v17  ;;  %v10361_v55 = vld [vmem:[%s11305_s9 + $0xa4] sm:$0xf]  ;;  %v7511_v0 = vor.u32 %v10461_v52, %v7508_v54 }
  0x61   :  { %v7026_v16 = vld [vmem:[%s11305_s9] sm:$0xf]  ;;  %v10343_v18 = vld [vmem:[%s11305_s9 + $0xc] sm:$0xf0]  ;;  %v7427_v26 = vor.u32 %v10443_v15, %v7426_v14  ;;  %1113 = vmatpush.bf16.msra.mxu1 %v7171_v21  ;;  %v7108_v62 = vld [vmem:[%s11305_s9 + $0xb0] sm:$0xf0] }
  0x62   :  { %v7154_v19 = vld [vmem:[%s11305_s9 + $0x100] sm:$0xf]  ;;  %v10375_v20 = vld [vmem:[%s11305_s9 + $0x10c] sm:$0xf0]  ;;  %v7027_v32 = vor.u32 %v10343_v18, %v7026_v16  ;;  %1126 = vmatpush.bf16.msra.mxu2 %v7299_v22  ;;  %v10393_v63 = vld [vmem:[%s11305_s9 + $0x1a4] sm:$0xf]  ;;  %v7111_v6 = vor.u32 %v10361_v55, %v7108_v62 }
  0x63   :  { %v7282_v23 = vld [vmem:[%s11305_s9 + $0x200] sm:$0xf]  ;;  %v10407_v24 = vld [vmem:[%s11305_s9 + $0x20c] sm:$0xf0]  ;;  %v7155_v36 = vor.u32 %v10375_v20, %v7154_v19  ;;  %1139 = vmatpush.bf16.msra.mxu3 %v7427_v26  ;;  %v7236_v1 = vld [vmem:[%s11305_s9 + $0x1b0] sm:$0xf0] }
  0x64   :  { %v176_v25 = vld [vmem:[%s11300_s5] sm:$0xf]  ;;  %v10439_v28 = vld [vmem:[%s11305_s9 + $0x30c] sm:$0xf0]  ;;  %v7283_v37 = vor.u32 %v10407_v24, %v7282_v23  ;;  %1101 = vmatpush.bf16.msra.mxu0 %v7027_v32  ;;  %v10425_v2 = vld [vmem:[%s11305_s9 + $0x2a4] sm:$0xf]  ;;  %v7239_v7 = vor.u32 %v10393_v63, %v7236_v1 }
  0x65   :  { %v7410_v27 = vld [vmem:[%s11305_s9 + $0x300] sm:$0xf]  ;;  %445 = vst [vmem:[#allocation1] ss:$9 sm:$0xff] %v176_v25  ;;  %v2167_v48 = vunpack.c.l.bf16 %v176_v25  ;;  %1114 = vmatpush.bf16.msra.mxu1 %v7155_v36  ;;  %v7364_v3 = vld [vmem:[%s11305_s9 + $0x2b0] sm:$0xf0] }
  0x66   :  { %v7411_v40 = vor.u32 %v10439_v28, %v7410_v27  ;;  %1127 = vmatpush.bf16.msra.mxu2 %v7283_v37  ;;  %v10457_v4 = vld [vmem:[%s11305_s9 + $0x3a4] sm:$0xf]  ;;  %v7492_v5 = vld [vmem:[%s11305_s9 + $0x3b0] sm:$0xf0]  ;;  %v7367_v8 = vor.u32 %v10425_v2, %v7364_v3 }
  0x67   :  { %v10357_v9 = vld [vmem:[%s11305_s9 + $0x84] sm:$0xf]  ;;  %v7092_v10 = vld [vmem:[%s11305_s9 + $0x90] sm:$0xf0]  ;;  %v7495_v12 = vor.u32 %v10457_v4, %v7492_v5 }
  0x68   :  { %1140 = vmatpush.bf16.msra.mxu3 %v7411_v40  ;;  %1146 = vmatpush.bf16.msrb.mxu0 %v7143_v41  ;;  %v10389_v11 = vld [vmem:[%s11305_s9 + $0x184] sm:$0xf]  ;;  %v7220_v13 = vld [vmem:[%s11305_s9 + $0x190] sm:$0xf0]  ;;  %v7095_v18 = vor.u32 %v10357_v9, %v7092_v10  ;;  %v10404_v10 = vld [vmem:[%s11305_s9 + $0x1f4] sm:$0xf0] }
  0x69   :  { %1159 = vmatpush.bf16.msrb.mxu1 %v7271_v43  ;;  %v10421_v14 = vld [vmem:[%s11305_s9 + $0x284] sm:$0xf]  ;;  %v7348_v15 = vld [vmem:[%s11305_s9 + $0x290] sm:$0xf0]  ;;  %v7223_v19 = vor.u32 %v10389_v11, %v7220_v13  ;;  %v7402_v11 = vld [vmem:[%s11305_s9 + $0x2e8] sm:$0xf] }
  0x6a   :  { %1172 = vmatpush.bf16.msrb.mxu2 %v7399_v44  ;;  %v10453_v16 = vld [vmem:[%s11305_s9 + $0x384] sm:$0xf]  ;;  %v7476_v17 = vld [vmem:[%s11305_s9 + $0x390] sm:$0xf0]  ;;  %v7351_v20 = vor.u32 %v10421_v14, %v7348_v15  ;;  %v7530_v15 = vld [vmem:[%s11305_s9 + $0x3e8] sm:$0xf] }
  0x6b   :  { %v10353_v21 = vld [vmem:[%s11305_s9 + $0x64] sm:$0xf]  ;;  %v7076_v22 = vld [vmem:[%s11305_s9 + $0x70] sm:$0xf0]  ;;  %v7479_v24 = vor.u32 %v10453_v16, %v7476_v17  ;;  %v10468_v16 = vld [vmem:[%s11305_s9 + $0x3f4] sm:$0xf0] }
  0x6c   :  { %v11592_v53 = vld [vmem:[#allocation1 + $0x12] sm:$0xff]  ;;  %v11596_v57 = vld [vmem:[#allocation1] sm:$0xff]  ;;  %v11600_v59 = vld [vmem:[#allocation1 + $0x9] sm:$0xff]  ;;  %1185 = vmatpush.bf16.msrb.mxu3 %v7527_v49  ;;  %1147 = vmatpush.bf16.msrb.mxu0 %v7127_v56  ;;  %v7079_v30 = vor.u32 %v10353_v21, %v7076_v22 }
  0x6d   :  { %v11598_v58 = vld [vmem:[#allocation1 + $0x1b] sm:$0xff]  ;;  %1128 = vmatmul.bf16.vlgmr.msra.gmra.mxu2 %v11592_v53  ;;  %1102 = vmatmul.bf16.vlgmr.msra.gmra.mxu0 %v11596_v57  ;;  %v10385_v23 = vld [vmem:[%s11305_s9 + $0x164] sm:$0xf]  ;;  %v7130_v21 = vld [vmem:[%s11305_s9 + $0xc8] sm:$0xf] }
  0x6e   :  { %2169 = vst [vmem:[#allocation1] ss:$4 sm:$0xff] %v2167_v48  ;;  %1141 = vmatmul.bf16.vlgmr.msra.gmra.mxu3 %v11598_v58  ;;  %1115 = vmatmul.bf16.vlgmr.msra.gmra.mxu1 %v11600_v59  ;;  %v7204_v25 = vld [vmem:[%s11305_s9 + $0x170] sm:$0xf0]  ;;  %v10417_v26 = vld [vmem:[%s11305_s9 + $0x264] sm:$0xf] }
  0x6f   :  { %1160 = vmatpush.bf16.msrb.mxu1 %v7255_v60  ;;  %1173 = vmatpush.bf16.msrb.mxu2 %v7383_v61  ;;  %v7332_v27 = vld [vmem:[%s11305_s9 + $0x270] sm:$0xf0]  ;;  %v10449_v28 = vld [vmem:[%s11305_s9 + $0x364] sm:$0xf]  ;;  %v7207_v31 = vor.u32 %v10385_v23, %v7204_v25  ;;  %v10368_v22 = vld [vmem:[%s11305_s9 + $0xd4] sm:$0xf0] }
  0x70   :  { %1186 = vmatpush.bf16.msrb.mxu3 %v7511_v0  ;;  %1148 = vmatpush.bf16.msrb.mxu0 %v7111_v6  ;;  %v7460_v29 = vld [vmem:[%s11305_s9 + $0x370] sm:$0xf0]  ;;  %v7335_v32 = vor.u32 %v10417_v26, %v7332_v27  ;;  %v10349_v33 = vld [vmem:[%s11305_s9 + $0x44] sm:$0xf]  ;;  %v7146_v6 = vld [vmem:[%s11305_s9 + $0xe8] sm:$0xf] }
  0x71   :  { %v7060_v34 = vld [vmem:[%s11305_s9 + $0x50] sm:$0xf0]  ;;  %v10381_v35 = vld [vmem:[%s11305_s9 + $0x144] sm:$0xf]  ;;  %v7463_v36 = vor.u32 %v10449_v28, %v7460_v29  ;;  %v7258_v23 = vld [vmem:[%s11305_s9 + $0x1c8] sm:$0xf] }
  0x72   :  { %v7188_v37 = vld [vmem:[%s11305_s9 + $0x150] sm:$0xf0]  ;;  %v10413_v38 = vld [vmem:[%s11305_s9 + $0x244] sm:$0xf]  ;;  %v7063_v42 = vor.u32 %v10349_v33, %v7060_v34  ;;  %v10400_v25 = vld [vmem:[%s11305_s9 + $0x1d4] sm:$0xf0] }
  0x73   :  { %1161 = vmatpush.bf16.msrb.mxu1 %v7239_v7  ;;  %1174 = vmatpush.bf16.msrb.mxu2 %v7367_v8  ;;  %v7316_v39 = vld [vmem:[%s11305_s9 + $0x250] sm:$0xf0]  ;;  %v10445_v40 = vld [vmem:[%s11305_s9 + $0x344] sm:$0xf]  ;;  %v7191_v43 = vor.u32 %v10381_v35, %v7188_v37  ;;  %v10372_v7 = vld [vmem:[%s11305_s9 + $0xf4] sm:$0xf0] }
  0x74   :  { %1187 = vmatpush.bf16.msrb.mxu3 %v7495_v12  ;;  %1149 = vmatpush.bf16.msrb.mxu0 %v7095_v18  ;;  %v7444_v41 = vld [vmem:[%s11305_s9 + $0x350] sm:$0xf0]  ;;  %v7319_v44 = vor.u32 %v10413_v38, %v7316_v39  ;;  %v10345_v45 = vld [vmem:[%s11305_s9 + $0x24] sm:$0xf]  ;;  %v7274_v8 = vld [vmem:[%s11305_s9 + $0x1e8] sm:$0xf]  ;;  %v7147_v18 = vor.u32 %v10372_v7, %v7146_v6 }
  0x75   :  { %v7044_v46 = vld [vmem:[%s11305_s9 + $0x30] sm:$0xf0]  ;;  %v10377_v47 = vld [vmem:[%s11305_s9 + $0x124] sm:$0xf]  ;;  %v7447_v48 = vor.u32 %v10445_v40, %v7444_v41  ;;  %v10436_v12 = vld [vmem:[%s11305_s9 + $0x2f4] sm:$0xf0] }
  0x76   :  { %v7172_v49 = vld [vmem:[%s11305_s9 + $0x130] sm:$0xf0]  ;;  %v10409_v50 = vld [vmem:[%s11305_s9 + $0x224] sm:$0xf]  ;;  %v7047_v55 = vor.u32 %v10345_v45, %v7044_v46  ;;  %v7386_v26 = vld [vmem:[%s11305_s9 + $0x2c8] sm:$0xf] }
  0x77   :  { %1162 = vmatpush.bf16.msrb.mxu1 %v7223_v19  ;;  %1175 = vmatpush.bf16.msrb.mxu2 %v7351_v20  ;;  %v7300_v51 = vld [vmem:[%s11305_s9 + $0x230] sm:$0xf0]  ;;  %v10441_v52 = vld [vmem:[%s11305_s9 + $0x324] sm:$0xf]  ;;  %v7175_v61 = vor.u32 %v10377_v47, %v7172_v49  ;;  %v7275_v19 = vor.u32 %v10404_v10, %v7274_v8  ;;  %v7403_v20 = vor.u32 %v10436_v12, %v7402_v11  ;;  %v10432_v27 = vld [vmem:[%s11305_s9 + $0x2d4] sm:$0xf0] }
  0x78   :  { %1188 = vmatpush.bf16.msrb.mxu3 %v7479_v24  ;;  %1150 = vmatpush.bf16.msrb.mxu0 %v7079_v30  ;;  %v7428_v54 = vld [vmem:[%s11305_s9 + $0x330] sm:$0xf0]  ;;  %v10341_v56 = vld [vmem:[%s11305_s9 + $0x4] sm:$0xf]  ;;  %v7303_v62 = vor.u32 %v10409_v50, %v7300_v51  ;;  %v7531_v24 = vor.u32 %v10468_v16, %v7530_v15  ;;  %v7514_v28 = vld [vmem:[%s11305_s9 + $0x3c8] sm:$0xf]  ;;  %v7131_v30 = vor.u32 %v10368_v22, %v7130_v21 }
  0x79   :  { %v7028_v60 = vld [vmem:[%s11305_s9 + $0x10] sm:$0xf0]  ;;  %v10373_v63 = vld [vmem:[%s11305_s9 + $0x104] sm:$0xf]  ;;  %v7431_v2 = vor.u32 %v10441_v52, %v7428_v54  ;;  %v10464_v29 = vld [vmem:[%s11305_s9 + $0x3d4] sm:$0xf0] }
  0x7a   :  { %v7156_v0 = vld [vmem:[%s11305_s9 + $0x110] sm:$0xf0]  ;;  %v10405_v1 = vld [vmem:[%s11305_s9 + $0x204] sm:$0xf]  ;;  %v7031_v9 = vor.u32 %v10341_v56, %v7028_v60  ;;  %v7114_v33 = vld [vmem:[%s11305_s9 + $0xa8] sm:$0xf] }
  0x7b   :  { %1163 = vmatpush.bf16.msrb.mxu1 %v7207_v31  ;;  %1176 = vmatpush.bf16.msrb.mxu2 %v7335_v32  ;;  %v7284_v3 = vld [vmem:[%s11305_s9 + $0x210] sm:$0xf0]  ;;  %v10437_v4 = vld [vmem:[%s11305_s9 + $0x304] sm:$0xf]  ;;  %v7159_v13 = vor.u32 %v10373_v63, %v7156_v0  ;;  %v7259_v31 = vor.u32 %v10400_v25, %v7258_v23  ;;  %v7387_v32 = vor.u32 %v10432_v27, %v7386_v26  ;;  %v10364_v34 = vld [vmem:[%s11305_s9 + $0xb4] sm:$0xf0] }
  0x7c   :  { %1189 = vmatpush.bf16.msrb.mxu3 %v7463_v36  ;;  %1151 = vmatpush.bf16.msrb.mxu0 %v7063_v42  ;;  %v7412_v5 = vld [vmem:[%s11305_s9 + $0x310] sm:$0xf0]  ;;  %v7287_v14 = vor.u32 %v10405_v1, %v7284_v3  ;;  %v7242_v35 = vld [vmem:[%s11305_s9 + $0x1a8] sm:$0xf]  ;;  %v7515_v36 = vor.u32 %v10464_v29, %v7514_v28  ;;  %v10396_v37 = vld [vmem:[%s11305_s9 + $0x1b4] sm:$0xf0]  ;;  %v7115_v42 = vor.u32 %v10364_v34, %v7114_v33 }
  0x7d   :  { %v7415_v17 = vor.u32 %v10437_v4, %v7412_v5  ;;  %v7370_v38 = vld [vmem:[%s11305_s9 + $0x2a8] sm:$0xf]  ;;  %v10428_v39 = vld [vmem:[%s11305_s9 + $0x2b4] sm:$0xf0] }
  0x7e   :  { %v7498_v40 = vld [vmem:[%s11305_s9 + $0x3a8] sm:$0xf]  ;;  %v10460_v41 = vld [vmem:[%s11305_s9 + $0x3b4] sm:$0xf0] }
  0x7f   :  { %1164 = vmatpush.bf16.msrb.mxu1 %v7191_v43  ;;  %1177 = vmatpush.bf16.msrb.mxu2 %v7319_v44  ;;  %v7243_v43 = vor.u32 %v10396_v37, %v7242_v35  ;;  %v7371_v44 = vor.u32 %v10428_v39, %v7370_v38  ;;  %v7098_v45 = vld [vmem:[%s11305_s9 + $0x88] sm:$0xf]  ;;  %v10360_v46 = vld [vmem:[%s11305_s9 + $0x94] sm:$0xf0] }
  0x80   :  { %1190 = vmatpush.bf16.msrb.mxu3 %v7447_v48  ;;  %1152 = vmatpush.bf16.msrb.mxu0 %v7047_v55  ;;  %v7226_v47 = vld [vmem:[%s11305_s9 + $0x188] sm:$0xf]  ;;  %v7499_v48 = vor.u32 %v10460_v41, %v7498_v40  ;;  %v10392_v49 = vld [vmem:[%s11305_s9 + $0x194] sm:$0xf0]  ;;  %v7099_v55 = vor.u32 %v10360_v46, %v7098_v45  ;;  %v10370_v41 = vld [vmem:[%s11305_s9 + $0xec] sm:$0xf] }
  0x81   :  { %v7354_v50 = vld [vmem:[%s11305_s9 + $0x288] sm:$0xf]  ;;  %v10424_v51 = vld [vmem:[%s11305_s9 + $0x294] sm:$0xf0]  ;;  %v7227_v56 = vor.u32 %v10392_v49, %v7226_v47  ;;  %v7276_v45 = vld [vmem:[%s11305_s9 + $0x1f8] sm:$0xf0] }
  0x82   :  { %v7482_v52 = vld [vmem:[%s11305_s9 + $0x388] sm:$0xf]  ;;  %v10456_v54 = vld [vmem:[%s11305_s9 + $0x394] sm:$0xf0]  ;;  %v7355_v60 = vor.u32 %v10424_v51, %v7354_v50  ;;  %v10434_v47 = vld [vmem:[%s11305_s9 + $0x2ec] sm:$0xf] }
  0x83   :  { %1165 = vmatpush.bf16.msrb.mxu1 %v7175_v61  ;;  %1178 = vmatpush.bf16.msrb.mxu2 %v7303_v62  ;;  %v7082_v61 = vld [vmem:[%s11305_s9 + $0x68] sm:$0xf]  ;;  %v10356_v62 = vld [vmem:[%s11305_s9 + $0x74] sm:$0xf0]  ;;  %v7483_v0 = vor.u32 %v10456_v54, %v7482_v52  ;;  %v10466_v51 = vld [vmem:[%s11305_s9 + $0x3ec] sm:$0xf] }
  0x84   :  { %1191 = vmatpush.bf16.msrb.mxu3 %v7431_v2  ;;  %1153 = vmatpush.bf16.msrb.mxu0 %v7031_v9  ;;  %v7210_v63 = vld [vmem:[%s11305_s9 + $0x168] sm:$0xf]  ;;  %v10388_v1 = vld [vmem:[%s11305_s9 + $0x174] sm:$0xf0]  ;;  %v7083_v6 = vor.u32 %v10356_v62, %v7082_v61  ;;  %v7532_v52 = vld [vmem:[%s11305_s9 + $0x3f8] sm:$0xf0] }
  0x85   :  { %v7338_v2 = vld [vmem:[%s11305_s9 + $0x268] sm:$0xf]  ;;  %v10420_v3 = vld [vmem:[%s11305_s9 + $0x274] sm:$0xf0]  ;;  %v7211_v7 = vor.u32 %v10388_v1, %v7210_v63  ;;  %v10366_v54 = vld [vmem:[%s11305_s9 + $0xcc] sm:$0xf] }
  0x86   :  { %v7466_v4 = vld [vmem:[%s11305_s9 + $0x368] sm:$0xf]  ;;  %v10452_v5 = vld [vmem:[%s11305_s9 + $0x374] sm:$0xf0]  ;;  %v7339_v8 = vor.u32 %v10420_v3, %v7338_v2  ;;  %v10398_v61 = vld [vmem:[%s11305_s9 + $0x1cc] sm:$0xf]  ;;  %v7535_v3 = vor.u32 %v10466_v51, %v7532_v52 }
  0x87   :  { %1166 = vmatpush.bf16.msrb.mxu1 %v7159_v13  ;;  %1179 = vmatpush.bf16.msrb.mxu2 %v7287_v14  ;;  %v7066_v9 = vld [vmem:[%s11305_s9 + $0x48] sm:$0xf]  ;;  %v10352_v10 = vld [vmem:[%s11305_s9 + $0x54] sm:$0xf0]  ;;  %v7467_v12 = vor.u32 %v10452_v5, %v7466_v4  ;;  %v7260_v62 = vld [vmem:[%s11305_s9 + $0x1d8] sm:$0xf0] }
  0x88   :  { %1192 = vmatpush.bf16.msrb.mxu3 %v7415_v17  ;;  %1198 = vmatpush.bf16.msra.mxu0 %v7147_v18  ;;  %v7194_v11 = vld [vmem:[%s11305_s9 + $0x148] sm:$0xf]  ;;  %v10384_v13 = vld [vmem:[%s11305_s9 + $0x154] sm:$0xf0]  ;;  %v7067_v18 = vor.u32 %v10352_v10, %v7066_v9  ;;  %v10430_v1 = vld [vmem:[%s11305_s9 + $0x2cc] sm:$0xf] }
  0x89   :  { %1154 = vmatmul.bf16.vlgmr.msrb.gmra.mxu0 %v11596_v57  ;;  %v7322_v14 = vld [vmem:[%s11305_s9 + $0x248] sm:$0xf]  ;;  %v10416_v15 = vld [vmem:[%s11305_s9 + $0x254] sm:$0xf0]  ;;  %v7195_v21 = vor.u32 %v10384_v13, %v7194_v11  ;;  %v7388_v2 = vld [vmem:[%s11305_s9 + $0x2d8] sm:$0xf0] }
  0x8a   :  { %1180 = vmatmul.bf16.vlgmr.msrb.gmra.mxu2 %v11592_v53  ;;  %1167 = vmatmul.bf16.vlgmr.msrb.gmra.mxu1 %v11600_v59  ;;  %v7450_v16 = vld [vmem:[%s11305_s9 + $0x348] sm:$0xf]  ;;  %v10448_v17 = vld [vmem:[%s11305_s9 + $0x354] sm:$0xf0]  ;;  %v7323_v22 = vor.u32 %v10416_v15, %v7322_v14  ;;  %v10462_v4 = vld [vmem:[%s11305_s9 + $0x3cc] sm:$0xf] }
  0x8b   :  { %1211 = vmatpush.bf16.msra.mxu1 %v7275_v19  ;;  %1224 = vmatpush.bf16.msra.mxu2 %v7403_v20  ;;  %v7050_v19 = vld [vmem:[%s11305_s9 + $0x28] sm:$0xf]  ;;  %v10348_v20 = vld [vmem:[%s11305_s9 + $0x34] sm:$0xf0]  ;;  %v7451_v26 = vor.u32 %v10448_v17, %v7450_v16  ;;  %v7516_v5 = vld [vmem:[%s11305_s9 + $0x3d8] sm:$0xf0] }
  0x8c   :  { %1237 = vmatpush.bf16.msra.mxu3 %v7531_v24  ;;  %1199 = vmatpush.bf16.msra.mxu0 %v7131_v30  ;;  %v7178_v23 = vld [vmem:[%s11305_s9 + $0x128] sm:$0xf]  ;;  %v10380_v24 = vld [vmem:[%s11305_s9 + $0x134] sm:$0xf0] }
  0x8d   :  { %1193 = vmatmul.bf16.vlgmr.msrb.gmra.mxu3 %v11598_v58  ;;  %v7306_v25 = vld [vmem:[%s11305_s9 + $0x228] sm:$0xf]  ;;  %v10412_v27 = vld [vmem:[%s11305_s9 + $0x234] sm:$0xf0]  ;;  %v7179_v37 = vor.u32 %v10380_v24, %v7178_v23 }
  0x8e   :  { %v7434_v28 = vld [vmem:[%s11305_s9 + $0x328] sm:$0xf]  ;;  %v10444_v29 = vld [vmem:[%s11305_s9 + $0x334] sm:$0xf0]  ;;  %v7307_v38 = vor.u32 %v10412_v27, %v7306_v25 }
  0x8f   :  { %1212 = vmatpush.bf16.msra.mxu1 %v7259_v31  ;;  %1225 = vmatpush.bf16.msra.mxu2 %v7387_v32  ;;  %v7034_v30 = vld [vmem:[%s11305_s9 + $0x8] sm:$0xf]  ;;  %v10344_v31 = vld [vmem:[%s11305_s9 + $0x14] sm:$0xf0]  ;;  %v7051_v32 = vor.u32 %v10348_v20, %v7050_v19 }
  0x90   :  { %1238 = vmatpush.bf16.msra.mxu3 %v7515_v36  ;;  %1200 = vmatpush.bf16.msra.mxu0 %v7115_v42  ;;  %v7162_v33 = vld [vmem:[%s11305_s9 + $0x108] sm:$0xf]  ;;  %v10376_v34 = vld [vmem:[%s11305_s9 + $0x114] sm:$0xf0]  ;;  %v7435_v42 = vor.u32 %v10444_v29, %v7434_v28  ;;  %v7035_v46 = vor.u32 %v10344_v31, %v7034_v30 }
  0x91   :  { %v7290_v35 = vld [vmem:[%s11305_s9 + $0x208] sm:$0xf]  ;;  %v10408_v36 = vld [vmem:[%s11305_s9 + $0x214] sm:$0xf0]  ;;  %v7163_v49 = vor.u32 %v10376_v34, %v7162_v33 }
  0x92   :  { %v7418_v39 = vld [vmem:[%s11305_s9 + $0x308] sm:$0xf]  ;;  %v10440_v40 = vld [vmem:[%s11305_s9 + $0x314] sm:$0xf0]  ;;  %v7291_v50 = vor.u32 %v10408_v36, %v7290_v35 }
  0x93   :  { %1213 = vmatpush.bf16.msra.mxu1 %v7243_v43  ;;  %1226 = vmatpush.bf16.msra.mxu2 %v7371_v44  ;;  %v7148_v43 = vld [vmem:[%s11305_s9 + $0xf8] sm:$0xf0]  ;;  %v10402_v44 = vld [vmem:[%s11305_s9 + $0x1ec] sm:$0xf] }
  0x94   :  { %1239 = vmatpush.bf16.msra.mxu3 %v7499_v48  ;;  %1201 = vmatpush.bf16.msra.mxu0 %v7099_v55  ;;  %v7404_v48 = vld [vmem:[%s11305_s9 + $0x2f8] sm:$0xf0]  ;;  %v7419_v55 = vor.u32 %v10440_v40, %v7418_v39  ;;  %v7279_v63 = vor.u32 %v10402_v44, %v7276_v45 }
  0x97   :  { %1214 = vmatpush.bf16.msra.mxu1 %v7227_v56  ;;  %1227 = vmatpush.bf16.msra.mxu2 %v7355_v60  ;;  %v7151_v56 = vor.u32 %v10370_v41, %v7148_v43  ;;  %v7132_v60 = vld [vmem:[%s11305_s9 + $0xd8] sm:$0xf0] }
  0x98   :  { %1240 = vmatpush.bf16.msra.mxu3 %v7483_v0  ;;  %1202 = vmatpush.bf16.msra.mxu0 %v7083_v6  ;;  %v7407_v0 = vor.u32 %v10434_v47, %v7404_v48 }
  0x9b   :  { %1215 = vmatpush.bf16.msra.mxu1 %v7211_v7  ;;  %1228 = vmatpush.bf16.msra.mxu2 %v7339_v8 }
  0x9c   :  { %1241 = vmatpush.bf16.msra.mxu3 %v7467_v12  ;;  %1203 = vmatpush.bf16.msra.mxu0 %v7067_v18 }
  0x9f   :  { %1216 = vmatpush.bf16.msra.mxu1 %v7195_v21  ;;  %1229 = vmatpush.bf16.msra.mxu2 %v7323_v22 }
  0xa0   :  { %1242 = vmatpush.bf16.msra.mxu3 %v7451_v26  ;;  %1204 = vmatpush.bf16.msra.mxu0 %v7051_v32 }
  0xa3   :  { %1217 = vmatpush.bf16.msra.mxu1 %v7179_v37  ;;  %1230 = vmatpush.bf16.msra.mxu2 %v7307_v38 }
  0xa4   :  { %1243 = vmatpush.bf16.msra.mxu3 %v7435_v42  ;;  %1205 = vmatpush.bf16.msra.mxu0 %v7035_v46 }
  0xa7   :  { %1218 = vmatpush.bf16.msra.mxu1 %v7163_v49  ;;  %1231 = vmatpush.bf16.msra.mxu2 %v7291_v50 }
  0xa8   :  { %90 = vsyncpa [#allocation3], 0  ;;  %1244 = vmatpush.bf16.msra.mxu3 %v7419_v55  ;;  %1250 = vmatpush.bf16.msrb.mxu0 %v7151_v56  ;;  %v7135_v6 = vor.u32 %v10366_v54, %v7132_v60  ;;  %v7263_v7 = vor.u32 %v10398_v61, %v7260_v62  ;;  %v7391_v8 = vor.u32 %v10430_v1, %v7388_v2  ;;  %v10362_v9 = vld [vmem:[%s11305_s9 + $0xac] sm:$0xf]  ;;  %v7116_v10 = vld [vmem:[%s11305_s9 + $0xb8] sm:$0xf0] }
  0xa9   :  { %v10394_v11 = vld [vmem:[%s11305_s9 + $0x1ac] sm:$0xf]  ;;  %v7519_v12 = vor.u32 %v10462_v4, %v7516_v5  ;;  %v7244_v13 = vld [vmem:[%s11305_s9 + $0x1b8] sm:$0xf0]  ;;  %1206 = vmatmul.bf16.vlgmr.msra.gmra.mxu0 %v11596_v57  ;;  %v7119_v18 = vor.u32 %v10362_v9, %v7116_v10  ;;  %s13440_s0 = sld [smem:[#allocation6_spill]]  ;;  %vm6670_vm0 = vcmask 523264  }
  0xaa   :  { %1232 = vmatmul.bf16.vlgmr.msra.gmra.mxu2 %v11592_v53  ;;  %v10426_v14 = vld [vmem:[%s11305_s9 + $0x2ac] sm:$0xf]  ;;  %v7372_v15 = vld [vmem:[%s11305_s9 + $0x2b8] sm:$0xf0]  ;;  %1219 = vmatmul.bf16.vlgmr.msra.gmra.mxu1 %v11600_v59  ;;  %v7247_v19 = vor.u32 %v10394_v11, %v7244_v13  ;;  %s13441_s5 = sld [smem:[#allocation8_spill]]  ;;  %s6973_s10 = sshll.u32 %s11510_s30, 4  ;;  %s6974_s10 = int_to_ptr.hbm [resolvable:$true] %s6973_s10 }
  0xab   :  { %1263 = vmatpush.bf16.msrb.mxu1 %v7279_v63  ;;  %1276 = vmatpush.bf16.msrb.mxu2 %v7407_v0  ;;  %v10458_v16 = vld [vmem:[%s11305_s9 + $0x3ac] sm:$0xf]  ;;  %v7500_v17 = vld [vmem:[%s11305_s9 + $0x3b8] sm:$0xf0]  ;;  %v7375_v20 = vor.u32 %v10426_v14, %v7372_v15  ;;  %s13455_s15 = sld [smem:[#allocation17_spill]]  ;;  %s11235_s11 = sshra.s32 %s6974_s10, 4  ;;  %s11236_s11 = int_to_ptr.hbm [resolvable:$true] %s11235_s11 }
  0xac   :  { %1289 = vmatpush.bf16.msrb.mxu3 %v7535_v3  ;;  %1251 = vmatpush.bf16.msrb.mxu0 %v7135_v6  ;;  %v10358_v21 = vld [vmem:[%s11305_s9 + $0x8c] sm:$0xf]  ;;  %v7100_v22 = vld [vmem:[%s11305_s9 + $0x98] sm:$0xf0]  ;;  %v7503_v24 = vor.u32 %v10458_v16, %v7500_v17  ;;  %s13456_s16 = sld [smem:[#allocation22_spill]]  ;;  %p11240_p1 = scmp.lt.s32.totalorder %s11236_s11, %s11510_s30 }
  0xad   :  { %1245 = vmatmul.bf16.vlgmr.msra.gmra.mxu3 %v11598_v58  ;;  %v10390_v23 = vld [vmem:[%s11305_s9 + $0x18c] sm:$0xf]  ;;  %v7228_v25 = vld [vmem:[%s11305_s9 + $0x198] sm:$0xf0]  ;;  %v7103_v30 = vor.u32 %v10358_v21, %v7100_v22  ;;  %v7778_v21 = vld [vmem:[%s11315_s17 + $0x1e0] sm:$0xf] }
  0xae   :  { %v10422_v26 = vld [vmem:[%s11305_s9 + $0x28c] sm:$0xf]  ;;  %v7356_v27 = vld [vmem:[%s11305_s9 + $0x298] sm:$0xf0]  ;;  %v7231_v31 = vor.u32 %v10390_v23, %v7228_v25  ;;  %v10531_v22 = vld [vmem:[%s11315_s17 + $0x1ec] sm:$0xf0] }
  0xaf   :  { %1264 = vmatpush.bf16.msrb.mxu1 %v7263_v7  ;;  %1277 = vmatpush.bf16.msrb.mxu2 %v7391_v8  ;;  %v10454_v28 = vld [vmem:[%s11305_s9 + $0x38c] sm:$0xf]  ;;  %v7484_v29 = vld [vmem:[%s11305_s9 + $0x398] sm:$0xf0]  ;;  %v7359_v32 = vor.u32 %v10422_v26, %v7356_v27  ;;  %v7634_v27 = vld [vmem:[%s11315_s17 + $0xc0] sm:$0xf] }
  0xb0   :  { %1290 = vmatpush.bf16.msrb.mxu3 %v7519_v12  ;;  %1252 = vmatpush.bf16.msrb.mxu0 %v7119_v18  ;;  %v10354_v33 = vld [vmem:[%s11305_s9 + $0x6c] sm:$0xf]  ;;  %v7084_v34 = vld [vmem:[%s11305_s9 + $0x78] sm:$0xf0]  ;;  %v7487_v36 = vor.u32 %v10454_v28, %v7484_v29  ;;  %v7650_v18 = vld [vmem:[%s11315_s17 + $0xe0] sm:$0xf]  ;;  %v7779_v29 = vor.u32 %v10531_v22, %v7778_v21 }
  0xb1   :  { %v10386_v35 = vld [vmem:[%s11305_s9 + $0x16c] sm:$0xf]  ;;  %v7212_v37 = vld [vmem:[%s11305_s9 + $0x178] sm:$0xf0]  ;;  %v7087_v42 = vor.u32 %v10354_v33, %v7084_v34  ;;  %v10495_v28 = vld [vmem:[%s11315_s17 + $0xcc] sm:$0xf0] }
  0xb2   :  { %v10418_v38 = vld [vmem:[%s11305_s9 + $0x26c] sm:$0xf]  ;;  %v7340_v39 = vld [vmem:[%s11305_s9 + $0x278] sm:$0xf0]  ;;  %v7215_v43 = vor.u32 %v10386_v35, %v7212_v37  ;;  %v7618_v33 = vld [vmem:[%s11315_s17 + $0xa0] sm:$0xf] }
  0xb3   :  { %1265 = vmatpush.bf16.msrb.mxu1 %v7247_v19  ;;  %1278 = vmatpush.bf16.msrb.mxu2 %v7375_v20  ;;  %v10450_v40 = vld [vmem:[%s11305_s9 + $0x36c] sm:$0xf]  ;;  %v7468_v41 = vld [vmem:[%s11305_s9 + $0x378] sm:$0xf0]  ;;  %v7343_v44 = vor.u32 %v10418_v38, %v7340_v39  ;;  %v10499_v19 = vld [vmem:[%s11315_s17 + $0xec] sm:$0xf0] }
  0xb4   :  { %1291 = vmatpush.bf16.msrb.mxu3 %v7503_v24  ;;  %1253 = vmatpush.bf16.msrb.mxu0 %v7103_v30  ;;  %v10350_v45 = vld [vmem:[%s11305_s9 + $0x4c] sm:$0xf]  ;;  %v7068_v46 = vld [vmem:[%s11305_s9 + $0x58] sm:$0xf0]  ;;  %v7471_v48 = vor.u32 %v10450_v40, %v7468_v41  ;;  %v7651_v26 = vor.u32 %v10499_v19, %v7650_v18  ;;  %v7762_v30 = vld [vmem:[%s11315_s17 + $0x1c0] sm:$0xf] }
  0xb5   :  { %v10382_v47 = vld [vmem:[%s11305_s9 + $0x14c] sm:$0xf]  ;;  %v7196_v49 = vld [vmem:[%s11305_s9 + $0x158] sm:$0xf0]  ;;  %v7071_v55 = vor.u32 %v10350_v45, %v7068_v46  ;;  %v10491_v34 = vld [vmem:[%s11315_s17 + $0xac] sm:$0xf0] }
  0xb6   :  { %v10414_v50 = vld [vmem:[%s11305_s9 + $0x24c] sm:$0xf]  ;;  %v7324_v51 = vld [vmem:[%s11305_s9 + $0x258] sm:$0xf0]  ;;  %v7199_v56 = vor.u32 %v10382_v47, %v7196_v49  ;;  %v10523_v37 = vld [vmem:[%s11315_s17 + $0x1ac] sm:$0xf0] }
  0xb7   :  { %1266 = vmatpush.bf16.msrb.mxu1 %v7231_v31  ;;  %1279 = vmatpush.bf16.msrb.mxu2 %v7359_v32  ;;  %v10446_v52 = vld [vmem:[%s11305_s9 + $0x34c] sm:$0xf]  ;;  %v7452_v54 = vld [vmem:[%s11305_s9 + $0x358] sm:$0xf0]  ;;  %v7327_v60 = vor.u32 %v10414_v50, %v7324_v51  ;;  %v10527_v31 = vld [vmem:[%s11315_s17 + $0x1cc] sm:$0xf0]  ;;  %v7635_v32 = vor.u32 %v10495_v28, %v7634_v27 }
  0xb8   :  { %1292 = vmatpush.bf16.msrb.mxu3 %v7487_v36  ;;  %1254 = vmatpush.bf16.msrb.mxu0 %v7087_v42  ;;  %v10346_v61 = vld [vmem:[%s11305_s9 + $0x2c] sm:$0xf]  ;;  %v7052_v62 = vld [vmem:[%s11305_s9 + $0x38] sm:$0xf0]  ;;  %v7455_v0 = vor.u32 %v10446_v52, %v7452_v54  ;;  %v7763_v35 = vor.u32 %v10527_v31, %v7762_v30  ;;  %v7746_v36 = vld [vmem:[%s11315_s17 + $0x1a0] sm:$0xf] }
  0xb9   :  { %v10378_v63 = vld [vmem:[%s11305_s9 + $0x12c] sm:$0xf]  ;;  %v7180_v1 = vld [vmem:[%s11305_s9 + $0x138] sm:$0xf0]  ;;  %v7055_v6 = vor.u32 %v10346_v61, %v7052_v62  ;;  %v7602_v38 = vld [vmem:[%s11315_s17 + $0x80] sm:$0xf]  ;;  %v7747_v40 = vor.u32 %v10523_v37, %v7746_v36 }
  0xba   :  { %v10410_v2 = vld [vmem:[%s11305_s9 + $0x22c] sm:$0xf]  ;;  %v7308_v3 = vld [vmem:[%s11305_s9 + $0x238] sm:$0xf0]  ;;  %v7183_v8 = vor.u32 %v10378_v63, %v7180_v1  ;;  %v10487_v39 = vld [vmem:[%s11315_s17 + $0x8c] sm:$0xf0] }
  0xbb   :  { %1267 = vmatpush.bf16.msrb.mxu1 %v7215_v43  ;;  %1280 = vmatpush.bf16.msrb.mxu2 %v7343_v44  ;;  %v10442_v4 = vld [vmem:[%s11305_s9 + $0x32c] sm:$0xf]  ;;  %v7436_v5 = vld [vmem:[%s11305_s9 + $0x338] sm:$0xf0]  ;;  %v7311_v9 = vor.u32 %v10410_v2, %v7308_v3  ;;  %v7730_v41 = vld [vmem:[%s11315_s17 + $0x180] sm:$0xf] }
  0xbc   :  { %1293 = vmatpush.bf16.msrb.mxu3 %v7471_v48  ;;  %1255 = vmatpush.bf16.msrb.mxu0 %v7071_v55  ;;  %v10342_v7 = vld [vmem:[%s11305_s9 + $0xc] sm:$0xf]  ;;  %v7036_v10 = vld [vmem:[%s11305_s9 + $0x18] sm:$0xf0]  ;;  %v7439_v13 = vor.u32 %v10442_v4, %v7436_v5  ;;  %v7586_v42 = vld [vmem:[%s11315_s17 + $0x60] sm:$0xf] }
  0xbd   :  { %v10374_v11 = vld [vmem:[%s11305_s9 + $0x10c] sm:$0xf]  ;;  %v7164_v12 = vld [vmem:[%s11305_s9 + $0x118] sm:$0xf0]  ;;  %v7039_v20 = vor.u32 %v10342_v7, %v7036_v10  ;;  %v10483_v43 = vld [vmem:[%s11315_s17 + $0x6c] sm:$0xf0] }
  0xbe   :  { %v10406_v14 = vld [vmem:[%s11305_s9 + $0x20c] sm:$0xf]  ;;  %v7292_v15 = vld [vmem:[%s11305_s9 + $0x218] sm:$0xf0]  ;;  %v7167_v23 = vor.u32 %v10374_v11, %v7164_v12  ;;  %v7714_v44 = vld [vmem:[%s11315_s17 + $0x160] sm:$0xf]  ;;  %v7587_v46 = vor.u32 %v10483_v43, %v7586_v42 }
  0xbf   :  { %1268 = vmatpush.bf16.msrb.mxu1 %v7199_v56  ;;  %1281 = vmatpush.bf16.msrb.mxu2 %v7327_v60  ;;  %v10438_v16 = vld [vmem:[%s11305_s9 + $0x30c] sm:$0xf]  ;;  %v7420_v17 = vld [vmem:[%s11305_s9 + $0x318] sm:$0xf0]  ;;  %v7295_v24 = vor.u32 %v10406_v14, %v7292_v15  ;;  %v10515_v45 = vld [vmem:[%s11315_s17 + $0x16c] sm:$0xf0] }
  0xc0   :  { %1294 = vmatpush.bf16.msrb.mxu3 %v7455_v0  ;;  %1256 = vmatpush.bf16.msrb.mxu0 %v7055_v6  ;;  %v7423_v25 = vor.u32 %v10438_v16, %v7420_v17  ;;  %v7570_v47 = vld [vmem:[%s11315_s17 + $0x40] sm:$0xf]  ;;  %v10479_v48 = vld [vmem:[%s11315_s17 + $0x4c] sm:$0xf0]  ;;  %v7715_v49 = vor.u32 %v10515_v45, %v7714_v44  ;;  %v10497_v1 = vld [vmem:[%s11315_s17 + $0xe4] sm:$0xf] }
  0xc1   :  { %v7698_v50 = vld [vmem:[%s11315_s17 + $0x140] sm:$0xf]  ;;  %v10511_v51 = vld [vmem:[%s11315_s17 + $0x14c] sm:$0xf0]  ;;  %v7571_v52 = vor.u32 %v10479_v48, %v7570_v47  ;;  %v7652_v5 = vld [vmem:[%s11315_s17 + $0xf0] sm:$0xf0] }
  0xc2   :  { %v7554_v54 = vld [vmem:[%s11315_s17 + $0x20] sm:$0xf]  ;;  %v10475_v55 = vld [vmem:[%s11315_s17 + $0x2c] sm:$0xf0]  ;;  %v7699_v56 = vor.u32 %v10511_v51, %v7698_v50  ;;  %v7780_v10 = vld [vmem:[%s11315_s17 + $0x1f0] sm:$0xf0]  ;;  %v7655_v12 = vor.u32 %v10497_v1, %v7652_v5 }
  0xc3   :  { %1269 = vmatpush.bf16.msrb.mxu1 %v7183_v8  ;;  %1282 = vmatpush.bf16.msrb.mxu2 %v7311_v9  ;;  %v7682_v60 = vld [vmem:[%s11315_s17 + $0x120] sm:$0xf]  ;;  %v10507_v61 = vld [vmem:[%s11315_s17 + $0x12c] sm:$0xf0]  ;;  %v7555_v62 = vor.u32 %v10475_v55, %v7554_v54  ;;  %v10529_v9 = vld [vmem:[%s11315_s17 + $0x1e4] sm:$0xf] }
  0xc4   :  { %1295 = vmatpush.bf16.msrb.mxu3 %v7439_v13  ;;  %1257 = vmatpush.bf16.msrb.mxu0 %v7039_v20  ;;  %v7538_v63 = vld [vmem:[%s11315_s17] sm:$0xf]  ;;  %v10471_v0 = vld [vmem:[%s11315_s17 + $0xc] sm:$0xf0]  ;;  %v7683_v2 = vor.u32 %v10507_v61, %v7682_v60  ;;  %v10493_v16 = vld [vmem:[%s11315_s17 + $0xc4] sm:$0xf]  ;;  %v7783_v18 = vor.u32 %v10529_v9, %v7780_v10 }
  0xc5   :  { %v7906_v3 = vld [vmem:[%s11315_s17 + $0x2e0] sm:$0xf]  ;;  %v10563_v4 = vld [vmem:[%s11315_s17 + $0x2ec] sm:$0xf0]  ;;  %v7539_v11 = vor.u32 %v10471_v0, %v7538_v63  ;;  %v7636_v17 = vld [vmem:[%s11315_s17 + $0xd0] sm:$0xf0] }
  0xc6   :  { %v7666_v6 = vld [vmem:[%s11315_s17 + $0x100] sm:$0xf]  ;;  %v10503_v7 = vld [vmem:[%s11315_s17 + $0x10c] sm:$0xf0]  ;;  %v7907_v8 = vor.u32 %v10563_v4, %v7906_v3  ;;  %v10525_v20 = vld [vmem:[%s11315_s17 + $0x1c4] sm:$0xf]  ;;  %v7639_v22 = vor.u32 %v10493_v16, %v7636_v17 }
  0xc7   :  { %1270 = vmatpush.bf16.msrb.mxu1 %v7167_v23  ;;  %1283 = vmatpush.bf16.msrb.mxu2 %v7295_v24  ;;  %v7667_v13 = vor.u32 %v10503_v7, %v7666_v6  ;;  %v7890_v14 = vld [vmem:[%s11315_s17 + $0x2c0] sm:$0xf]  ;;  %v10559_v15 = vld [vmem:[%s11315_s17 + $0x2cc] sm:$0xf0]  ;;  %v7764_v21 = vld [vmem:[%s11315_s17 + $0x1d0] sm:$0xf0] }
  0xc8   :  { %1296 = vmatpush.bf16.msrb.mxu3 %v7423_v25  ;;  %1959 = vmatpush.bf16.msra.mxu0 %v7651_v26  ;;  %v7891_v19 = vor.u32 %v10559_v15, %v7890_v14  ;;  %v7874_v23 = vld [vmem:[%s11315_s17 + $0x2a0] sm:$0xf]  ;;  %v10555_v24 = vld [vmem:[%s11315_s17 + $0x2ac] sm:$0xf0]  ;;  %v10489_v25 = vld [vmem:[%s11315_s17 + $0xa4] sm:$0xf]  ;;  %v7767_v27 = vor.u32 %v10525_v20, %v7764_v21 }
  0xc9   :  { %1258 = vmatmul.bf16.vlgmr.msrb.gmra.mxu0 %v11596_v57  ;;  %v7619_v57 = vor.u32 %v10491_v34, %v7618_v33  ;;  %v7620_v26 = vld [vmem:[%s11315_s17 + $0xb0] sm:$0xf0]  ;;  %v7875_v28 = vor.u32 %v10555_v24, %v7874_v23  ;;  %v11844_v31 = vld [vmem:[%s11310_s13] sm:$0xf]  ;;  %v10551_v34 = vld [vmem:[%s11315_s17 + $0x28c] sm:$0xf0] }
  0xca   :  { %1271 = vmatmul.bf16.vlgmr.msrb.gmra.mxu1 %v11600_v59  ;;  %1284 = vmatmul.bf16.vlgmr.msrb.gmra.mxu2 %v11592_v53  ;;  %v10519_v59 = vld [vmem:[%s11315_s17 + $0x18c] sm:$0xf0]  ;;  %v7603_v53 = vor.u32 %v10487_v39, %v7602_v38  ;;  %v7748_v30 = vld [vmem:[%s11315_s17 + $0x1b0] sm:$0xf0]  ;;  %v7858_v33 = vld [vmem:[%s11315_s17 + $0x280] sm:$0xf] }
  0xcb   :  { %1972 = vmatpush.bf16.msra.mxu1 %v7779_v29  ;;  %1297 = vmatmul.bf16.vlgmr.msrb.gmra.mxu3 %v11598_v58  ;;  %v7731_v58 = vor.u32 %v10519_v59, %v7730_v41  ;;  %v10521_v29 = vld [vmem:[%s11315_s17 + $0x1a4] sm:$0xf]  ;;  %v7604_v36 = vld [vmem:[%s11315_s17 + $0x90] sm:$0xf0]  ;;  %v436_v38 = vperm.slane %v11844_v31, 0  ;;  %s13442_s9 = sld [smem:[#allocation5_spill]] }
  0xcc   :  { %1960 = vmatpush.bf16.msra.mxu0 %v7635_v32  ;;  %1985 = vmatpush.bf16.msra.mxu2 %v7907_v8  ;;  %v7623_v32 = vor.u32 %v10489_v25, %v7620_v26  ;;  %v7751_v37 = vor.u32 %v10521_v29, %v7748_v30  ;;  %v10517_v39 = vld [vmem:[%s11315_s17 + $0x184] sm:$0xf]  ;;  %v7842_v59 = vld [vmem:[%s11315_s17 + $0x260] sm:$0xf]  ;;  %v10543_v54 = vld [vmem:[%s11315_s17 + $0x24c] sm:$0xf0] }
  0xcd   :  { %v10481_v43 = vld [vmem:[%s11315_s17 + $0x64] sm:$0xf]  ;;  %v7700_v0 = vld [vmem:[%s11315_s17 + $0x150] sm:$0xf0]  ;;  %v7810_v4 = vld [vmem:[%s11315_s17 + $0x220] sm:$0xf] }
  0xce   :  { %v10513_v48 = vld [vmem:[%s11315_s17 + $0x164] sm:$0xf]  ;;  %v10539_v5 = vld [vmem:[%s11315_s17 + $0x22c] sm:$0xf0]  ;;  %v7556_v8 = vld [vmem:[%s11315_s17 + $0x30] sm:$0xf0] }
  0xcf   :  { %1973 = vmatpush.bf16.msra.mxu1 %v7763_v35  ;;  %v10485_v35 = vld [vmem:[%s11315_s17 + $0x84] sm:$0xf]  ;;  %v7684_v14 = vld [vmem:[%s11315_s17 + $0x130] sm:$0xf0]  ;;  %v10500_v20 = vld [vmem:[%s11315_s17 + $0xf4] sm:$0xf0] }
  0xd0   :  { %1961 = vmatpush.bf16.msra.mxu0 %v7619_v57  ;;  %1986 = vmatpush.bf16.msra.mxu2 %v7891_v19  ;;  %v7859_v57 = vor.u32 %v10551_v34, %v7858_v33  ;;  %v7607_v41 = vor.u32 %v10485_v35, %v7604_v36  ;;  %v10477_v55 = vld [vmem:[%s11315_s17 + $0x44] sm:$0xf]  ;;  %v7540_v17 = vld [vmem:[%s11315_s17 + $0x10] sm:$0xf0]  ;;  %v7658_v19 = vld [vmem:[%s11315_s17 + $0xe8] sm:$0xf] }
  0xd1   :  { %v10509_v63 = vld [vmem:[%s11315_s17 + $0x144] sm:$0xf]  ;;  %v7794_v21 = vld [vmem:[%s11315_s17 + $0x200] sm:$0xf]  ;;  %v7668_v30 = vld [vmem:[%s11315_s17 + $0x110] sm:$0xf0] }
  0xd2   :  { %v10473_v7 = vld [vmem:[%s11315_s17 + $0x24] sm:$0xf]  ;;  %v7703_v10 = vor.u32 %v10509_v63, %v7700_v0  ;;  %v7908_v34 = vld [vmem:[%s11315_s17 + $0x2f0] sm:$0xf0]  ;;  %s13443_s13 = sld [smem:[#allocation10_spill]] }
  0xd3   :  { %1974 = vmatpush.bf16.msra.mxu1 %v7747_v40  ;;  %v7732_v40 = vld [vmem:[%s11315_s17 + $0x190] sm:$0xf0]  ;;  %v10469_v16 = vld [vmem:[%s11315_s17 + $0x4] sm:$0xf]  ;;  %s13457_s18 = sld [smem:[#allocation19_spill]] }
  0xd4   :  { %1962 = vmatpush.bf16.msra.mxu0 %v7603_v53  ;;  %1987 = vmatpush.bf16.msra.mxu2 %v7875_v28  ;;  %v10547_v53 = vld [vmem:[%s11315_s17 + $0x26c] sm:$0xf0]  ;;  %v7735_v44 = vor.u32 %v10517_v39, %v7732_v40  ;;  %v10501_v26 = vld [vmem:[%s11315_s17 + $0x104] sm:$0xf]  ;;  %v8018_v39 = vld [vmem:[%s11315_s17 + $0x3c0] sm:$0xf] }
  0xd5   :  { %v7843_v45 = vor.u32 %v10547_v53, %v7842_v59  ;;  %v10595_v28 = vld [vmem:[%s11315_s17 + $0x3ec] sm:$0xf0]  ;;  %v10561_v33 = vld [vmem:[%s11315_s17 + $0x2e4] sm:$0xf]  ;;  %v7642_v59 = vld [vmem:[%s11315_s17 + $0xc8] sm:$0xf] }
  0xd6   :  { %v7911_v36 = vor.u32 %v10561_v33, %v7908_v34  ;;  %v10591_v40 = vld [vmem:[%s11315_s17 + $0x3cc] sm:$0xf0]  ;;  %v10496_v53 = vld [vmem:[%s11315_s17 + $0xd4] sm:$0xf0]  ;;  %v7860_v0 = vld [vmem:[%s11315_s17 + $0x290] sm:$0xf0] }
  0xd7   :  { %1975 = vmatpush.bf16.msra.mxu1 %v7731_v58  ;;  %v7588_v58 = vld [vmem:[%s11315_s17 + $0x70] sm:$0xf0]  ;;  %v10537_v33 = vld [vmem:[%s11315_s17 + $0x224] sm:$0xf]  ;;  %v7562_v34 = vld [vmem:[%s11315_s17 + $0x28] sm:$0xf] }
  0xd8   :  { %1963 = vmatpush.bf16.msra.mxu0 %v7587_v46  ;;  %1988 = vmatpush.bf16.msra.mxu2 %v7859_v57  ;;  %v7591_v50 = vor.u32 %v10481_v43, %v7588_v58  ;;  %v7659_v57 = vor.u32 %v10500_v20, %v7658_v19  ;;  %v7892_v43 = vld [vmem:[%s11315_s17 + $0x2d0] sm:$0xf0]  ;;  %v7578_v20 = vld [vmem:[%s11315_s17 + $0x48] sm:$0xf]  ;;  %s13458_s22 = sld [smem:[#allocation26_spill]] }
  0xd9   :  { %s13459_s23 = sld [smem:[#allocation21_spill]] }
  0xda   :  { %s13460_s26 = sld [smem:[#allocation28_spill]] }
  0xdb   :  { %1976 = vmatpush.bf16.msra.mxu1 %v7715_v49  ;;  %v7716_v49 = vld [vmem:[%s11315_s17 + $0x170] sm:$0xf0]  ;;  %s13461_s28 = sld [smem:[#allocation25_spill]] }
  0xdc   :  { %1964 = vmatpush.bf16.msra.mxu0 %v7571_v52  ;;  %1989 = vmatpush.bf16.msra.mxu2 %v7843_v45  ;;  %v7826_v52 = vld [vmem:[%s11315_s17 + $0x240] sm:$0xf]  ;;  %v7719_v60 = vor.u32 %v10513_v48, %v7716_v49  ;;  %v7626_v48 = vld [vmem:[%s11315_s17 + $0xa8] sm:$0xf]  ;;  %v10492_v49 = vld [vmem:[%s11315_s17 + $0xb4] sm:$0xf0] }
  0xdd   :  { %v7827_v61 = vor.u32 %v10543_v54, %v7826_v52  ;;  %v8002_v45 = vld [vmem:[%s11315_s17 + $0x3a0] sm:$0xf]  ;;  %v7627_v54 = vor.u32 %v10492_v49, %v7626_v48  ;;  %v7770_v49 = vld [vmem:[%s11315_s17 + $0x1c8] sm:$0xf]  ;;  %s13462_s1 = sld [smem:[#allocation23_spill]] }
  0xde   :  { %s13463_s2 = sld [smem:[#allocation27_spill]] }
  0xdf   :  { %1977 = vmatpush.bf16.msra.mxu1 %v7699_v56  ;;  %v7572_v56 = vld [vmem:[%s11315_s17 + $0x50] sm:$0xf0]  ;;  %s13464_s7 = sld [smem:[#allocation29_spill]] }
  0xe0   :  { %1965 = vmatpush.bf16.msra.mxu0 %v7555_v62  ;;  %1990 = vmatpush.bf16.msra.mxu2 %v7827_v61  ;;  %v7575_v3 = vor.u32 %v10477_v55, %v7572_v56  ;;  %v7986_v55 = vld [vmem:[%s11315_s17 + $0x380] sm:$0xf]  ;;  %v10583_v56 = vld [vmem:[%s11315_s17 + $0x38c] sm:$0xf0]  ;;  %v7610_v61 = vld [vmem:[%s11315_s17 + $0x88] sm:$0xf] }
  0xe1   :  { %v7987_v63 = vor.u32 %v10583_v56, %v7986_v55  ;;  %v10528_v55 = vld [vmem:[%s11315_s17 + $0x1d4] sm:$0xf0] }
  0xe3   :  { %1978 = vmatpush.bf16.msra.mxu1 %v7683_v2 }
  0xe4   :  { %1966 = vmatpush.bf16.msra.mxu0 %v7539_v11  ;;  %v7811_v11 = vor.u32 %v10539_v5, %v7810_v4  ;;  %v7970_v4 = vld [vmem:[%s11315_s17 + $0x360] sm:$0xf]  ;;  %v10579_v5 = vld [vmem:[%s11315_s17 + $0x36c] sm:$0xf0] }
  0xe6   :  { %1991 = vmatpush.bf16.msra.mxu2 %v7811_v11 }
  0xe7   :  { %1979 = vmatpush.bf16.msra.mxu1 %v7667_v13  ;;  %v10505_v13 = vld [vmem:[%s11315_s17 + $0x124] sm:$0xf] }
  0xe8   :  { %2011 = vmatpush.bf16.msrb.mxu0 %v7655_v12  ;;  %v7687_v24 = vor.u32 %v10505_v13, %v7684_v14 }
  0xea   :  { %v1103_v42 = vpop.f32.mrf.mxu0 }
  0xeb   :  { %2024 = vmatpush.bf16.msrb.mxu1 %v7783_v18  ;;  %v1104_v46 = vadd.f32 %v1103_v42, %v436_v38  ;;  %v1116_v47 = vpop.f32.mrf.mxu1  ;;  %v7559_v18 = vor.u32 %v10473_v7, %v7556_v8  ;;  %v7671_v38 = vor.u32 %v10501_v26, %v7668_v30  ;;  %v8019_v42 = vor.u32 %v10591_v40, %v8018_v39  ;;  %v7594_v7 = vld [vmem:[%s11315_s17 + $0x68] sm:$0xf]  ;;  %v10484_v8 = vld [vmem:[%s11315_s17 + $0x74] sm:$0xf0]  ;;  %v7938_v30 = vld [vmem:[%s11315_s17 + $0x320] sm:$0xf] }
  0xec   :  { %2012 = vmatpush.bf16.msrb.mxu0 %v7639_v22  ;;  %v10535_v22 = vld [vmem:[%s11315_s17 + $0x20c] sm:$0xf0]  ;;  %v10532_v39 = vld [vmem:[%s11315_s17 + $0x1f4] sm:$0xf0] }
  0xed   :  { %v1117_v51 = vadd.f32 %v1116_v47, %v1104_v46  ;;  %v7795_v25 = vor.u32 %v10535_v22, %v7794_v21  ;;  %v10587_v46 = vld [vmem:[%s11315_s17 + $0x3ac] sm:$0xf0]  ;;  %v10553_v47 = vld [vmem:[%s11315_s17 + $0x2a4] sm:$0xf]  ;;  %v10480_v21 = vld [vmem:[%s11315_s17 + $0x54] sm:$0xf0] }
  0xef   :  { %2025 = vmatpush.bf16.msrb.mxu1 %v7767_v27  ;;  %v8034_v27 = vld [vmem:[%s11315_s17 + $0x3e0] sm:$0xf]  ;;  %1992 = vmatpush.bf16.msra.mxu2 %v7795_v25 }
  0xf0   :  { %2013 = vmatpush.bf16.msrb.mxu0 %v7623_v32  ;;  %v1129_v62 = vpop.f32.mrf.mxu2  ;;  %v8035_v32 = vor.u32 %v10595_v28, %v8034_v27 }
  0xf1   :  { %v1130_v1 = vadd.f32 %v1129_v62, %v1117_v51  ;;  %v1142_v2 = vpop.f32.mrf.mxu3  ;;  %v7876_v51 = vld [vmem:[%s11315_s17 + $0x2b0] sm:$0xf0]  ;;  %v10488_v62 = vld [vmem:[%s11315_s17 + $0x94] sm:$0xf0] }
  0xf2   :  { %v1105_v9 = vpop.f32.mrf.mxu0  ;;  %1998 = vmatpush.bf16.msra.mxu3 %v8035_v32  ;;  %v7879_v52 = vor.u32 %v10553_v47, %v7876_v51  ;;  %v10571_v32 = vld [vmem:[%s11315_s17 + $0x32c] sm:$0xf0]  ;;  %v10533_v51 = vld [vmem:[%s11315_s17 + $0x204] sm:$0xf] }
  0xf3   :  { %2026 = vmatpush.bf16.msrb.mxu1 %v7751_v37  ;;  %v1143_v6 = vadd.f32 %v1142_v2, %v1130_v1  ;;  %v1118_v12 = vpop.f32.mrf.mxu1  ;;  %v7543_v37 = vor.u32 %v10469_v16, %v7540_v17  ;;  %2037 = vmatpush.bf16.msrb.mxu2 %v7911_v36  ;;  %v437_v2 = vperm.slane %v11844_v31, 1  ;;  %v7971_v9 = vor.u32 %v10579_v5, %v7970_v4  ;;  %v7954_v16 = vld [vmem:[%s11315_s17 + $0x340] sm:$0xf]  ;;  %v10575_v17 = vld [vmem:[%s11315_s17 + $0x34c] sm:$0xf0] }
  0xf4   :  { %2014 = vmatpush.bf16.msrb.mxu0 %v7607_v41  ;;  %v10557_v41 = vld [vmem:[%s11315_s17 + $0x2c4] sm:$0xf]  ;;  %v7955_v22 = vor.u32 %v10575_v17, %v7954_v16  ;;  %v7939_v36 = vor.u32 %v10571_v32, %v7938_v30  ;;  %v10567_v47 = vld [vmem:[%s11315_s17 + $0x30c] sm:$0xf0]  ;;  %v10494_v4 = vld [vmem:[%s11315_s17 + $0xcc] sm:$0xf] }
  0xf5   :  { %v1302_v15 = vmax.f32 %v1143_v6, 0.0  ;;  %v7895_v58 = vor.u32 %v10557_v41, %v7892_v43  ;;  %v10545_v6 = vld [vmem:[%s11315_s17 + $0x264] sm:$0xf]  ;;  %v7628_v16 = vld [vmem:[%s11315_s17 + $0xb8] sm:$0xf0]  ;;  %v438_v30 = vperm.slane %v11844_v31, 2 }
  0xf6   :  { %1999 = vmatpush.bf16.msra.mxu3 %v8019_v42  ;;  %v10589_v5 = vld [vmem:[%s11315_s17 + $0x3c4] sm:$0xf]  ;;  %v7738_v17 = vld [vmem:[%s11315_s17 + $0x188] sm:$0xf] }
  0xf7   :  { %2027 = vmatpush.bf16.msrb.mxu1 %v7735_v44  ;;  %v11877_v23 = vpack.c.bf16 %v1302_v15, %v1302_v15  ;;  %v7643_v44 = vor.u32 %v10496_v53, %v7642_v59  ;;  %2038 = vmatpush.bf16.msrb.mxu2 %v7895_v58  ;;  %v7595_v15 = vor.u32 %v10484_v8, %v7594_v7  ;;  %v7546_v59 = vld [vmem:[%s11315_s17 + $0x8] sm:$0xf]  ;;  %v10472_v53 = vld [vmem:[%s11315_s17 + $0x14] sm:$0xf0]  ;;  %v7644_v7 = vld [vmem:[%s11315_s17 + $0xd8] sm:$0xf0] }
  0xf8   :  { %2015 = vmatpush.bf16.msrb.mxu0 %v7591_v50  ;;  %v1131_v29 = vpop.f32.mrf.mxu2  ;;  %v8003_v50 = vor.u32 %v10587_v46, %v8002_v45  ;;  %v7660_v45 = vld [vmem:[%s11315_s17 + $0xf8] sm:$0xf0]  ;;  %v7922_v46 = vld [vmem:[%s11315_s17 + $0x300] sm:$0xf]  ;;  %v7754_v8 = vld [vmem:[%s11315_s17 + $0x1a8] sm:$0xf] }
  0xf9   :  { %1967 = vmatmul.bf16.vlgmr.msra.gmra.mxu0 %v11877_v23  ;;  %v1144_v35 = vpop.f32.mrf.mxu3  ;;  %v7579_v29 = vor.u32 %v10480_v21, %v7578_v20  ;;  %v10581_v20 = vld [vmem:[%s11315_s17 + $0x384] sm:$0xf]  ;;  %v7988_v21 = vld [vmem:[%s11315_s17 + $0x390] sm:$0xf0] }
  0xfa   :  { %2000 = vmatpush.bf16.msra.mxu3 %v8003_v50  ;;  %v10476_v35 = vld [vmem:[%s11315_s17 + $0x34] sm:$0xf0]  ;;  %v7923_v50 = vor.u32 %v10567_v47, %v7922_v46  ;;  %v7690_v46 = vld [vmem:[%s11315_s17 + $0x128] sm:$0xf] }
  0xfb   :  { %2028 = vmatpush.bf16.msrb.mxu1 %v7719_v60  ;;  %v10549_v60 = vld [vmem:[%s11315_s17 + $0x284] sm:$0xf]  ;;  %2039 = vmatpush.bf16.msrb.mxu2 %v7879_v52  ;;  %v7563_v58 = vor.u32 %v10476_v35, %v7562_v34  ;;  %v7796_v52 = vld [vmem:[%s11315_s17 + $0x210] sm:$0xf0]  ;;  %v10482_v34 = vld [vmem:[%s11315_s17 + $0x6c] sm:$0xf] }
  0xfc   :  { %2016 = vmatpush.bf16.msrb.mxu0 %v7575_v3  ;;  %v7863_v1 = vor.u32 %v10549_v60, %v7860_v0  ;;  %v7611_v3 = vor.u32 %v10488_v62, %v7610_v61  ;;  %v7799_v56 = vor.u32 %v10533_v51, %v7796_v52  ;;  %v10593_v60 = vld [vmem:[%s11315_s17 + $0x3e4] sm:$0xf]  ;;  %v8036_v61 = vld [vmem:[%s11315_s17 + $0x3f0] sm:$0xf0]  ;;  %v7547_v0 = vor.u32 %v10472_v53, %v7546_v59  ;;  %v10508_v47 = vld [vmem:[%s11315_s17 + $0x134] sm:$0xf0] }
  0xfd   :  { %v10577_v35 = vld [vmem:[%s11315_s17 + $0x364] sm:$0xf]  ;;  %v7691_v52 = vor.u32 %v10508_v47, %v7690_v46  ;;  %v10510_v46 = vld [vmem:[%s11315_s17 + $0x14c] sm:$0xf]  ;;  %v7708_v47 = vld [vmem:[%s11315_s17 + $0x158] sm:$0xf0] }
  0xfe   :  { %2001 = vmatpush.bf16.msra.mxu3 %v7987_v63  ;;  %v8039_v63 = vor.u32 %v10593_v60, %v8036_v61  ;;  %v7940_v60 = vld [vmem:[%s11315_s17 + $0x330] sm:$0xf0] }
  0xff   :  { %2029 = vmatpush.bf16.msrb.mxu1 %v7703_v10  ;;  %2040 = vmatpush.bf16.msrb.mxu2 %v7863_v1  ;;  %v7844_v10 = vld [vmem:[%s11315_s17 + $0x270] sm:$0xf0] }
 0x100   :  { %2017 = vmatpush.bf16.msrb.mxu0 %v7559_v18  ;;  %v7847_v12 = vor.u32 %v10545_v6, %v7844_v10  ;;  %v10541_v18 = vld [vmem:[%s11315_s17 + $0x244] sm:$0xf]  ;;  %v8020_v6 = vld [vmem:[%s11315_s17 + $0x3d0] sm:$0xf0] }
 0x101   :  { %v8023_v10 = vor.u32 %v10589_v5, %v8020_v6 }
 0x102   :  { %2002 = vmatpush.bf16.msra.mxu3 %v7971_v9  ;;  %v10524_v9 = vld [vmem:[%s11315_s17 + $0x1b4] sm:$0xf0] }
 0x103   :  { %2030 = vmatpush.bf16.msrb.mxu1 %v7687_v24  ;;  %2041 = vmatpush.bf16.msrb.mxu2 %v7847_v12  ;;  %v7828_v24 = vld [vmem:[%s11315_s17 + $0x250] sm:$0xf0] }
 0x104   :  { %2018 = vmatpush.bf16.msrb.mxu0 %v7543_v37  ;;  %v7831_v25 = vor.u32 %v10541_v18, %v7828_v24  ;;  %v7812_v37 = vld [vmem:[%s11315_s17 + $0x230] sm:$0xf0]  ;;  %v10520_v18 = vld [vmem:[%s11315_s17 + $0x194] sm:$0xf0] }
 0x105   :  { %v7815_v41 = vor.u32 %v10537_v33, %v7812_v37  ;;  %v8004_v12 = vld [vmem:[%s11315_s17 + $0x3b0] sm:$0xf0]  ;;  %v7739_v24 = vor.u32 %v10520_v18, %v7738_v17  ;;  %v7596_v37 = vld [vmem:[%s11315_s17 + $0x78] sm:$0xf0] }
 0x106   :  { %v1155_v11 = vpop.f32.mrf.mxu0  ;;  %2003 = vmatpush.bf16.msra.mxu3 %v7955_v22  ;;  %v7599_v53 = vor.u32 %v10482_v34, %v7596_v37  ;;  %v7548_v17 = vld [vmem:[%s11315_s17 + $0x18] sm:$0xf0]  ;;  %v7882_v34 = vld [vmem:[%s11315_s17 + $0x2a8] sm:$0xf] }
 0x107   :  { %2031 = vmatpush.bf16.msrb.mxu1 %v7671_v38  ;;  %v1156_v13 = vadd.f32 %v1155_v11, %v437_v2  ;;  %v1168_v14 = vpop.f32.mrf.mxu1  ;;  %2042 = vmatpush.bf16.msrb.mxu2 %v7831_v25  ;;  %v7786_v38 = vld [vmem:[%s11315_s17 + $0x1e8] sm:$0xf]  ;;  %v10585_v11 = vld [vmem:[%s11315_s17 + $0x3a4] sm:$0xf]  ;;  %v10486_v25 = vld [vmem:[%s11315_s17 + $0x8c] sm:$0xf] }
 0x108   :  { %2063 = vmatpush.bf16.msra.mxu0 %v7659_v57  ;;  %v7787_v48 = vor.u32 %v10532_v39, %v7786_v38  ;;  %v10512_v38 = vld [vmem:[%s11315_s17 + $0x154] sm:$0xf0] }
 0x109   :  { %2019 = vmatmul.bf16.vlgmr.msrb.gmra.mxu0 %v11877_v23  ;;  %v1169_v19 = vadd.f32 %v1168_v14, %v1156_v13  ;;  %v7647_v13 = vor.u32 %v10494_v4, %v7644_v7  ;;  %v7755_v14 = vor.u32 %v10524_v9, %v7754_v8  ;;  %v7788_v4 = vld [vmem:[%s11315_s17 + $0x1f8] sm:$0xf0]  ;;  %v7914_v7 = vld [vmem:[%s11315_s17 + $0x2e8] sm:$0xf]  ;;  %v10564_v8 = vld [vmem:[%s11315_s17 + $0x2f4] sm:$0xf0] }
 0x10a   :  { %2004 = vmatpush.bf16.msra.mxu3 %v7939_v36  ;;  %v7972_v36 = vld [vmem:[%s11315_s17 + $0x370] sm:$0xf0]  ;;  %v7915_v18 = vor.u32 %v10564_v8, %v7914_v7  ;;  %v7802_v8 = vld [vmem:[%s11315_s17 + $0x208] sm:$0xf] }
 0x10b   :  { %2043 = vmatpush.bf16.msrb.mxu2 %v7815_v41  ;;  %v7975_v39 = vor.u32 %v10577_v35, %v7972_v36  ;;  %v10556_v35 = vld [vmem:[%s11315_s17 + $0x2b4] sm:$0xf0] }
 0x10c   :  { %2064 = vmatpush.bf16.msra.mxu0 %v7643_v44  ;;  %v10498_v44 = vld [vmem:[%s11315_s17 + $0xec] sm:$0xf]  ;;  %v7883_v37 = vor.u32 %v10556_v35, %v7882_v34  ;;  %v7884_v34 = vld [vmem:[%s11315_s17 + $0x2b8] sm:$0xf0]  ;;  %v8010_v35 = vld [vmem:[%s11315_s17 + $0x3a8] sm:$0xf] }
 0x10d   :  { %v1181_v26 = vpop.f32.mrf.mxu2  ;;  %v7663_v2 = vor.u32 %v10498_v44, %v7660_v45  ;;  %v7956_v44 = vld [vmem:[%s11315_s17 + $0x350] sm:$0xf0]  ;;  %v7580_v45 = vld [vmem:[%s11315_s17 + $0x58] sm:$0xf0] }
 0x10e   :  { %v1182_v27 = vadd.f32 %v1181_v26, %v1169_v19  ;;  %v1157_v40 = vpop.f32.mrf.mxu0  ;;  %2005 = vmatpush.bf16.msra.mxu3 %v7923_v50  ;;  %v8007_v19 = vor.u32 %v10585_v11, %v8004_v12  ;;  %v7612_v26 = vld [vmem:[%s11315_s17 + $0x98] sm:$0xf0]  ;;  %v10565_v12 = vld [vmem:[%s11315_s17 + $0x304] sm:$0xf] }
 0x10f   :  { %v1170_v42 = vpop.f32.mrf.mxu1  ;;  %2044 = vmatpush.bf16.msrb.mxu2 %v7799_v56  ;;  %v7615_v32 = vor.u32 %v10486_v25, %v7612_v26  ;;  %v10569_v56 = vld [vmem:[%s11315_s17 + $0x324] sm:$0xf]  ;;  %v10560_v25 = vld [vmem:[%s11315_s17 + $0x2d4] sm:$0xf0] }
 0x110   :  { %2065 = vmatpush.bf16.msra.mxu0 %v7627_v54  ;;  %v1194_v28 = vpop.f32.mrf.mxu3 }
 0x111   :  { %v1195_v57 = vadd.f32 %v1194_v28, %v1182_v27  ;;  %v7722_v27 = vld [vmem:[%s11315_s17 + $0x168] sm:$0xf]  ;;  %v10516_v28 = vld [vmem:[%s11315_s17 + $0x174] sm:$0xf0] }
 0x112   :  { %2050 = vmatpush.bf16.msrb.mxu3 %v8039_v63  ;;  %v7723_v33 = vor.u32 %v10516_v28, %v7722_v27  ;;  %v7564_v63 = vld [vmem:[%s11315_s17 + $0x38] sm:$0xf0] }
 0x113   :  { %v1303_v43 = vmax.f32 %v1195_v57, 0.0  ;;  %v7706_v57 = vld [vmem:[%s11315_s17 + $0x148] sm:$0xf] }
 0x114   :  { %2066 = vmatpush.bf16.msra.mxu0 %v7611_v3  ;;  %v7771_v3 = vor.u32 %v10528_v55, %v7770_v49  ;;  %v7707_v42 = vor.u32 %v10512_v38, %v7706_v57  ;;  %v10474_v55 = vld [vmem:[%s11315_s17 + $0x2c] sm:$0xf]  ;;  %v7740_v38 = vld [vmem:[%s11315_s17 + $0x198] sm:$0xf0] }
 0x115   :  { %v11935_v54 = vpack.c.bf16 %v1303_v43, %v1303_v43  ;;  %v1183_v62 = vpop.f32.mrf.mxu2  ;;  %v10478_v43 = vld [vmem:[%s11315_s17 + $0x4c] sm:$0xf]  ;;  %v7567_v9 = vor.u32 %v10474_v55, %v7564_v63  ;;  %v10540_v63 = vld [vmem:[%s11315_s17 + $0x234] sm:$0xf0] }
 0x116   :  { %2051 = vmatpush.bf16.msrb.mxu3 %v8023_v10  ;;  %v7583_v51 = vor.u32 %v10478_v43, %v7580_v45  ;;  %v10518_v57 = vld [vmem:[%s11315_s17 + $0x18c] sm:$0xf]  ;;  %v7850_v43 = vld [vmem:[%s11315_s17 + $0x268] sm:$0xf] }
 0x117   :  { %1980 = vmatmul.bf16.vlgmr.msra.gmra.mxu1 %v11935_v54 }
 0x118   :  { %2067 = vmatpush.bf16.msra.mxu0 %v7595_v15  ;;  %v1196_v1 = vpop.f32.mrf.mxu3  ;;  %2076 = vmatpush.bf16.msra.mxu1 %v7787_v48  ;;  %v10490_v15 = vld [vmem:[%s11315_s17 + $0xac] sm:$0xf] }
 0x119   :  { %v7631_v22 = vor.u32 %v10490_v15, %v7628_v16  ;;  %v10504_v1 = vld [vmem:[%s11315_s17 + $0x114] sm:$0xf0]  ;;  %v10470_v16 = vld [vmem:[%s11315_s17 + $0xc] sm:$0xf] }
 0x11a   :  { %2052 = vmatpush.bf16.msrb.mxu3 %v8007_v19  ;;  %v10526_v19 = vld [vmem:[%s11315_s17 + $0x1cc] sm:$0xf]  ;;  %v7551_v26 = vor.u32 %v10470_v16, %v7548_v17  ;;  %v10596_v16 = vld [vmem:[%s11315_s17 + $0x3f4] sm:$0xf0] }
 0x11c   :  { %2068 = vmatpush.bf16.msra.mxu0 %v7579_v29  ;;  %2077 = vmatpush.bf16.msra.mxu1 %v7771_v3  ;;  %v7991_v29 = vor.u32 %v10581_v20, %v7988_v21  ;;  %v10530_v3 = vld [vmem:[%s11315_s17 + $0x1ec] sm:$0xf]  ;;  %v7772_v20 = vld [vmem:[%s11315_s17 + $0x1d8] sm:$0xf0] }
 0x11d   :  { %v7791_v15 = vor.u32 %v10530_v3, %v7788_v4  ;;  %v7775_v28 = vor.u32 %v10526_v19, %v7772_v20  ;;  %v10502_v3 = vld [vmem:[%s11315_s17 + $0x10c] sm:$0xf]  ;;  %v7676_v4 = vld [vmem:[%s11315_s17 + $0x118] sm:$0xf0] }
 0x11e   :  { %2053 = vmatpush.bf16.msrb.mxu3 %v7991_v29 }
 0x120   :  { %2069 = vmatpush.bf16.msra.mxu0 %v7563_v58  ;;  %2078 = vmatpush.bf16.msra.mxu1 %v7755_v14  ;;  %v10573_v58 = vld [vmem:[%s11315_s17 + $0x344] sm:$0xf] }
 0x121   :  { %v7959_v48 = vor.u32 %v10573_v58, %v7956_v44  ;;  %v10548_v58 = vld [vmem:[%s11315_s17 + $0x274] sm:$0xf0]  ;;  %v439_v44 = vperm.slane %v11844_v31, 3  ;;  %v7711_v31 = vor.u32 %v10510_v46, %v7708_v47  ;;  %v7836_v46 = vld [vmem:[%s11315_s17 + $0x258] sm:$0xf0] }
 0x122   :  { %2054 = vmatpush.bf16.msrb.mxu3 %v7975_v39  ;;  %v7866_v39 = vld [vmem:[%s11315_s17 + $0x288] sm:$0xf] }
 0x123   :  { %v7962_v47 = vld [vmem:[%s11315_s17 + $0x348] sm:$0xf] }
 0x124   :  { %2070 = vmatpush.bf16.msra.mxu0 %v7547_v0  ;;  %2079 = vmatpush.bf16.msra.mxu1 %v7739_v24  ;;  %v7674_v0 = vld [vmem:[%s11315_s17 + $0x108] sm:$0xf] }
 0x125   :  { %v7675_v10 = vor.u32 %v10504_v1, %v7674_v0  ;;  %v7898_v24 = vld [vmem:[%s11315_s17 + $0x2c8] sm:$0xf] }
 0x126   :  { %v1207_v40 = vpop.f32.mrf.mxu0  ;;  %2055 = vmatpush.bf16.msrb.mxu3 %v7959_v48 }
 0x127   :  { %2071 = vmatmul.bf16.vlgmr.msra.gmra.mxu0 %v11877_v23  ;;  %2032 = vmatmul.bf16.vlgmr.msrb.gmra.mxu1 %v11935_v54  ;;  %v1208_v41 = vadd.f32 %v1207_v40, %v438_v30  ;;  %v1220_v59 = vpop.f32.mrf.mxu1  ;;  %v7899_v30 = vor.u32 %v10560_v25, %v7898_v24  ;;  %v10552_v40 = vld [vmem:[%s11315_s17 + $0x294] sm:$0xf0]  ;;  %v7900_v24 = vld [vmem:[%s11315_s17 + $0x2d8] sm:$0xf0] }
 0x128   :  { %2115 = vmatpush.bf16.msrb.mxu0 %v7663_v2  ;;  %2080 = vmatpush.bf16.msra.mxu1 %v7723_v33  ;;  %v7943_v2 = vor.u32 %v10569_v56, %v7940_v60  ;;  %v7756_v33 = vld [vmem:[%s11315_s17 + $0x1b8] sm:$0xf0]  ;;  %v10506_v56 = vld [vmem:[%s11315_s17 + $0x12c] sm:$0xf] }
 0x129   :  { %v1221_v49 = vadd.f32 %v1220_v59, %v1208_v41  ;;  %v7743_v41 = vor.u32 %v10518_v57, %v7740_v38  ;;  %v7867_v59 = vor.u32 %v10552_v40, %v7866_v39  ;;  %v7692_v60 = vld [vmem:[%s11315_s17 + $0x138] sm:$0xf0]  ;;  %v10550_v38 = vld [vmem:[%s11315_s17 + $0x28c] sm:$0xf]  ;;  %v10584_v40 = vld [vmem:[%s11315_s17 + $0x394] sm:$0xf0] }
 0x12a   :  { %2056 = vmatpush.bf16.msrb.mxu3 %v7943_v2  ;;  %v7695_v0 = vor.u32 %v10506_v56, %v7692_v60  ;;  %v7868_v39 = vld [vmem:[%s11315_s17 + $0x298] sm:$0xf0] }
 0x12c   :  { %2116 = vmatpush.bf16.msrb.mxu0 %v7647_v13  ;;  %2081 = vmatpush.bf16.msra.mxu1 %v7707_v42  ;;  %v7924_v13 = vld [vmem:[%s11315_s17 + $0x310] sm:$0xf0]  ;;  %v7724_v42 = vld [vmem:[%s11315_s17 + $0x178] sm:$0xf0] }
 0x12d   :  { %v1233_v50 = vpop.f32.mrf.mxu2  ;;  %v7927_v21 = vor.u32 %v10565_v12, %v7924_v13  ;;  %v7916_v12 = vld [vmem:[%s11315_s17 + $0x2f8] sm:$0xf0] }
 0x12e   :  { %v1234_v61 = vadd.f32 %v1233_v50, %v1221_v49  ;;  %v1209_v6 = vpop.f32.mrf.mxu0  ;;  %v7834_v49 = vld [vmem:[%s11315_s17 + $0x248] sm:$0xf]  ;;  %v10544_v50 = vld [vmem:[%s11315_s17 + $0x254] sm:$0xf0] }
 0x12f   :  { %v1222_v11 = vpop.f32.mrf.mxu1  ;;  %2057 = vmatpush.bf16.msrb.mxu3 %v7927_v21  ;;  %v7835_v55 = vor.u32 %v10544_v50, %v7834_v49  ;;  %v10558_v21 = vld [vmem:[%s11315_s17 + $0x2cc] sm:$0xf] }
 0x130   :  { %2117 = vmatpush.bf16.msrb.mxu0 %v7631_v22  ;;  %v1246_v62 = vpop.f32.mrf.mxu3  ;;  %2082 = vmatpush.bf16.msra.mxu1 %v7691_v52  ;;  %v10562_v11 = vld [vmem:[%s11315_s17 + $0x2ec] sm:$0xf] }
 0x131   :  { %v1247_v5 = vadd.f32 %v1246_v62, %v1234_v61  ;;  %v7818_v62 = vld [vmem:[%s11315_s17 + $0x228] sm:$0xf]  ;;  %v7919_v19 = vor.u32 %v10562_v11, %v7916_v12 }
 0x132   :  { %v7819_v2 = vor.u32 %v10540_v63, %v7818_v62  ;;  %v7804_v62 = vld [vmem:[%s11315_s17 + $0x218] sm:$0xf0]  ;;  %v7930_v63 = vld [vmem:[%s11315_s17 + $0x308] sm:$0xf] }
 0x133   :  { %v1304_v14 = vmax.f32 %v1247_v5, 0.0 }
 0x134   :  { %2118 = vmatpush.bf16.msrb.mxu0 %v7615_v32  ;;  %2083 = vmatpush.bf16.msra.mxu1 %v7675_v10  ;;  %v10522_v32 = vld [vmem:[%s11315_s17 + $0x1ac] sm:$0xf] }
 0x135   :  { %v11990_v22 = vpack.c.bf16 %v1304_v14, %v1304_v14  ;;  %v1235_v27 = vpop.f32.mrf.mxu2  ;;  %v7759_v36 = vor.u32 %v10522_v32, %v7756_v33  ;;  %v7679_v14 = vor.u32 %v10502_v3, %v7676_v4  ;;  %v10554_v33 = vld [vmem:[%s11315_s17 + $0x2ac] sm:$0xf] }
 0x136   :  { %v10592_v27 = vld [vmem:[%s11315_s17 + $0x3d4] sm:$0xf0] }
 0x137   :  { %1993 = vmatmul.bf16.vlgmr.msra.gmra.mxu2 %v11990_v22  ;;  %2084 = vmatmul.bf16.vlgmr.msra.gmra.mxu1 %v11935_v54 }
 0x138   :  { %2119 = vmatpush.bf16.msrb.mxu0 %v7599_v53  ;;  %2128 = vmatpush.bf16.msrb.mxu1 %v7791_v15  ;;  %v1248_v29 = vpop.f32.mrf.mxu3  ;;  %v10514_v53 = vld [vmem:[%s11315_s17 + $0x16c] sm:$0xf]  ;;  %v8042_v15 = vld [vmem:[%s11315_s17 + $0x3e8] sm:$0xf] }
 0x139   :  { %2089 = vmatpush.bf16.msra.mxu2 %v7915_v18  ;;  %v7727_v45 = vor.u32 %v10514_v53, %v7724_v42  ;;  %v8043_v20 = vor.u32 %v10596_v16, %v8042_v15  ;;  %v10546_v53 = vld [vmem:[%s11315_s17 + $0x26c] sm:$0xf]  ;;  %v7852_v42 = vld [vmem:[%s11315_s17 + $0x278] sm:$0xf0] }
 0x13a   :  { %v10578_v16 = vld [vmem:[%s11315_s17 + $0x36c] sm:$0xf] }
 0x13c   :  { %2120 = vmatpush.bf16.msrb.mxu0 %v7583_v51  ;;  %2129 = vmatpush.bf16.msrb.mxu1 %v7775_v28 }
 0x13d   :  { %2090 = vmatpush.bf16.msra.mxu2 %v7899_v30  ;;  %v7903_v30 = vor.u32 %v10558_v21, %v7900_v24  ;;  %v10570_v24 = vld [vmem:[%s11315_s17 + $0x32c] sm:$0xf] }
 0x140   :  { %2121 = vmatpush.bf16.msrb.mxu0 %v7567_v9  ;;  %2130 = vmatpush.bf16.msrb.mxu1 %v7759_v36  ;;  %v10536_v9 = vld [vmem:[%s11315_s17 + $0x214] sm:$0xf0] }
 0x141   :  { %2091 = vmatpush.bf16.msra.mxu2 %v7883_v37  ;;  %v7803_v17 = vor.u32 %v10536_v9, %v7802_v8  ;;  %v10588_v36 = vld [vmem:[%s11315_s17 + $0x3b4] sm:$0xf0]  ;;  %v7887_v37 = vor.u32 %v10554_v33, %v7884_v34  ;;  %v10586_v9 = vld [vmem:[%s11315_s17 + $0x3ac] sm:$0xf]  ;;  %v12082_v33 = vld [vmem:[%s11320_s21] sm:$0xf] }
 0x142   :  { %v8011_v57 = vor.u32 %v10588_v36, %v8010_v35  ;;  %v1311_v34 = vperm.slane %v12082_v33, 0  ;;  %s13445_s21 = sld [smem:[#allocation7_spill]] }
 0x144   :  { %2122 = vmatpush.bf16.msrb.mxu0 %v7551_v26  ;;  %2131 = vmatpush.bf16.msrb.mxu1 %v7743_v41  ;;  %v8026_v26 = vld [vmem:[%s11315_s17 + $0x3c8] sm:$0xf]  ;;  %v7871_v41 = vor.u32 %v10550_v38, %v7868_v39  ;;  %v8162_v38 = vld [vmem:[%s11325_s25 + $0xe0] sm:$0xf]  ;;  %v10627_v39 = vld [vmem:[%s11325_s25 + $0xec] sm:$0xf0] }
 0x145   :  { %2092 = vmatpush.bf16.msra.mxu2 %v7867_v59  ;;  %v8027_v32 = vor.u32 %v10592_v27, %v8026_v26  ;;  %v7948_v26 = vld [vmem:[%s11315_s17 + $0x338] sm:$0xf0] }
 0x146   :  { %v1259_v48 = vpop.f32.mrf.mxu0  ;;  %v7951_v27 = vor.u32 %v10570_v24, %v7948_v26 }
 0x147   :  { %2123 = vmatmul.bf16.vlgmr.msrb.gmra.mxu0 %v11877_v23  ;;  %v7851_v23 = vor.u32 %v10548_v58, %v7850_v43  ;;  %v1260_v51 = vadd.f32 %v1259_v48, %v439_v44  ;;  %v1272_v52 = vpop.f32.mrf.mxu1  ;;  %2045 = vmatmul.bf16.vlgmr.msrb.gmra.mxu2 %v11990_v22  ;;  %v7978_v43 = vld [vmem:[%s11315_s17 + $0x368] sm:$0xf]  ;;  %v10580_v58 = vld [vmem:[%s11315_s17 + $0x374] sm:$0xf0]  ;;  %v7855_v44 = vor.u32 %v10546_v53, %v7852_v42  ;;  %v8146_v53 = vld [vmem:[%s11325_s25 + $0xc0] sm:$0xf] }
 0x148   :  { %2132 = vmatpush.bf16.msrb.mxu1 %v7727_v45  ;;  %v7979_v45 = vor.u32 %v10580_v58, %v7978_v43  ;;  %v10576_v48 = vld [vmem:[%s11315_s17 + $0x354] sm:$0xf0]  ;;  %v10623_v42 = vld [vmem:[%s11325_s25 + $0xcc] sm:$0xf0]  ;;  %v8274_v43 = vld [vmem:[%s11325_s25 + $0x1c0] sm:$0xf] }
 0x149   :  { %2093 = vmatpush.bf16.msra.mxu2 %v7851_v23  ;;  %v1273_v61 = vadd.f32 %v1272_v52, %v1260_v51  ;;  %v10542_v23 = vld [vmem:[%s11315_s17 + $0x24c] sm:$0xf]  ;;  %v7963_v50 = vor.u32 %v10576_v48, %v7962_v47  ;;  %v7820_v52 = vld [vmem:[%s11315_s17 + $0x238] sm:$0xf0]  ;;  %v10655_v58 = vld [vmem:[%s11325_s25 + $0x1cc] sm:$0xf0] }
 0x14a   :  { %v7839_v49 = vor.u32 %v10542_v23, %v7836_v46  ;;  %v10538_v51 = vld [vmem:[%s11315_s17 + $0x22c] sm:$0xf]  ;;  %v8130_v46 = vld [vmem:[%s11325_s25 + $0xa0] sm:$0xf]  ;;  %v10619_v47 = vld [vmem:[%s11325_s25 + $0xac] sm:$0xf0] }
 0x14b   :  { %v7823_v56 = vor.u32 %v10538_v51, %v7820_v52  ;;  %v8258_v48 = vld [vmem:[%s11325_s25 + $0x1a0] sm:$0xf]  ;;  %v10615_v52 = vld [vmem:[%s11325_s25 + $0x8c] sm:$0xf0] }
 0x14c   :  { %2133 = vmatpush.bf16.msrb.mxu1 %v7711_v31  ;;  %v7946_v31 = vld [vmem:[%s11315_s17 + $0x328] sm:$0xf]  ;;  %v8114_v51 = vld [vmem:[%s11325_s25 + $0x80] sm:$0xf] }
 0x14d   :  { %v1285_v1 = vpop.f32.mrf.mxu2  ;;  %2094 = vmatpush.bf16.msra.mxu2 %v7835_v55  ;;  %v10572_v55 = vld [vmem:[%s11315_s17 + $0x334] sm:$0xf0] }
 0x14e   :  { %v1286_v5 = vadd.f32 %v1285_v1, %v1273_v61  ;;  %v1298_v6 = vpop.f32.mrf.mxu3  ;;  %v1261_v7 = vpop.f32.mrf.mxu0  ;;  %v7947_v60 = vor.u32 %v10572_v55, %v7946_v31  ;;  %v10534_v61 = vld [vmem:[%s11315_s17 + $0x20c] sm:$0xf]  ;;  %v8242_v55 = vld [vmem:[%s11325_s25 + $0x180] sm:$0xf] }
 0x14f   :  { %v1274_v10 = vpop.f32.mrf.mxu1  ;;  %v10594_v1 = vld [vmem:[%s11315_s17 + $0x3ec] sm:$0xf]  ;;  %v7807_v3 = vor.u32 %v10534_v61, %v7804_v62  ;;  %v8028_v7 = vld [vmem:[%s11315_s17 + $0x3d8] sm:$0xf0] }
 0x150   :  { %v1299_v13 = vadd.f32 %v1298_v6, %v1286_v5  ;;  %2134 = vmatpush.bf16.msrb.mxu1 %v7695_v0  ;;  %v10568_v0 = vld [vmem:[%s11315_s17 + $0x314] sm:$0xf0]  ;;  %v10590_v6 = vld [vmem:[%s11315_s17 + $0x3cc] sm:$0xf]  ;;  %v8012_v10 = vld [vmem:[%s11315_s17 + $0x3b8] sm:$0xf0] }
 0x151   :  { %2095 = vmatpush.bf16.msra.mxu2 %v7819_v2  ;;  %v8044_v2 = vld [vmem:[%s11315_s17 + $0x3f8] sm:$0xf0]  ;;  %v7931_v4 = vor.u32 %v10568_v0, %v7930_v63  ;;  %v8031_v8 = vor.u32 %v10590_v6, %v8028_v7  ;;  %v8015_v11 = vor.u32 %v10586_v9, %v8012_v10  ;;  %v8098_v0 = vld [vmem:[%s11325_s25 + $0x60] sm:$0xf]  ;;  %v10607_v7 = vld [vmem:[%s11325_s25 + $0x4c] sm:$0xf0] }
 0x152   :  { %v1305_v18 = vmax.f32 %v1299_v13, 0.0  ;;  %v8047_v5 = vor.u32 %v10594_v1, %v8044_v2  ;;  %v10582_v13 = vld [vmem:[%s11315_s17 + $0x38c] sm:$0xf]  ;;  %v10611_v1 = vld [vmem:[%s11325_s25 + $0x6c] sm:$0xf0] }
 0x153   :  { %v8226_v2 = vld [vmem:[%s11325_s25 + $0x160] sm:$0xf]  ;;  %v10639_v10 = vld [vmem:[%s11325_s25 + $0x14c] sm:$0xf0] }
 0x154   :  { %v12029_v25 = vpack.c.bf16 %v1305_v18, %v1305_v18  ;;  %2135 = vmatpush.bf16.msrb.mxu1 %v7679_v14  ;;  %v7996_v14 = vld [vmem:[%s11315_s17 + $0x398] sm:$0xf0]  ;;  %v8082_v6 = vld [vmem:[%s11325_s25 + $0x40] sm:$0xf] }
 0x155   :  { %v1287_v28 = vpop.f32.mrf.mxu2  ;;  %2096 = vmatpush.bf16.msra.mxu2 %v7803_v17  ;;  %v7999_v15 = vor.u32 %v10582_v13, %v7996_v14  ;;  %v7980_v17 = vld [vmem:[%s11315_s17 + $0x378] sm:$0xf0]  ;;  %v8083_v9 = vor.u32 %v10607_v7, %v8082_v6  ;;  %v1313_v13 = vperm.slane %v12082_v33, 2  ;;  %v8066_v14 = vld [vmem:[%s11325_s25 + $0x20] sm:$0xf] }
 0x156   :  { %v1300_v29 = vpop.f32.mrf.mxu3  ;;  %2006 = vmatmul.bf16.vlgmr.msra.gmra.mxu3 %v12029_v25  ;;  %v10641_v6 = vld [vmem:[%s11325_s25 + $0x164] sm:$0xf] }
 0x157   :  { %2102 = vmatpush.bf16.msra.mxu3 %v8043_v20  ;;  %2136 = vmatmul.bf16.vlgmr.msrb.gmra.mxu1 %v11935_v54  ;;  %v7994_v54 = vld [vmem:[%s11315_s17 + $0x388] sm:$0xf]  ;;  %v7964_v20 = vld [vmem:[%s11315_s17 + $0x358] sm:$0xf0]  ;;  %v10566_v29 = vld [vmem:[%s11315_s17 + $0x30c] sm:$0xf] }
 0x158   :  { %2097 = vmatmul.bf16.vlgmr.msra.gmra.mxu2 %v11990_v22  ;;  %v7995_v59 = vor.u32 %v10584_v40, %v7994_v54  ;;  %v8290_v54 = vld [vmem:[%s11325_s25 + $0x1e0] sm:$0xf]  ;;  %v8163_v40 = vor.u32 %v10627_v39, %v8162_v38  ;;  %v8292_v38 = vld [vmem:[%s11325_s25 + $0x1f0] sm:$0xf0] }
 0x159   :  { %2141 = vmatpush.bf16.msrb.mxu2 %v7919_v19  ;;  %v10574_v19 = vld [vmem:[%s11315_s17 + $0x34c] sm:$0xf] }
 0x15a   :  { %v7967_v21 = vor.u32 %v10574_v19, %v7964_v20  ;;  %3109 = vmatpush.bf16.msra.mxu0 %v8163_v40  ;;  %v8050_v19 = vld [vmem:[%s11325_s25] sm:$0xf]  ;;  %v10599_v20 = vld [vmem:[%s11325_s25 + $0xc] sm:$0xf0] }
 0x15b   :  { %2103 = vmatpush.bf16.msra.mxu3 %v8027_v32  ;;  %v8051_v26 = vor.u32 %v10599_v20, %v8050_v19  ;;  %v8212_v20 = vld [vmem:[%s11325_s25 + $0x150] sm:$0xf0] }
 0x15d   :  { %2142 = vmatpush.bf16.msrb.mxu2 %v7903_v30  ;;  %v7932_v30 = vld [vmem:[%s11315_s17 + $0x318] sm:$0xf0]  ;;  %s13444_s17 = sld [smem:[#allocation14_spill]] }
 0x15e   :  { %v7935_v32 = vor.u32 %v10566_v29, %v7932_v30 }
 0x15f   :  { %2104 = vmatpush.bf16.msra.mxu3 %v8011_v57 }
 0x161   :  { %2143 = vmatpush.bf16.msrb.mxu2 %v7887_v37 }
 0x163   :  { %2105 = vmatpush.bf16.msra.mxu3 %v7995_v59 }
 0x165   :  { %2144 = vmatpush.bf16.msrb.mxu2 %v7871_v41  ;;  %v10659_v41 = vld [vmem:[%s11325_s25 + $0x1ec] sm:$0xf0] }
 0x166   :  { %2058 = vmatmul.bf16.vlgmr.msrb.gmra.mxu3 %v12029_v25  ;;  %v8291_v59 = vor.u32 %v10659_v41, %v8290_v54  ;;  %v10621_v41 = vld [vmem:[%s11325_s25 + $0xc4] sm:$0xf] }
 0x167   :  { %2106 = vmatpush.bf16.msra.mxu3 %v7979_v45  ;;  %v8275_v45 = vor.u32 %v10655_v58, %v8274_v43  ;;  %v8276_v43 = vld [vmem:[%s11325_s25 + $0x1d0] sm:$0xf0] }
 0x168   :  { %3122 = vmatpush.bf16.msra.mxu1 %v8291_v59  ;;  %v8148_v59 = vld [vmem:[%s11325_s25 + $0xd0] sm:$0xf0] }
 0x169   :  { %2145 = vmatpush.bf16.msrb.mxu2 %v7855_v44 }
 0x16b   :  { %2107 = vmatpush.bf16.msra.mxu3 %v7963_v50  ;;  %v10651_v50 = vld [vmem:[%s11325_s25 + $0x1ac] sm:$0xf0] }
 0x16c   :  { %3123 = vmatpush.bf16.msra.mxu1 %v8275_v45  ;;  %v8259_v31 = vor.u32 %v10651_v50, %v8258_v48  ;;  %v8132_v45 = vld [vmem:[%s11325_s25 + $0xb0] sm:$0xf0] }
 0x16d   :  { %2146 = vmatpush.bf16.msrb.mxu2 %v7839_v49  ;;  %v8131_v49 = vor.u32 %v10619_v47, %v8130_v46  ;;  %v8260_v47 = vld [vmem:[%s11325_s25 + $0x1b0] sm:$0xf0] }
 0x16f   :  { %2108 = vmatpush.bf16.msra.mxu3 %v7947_v60  ;;  %v8115_v60 = vor.u32 %v10615_v52, %v8114_v51  ;;  %v10613_v51 = vld [vmem:[%s11325_s25 + $0x84] sm:$0xf]  ;;  %v8116_v52 = vld [vmem:[%s11325_s25 + $0x90] sm:$0xf0] }
 0x170   :  { %3124 = vmatpush.bf16.msra.mxu1 %v8259_v31  ;;  %v10645_v31 = vld [vmem:[%s11325_s25 + $0x184] sm:$0xf] }
 0x171   :  { %2147 = vmatpush.bf16.msrb.mxu2 %v7823_v56  ;;  %v10647_v56 = vld [vmem:[%s11325_s25 + $0x18c] sm:$0xf0] }
 0x172   :  { %v8243_v62 = vor.u32 %v10647_v56, %v8242_v55  ;;  %v8119_v55 = vor.u32 %v10613_v51, %v8116_v52  ;;  %v8244_v56 = vld [vmem:[%s11325_s25 + $0x190] sm:$0xf0]  ;;  %v8354_v51 = vld [vmem:[%s11325_s25 + $0x260] sm:$0xf]  ;;  %v10675_v52 = vld [vmem:[%s11325_s25 + $0x26c] sm:$0xf0] }
 0x173   :  { %2109 = vmatpush.bf16.msra.mxu3 %v7931_v4  ;;  %v10643_v4 = vld [vmem:[%s11325_s25 + $0x16c] sm:$0xf0] }
 0x174   :  { %3125 = vmatpush.bf16.msra.mxu1 %v8243_v62  ;;  %v8247_v62 = vor.u32 %v10645_v31, %v8244_v56  ;;  %v8482_v31 = vld [vmem:[%s11325_s25 + $0x360] sm:$0xf]  ;;  %v10707_v56 = vld [vmem:[%s11325_s25 + $0x36c] sm:$0xf0] }
 0x175   :  { %2148 = vmatpush.bf16.msrb.mxu2 %v7807_v3  ;;  %v8099_v3 = vor.u32 %v10611_v1, %v8098_v0  ;;  %v8546_v1 = vld [vmem:[%s11325_s25 + $0x3e0] sm:$0xf] }
 0x176   :  { %2110 = vmatmul.bf16.vlgmr.msra.gmra.mxu3 %v12029_v25  ;;  %v1968_v12 = vpop.f32.mrf.mxu0 }
 0x177   :  { %2154 = vmatpush.bf16.msrb.mxu3 %v8047_v5  ;;  %v1969_v36 = vadd.f32 %v1968_v12, %v1311_v34  ;;  %v8227_v5 = vor.u32 %v10643_v4, %v8226_v2  ;;  %v8164_v34 = vld [vmem:[%s11325_s25 + $0xf0] sm:$0xf0]  ;;  %v10723_v2 = vld [vmem:[%s11325_s25 + $0x3ec] sm:$0xf0]  ;;  %v10609_v4 = vld [vmem:[%s11325_s25 + $0x64] sm:$0xf] }
 0x178   :  { %2149 = vmatmul.bf16.vlgmr.msrb.gmra.mxu2 %v11990_v22  ;;  %v7983_v22 = vor.u32 %v10578_v16, %v7980_v17  ;;  %v8194_v16 = vld [vmem:[%s11325_s25 + $0x120] sm:$0xf] }
 0x179   :  { %3126 = vmatpush.bf16.msra.mxu1 %v8227_v5  ;;  %v8100_v5 = vld [vmem:[%s11325_s25 + $0x70] sm:$0xf0] }
 0x17a   :  { %v8103_v7 = vor.u32 %v10609_v4, %v8100_v5 }
 0x17b   :  { %2155 = vmatpush.bf16.msrb.mxu3 %v8031_v8  ;;  %v8210_v8 = vld [vmem:[%s11325_s25 + $0x140] sm:$0xf] }
 0x17e   :  { %v1970_v18 = vpop.f32.mrf.mxu0 }
 0x17f   :  { %2156 = vmatpush.bf16.msrb.mxu3 %v8015_v11  ;;  %v8211_v11 = vor.u32 %v10639_v10, %v8210_v8  ;;  %v8228_v8 = vld [vmem:[%s11325_s25 + $0x170] sm:$0xf0]  ;;  %v8402_v10 = vld [vmem:[%s11325_s25 + $0x2c0] sm:$0xf] }
 0x181   :  { %3127 = vmatpush.bf16.msra.mxu1 %v8211_v11 }
 0x183   :  { %2157 = vmatpush.bf16.msrb.mxu3 %v7999_v15  ;;  %v10603_v15 = vld [vmem:[%s11325_s25 + $0x2c] sm:$0xf0] }
 0x184   :  { %v8067_v17 = vor.u32 %v10603_v15, %v8066_v14  ;;  %v10719_v14 = vld [vmem:[%s11325_s25 + $0x3cc] sm:$0xf0] }
 0x186   :  { %v12077_v28 = vpop.f32.mrf.mxu0 }
 0x187   :  { %2158 = vmatpush.bf16.msrb.mxu3 %v7983_v22  ;;  %v10635_v22 = vld [vmem:[%s11325_s25 + $0x12c] sm:$0xf0] }
 0x188   :  { %v8195_v18 = vor.u32 %v10635_v22, %v8194_v16  ;;  %v8084_v22 = vld [vmem:[%s11325_s25 + $0x50] sm:$0xf0] }
 0x18a   :  { %3128 = vmatpush.bf16.msra.mxu1 %v8195_v18  ;;  %v10637_v18 = vld [vmem:[%s11325_s25 + $0x144] sm:$0xf] }
 0x18b   :  { %2159 = vmatpush.bf16.msrb.mxu3 %v7967_v21  ;;  %v8178_v21 = vld [vmem:[%s11325_s25 + $0x100] sm:$0xf] }
 0x18e   :  { %v2022_v35 = vpop.f32.mrf.mxu0 }
 0x18f   :  { %2160 = vmatpush.bf16.msrb.mxu3 %v7951_v27  ;;  %v10631_v27 = vld [vmem:[%s11325_s25 + $0x10c] sm:$0xf0]  ;;  %v10657_v35 = vld [vmem:[%s11325_s25 + $0x1e4] sm:$0xf] }
 0x190   :  { %v8179_v30 = vor.u32 %v10631_v27, %v8178_v21  ;;  %v8295_v39 = vor.u32 %v10657_v35, %v8292_v38  ;;  %v8215_v21 = vor.u32 %v10637_v18, %v8212_v20  ;;  %v8514_v27 = vld [vmem:[%s11325_s25 + $0x3a0] sm:$0xf]  ;;  %v10633_v38 = vld [vmem:[%s11325_s25 + $0x124] sm:$0xf]  ;;  %v10695_v20 = vld [vmem:[%s11325_s25 + $0x30c] sm:$0xf0] }
 0x192   :  { %3129 = vmatpush.bf16.msra.mxu1 %v8179_v30  ;;  %v10715_v30 = vld [vmem:[%s11325_s25 + $0x3ac] sm:$0xf0] }
 0x193   :  { %2161 = vmatpush.bf16.msrb.mxu3 %v7935_v32  ;;  %v10625_v32 = vld [vmem:[%s11325_s25 + $0xe4] sm:$0xf]  ;;  %v8515_v35 = vor.u32 %v10715_v30, %v8514_v27 }
 0x194   :  { %v1981_v37 = vpop.f32.mrf.mxu1 }
 0x195   :  { %v12086_v57 = vadd.f32 %v1981_v37, %v1969_v36  ;;  %v8167_v37 = vor.u32 %v10625_v32, %v8164_v34  ;;  %v10601_v32 = vld [vmem:[%s11325_s25 + $0x24] sm:$0xf]  ;;  %v8068_v34 = vld [vmem:[%s11325_s25 + $0x30] sm:$0xf0] }
 0x196   :  { %2162 = vmatmul.bf16.vlgmr.msrb.gmra.mxu3 %v12029_v25  ;;  %v8147_v25 = vor.u32 %v10623_v42, %v8146_v53  ;;  %3174 = vmatpush.bf16.msrb.mxu1 %v8295_v39  ;;  %v10653_v53 = vld [vmem:[%s11325_s25 + $0x1c4] sm:$0xf]  ;;  %v8151_v42 = vor.u32 %v10621_v41, %v8148_v59  ;;  %v8196_v39 = vld [vmem:[%s11325_s25 + $0x130] sm:$0xf0]  ;;  %v8370_v59 = vld [vmem:[%s11325_s25 + $0x280] sm:$0xf] }
 0x197   :  { %v8199_v41 = vor.u32 %v10633_v38, %v8196_v39  ;;  %v2170_v39 = vld.sshfl [vmem:[#allocation1] sm:$0xff pattern:$0x73625140] }
 0x198   :  { %3110 = vmatpush.bf16.msra.mxu0 %v8147_v25  ;;  %v8279_v25 = vor.u32 %v10653_v53, %v8276_v43  ;;  %v10679_v53 = vld [vmem:[%s11325_s25 + $0x28c] sm:$0xf0] }
 0x199   :  { %v8371_v43 = vor.u32 %v10679_v53, %v8370_v59  ;;  %v8532_v53 = vld [vmem:[%s11325_s25 + $0x3d0] sm:$0xf0] }
 0x19a   :  { %3175 = vmatpush.bf16.msrb.mxu1 %v8279_v25  ;;  %v10711_v25 = vld [vmem:[%s11325_s25 + $0x38c] sm:$0xf0] }
 0x19c   :  { %v1983_v23 = vpop.f32.mrf.mxu1  ;;  %3111 = vmatpush.bf16.msra.mxu0 %v8131_v49 }
 0x19d   :  { %v10649_v23 = vld [vmem:[%s11325_s25 + $0x1a4] sm:$0xf] }
 0x19e   :  { %v8263_v48 = vor.u32 %v10649_v23, %v8260_v47  ;;  %v10629_v47 = vld [vmem:[%s11325_s25 + $0x104] sm:$0xf] }
 0x1a0   :  { %3112 = vmatpush.bf16.msra.mxu0 %v8115_v60  ;;  %3176 = vmatpush.bf16.msrb.mxu1 %v8263_v48  ;;  %v8418_v60 = vld [vmem:[%s11325_s25 + $0x2e0] sm:$0xf]  ;;  %v8180_v48 = vld [vmem:[%s11325_s25 + $0x110] sm:$0xf0] }
 0x1a4   :  { %v2072_v44 = vpop.f32.mrf.mxu0  ;;  %v12104_v63 = vpop.f32.mrf.mxu1  ;;  %3113 = vmatpush.bf16.msra.mxu0 %v8099_v3  ;;  %v8547_v3 = vor.u32 %v10723_v2, %v8546_v1  ;;  %3177 = vmatpush.bf16.msrb.mxu1 %v8247_v62  ;;  %v8338_v62 = vld [vmem:[%s11325_s25 + $0x240] sm:$0xf]  ;;  %v10671_v1 = vld [vmem:[%s11325_s25 + $0x24c] sm:$0xf0] }
 0x1a5   :  { %v2073_v24 = vadd.f32 %v2072_v44, %v1313_v13  ;;  %v10617_v44 = vld [vmem:[%s11325_s25 + $0xa4] sm:$0xf]  ;;  %v8530_v13 = vld [vmem:[%s11325_s25 + $0x3c0] sm:$0xf]  ;;  %v8339_v5 = vor.u32 %v10671_v1, %v8338_v62  ;;  %v8298_v62 = vld [vmem:[%s11325_s25 + $0x1e8] sm:$0xf] }
 0x1a6   :  { %v8135_v46 = vor.u32 %v10617_v44, %v8132_v45  ;;  %3148 = vmatpush.bf16.msra.mxu3 %v8547_v3  ;;  %v8531_v16 = vor.u32 %v10719_v14, %v8530_v13  ;;  %v8052_v44 = vld [vmem:[%s11325_s25 + $0x10] sm:$0xf0]  ;;  %v8466_v2 = vld [vmem:[%s11325_s25 + $0x340] sm:$0xf]  ;;  %v10703_v3 = vld [vmem:[%s11325_s25 + $0x34c] sm:$0xf0] }
 0x1a7   :  { %v1312_v13 = vperm.slane %v12082_v33, 1  ;;  %v10660_v1 = vld [vmem:[%s11325_s25 + $0x1f4] sm:$0xf0] }
 0x1a8   :  { %3114 = vmatpush.bf16.msra.mxu0 %v8083_v9  ;;  %v8231_v9 = vor.u32 %v10641_v6, %v8228_v8  ;;  %v8467_v6 = vor.u32 %v10703_v3, %v8466_v2  ;;  %v10667_v8 = vld [vmem:[%s11325_s25 + $0x22c] sm:$0xf0]  ;;  %v8500_v3 = vld [vmem:[%s11325_s25 + $0x390] sm:$0xf0] }
 0x1aa   :  { %3178 = vmatpush.bf16.msrb.mxu1 %v8231_v9  ;;  %3149 = vmatpush.bf16.msra.mxu3 %v8531_v16  ;;  %v8306_v16 = vld [vmem:[%s11325_s25 + $0x200] sm:$0xf] }
 0x1ac   :  { %v2074_v61 = vpop.f32.mrf.mxu0  ;;  %v2035_v12 = vpop.f32.mrf.mxu1  ;;  %3115 = vmatpush.bf16.msra.mxu0 %v8067_v17  ;;  %v10605_v17 = vld [vmem:[%s11325_s25 + $0x44] sm:$0xf] }
 0x1ad   :  { %v10691_v61 = vld [vmem:[%s11325_s25 + $0x2ec] sm:$0xf0]  ;;  %v8087_v19 = vor.u32 %v10605_v17, %v8084_v22  ;;  %v8434_v22 = vld [vmem:[%s11325_s25 + $0x300] sm:$0xf] }
 0x1ae   :  { %v8419_v0 = vor.u32 %v10691_v61, %v8418_v60  ;;  %v10687_v12 = vld [vmem:[%s11325_s25 + $0x2cc] sm:$0xf0]  ;;  %3179 = vmatpush.bf16.msrb.mxu1 %v8215_v21  ;;  %3150 = vmatpush.bf16.msra.mxu3 %v8515_v35  ;;  %v8483_v60 = vor.u32 %v10707_v56, %v8482_v31  ;;  %v10689_v21 = vld [vmem:[%s11325_s25 + $0x2e4] sm:$0xf]  ;;  %v10628_v31 = vld [vmem:[%s11325_s25 + $0xf4] sm:$0xf0] }
 0x1af   :  { %v8403_v15 = vor.u32 %v10687_v12, %v8402_v10  ;;  %v8450_v10 = vld [vmem:[%s11325_s25 + $0x320] sm:$0xf]  ;;  %v10699_v12 = vld [vmem:[%s11325_s25 + $0x32c] sm:$0xf0]  ;;  %v8372_v56 = vld [vmem:[%s11325_s25 + $0x290] sm:$0xf0] }
 0x1b0   :  { %3116 = vmatpush.bf16.msra.mxu0 %v8051_v26  ;;  %3135 = vmatpush.bf16.msra.mxu2 %v8419_v0  ;;  %v10683_v26 = vld [vmem:[%s11325_s25 + $0x2ac] sm:$0xf0]  ;;  %v8451_v14 = vor.u32 %v10699_v12, %v8450_v10  ;;  %v8299_v12 = vor.u32 %v10660_v1, %v8298_v62  ;;  %v8436_v1 = vld [vmem:[%s11325_s25 + $0x310] sm:$0xf0] }
 0x1b1   :  { %v10663_v17 = vld [vmem:[%s11325_s25 + $0x20c] sm:$0xf0] }
 0x1b2   :  { %3180 = vmatpush.bf16.msrb.mxu1 %v8199_v41  ;;  %v8404_v41 = vld [vmem:[%s11325_s25 + $0x2d0] sm:$0xf0] }
 0x1b4   :  { %v2085_v29 = vpop.f32.mrf.mxu1  ;;  %3161 = vmatpush.bf16.msrb.mxu0 %v8167_v37  ;;  %3136 = vmatpush.bf16.msra.mxu2 %v8403_v15  ;;  %v8071_v37 = vor.u32 %v10601_v32, %v8068_v34  ;;  %v10721_v32 = vld [vmem:[%s11325_s25 + $0x3e4] sm:$0xf]  ;;  %v8548_v34 = vld [vmem:[%s11325_s25 + $0x3f0] sm:$0xf0] }
 0x1b5   :  { %v12126_v36 = vadd.f32 %v2085_v29, %v2073_v24  ;;  %v8386_v24 = vld [vmem:[%s11325_s25 + $0x2a0] sm:$0xf]  ;;  %v8551_v35 = vor.u32 %v10721_v32, %v8548_v34  ;;  %v10652_v32 = vld [vmem:[%s11325_s25 + $0x1b4] sm:$0xf0]  ;;  %v10669_v34 = vld [vmem:[%s11325_s25 + $0x244] sm:$0xf] }
 0x1b6   :  { %v8387_v29 = vor.u32 %v10683_v26, %v8386_v24  ;;  %v8420_v24 = vld [vmem:[%s11325_s25 + $0x2f0] sm:$0xf0]  ;;  %v2021_v26 = vadd.f32 %v12077_v28, %v1312_v13  ;;  %v10685_v28 = vld [vmem:[%s11325_s25 + $0x2c4] sm:$0xf] }
 0x1b7   :  { %v8423_v30 = vor.u32 %v10689_v21, %v8420_v24  ;;  %v8407_v59 = vor.u32 %v10685_v28, %v8404_v41  ;;  %v10673_v13 = vld [vmem:[%s11325_s25 + $0x264] sm:$0xf]  ;;  %v8138_v24 = vld [vmem:[%s11325_s25 + $0xa8] sm:$0xf] }
 0x1b8   :  { %3162 = vmatpush.bf16.msrb.mxu0 %v8151_v42  ;;  %v8498_v42 = vld [vmem:[%s11325_s25 + $0x380] sm:$0xf]  ;;  %3137 = vmatpush.bf16.msra.mxu2 %v8387_v29  ;;  %v8435_v29 = vor.u32 %v10695_v20, %v8434_v22  ;;  %v8282_v22 = vld [vmem:[%s11325_s25 + $0x1c8] sm:$0xf]  ;;  %v8484_v20 = vld [vmem:[%s11325_s25 + $0x370] sm:$0xf0] }
 0x1b9   :  { %v8499_v23 = vor.u32 %v10711_v25, %v8498_v42 }
 0x1ba   :  { %v12131_v40 = vpop.f32.mrf.mxu2 }
 0x1bb   :  { %3151 = vmatpush.bf16.msra.mxu3 %v8499_v23  ;;  %v1995_v27 = vadd.f32 %v12131_v40, %v12086_v57  ;;  %v10717_v57 = vld [vmem:[%s11325_s25 + $0x3c4] sm:$0xf] }
 0x1bc   :  { %v2087_v58 = vpop.f32.mrf.mxu1  ;;  %3163 = vmatpush.bf16.msrb.mxu0 %v8135_v46  ;;  %3138 = vmatpush.bf16.msra.mxu2 %v8371_v43  ;;  %v8535_v43 = vor.u32 %v10717_v57, %v8532_v53  ;;  %v10713_v23 = vld [vmem:[%s11325_s25 + $0x3a4] sm:$0xf] }
 0x1bd   :  { %v10597_v58 = vld [vmem:[%s11325_s25 + $0x4] sm:$0xf] }
 0x1be   :  { %v8055_v46 = vor.u32 %v10597_v58, %v8052_v44  ;;  %v10681_v44 = vld [vmem:[%s11325_s25 + $0x2a4] sm:$0xf] }
 0x1bf   :  { %3152 = vmatpush.bf16.msra.mxu3 %v8483_v60  ;;  %v10709_v60 = vld [vmem:[%s11325_s25 + $0x384] sm:$0xf] }
 0x1c0   :  { %3164 = vmatpush.bf16.msrb.mxu0 %v8119_v55  ;;  %v8355_v55 = vor.u32 %v10675_v52, %v8354_v51  ;;  %v8170_v52 = vld [vmem:[%s11325_s25 + $0xe8] sm:$0xf] }
 0x1c1   :  { %v8171_v10 = vor.u32 %v10628_v31, %v8170_v52  ;;  %v8308_v52 = vld [vmem:[%s11325_s25 + $0x210] sm:$0xf0]  ;;  %v10693_v31 = vld [vmem:[%s11325_s25 + $0x304] sm:$0xf] }
 0x1c2   :  { %v1996_v50 = vpop.f32.mrf.mxu2  ;;  %3139 = vmatpush.bf16.msra.mxu2 %v8355_v55  ;;  %v10677_v55 = vld [vmem:[%s11325_s25 + $0x284] sm:$0xf] }
 0x1c3   :  { %v8183_v50 = vor.u32 %v10629_v47, %v8180_v48  ;;  %3153 = vmatpush.bf16.msra.mxu3 %v8467_v6  ;;  %v8516_v47 = vld [vmem:[%s11325_s25 + $0x3b0] sm:$0xf0]  ;;  %v8375_v2 = vor.u32 %v10677_v55, %v8372_v56  ;;  %v8234_v56 = vld [vmem:[%s11325_s25 + $0x168] sm:$0xf] }
 0x1c4   :  { %v12129_v54 = vpop.f32.mrf.mxu0  ;;  %3165 = vmatpush.bf16.msrb.mxu0 %v8103_v7  ;;  %v8322_v7 = vld [vmem:[%s11325_s25 + $0x220] sm:$0xf]  ;;  %v8519_v48 = vor.u32 %v10713_v23, %v8516_v47  ;;  %v8452_v23 = vld [vmem:[%s11325_s25 + $0x330] sm:$0xf0]  ;;  %v10612_v47 = vld [vmem:[%s11325_s25 + $0x74] sm:$0xf0] }
 0x1c5   :  { %3181 = vmatpush.bf16.msrb.mxu1 %v8183_v50  ;;  %v8323_v9 = vor.u32 %v10667_v8, %v8322_v7  ;;  %v8154_v8 = vld [vmem:[%s11325_s25 + $0xc8] sm:$0xf] }
 0x1c6   :  { %3140 = vmatpush.bf16.msra.mxu2 %v8339_v5  ;;  %v8503_v5 = vor.u32 %v10709_v60, %v8500_v3  ;;  %v10644_v60 = vld [vmem:[%s11325_s25 + $0x174] sm:$0xf0]  ;;  %v8439_v3 = vor.u32 %v10693_v31, %v8436_v1  ;;  %v8252_v31 = vld [vmem:[%s11325_s25 + $0x198] sm:$0xf0]  ;;  %v8426_v1 = vld [vmem:[%s11325_s25 + $0x2e8] sm:$0xf] }
 0x1c7   :  { %3154 = vmatpush.bf16.msra.mxu3 %v8451_v14  ;;  %v8356_v14 = vld [vmem:[%s11325_s25 + $0x270] sm:$0xf0] }
 0x1c8   :  { %3166 = vmatpush.bf16.msrb.mxu0 %v8087_v19  ;;  %v8307_v19 = vor.u32 %v10663_v17, %v8306_v16 }
 0x1ca   :  { %v12154_v11 = vpop.f32.mrf.mxu2  ;;  %3141 = vmatpush.bf16.msra.mxu2 %v8323_v9  ;;  %v10624_v9 = vld [vmem:[%s11325_s25 + $0xd4] sm:$0xf0] }
 0x1cb   :  { %3155 = vmatpush.bf16.msra.mxu3 %v8435_v29 }
 0x1cc   :  { %v2126_v49 = vpop.f32.mrf.mxu0  ;;  %3167 = vmatpush.bf16.msrb.mxu0 %v8071_v37  ;;  %v2034_v37 = vadd.f32 %v12104_v63, %v2021_v26  ;;  %v2171_v63 = vld.sshfl [vmem:[#allocation1 + $0x8] sm:$0xff pattern:$0x73625140]  ;;  %v10620_v26 = vld [vmem:[%s11325_s25 + $0xb4] sm:$0xf0] }
 0x1cd   :  { %v8139_v53 = vor.u32 %v10620_v26, %v8138_v24  ;;  %v10600_v24 = vld [vmem:[%s11325_s25 + $0x14] sm:$0xf0]  ;;  %v8186_v26 = vld [vmem:[%s11325_s25 + $0x108] sm:$0xf] }
 0x1ce   :  { %3142 = vmatpush.bf16.msra.mxu2 %v8307_v19  ;;  %v2047_v40 = vadd.f32 %v12154_v11, %v2034_v37  ;;  %v8359_v19 = vor.u32 %v10673_v13, %v8356_v14  ;;  %v8340_v37 = vld [vmem:[%s11325_s25 + $0x250] sm:$0xf0]  ;;  %v8074_v13 = vld [vmem:[%s11325_s25 + $0x28] sm:$0xf]  ;;  %v10604_v14 = vld [vmem:[%s11325_s25 + $0x34] sm:$0xf0] }
 0x1cf   :  { %3200 = vmatpush.bf16.msrb.mxu3 %v8551_v35  ;;  %v8343_v41 = vor.u32 %v10669_v34, %v8340_v37  ;;  %v8300_v34 = vld [vmem:[%s11325_s25 + $0x1f8] sm:$0xf0] }
 0x1d0   :  { %3168 = vmatpush.bf16.msrb.mxu0 %v8055_v46 }
 0x1d2   :  { %v2048_v45 = vpop.f32.mrf.mxu2  ;;  %3187 = vmatpush.bf16.msrb.mxu2 %v8423_v30  ;;  %v8266_v30 = vld [vmem:[%s11325_s25 + $0x1a8] sm:$0xf] }
 0x1d3   :  { %3201 = vmatpush.bf16.msrb.mxu3 %v8535_v43  ;;  %v8388_v45 = vld [vmem:[%s11325_s25 + $0x2b0] sm:$0xf0] }
 0x1d4   :  { %v12179_v49 = vpop.f32.mrf.mxu1  ;;  %v8391_v46 = vor.u32 %v10681_v44, %v8388_v45  ;;  %v8324_v43 = vld [vmem:[%s11325_s25 + $0x230] sm:$0xf0]  ;;  %v10648_v44 = vld [vmem:[%s11325_s25 + $0x194] sm:$0xf0] }
 0x1d6   :  { %3188 = vmatpush.bf16.msrb.mxu2 %v8407_v59  ;;  %v10616_v59 = vld [vmem:[%s11325_s25 + $0x94] sm:$0xf0] }
 0x1d7   :  { %3202 = vmatpush.bf16.msrb.mxu3 %v8519_v48 }
 0x1d9   :  { %v2007_v61 = vpop.f32.mrf.mxu3 }
 0x1da   :  { %v2008_v38 = vadd.f32 %v2007_v61, %v1995_v27  ;;  %3189 = vmatpush.bf16.msrb.mxu2 %v8391_v46  ;;  %v8155_v27 = vor.u32 %v10624_v9, %v8154_v8  ;;  %v8106_v46 = vld [vmem:[%s11325_s25 + $0x68] sm:$0xf]  ;;  %v10640_v9 = vld [vmem:[%s11325_s25 + $0x154] sm:$0xf0] }
 0x1db   :  { %v12186_v0 = vpop.f32.mrf.mxu2  ;;  %3203 = vmatpush.bf16.msrb.mxu3 %v8503_v5  ;;  %v8235_v5 = vor.u32 %v10644_v60, %v8234_v56  ;;  %v8218_v8 = vld [vmem:[%s11325_s25 + $0x148] sm:$0xf] }
 0x1dc   :  { %v2139_v4 = vpop.f32.mrf.mxu1  ;;  %v2178_v25 = vadd.f32 %v2170_v39, %v2008_v38  ;;  %v10701_v38 = vld [vmem:[%s11325_s25 + $0x344] sm:$0xf]  ;;  %v8468_v39 = vld [vmem:[%s11325_s25 + $0x350] sm:$0xf0] }
 0x1dd   :  { %v8471_v57 = vor.u32 %v10701_v38, %v8468_v39 }
 0x1de   :  { %v2182_v50 = vmax.f32 %v2178_v25, 0.0  ;;  %3190 = vmatpush.bf16.msrb.mxu2 %v8375_v2  ;;  %v10697_v25 = vld [vmem:[%s11325_s25 + $0x324] sm:$0xf] }
 0x1e1   :  { %v2009_v15 = vpop.f32.mrf.mxu3 }
 0x1e2   :  { %v10705_v15 = vld [vmem:[%s11325_s25 + $0x364] sm:$0xf]  ;;  %3191 = vmatpush.bf16.msrb.mxu2 %v8359_v19  ;;  %v8075_v19 = vor.u32 %v10604_v14, %v8074_v13 }
 0x1e3   :  { %v2100_v18 = vpop.f32.mrf.mxu2  ;;  %v8487_v21 = vor.u32 %v10705_v15, %v8484_v20  ;;  %v8202_v15 = vld [vmem:[%s11325_s25 + $0x128] sm:$0xf] }
 0x1e4   :  { %v10656_v18 = vld [vmem:[%s11325_s25 + $0x1d4] sm:$0xf0] }
 0x1e5   :  { %v8283_v29 = vor.u32 %v10656_v18, %v8282_v22  ;;  %3204 = vmatpush.bf16.msrb.mxu3 %v8487_v21  ;;  %v10636_v22 = vld [vmem:[%s11325_s25 + $0x134] sm:$0xf0]  ;;  %v1314_v18 = vperm.slane %v12082_v33, 3  ;;  %v8058_v21 = vld [vmem:[%s11325_s25 + $0x8] sm:$0xf] }
 0x1e6   :  { %3192 = vmatpush.bf16.msrb.mxu2 %v8343_v41  ;;  %v8203_v20 = vor.u32 %v10636_v22, %v8202_v15  ;;  %v8059_v37 = vor.u32 %v10600_v24, %v8058_v21  ;;  %v10622_v41 = vld [vmem:[%s11325_s25 + $0xcc] sm:$0xf]  ;;  %v8410_v22 = vld [vmem:[%s11325_s25 + $0x2c8] sm:$0xf] }
 0x1e9   :  { %v2059_v42 = vpop.f32.mrf.mxu3  ;;  %3205 = vmatpush.bf16.msrb.mxu3 %v8471_v57  ;;  %v2125_v57 = vadd.f32 %v12129_v54, %v1314_v18  ;;  %v10688_v18 = vld [vmem:[%s11325_s25 + $0x2d4] sm:$0xf0] }
 0x1ea   :  { %v2060_v58 = vadd.f32 %v2059_v42, %v2047_v40  ;;  %v8122_v40 = vld [vmem:[%s11325_s25 + $0x88] sm:$0xf]  ;;  %v8267_v42 = vor.u32 %v10652_v32, %v8266_v30  ;;  %v8172_v30 = vld [vmem:[%s11325_s25 + $0xf8] sm:$0xf0]  ;;  %v10658_v32 = vld [vmem:[%s11325_s25 + $0x1ec] sm:$0xf] }
 0x1eb   :  { %v8123_v48 = vor.u32 %v10616_v59, %v8122_v40  ;;  %v8303_v39 = vor.u32 %v10658_v32, %v8300_v34  ;;  %v2099_v40 = vadd.f32 %v12186_v0, %v12126_v36  ;;  %v8156_v59 = vld [vmem:[%s11325_s25 + $0xd8] sm:$0xf0]  ;;  %v10638_v32 = vld [vmem:[%s11325_s25 + $0x14c] sm:$0xf] }
 0x1ec   :  { %v2179_v11 = vadd.f32 %v2171_v63, %v2060_v58  ;;  %v10665_v63 = vld [vmem:[%s11325_s25 + $0x224] sm:$0xf]  ;;  %v8250_v58 = vld [vmem:[%s11325_s25 + $0x188] sm:$0xf]  ;;  %v8140_v0 = vld [vmem:[%s11325_s25 + $0xb8] sm:$0xf0] }
 0x1ed   :  { %v8327_v45 = vor.u32 %v10665_v63, %v8324_v43  ;;  %v2138_v63 = vadd.f32 %v12179_v49, %v2125_v57  ;;  %v8220_v34 = vld [vmem:[%s11325_s25 + $0x158] sm:$0xf0] }
 0x1ee   :  { %v2183_v51 = vmax.f32 %v2179_v11, 0.0  ;;  %v8455_v11 = vor.u32 %v10697_v25, %v8452_v23  ;;  %v2172_v25 = vld.sshfl [vmem:[#allocation1 + $0x10] sm:$0xff pattern:$0x73625140]  ;;  %v8268_v23 = vld [vmem:[%s11325_s25 + $0x1b8] sm:$0xf0]  ;;  %v8223_v57 = vor.u32 %v10638_v32, %v8220_v34 }
 0x1ef   :  { %3193 = vmatpush.bf16.msrb.mxu2 %v8327_v45  ;;  %v10650_v45 = vld [vmem:[%s11325_s25 + $0x1ac] sm:$0xf]  ;;  %v8412_v34 = vld [vmem:[%s11325_s25 + $0x2d8] sm:$0xf0] }
 0x1f0   :  { %v12222_v61 = vpack.c.bf16 %v2183_v51, %v2182_v50  ;;  %v8251_v50 = vor.u32 %v10648_v44, %v8250_v58  ;;  %v10661_v51 = vld [vmem:[%s11325_s25 + $0x204] sm:$0xf]  ;;  %3206 = vmatpush.bf16.msrb.mxu3 %v8455_v11  ;;  %v8159_v58 = vor.u32 %v10622_v41, %v8156_v59  ;;  %v10618_v44 = vld [vmem:[%s11325_s25 + $0xac] sm:$0xf]  ;;  %v10716_v59 = vld [vmem:[%s11325_s25 + $0x3b4] sm:$0xf0] }
 0x1f1   :  { %v2061_v4 = vpop.f32.mrf.mxu3  ;;  %v8311_v62 = vor.u32 %v10661_v51, %v8308_v52  ;;  %v2173_v11 = vld.sshfl [vmem:[#allocation1 + $0x18] sm:$0xff pattern:$0x73625140]  ;;  %v8124_v51 = vld [vmem:[%s11325_s25 + $0x98] sm:$0xf0] }
 0x1f2   :  { %v2457_v6 = vunpack.c.l.b16 %v12222_v61  ;;  %v2458_v7 = vunpack.c.h.b16 %v12222_v61  ;;  %v8107_v4 = vor.u32 %v10612_v47, %v8106_v46  ;;  %v8143_v47 = vor.u32 %v10618_v44, %v8140_v0  ;;  %v10646_v52 = vld [vmem:[%s11325_s25 + $0x18c] sm:$0xf]  ;;  %v10680_v44 = vld [vmem:[%s11325_s25 + $0x294] sm:$0xf0] }
 0x1f3   :  { %3194 = vmatpush.bf16.msrb.mxu2 %v8311_v62  ;;  %v8255_v62 = vor.u32 %v10646_v52, %v8252_v31  ;;  %v10676_v52 = vld [vmem:[%s11325_s25 + $0x274] sm:$0xf0]  ;;  %v8490_v31 = vld [vmem:[%s11325_s25 + $0x368] sm:$0xf]  ;;  %v10686_v32 = vld [vmem:[%s11325_s25 + $0x2cc] sm:$0xf] }
 0x1f4   :  { %v12234_v16 = vpack.c.b16 %v2457_v6, %v2457_v6  ;;  %v12236_v17 = vpack.c.b16 %v2458_v7, %v2458_v7  ;;  %v8090_v6 = vld [vmem:[%s11325_s25 + $0x48] sm:$0xf]  ;;  %v10608_v7 = vld [vmem:[%s11325_s25 + $0x54] sm:$0xf0]  ;;  %3207 = vmatpush.bf16.msrb.mxu3 %v8439_v3 }
 0x1f6   :  { %3117 = vmatmul.bf16.vlgmr.msra.gmra.mxu0 %v12234_v16  ;;  %3130 = vmatmul.bf16.vlgmr.msra.gmra.mxu1 %v12236_v17 }
 0x1f7   :  { %3213 = vmatpush.bf16.msra.mxu0 %v8171_v10  ;;  %3226 = vmatpush.bf16.msra.mxu1 %v8299_v12  ;;  %v8091_v10 = vor.u32 %v10608_v7, %v8090_v6  ;;  %v8219_v12 = vor.u32 %v10640_v9, %v8218_v8  ;;  %v10610_v6 = vld [vmem:[%s11325_s25 + $0x6c] sm:$0xf]  ;;  %v8108_v8 = vld [vmem:[%s11325_s25 + $0x78] sm:$0xf0] }
 0x1f8   :  { %v10642_v9 = vld [vmem:[%s11325_s25 + $0x16c] sm:$0xf]  ;;  %v8111_v21 = vor.u32 %v10610_v6, %v8108_v8  ;;  %v10668_v8 = vld [vmem:[%s11325_s25 + $0x234] sm:$0xf0] }
 0x1f9   :  { %v12253_v28 = vpop.f32.mrf.mxu3 }
 0x1fa   :  { %v2112_v43 = vadd.f32 %v12253_v28, %v2099_v40  ;;  %v8522_v40 = vld [vmem:[%s11325_s25 + $0x3a8] sm:$0xf] }
 0x1fb   :  { %v12248_v35 = vpop.f32.mrf.mxu2  ;;  %3214 = vmatpush.bf16.msra.mxu0 %v8155_v27  ;;  %3227 = vmatpush.bf16.msra.mxu1 %v8283_v29  ;;  %v10632_v27 = vld [vmem:[%s11325_s25 + $0x114] sm:$0xf0]  ;;  %v10626_v29 = vld [vmem:[%s11325_s25 + $0xec] sm:$0xf] }
 0x1fc   :  { %v8187_v33 = vor.u32 %v10632_v27, %v8186_v26  ;;  %v8175_v38 = vor.u32 %v10626_v29, %v8172_v30  ;;  %v2151_v36 = vadd.f32 %v12248_v35, %v2138_v63  ;;  %v2180_v28 = vadd.f32 %v2172_v25, %v2112_v43  ;;  %v8538_v26 = vld [vmem:[%s11325_s25 + $0x3c8] sm:$0xf]  ;;  %v10720_v27 = vld [vmem:[%s11325_s25 + $0x3d4] sm:$0xf0]  ;;  %v10606_v29 = vld [vmem:[%s11325_s25 + $0x4c] sm:$0xf] }
 0x1fd   :  { %v8271_v35 = vor.u32 %v10650_v45, %v8268_v23  ;;  %v8092_v30 = vld [vmem:[%s11325_s25 + $0x58] sm:$0xf0]  ;;  %v10634_v63 = vld [vmem:[%s11325_s25 + $0x12c] sm:$0xf]  ;;  %v8506_v45 = vld [vmem:[%s11325_s25 + $0x388] sm:$0xf] }
 0x1fe   :  { %v8095_v41 = vor.u32 %v10606_v29, %v8092_v30  ;;  %v8204_v43 = vld [vmem:[%s11325_s25 + $0x138] sm:$0xf0]  ;;  %v10712_v23 = vld [vmem:[%s11325_s25 + $0x394] sm:$0xf0] }
 0x1ff   :  { %3215 = vmatpush.bf16.msra.mxu0 %v8139_v53  ;;  %3228 = vmatpush.bf16.msra.mxu1 %v8267_v42  ;;  %v10654_v53 = vld [vmem:[%s11325_s25 + $0x1cc] sm:$0xf]  ;;  %v8284_v42 = vld [vmem:[%s11325_s25 + $0x1d8] sm:$0xf0]  ;;  %v8207_v0 = vor.u32 %v10634_v63, %v8204_v43 }
 0x200   :  { %v8287_v54 = vor.u32 %v10654_v53, %v8284_v42  ;;  %v10602_v53 = vld [vmem:[%s11325_s25 + $0x2c] sm:$0xf]  ;;  %v8076_v42 = vld [vmem:[%s11325_s25 + $0x38] sm:$0xf0] }
 0x201   :  { %v2113_v2 = vpop.f32.mrf.mxu3  ;;  %v10678_v63 = vld [vmem:[%s11325_s25 + $0x28c] sm:$0xf]  ;;  %v8380_v43 = vld [vmem:[%s11325_s25 + $0x298] sm:$0xf0] }
 0x202   :  { %v10692_v2 = vld [vmem:[%s11325_s25 + $0x2f4] sm:$0xf0] }
 0x203   :  { %v2152_v55 = vpop.f32.mrf.mxu2  ;;  %3216 = vmatpush.bf16.msra.mxu0 %v8123_v48  ;;  %3229 = vmatpush.bf16.msra.mxu1 %v8251_v50  ;;  %v10614_v48 = vld [vmem:[%s11325_s25 + $0x8c] sm:$0xf]  ;;  %v8427_v14 = vor.u32 %v10692_v2, %v8426_v1  ;;  %v10672_v1 = vld [vmem:[%s11325_s25 + $0x254] sm:$0xf0]  ;;  %v8474_v2 = vld [vmem:[%s11325_s25 + $0x348] sm:$0xf] }
 0x204   :  { %v2184_v55 = vmax.f32 %v2180_v28, 0.0  ;;  %v8127_v60 = vor.u32 %v10614_v48, %v8124_v51  ;;  %v10630_v28 = vld [vmem:[%s11325_s25 + $0x10c] sm:$0xf]  ;;  %v8362_v48 = vld [vmem:[%s11325_s25 + $0x268] sm:$0xf] }
 0x206   :  { %3169 = vmatmul.bf16.vlgmr.msrb.gmra.mxu0 %v12234_v16  ;;  %3182 = vmatmul.bf16.vlgmr.msrb.gmra.mxu1 %v12236_v17 }
 0x207   :  { %3217 = vmatpush.bf16.msra.mxu0 %v8107_v4  ;;  %3230 = vmatpush.bf16.msra.mxu1 %v8235_v5  ;;  %v8554_v4 = vld [vmem:[%s11325_s25 + $0x3e8] sm:$0xf]  ;;  %v10724_v5 = vld [vmem:[%s11325_s25 + $0x3f4] sm:$0xf0] }
 0x208   :  { %v8555_v15 = vor.u32 %v10724_v5, %v8554_v4  ;;  %v10704_v4 = vld [vmem:[%s11325_s25 + $0x354] sm:$0xf0] }
 0x209   :  { %v8475_v6 = vor.u32 %v10704_v4, %v8474_v2  ;;  %v10662_v2 = vld [vmem:[%s11325_s25 + $0x20c] sm:$0xf]  ;;  %v8316_v4 = vld [vmem:[%s11325_s25 + $0x218] sm:$0xf0] }
 0x20b   :  { %3218 = vmatpush.bf16.msra.mxu0 %v8091_v10  ;;  %3231 = vmatpush.bf16.msra.mxu1 %v8219_v12  ;;  %v8236_v10 = vld [vmem:[%s11325_s25 + $0x178] sm:$0xf0] }
 0x20c   :  { %v8239_v24 = vor.u32 %v10642_v9, %v8236_v10  ;;  %v8458_v9 = vld [vmem:[%s11325_s25 + $0x328] sm:$0xf]  ;;  %v10700_v10 = vld [vmem:[%s11325_s25 + $0x334] sm:$0xf0] }
 0x20f   :  { %3219 = vmatpush.bf16.msra.mxu0 %v8075_v19  ;;  %3232 = vmatpush.bf16.msra.mxu1 %v8203_v20 }
 0x213   :  { %3220 = vmatpush.bf16.msra.mxu0 %v8059_v37  ;;  %3233 = vmatpush.bf16.msra.mxu1 %v8187_v33  ;;  %v8411_v37 = vor.u32 %v10688_v18, %v8410_v22  ;;  %v8539_v33 = vor.u32 %v10720_v27, %v8538_v26  ;;  %v8442_v22 = vld [vmem:[%s11325_s25 + $0x308] sm:$0xf]  ;;  %v10696_v18 = vld [vmem:[%s11325_s25 + $0x314] sm:$0xf0]  ;;  %v8556_v26 = vld [vmem:[%s11325_s25 + $0x3f8] sm:$0xf0] }
 0x214   :  { %v8443_v27 = vor.u32 %v10696_v18, %v8442_v22  ;;  %v8626_v18 = vld [vmem:[%s11335_s3 + $0x80] sm:$0xf] }
 0x216   :  { %3221 = vmatmul.bf16.vlgmr.msra.gmra.mxu0 %v12234_v16  ;;  %3234 = vmatmul.bf16.vlgmr.msra.gmra.mxu1 %v12236_v17 }
 0x217   :  { %3265 = vmatpush.bf16.msrb.mxu0 %v8175_v38  ;;  %3278 = vmatpush.bf16.msrb.mxu1 %v8303_v39  ;;  %v8394_v38 = vld [vmem:[%s11325_s25 + $0x2a8] sm:$0xf]  ;;  %v10684_v39 = vld [vmem:[%s11325_s25 + $0x2b4] sm:$0xf0] }
 0x218   :  { %v8395_v25 = vor.u32 %v10684_v39, %v8394_v38  ;;  %v8415_v38 = vor.u32 %v10686_v32, %v8412_v34  ;;  %v8594_v32 = vld [vmem:[%s11335_s3 + $0x40] sm:$0xf]  ;;  %v10735_v34 = vld [vmem:[%s11335_s3 + $0x4c] sm:$0xf0] }
 0x219   :  { %v2163_v49 = vpop.f32.mrf.mxu3 }
 0x21a   :  { %v2164_v46 = vadd.f32 %v2163_v49, %v2151_v36  ;;  %v8079_v36 = vor.u32 %v10602_v53, %v8076_v42  ;;  %v10598_v49 = vld [vmem:[%s11325_s25 + $0xc] sm:$0xf] }
 0x21b   :  { %3266 = vmatpush.bf16.msrb.mxu0 %v8159_v58  ;;  %3279 = vmatpush.bf16.msrb.mxu1 %v8287_v54  ;;  %v8523_v58 = vor.u32 %v10716_v59, %v8522_v40  ;;  %v8378_v54 = vld [vmem:[%s11325_s25 + $0x288] sm:$0xf]  ;;  %v10714_v40 = vld [vmem:[%s11325_s25 + $0x3ac] sm:$0xf]  ;;  %v8524_v59 = vld [vmem:[%s11325_s25 + $0x3b8] sm:$0xf0] }
 0x21c   :  { %v2181_v50 = vadd.f32 %v2173_v11, %v2164_v46  ;;  %v8060_v11 = vld [vmem:[%s11325_s25 + $0x18] sm:$0xf0]  ;;  %v8527_v42 = vor.u32 %v10714_v40, %v8524_v59  ;;  %v10779_v40 = vld [vmem:[%s11335_s3 + $0x1ac] sm:$0xf0]  ;;  %v8562_v59 = vld [vmem:[%s11335_s3] sm:$0xf] }
 0x21d   :  { %v8188_v46 = vld [vmem:[%s11325_s25 + $0x118] sm:$0xf0] }
 0x21e   :  { %v2185_v56 = vmax.f32 %v2181_v50, 0.0  ;;  %v8063_v50 = vor.u32 %v10598_v49, %v8060_v11  ;;  %v8191_v51 = vor.u32 %v10630_v28, %v8188_v46  ;;  %v10670_v28 = vld [vmem:[%s11325_s25 + $0x24c] sm:$0xf]  ;;  %v8348_v46 = vld [vmem:[%s11325_s25 + $0x258] sm:$0xf0] }
 0x21f   :  { %3267 = vmatpush.bf16.msrb.mxu0 %v8143_v47  ;;  %3280 = vmatpush.bf16.msrb.mxu1 %v8271_v35  ;;  %v8379_v47 = vor.u32 %v10680_v44, %v8378_v54  ;;  %v8507_v35 = vor.u32 %v10712_v23, %v8506_v45  ;;  %v8383_v54 = vor.u32 %v10678_v63, %v8380_v43  ;;  %v10706_v45 = vld [vmem:[%s11325_s25 + $0x36c] sm:$0xf]  ;;  %v8492_v23 = vld [vmem:[%s11325_s25 + $0x378] sm:$0xf0]  ;;  %v8754_v63 = vld [vmem:[%s11335_s3 + $0x180] sm:$0xf] }
 0x220   :  { %v12312_v3 = vpack.c.bf16 %v2185_v56, %v2184_v55  ;;  %v10708_v55 = vld [vmem:[%s11325_s25 + $0x374] sm:$0xf0]  ;;  %v8363_v56 = vor.u32 %v10676_v52, %v8362_v48  ;;  %v8495_v11 = vor.u32 %v10706_v45, %v8492_v23  ;;  %v8351_v48 = vor.u32 %v10670_v28, %v8348_v46  ;;  %v8332_v52 = vld [vmem:[%s11325_s25 + $0x238] sm:$0xf0]  ;;  %v10775_v43 = vld [vmem:[%s11335_s3 + $0x18c] sm:$0xf0] }
 0x221   :  { %v2165_v7 = vpop.f32.mrf.mxu3  ;;  %v8738_v23 = vld [vmem:[%s11335_s3 + $0x160] sm:$0xf]  ;;  %v10819_v46 = vld [vmem:[%s11335_s3 + $0x2ec] sm:$0xf0] }
 0x222   :  { %v2459_v12 = vunpack.c.l.b16 %v12312_v3  ;;  %v2460_v13 = vunpack.c.h.b16 %v12312_v3  ;;  %v8330_v7 = vld [vmem:[%s11325_s25 + $0x228] sm:$0xf] }
 0x223   :  { %3268 = vmatpush.bf16.msrb.mxu0 %v8127_v60  ;;  %3281 = vmatpush.bf16.msrb.mxu1 %v8255_v62  ;;  %v8491_v60 = vor.u32 %v10708_v55, %v8490_v31  ;;  %v8346_v62 = vld [vmem:[%s11325_s25 + $0x248] sm:$0xf]  ;;  %v10698_v31 = vld [vmem:[%s11325_s25 + $0x32c] sm:$0xf]  ;;  %v8460_v55 = vld [vmem:[%s11325_s25 + $0x338] sm:$0xf0] }
 0x224   :  { %v12324_v19 = vpack.c.b16 %v2459_v12, %v2459_v12  ;;  %v12326_v20 = vpack.c.b16 %v2460_v13, %v2460_v13  ;;  %v8347_v5 = vor.u32 %v10672_v1, %v8346_v62  ;;  %v8331_v12 = vor.u32 %v10668_v8, %v8330_v7  ;;  %v8444_v7 = vld [vmem:[%s11325_s25 + $0x318] sm:$0xf0]  ;;  %v8658_v8 = vld [vmem:[%s11335_s3 + $0xc0] sm:$0xf] }
 0x225   :  { %v8459_v13 = vor.u32 %v10700_v10, %v8458_v9  ;;  %v8463_v1 = vor.u32 %v10698_v31, %v8460_v55  ;;  %v10751_v9 = vld [vmem:[%s11335_s3 + $0xcc] sm:$0xf0]  ;;  %v8914_v31 = vld [vmem:[%s11335_s3 + $0x2c0] sm:$0xf] }
 0x226   :  { %3143 = vmatmul.bf16.vlgmr.msra.gmra.mxu2 %v12324_v19  ;;  %3156 = vmatmul.bf16.vlgmr.msra.gmra.mxu3 %v12326_v20  ;;  %v8659_v10 = vor.u32 %v10751_v9, %v8658_v8  ;;  %v10815_v55 = vld [vmem:[%s11335_s3 + $0x2cc] sm:$0xf0]  ;;  %v8898_v8 = vld [vmem:[%s11335_s3 + $0x2a0] sm:$0xf] }
 0x227   :  { %3239 = vmatpush.bf16.msra.mxu2 %v8427_v14  ;;  %3252 = vmatpush.bf16.msra.mxu3 %v8555_v15  ;;  %v8314_v14 = vld [vmem:[%s11325_s25 + $0x208] sm:$0xf]  ;;  %v10664_v15 = vld [vmem:[%s11325_s25 + $0x214] sm:$0xf0] }
 0x228   :  { %3269 = vmatpush.bf16.msrb.mxu0 %v8111_v21  ;;  %3282 = vmatpush.bf16.msrb.mxu1 %v8239_v24  ;;  %v10690_v21 = vld [vmem:[%s11325_s25 + $0x2ec] sm:$0xf] }
 0x229   :  { %v10722_v24 = vld [vmem:[%s11325_s25 + $0x3ec] sm:$0xf] }
 0x22a   :  { %v8559_v30 = vor.u32 %v10722_v24, %v8556_v26  ;;  %v8610_v24 = vld [vmem:[%s11335_s3 + $0x60] sm:$0xf]  ;;  %v10739_v26 = vld [vmem:[%s11335_s3 + $0x6c] sm:$0xf0] }
 0x22b   :  { %3240 = vmatpush.bf16.msra.mxu2 %v8411_v37  ;;  %3253 = vmatpush.bf16.msra.mxu3 %v8539_v33  ;;  %v10718_v37 = vld [vmem:[%s11325_s25 + $0x3cc] sm:$0xf]  ;;  %v8540_v33 = vld [vmem:[%s11325_s25 + $0x3d8] sm:$0xf0] }
 0x22c   :  { %3270 = vmatpush.bf16.msrb.mxu0 %v8095_v41  ;;  %3283 = vmatpush.bf16.msrb.mxu1 %v8223_v57  ;;  %v8543_v39 = vor.u32 %v10718_v37, %v8540_v33  ;;  %v10682_v41 = vld [vmem:[%s11325_s25 + $0x2ac] sm:$0xf]  ;;  %v8396_v57 = vld [vmem:[%s11325_s25 + $0x2b8] sm:$0xf0]  ;;  %v8786_v37 = vld [vmem:[%s11335_s3 + $0x1c0] sm:$0xf] }
 0x22d   :  { %v8399_v53 = vor.u32 %v10682_v41, %v8396_v57  ;;  %v8770_v41 = vld [vmem:[%s11335_s3 + $0x1a0] sm:$0xf] }
 0x22f   :  { %3241 = vmatpush.bf16.msra.mxu2 %v8395_v25  ;;  %3254 = vmatpush.bf16.msra.mxu3 %v8523_v58  ;;  %v10710_v25 = vld [vmem:[%s11325_s25 + $0x38c] sm:$0xf]  ;;  %v8508_v58 = vld [vmem:[%s11325_s25 + $0x398] sm:$0xf0] }
 0x230   :  { %3271 = vmatpush.bf16.msrb.mxu0 %v8079_v36  ;;  %3284 = vmatpush.bf16.msrb.mxu1 %v8207_v0  ;;  %v8511_v44 = vor.u32 %v10710_v25, %v8508_v58  ;;  %v10674_v36 = vld [vmem:[%s11325_s25 + $0x26c] sm:$0xf]  ;;  %v8364_v0 = vld [vmem:[%s11325_s25 + $0x278] sm:$0xf0]  ;;  %v10753_v25 = vld [vmem:[%s11335_s3 + $0xe4] sm:$0xf] }
 0x231   :  { %v8367_v49 = vor.u32 %v10674_v36, %v8364_v0  ;;  %v8676_v58 = vld [vmem:[%s11335_s3 + $0xf0] sm:$0xf0] }
 0x232   :  { %v8679_v36 = vor.u32 %v10753_v25, %v8676_v58  ;;  %v10729_v25 = vld [vmem:[%s11335_s3 + $0x24] sm:$0xf]  ;;  %v8580_v58 = vld [vmem:[%s11335_s3 + $0x30] sm:$0xf0] }
 0x233   :  { %3242 = vmatpush.bf16.msra.mxu2 %v8379_v47  ;;  %3255 = vmatpush.bf16.msra.mxu3 %v8507_v35  ;;  %v10702_v47 = vld [vmem:[%s11325_s25 + $0x34c] sm:$0xf]  ;;  %v8476_v35 = vld [vmem:[%s11325_s25 + $0x358] sm:$0xf0] }
 0x234   :  { %3272 = vmatpush.bf16.msrb.mxu0 %v8063_v50  ;;  %3285 = vmatpush.bf16.msrb.mxu1 %v8191_v51  ;;  %v8479_v50 = vor.u32 %v10702_v47, %v8476_v35  ;;  %v10666_v51 = vld [vmem:[%s11325_s25 + $0x22c] sm:$0xf]  ;;  %v10749_v47 = vld [vmem:[%s11335_s3 + $0xc4] sm:$0xf]  ;;  %v8660_v35 = vld [vmem:[%s11335_s3 + $0xd0] sm:$0xf0] }
 0x235   :  { %v8335_v62 = vor.u32 %v10666_v51, %v8332_v52  ;;  %v8722_v51 = vld [vmem:[%s11335_s3 + $0x140] sm:$0xf]  ;;  %v10767_v52 = vld [vmem:[%s11335_s3 + $0x14c] sm:$0xf0] }
 0x236   :  { %3195 = vmatmul.bf16.vlgmr.msrb.gmra.mxu2 %v12324_v19  ;;  %3208 = vmatmul.bf16.vlgmr.msrb.gmra.mxu3 %v12326_v20 }
 0x237   :  { %3243 = vmatpush.bf16.msra.mxu2 %v8363_v56  ;;  %3256 = vmatpush.bf16.msra.mxu3 %v8491_v60  ;;  %v8674_v56 = vld [vmem:[%s11335_s3 + $0xe0] sm:$0xf]  ;;  %v10755_v60 = vld [vmem:[%s11335_s3 + $0xec] sm:$0xf0] }
 0x238   :  { %3273 = vmatmul.bf16.vlgmr.msrb.gmra.mxu0 %v12234_v16  ;;  %3286 = vmatmul.bf16.vlgmr.msrb.gmra.mxu1 %v12236_v17  ;;  %v8428_v16 = vld [vmem:[%s11325_s25 + $0x2f8] sm:$0xf0]  ;;  %v8315_v17 = vor.u32 %v10664_v15, %v8314_v14  ;;  %v8642_v14 = vld [vmem:[%s11335_s3 + $0xa0] sm:$0xf]  ;;  %v10747_v15 = vld [vmem:[%s11335_s3 + $0xac] sm:$0xf0] }
 0x239   :  { %v8431_v29 = vor.u32 %v10690_v21, %v8428_v16  ;;  %v8643_v22 = vor.u32 %v10747_v15, %v8642_v14  ;;  %v10743_v21 = vld [vmem:[%s11335_s3 + $0x8c] sm:$0xf0] }
 0x23a   :  { %v8627_v16 = vor.u32 %v10743_v21, %v8626_v18  ;;  %v10759_v18 = vld [vmem:[%s11335_s3 + $0x10c] sm:$0xf0]  ;;  %v8882_v21 = vld [vmem:[%s11335_s3 + $0x280] sm:$0xf] }
 0x23b   :  { %3244 = vmatpush.bf16.msra.mxu2 %v8347_v5  ;;  %3257 = vmatpush.bf16.msra.mxu3 %v8475_v6  ;;  %v10694_v5 = vld [vmem:[%s11325_s25 + $0x30c] sm:$0xf]  ;;  %v8675_v6 = vor.u32 %v10755_v60, %v8674_v56  ;;  %v10745_v56 = vld [vmem:[%s11335_s3 + $0xa4] sm:$0xf]  ;;  %v8644_v60 = vld [vmem:[%s11335_s3 + $0xb0] sm:$0xf0] }
 0x23c   :  { %s13446_s25 = sld [smem:[#allocation9_spill]] }
 0x23d   :  { %3974 = vmatpush.bf16.msra.mxu0 %v8675_v6  ;;  %v8706_v6 = vld [vmem:[%s11335_s3 + $0x120] sm:$0xf] }
 0x23f   :  { %3245 = vmatpush.bf16.msra.mxu2 %v8331_v12  ;;  %3258 = vmatpush.bf16.msra.mxu3 %v8459_v13  ;;  %v8319_v12 = vor.u32 %v10662_v2, %v8316_v4  ;;  %v8447_v13 = vor.u32 %v10694_v5, %v8444_v7  ;;  %v8647_v2 = vor.u32 %v10745_v56, %v8644_v60  ;;  %v10763_v7 = vld [vmem:[%s11335_s3 + $0x12c] sm:$0xf0] }
 0x240   :  { %v8707_v9 = vor.u32 %v10763_v7, %v8706_v6  ;;  %v10791_v56 = vld [vmem:[%s11335_s3 + $0x20c] sm:$0xf0]  ;;  %v10817_v6 = vld [vmem:[%s11335_s3 + $0x2e4] sm:$0xf]  ;;  %v8932_v7 = vld [vmem:[%s11335_s3 + $0x2f0] sm:$0xf0] }
 0x241   :  { %3975 = vmatpush.bf16.msra.mxu0 %v8659_v10  ;;  %v10811_v10 = vld [vmem:[%s11335_s3 + $0x2ac] sm:$0xf0] }
 0x242   :  { %v8899_v14 = vor.u32 %v10811_v10, %v8898_v8 }
 0x243   :  { %3246 = vmatpush.bf16.msra.mxu2 %v8315_v17  ;;  %3259 = vmatpush.bf16.msra.mxu3 %v8443_v27  ;;  %v8802_v17 = vld [vmem:[%s11335_s3 + $0x1e0] sm:$0xf]  ;;  %v8611_v27 = vor.u32 %v10739_v26, %v8610_v24  ;;  %v10737_v24 = vld [vmem:[%s11335_s3 + $0x64] sm:$0xf]  ;;  %v8612_v26 = vld [vmem:[%s11335_s3 + $0x70] sm:$0xf0] }
 0x245   :  { %3976 = vmatpush.bf16.msra.mxu0 %v8643_v22  ;;  %v8690_v22 = vld [vmem:[%s11335_s3 + $0x100] sm:$0xf] }
 0x246   :  { %3247 = vmatmul.bf16.vlgmr.msra.gmra.mxu2 %v12324_v19  ;;  %3260 = vmatmul.bf16.vlgmr.msra.gmra.mxu3 %v12326_v20 }
 0x247   :  { %3291 = vmatpush.bf16.msrb.mxu2 %v8431_v29  ;;  %3304 = vmatpush.bf16.msrb.mxu3 %v8559_v30  ;;  %v10787_v29 = vld [vmem:[%s11335_s3 + $0x1ec] sm:$0xf0] }
 0x248   :  { %v8803_v30 = vor.u32 %v10787_v29, %v8802_v17  ;;  %v10785_v17 = vld [vmem:[%s11335_s3 + $0x1e4] sm:$0xf]  ;;  %v8691_v29 = vor.u32 %v10759_v18, %v8690_v22  ;;  %v8724_v18 = vld [vmem:[%s11335_s3 + $0x150] sm:$0xf0] }
 0x249   :  { %3977 = vmatpush.bf16.msra.mxu0 %v8627_v16  ;;  %v10807_v16 = vld [vmem:[%s11335_s3 + $0x28c] sm:$0xf0]  ;;  %v10765_v22 = vld [vmem:[%s11335_s3 + $0x144] sm:$0xf] }
 0x24a   :  { %3987 = vmatpush.bf16.msra.mxu1 %v8803_v30  ;;  %v8883_v30 = vor.u32 %v10807_v16, %v8882_v21  ;;  %v10813_v21 = vld [vmem:[%s11335_s3 + $0x2c4] sm:$0xf]  ;;  %v8727_v16 = vor.u32 %v10765_v22, %v8724_v18  ;;  %v10752_v22 = vld [vmem:[%s11335_s3 + $0xd4] sm:$0xf0]  ;;  %v8946_v18 = vld [vmem:[%s11335_s3 + $0x300] sm:$0xf] }
 0x24b   :  { %3292 = vmatpush.bf16.msrb.mxu2 %v8415_v38  ;;  %3305 = vmatpush.bf16.msrb.mxu3 %v8543_v39  ;;  %v8578_v38 = vld [vmem:[%s11335_s3 + $0x20] sm:$0xf]  ;;  %v10731_v39 = vld [vmem:[%s11335_s3 + $0x2c] sm:$0xf0] }
 0x24c   :  { %v8579_v57 = vor.u32 %v10731_v39, %v8578_v38  ;;  %v10733_v39 = vld [vmem:[%s11335_s3 + $0x44] sm:$0xf] }
 0x24d   :  { %3978 = vmatpush.bf16.msra.mxu0 %v8611_v27  ;;  %v8804_v27 = vld [vmem:[%s11335_s3 + $0x1f0] sm:$0xf0] }
 0x24f   :  { %3293 = vmatpush.bf16.msrb.mxu2 %v8399_v53  ;;  %3306 = vmatpush.bf16.msrb.mxu3 %v8527_v42  ;;  %v10727_v53 = vld [vmem:[%s11335_s3 + $0xc] sm:$0xf0]  ;;  %v8771_v42 = vor.u32 %v10779_v40, %v8770_v41  ;;  %v8596_v41 = vld [vmem:[%s11335_s3 + $0x50] sm:$0xf0] }
 0x250   :  { %v8599_v40 = vor.u32 %v10733_v39, %v8596_v41 }
 0x253   :  { %3294 = vmatpush.bf16.msrb.mxu2 %v8383_v54  ;;  %3307 = vmatpush.bf16.msrb.mxu3 %v8511_v44  ;;  %v8563_v54 = vor.u32 %v10727_v53, %v8562_v59  ;;  %v8755_v44 = vor.u32 %v10775_v43, %v8754_v63  ;;  %v8788_v59 = vld [vmem:[%s11335_s3 + $0x1d0] sm:$0xf0]  ;;  %v10799_v63 = vld [vmem:[%s11335_s3 + $0x24c] sm:$0xf0] }
 0x257   :  { %3295 = vmatpush.bf16.msrb.mxu2 %v8367_v49  ;;  %3308 = vmatpush.bf16.msrb.mxu3 %v8495_v11  ;;  %v10771_v49 = vld [vmem:[%s11335_s3 + $0x16c] sm:$0xf0]  ;;  %v8930_v11 = vld [vmem:[%s11335_s3 + $0x2e0] sm:$0xf] }
 0x258   :  { %v8739_v28 = vor.u32 %v10771_v49, %v8738_v23 }
 0x25b   :  { %3296 = vmatpush.bf16.msrb.mxu2 %v8351_v48  ;;  %3309 = vmatpush.bf16.msrb.mxu3 %v8479_v50  ;;  %v8931_v48 = vor.u32 %v10819_v46, %v8930_v11  ;;  %v8663_v50 = vor.u32 %v10749_v47, %v8660_v35  ;;  %v10795_v46 = vld [vmem:[%s11335_s3 + $0x22c] sm:$0xf0]  ;;  %v10725_v35 = vld [vmem:[%s11335_s3 + $0x4] sm:$0xf] }
 0x25f   :  { %3297 = vmatpush.bf16.msrb.mxu2 %v8335_v62  ;;  %3310 = vmatpush.bf16.msrb.mxu3 %v8463_v1  ;;  %v8723_v62 = vor.u32 %v10767_v52, %v8722_v51  ;;  %v8915_v1 = vor.u32 %v10815_v55, %v8914_v31  ;;  %v8756_v52 = vld [vmem:[%s11335_s3 + $0x190] sm:$0xf0]  ;;  %v8818_v55 = vld [vmem:[%s11335_s3 + $0x200] sm:$0xf] }
 0x260   :  { %v8819_v60 = vor.u32 %v10791_v56, %v8818_v55 }
 0x263   :  { %3298 = vmatpush.bf16.msrb.mxu2 %v8319_v12  ;;  %3311 = vmatpush.bf16.msrb.mxu3 %v8447_v13  ;;  %v10741_v12 = vld [vmem:[%s11335_s3 + $0x84] sm:$0xf]  ;;  %v8628_v13 = vld [vmem:[%s11335_s3 + $0x90] sm:$0xf0] }
 0x264   :  { %v8631_v15 = vor.u32 %v10741_v12, %v8628_v13  ;;  %v8935_v12 = vor.u32 %v10817_v6, %v8932_v7  ;;  %v9042_v13 = vld [vmem:[%s11335_s3 + $0x3c0] sm:$0xf]  ;;  %v10793_v6 = vld [vmem:[%s11335_s3 + $0x224] sm:$0xf]  ;;  %v8836_v7 = vld [vmem:[%s11335_s3 + $0x230] sm:$0xf0] }
 0x266   :  { %3299 = vmatmul.bf16.vlgmr.msrb.gmra.mxu2 %v12324_v19  ;;  %3312 = vmatmul.bf16.vlgmr.msrb.gmra.mxu3 %v12326_v20  ;;  %v8595_v19 = vor.u32 %v10735_v34, %v8594_v32  ;;  %v10783_v20 = vld [vmem:[%s11335_s3 + $0x1cc] sm:$0xf0]  ;;  %v8615_v32 = vor.u32 %v10737_v24, %v8612_v26  ;;  %v8807_v34 = vor.u32 %v10785_v17, %v8804_v27  ;;  %v8916_v24 = vld [vmem:[%s11335_s3 + $0x2d0] sm:$0xf0]  ;;  %v12505_v17 = vld [vmem:[%s11330_s29] sm:$0xf] }
 0x267   :  { %v8787_v33 = vor.u32 %v10783_v20, %v8786_v37  ;;  %4000 = vmatpush.bf16.msra.mxu2 %v8931_v48  ;;  %v8866_v37 = vld [vmem:[%s11335_s3 + $0x260] sm:$0xf]  ;;  %v8564_v48 = vld [vmem:[%s11335_s3 + $0x10] sm:$0xf0]  ;;  %v8919_v26 = vor.u32 %v10813_v21, %v8916_v24  ;;  %v10823_v21 = vld [vmem:[%s11335_s3 + $0x30c] sm:$0xf0] }
 0x268   :  { %3979 = vmatpush.bf16.msra.mxu0 %v8595_v19  ;;  %v10803_v19 = vld [vmem:[%s11335_s3 + $0x26c] sm:$0xf0]  ;;  %v8567_v51 = vor.u32 %v10725_v35, %v8564_v48  ;;  %v9026_v27 = vld [vmem:[%s11335_s3 + $0x3a0] sm:$0xf]  ;;  %v8947_v24 = vor.u32 %v10823_v21, %v8946_v18  ;;  %v10732_v18 = vld [vmem:[%s11335_s3 + $0x34] sm:$0xf0] }
 0x269   :  { %3988 = vmatpush.bf16.msra.mxu1 %v8787_v33  ;;  %v8867_v38 = vor.u32 %v10803_v19, %v8866_v37  ;;  %v10809_v37 = vld [vmem:[%s11335_s3 + $0x2a4] sm:$0xf]  ;;  %v8978_v35 = vld [vmem:[%s11335_s3 + $0x340] sm:$0xf]  ;;  %v10831_v48 = vld [vmem:[%s11335_s3 + $0x34c] sm:$0xf0] }
 0x26a   :  { %v8778_v21 = vld [vmem:[%s11335_s3 + $0x1a8] sm:$0xf]  ;;  %s13447_s29 = sld [smem:[#allocation12_spill]] }
 0x26b   :  { %4001 = vmatpush.bf16.msra.mxu2 %v8915_v1  ;;  %v10851_v1 = vld [vmem:[%s11335_s3 + $0x3ec] sm:$0xf0] }
 0x26c   :  { %3980 = vmatpush.bf16.msra.mxu0 %v8579_v57  ;;  %v10781_v57 = vld [vmem:[%s11335_s3 + $0x1c4] sm:$0xf] }
 0x26d   :  { %3989 = vmatpush.bf16.msra.mxu1 %v8771_v42  ;;  %v8791_v53 = vor.u32 %v10781_v57, %v8788_v59  ;;  %v8850_v42 = vld [vmem:[%s11335_s3 + $0x240] sm:$0xf] }
 0x26e   :  { %v8851_v43 = vor.u32 %v10799_v63, %v8850_v42  ;;  %v9010_v59 = vld [vmem:[%s11335_s3 + $0x380] sm:$0xf]  ;;  %v10757_v63 = vld [vmem:[%s11335_s3 + $0x104] sm:$0xf] }
 0x26f   :  { %4002 = vmatpush.bf16.msra.mxu2 %v8899_v14  ;;  %v10847_v14 = vld [vmem:[%s11335_s3 + $0x3cc] sm:$0xf0] }
 0x270   :  { %3981 = vmatpush.bf16.msra.mxu0 %v8563_v54  ;;  %v10777_v54 = vld [vmem:[%s11335_s3 + $0x1a4] sm:$0xf] }
 0x271   :  { %3990 = vmatpush.bf16.msra.mxu1 %v8755_v44  ;;  %v8583_v44 = vor.u32 %v10729_v25, %v8580_v58  ;;  %v10805_v25 = vld [vmem:[%s11335_s3 + $0x284] sm:$0xf] }
 0x273   :  { %v12434_v0 = vpop.f32.mrf.mxu0  ;;  %v12436_v45 = vpop.f32.mrf.mxu1  ;;  %4003 = vmatpush.bf16.msra.mxu2 %v8883_v30 }
 0x274   :  { %4026 = vmatpush.bf16.msrb.mxu0 %v8679_v36  ;;  %v8772_v36 = vld [vmem:[%s11335_s3 + $0x1b0] sm:$0xf0] }
 0x275   :  { %3991 = vmatpush.bf16.msra.mxu1 %v8739_v28  ;;  %v8775_v11 = vor.u32 %v10777_v54, %v8772_v36  ;;  %v8834_v28 = vld [vmem:[%s11335_s3 + $0x220] sm:$0xf]  ;;  %v8884_v54 = vld [vmem:[%s11335_s3 + $0x290] sm:$0xf0] }
 0x276   :  { %v8835_v47 = vor.u32 %v10795_v46, %v8834_v28  ;;  %v8994_v36 = vld [vmem:[%s11335_s3 + $0x360] sm:$0xf]  ;;  %v8868_v46 = vld [vmem:[%s11335_s3 + $0x270] sm:$0xf0] }
 0x277   :  { %4004 = vmatpush.bf16.msra.mxu2 %v8867_v38  ;;  %v8900_v38 = vld [vmem:[%s11335_s3 + $0x2b0] sm:$0xf0] }
 0x278   :  { %4027 = vmatpush.bf16.msrb.mxu0 %v8663_v50  ;;  %v10773_v50 = vld [vmem:[%s11335_s3 + $0x184] sm:$0xf]  ;;  %v8903_v57 = vor.u32 %v10809_v37, %v8900_v38  ;;  %v9060_v37 = vld [vmem:[%s11335_s3 + $0x3f0] sm:$0xf0] }
 0x279   :  { %3992 = vmatpush.bf16.msra.mxu1 %v8723_v62  ;;  %v8759_v31 = vor.u32 %v10773_v50, %v8756_v52  ;;  %v9058_v62 = vld [vmem:[%s11335_s3 + $0x3e0] sm:$0xf]  ;;  %v10797_v52 = vld [vmem:[%s11335_s3 + $0x244] sm:$0xf] }
 0x27b   :  { %v3120_v4 = vpop.f32.mrf.mxu0  ;;  %v3133_v5 = vpop.f32.mrf.mxu1  ;;  %4005 = vmatpush.bf16.msra.mxu2 %v8851_v43  ;;  %v8692_v43 = vld [vmem:[%s11335_s3 + $0x110] sm:$0xf0] }
 0x27c   :  { %4028 = vmatpush.bf16.msrb.mxu0 %v8647_v2  ;;  %v10769_v2 = vld [vmem:[%s11335_s3 + $0x164] sm:$0xf]  ;;  %v9059_v4 = vor.u32 %v10851_v1, %v9058_v62  ;;  %v8740_v5 = vld [vmem:[%s11335_s3 + $0x170] sm:$0xf0]  ;;  %v8695_v58 = vor.u32 %v10757_v63, %v8692_v43  ;;  %v8682_v62 = vld [vmem:[%s11335_s3 + $0xe8] sm:$0xf] }
 0x27d   :  { %3993 = vmatpush.bf16.msra.mxu1 %v8707_v9  ;;  %v8743_v10 = vor.u32 %v10769_v2, %v8740_v5  ;;  %v8962_v1 = vld [vmem:[%s11335_s3 + $0x320] sm:$0xf]  ;;  %v10827_v2 = vld [vmem:[%s11335_s3 + $0x32c] sm:$0xf0] }
 0x27e   :  { %4013 = vmatpush.bf16.msra.mxu3 %v9059_v4  ;;  %v8963_v5 = vor.u32 %v10827_v2, %v8962_v1  ;;  %v8602_v1 = vld [vmem:[%s11335_s3 + $0x48] sm:$0xf]  ;;  %v10736_v2 = vld [vmem:[%s11335_s3 + $0x54] sm:$0xf0] }
 0x27f   :  { %4006 = vmatpush.bf16.msra.mxu2 %v8835_v47 }
 0x280   :  { %4029 = vmatpush.bf16.msrb.mxu0 %v8631_v15  ;;  %v9043_v15 = vor.u32 %v10847_v14, %v9042_v13  ;;  %v8666_v14 = vld [vmem:[%s11335_s3 + $0xc8] sm:$0xf] }
 0x281   :  { %3994 = vmatpush.bf16.msra.mxu1 %v8691_v29  ;;  %v10843_v29 = vld [vmem:[%s11335_s3 + $0x3ac] sm:$0xf0]  ;;  %v8667_v38 = vor.u32 %v10752_v22, %v8666_v14  ;;  %v8603_v14 = vor.u32 %v10736_v2, %v8602_v1  ;;  %v8586_v22 = vld [vmem:[%s11335_s3 + $0x28] sm:$0xf]  ;;  %v10816_v1 = vld [vmem:[%s11335_s3 + $0x2d4] sm:$0xf0] }
 0x282   :  { %4014 = vmatpush.bf16.msra.mxu3 %v9043_v15  ;;  %v9027_v30 = vor.u32 %v10843_v29, %v9026_v27  ;;  %v8820_v27 = vld [vmem:[%s11335_s3 + $0x210] sm:$0xf0]  ;;  %v10849_v29 = vld [vmem:[%s11335_s3 + $0x3e4] sm:$0xf]  ;;  %v10746_v2 = vld [vmem:[%s11335_s3 + $0xac] sm:$0xf] }
 0x283   :  { %v12466_v20 = vpop.f32.mrf.mxu0  ;;  %v12468_v33 = vpop.f32.mrf.mxu1  ;;  %4007 = vmatpush.bf16.msra.mxu2 %v8819_v60 }
 0x284   :  { %4030 = vmatpush.bf16.msrb.mxu0 %v8615_v32  ;;  %v10761_v32 = vld [vmem:[%s11335_s3 + $0x124] sm:$0xf] }
 0x285   :  { %4039 = vmatpush.bf16.msrb.mxu1 %v8807_v34  ;;  %v8708_v34 = vld [vmem:[%s11335_s3 + $0x130] sm:$0xf0] }
 0x286   :  { %v8711_v19 = vor.u32 %v10761_v32, %v8708_v34  ;;  %4015 = vmatpush.bf16.msra.mxu3 %v9027_v30 }
 0x287   :  { %4052 = vmatpush.bf16.msrb.mxu2 %v8935_v12  ;;  %v2448_v12 = vperm.slane %v12505_v17, 1 }
 0x288   :  { %4031 = vmatpush.bf16.msrb.mxu0 %v8599_v40  ;;  %v2447_v40 = vperm.slane %v12505_v17, 0 }
 0x289   :  { %4040 = vmatpush.bf16.msrb.mxu1 %v8791_v53  ;;  %v10839_v53 = vld [vmem:[%s11335_s3 + $0x38c] sm:$0xf0] }
 0x28a   :  { %v9011_v42 = vor.u32 %v10839_v53, %v9010_v59  ;;  %v9044_v59 = vld [vmem:[%s11335_s3 + $0x3d0] sm:$0xf0] }
 0x28b   :  { %v3172_v23 = vpop.f32.mrf.mxu0  ;;  %v3185_v49 = vpop.f32.mrf.mxu1  ;;  %4053 = vmatpush.bf16.msrb.mxu2 %v8919_v26  ;;  %v10789_v26 = vld [vmem:[%s11335_s3 + $0x204] sm:$0xf] }
 0x28c   :  { %4032 = vmatpush.bf16.msrb.mxu0 %v8583_v44  ;;  %v8887_v44 = vor.u32 %v10805_v25, %v8884_v54  ;;  %4016 = vmatpush.bf16.msra.mxu3 %v9011_v42  ;;  %v10835_v23 = vld [vmem:[%s11335_s3 + $0x36c] sm:$0xf0]  ;;  %v10801_v49 = vld [vmem:[%s11335_s3 + $0x264] sm:$0xf]  ;;  %v8823_v34 = vor.u32 %v10789_v26, %v8820_v27  ;;  %v8634_v25 = vld [vmem:[%s11335_s3 + $0x88] sm:$0xf] }
 0x28d   :  { %4041 = vmatpush.bf16.msrb.mxu1 %v8775_v11  ;;  %v3119_v11 = vadd.f32 %v12434_v0, %v2447_v40  ;;  %v8995_v28 = vor.u32 %v10835_v23, %v8994_v36  ;;  %v8871_v47 = vor.u32 %v10801_v49, %v8868_v46  ;;  %v8852_v0 = vld [vmem:[%s11335_s3 + $0x250] sm:$0xf0]  ;;  %v10845_v40 = vld [vmem:[%s11335_s3 + $0x3c4] sm:$0xf]  ;;  %v8618_v46 = vld [vmem:[%s11335_s3 + $0x68] sm:$0xf] }
 0x28e   :  { %v8855_v56 = vor.u32 %v10797_v52, %v8852_v0  ;;  %v9047_v63 = vor.u32 %v10845_v40, %v9044_v59  ;;  %v10841_v54 = vld [vmem:[%s11335_s3 + $0x3a4] sm:$0xf]  ;;  %v10780_v26 = vld [vmem:[%s11335_s3 + $0x1b4] sm:$0xf0] }
 0x28f   :  { %4054 = vmatpush.bf16.msrb.mxu2 %v8903_v57  ;;  %v3132_v50 = vadd.f32 %v12436_v45, %v3119_v11  ;;  %v10756_v45 = vld [vmem:[%s11335_s3 + $0xf4] sm:$0xf0]  ;;  %v10829_v27 = vld [vmem:[%s11335_s3 + $0x344] sm:$0xf] }
 0x290   :  { %4033 = vmatpush.bf16.msrb.mxu0 %v8567_v51  ;;  %4017 = vmatpush.bf16.msra.mxu3 %v8995_v28  ;;  %v8979_v51 = vor.u32 %v10831_v48, %v8978_v35  ;;  %v8683_v15 = vor.u32 %v10756_v45, %v8682_v62  ;;  %v10748_v57 = vld [vmem:[%s11335_s3 + $0xb4] sm:$0xf0]  ;;  %v8810_v35 = vld [vmem:[%s11335_s3 + $0x1e8] sm:$0xf] }
 0x291   :  { %4042 = vmatpush.bf16.msrb.mxu1 %v8759_v31 }
 0x293   :  { %v12494_v8 = vpop.f32.mrf.mxu0  ;;  %v12496_v9 = vpop.f32.mrf.mxu1  ;;  %4055 = vmatpush.bf16.msrb.mxu2 %v8887_v44  ;;  %v9028_v44 = vld [vmem:[%s11335_s3 + $0x3b0] sm:$0xf0] }
 0x294   :  { %4018 = vmatpush.bf16.msra.mxu3 %v8979_v51  ;;  %v9031_v49 = vor.u32 %v10841_v54, %v9028_v44  ;;  %v9012_v51 = vld [vmem:[%s11335_s3 + $0x390] sm:$0xf0]  ;;  %v8746_v54 = vld [vmem:[%s11335_s3 + $0x168] sm:$0xf]  ;;  %v10772_v44 = vld [vmem:[%s11335_s3 + $0x174] sm:$0xf0] }
 0x295   :  { %4043 = vmatpush.bf16.msrb.mxu1 %v8743_v10  ;;  %v8839_v10 = vor.u32 %v10793_v6, %v8836_v7  ;;  %v10833_v6 = vld [vmem:[%s11335_s3 + $0x364] sm:$0xf]  ;;  %v8996_v7 = vld [vmem:[%s11335_s3 + $0x370] sm:$0xf0] }
 0x297   :  { %4056 = vmatpush.bf16.msrb.mxu2 %v8871_v47  ;;  %v10740_v47 = vld [vmem:[%s11335_s3 + $0x74] sm:$0xf0] }
 0x298   :  { %4019 = vmatpush.bf16.msra.mxu3 %v8963_v5  ;;  %v10784_v5 = vld [vmem:[%s11335_s3 + $0x1d4] sm:$0xf0] }
 0x299   :  { %4044 = vmatpush.bf16.msrb.mxu1 %v8727_v16 }
 0x29b   :  { %v3224_v39 = vpop.f32.mrf.mxu0  ;;  %v3237_v41 = vpop.f32.mrf.mxu1  ;;  %4057 = vmatpush.bf16.msrb.mxu2 %v8855_v56 }
 0x29c   :  { %v8650_v39 = vld [vmem:[%s11335_s3 + $0xa8] sm:$0xf]  ;;  %4020 = vmatpush.bf16.msra.mxu3 %v8947_v24  ;;  %v3171_v41 = vadd.f32 %v12466_v20, %v2448_v12 }
 0x29d   :  { %4045 = vmatpush.bf16.msrb.mxu1 %v8711_v19  ;;  %v9063_v19 = vor.u32 %v10849_v29, %v9060_v37  ;;  %v8651_v43 = vor.u32 %v10748_v57, %v8650_v39  ;;  %v8980_v29 = vld [vmem:[%s11335_s3 + $0x350] sm:$0xf0]  ;;  %v8570_v37 = vld [vmem:[%s11335_s3 + $0x8] sm:$0xf] }
 0x29e   :  { %v3184_v20 = vadd.f32 %v12468_v33, %v3171_v41  ;;  %v10788_v33 = vld [vmem:[%s11335_s3 + $0x1f4] sm:$0xf0]  ;;  %v10825_v41 = vld [vmem:[%s11335_s3 + $0x324] sm:$0xf]  ;;  %v8964_v57 = vld [vmem:[%s11335_s3 + $0x330] sm:$0xf0] }
 0x29f   :  { %4058 = vmatpush.bf16.msrb.mxu2 %v8839_v10  ;;  %v8811_v62 = vor.u32 %v10788_v33, %v8810_v35  ;;  %v8668_v35 = vld [vmem:[%s11335_s3 + $0xd8] sm:$0xf0] }
 0x2a0   :  { %4065 = vmatpush.bf16.msrb.mxu3 %v9063_v19  ;;  %v10728_v19 = vld [vmem:[%s11335_s3 + $0x14] sm:$0xf0] }
 0x2a1   :  { %4046 = vmatpush.bf16.msrb.mxu1 %v8695_v58  ;;  %v10744_v58 = vld [vmem:[%s11335_s3 + $0x94] sm:$0xf0] }
 0x2a2   :  { %v8635_v28 = vor.u32 %v10744_v58, %v8634_v25  ;;  %v8967_v25 = vor.u32 %v10825_v41, %v8964_v57  ;;  %v8874_v57 = vld [vmem:[%s11335_s3 + $0x268] sm:$0xf] }
 0x2a3   :  { %4059 = vmatpush.bf16.msrb.mxu2 %v8823_v34  ;;  %v8779_v34 = vor.u32 %v10780_v26, %v8778_v21  ;;  %v8698_v26 = vld [vmem:[%s11335_s3 + $0x108] sm:$0xf] }
 0x2a4   :  { %4066 = vmatpush.bf16.msrb.mxu3 %v9047_v63  ;;  %v10754_v63 = vld [vmem:[%s11335_s3 + $0xec] sm:$0xf] }
 0x2a8   :  { %4067 = vmatpush.bf16.msrb.mxu3 %v9031_v49  ;;  %v8938_v49 = vld [vmem:[%s11335_s3 + $0x2e8] sm:$0xf] }
 0x2a9   :  { %v3144_v31 = vpop.f32.mrf.mxu2  ;;  %v3157_v55 = vpop.f32.mrf.mxu3 }
 0x2aa   :  { %v3145_v60 = vadd.f32 %v3144_v31, %v3132_v50  ;;  %v10837_v50 = vld [vmem:[%s11335_s3 + $0x384] sm:$0xf] }
 0x2ab   :  { %v9015_v31 = vor.u32 %v10837_v50, %v9012_v51  ;;  %v8747_v50 = vor.u32 %v10772_v44, %v8746_v54 }
 0x2ac   :  { %v3158_v4 = vadd.f32 %v3157_v55, %v3145_v60  ;;  %v2449_v55 = vperm.slane %v12505_v17, 2  ;;  %v8619_v60 = vor.u32 %v10740_v47, %v8618_v46  ;;  %v10820_v46 = vld [vmem:[%s11335_s3 + $0x2f4] sm:$0xf0]  ;;  %v10750_v47 = vld [vmem:[%s11335_s3 + $0xcc] sm:$0xf] }
 0x2ad   :  { %4068 = vmatpush.bf16.msrb.mxu3 %v9015_v31  ;;  %v8730_v31 = vld [vmem:[%s11335_s3 + $0x148] sm:$0xf] }
 0x2ae   :  { %v3317_v13 = vmax.f32 %v3158_v4, 0.0  ;;  %v8794_v4 = vld [vmem:[%s11335_s3 + $0x1c8] sm:$0xf]  ;;  %v3223_v24 = vadd.f32 %v12494_v8, %v2449_v55  ;;  %v10776_v8 = vld [vmem:[%s11335_s3 + $0x194] sm:$0xf0] }
 0x2af   :  { %v10768_v55 = vld [vmem:[%s11335_s3 + $0x154] sm:$0xf0] }
 0x2b0   :  { %v12541_v16 = vpack.c.bf16 %v3317_v13, %v3317_v13  ;;  %v8999_v13 = vor.u32 %v10833_v6, %v8996_v7  ;;  %v3236_v39 = vadd.f32 %v12496_v9, %v3223_v24  ;;  %v8571_v9 = vor.u32 %v10728_v19, %v8570_v37  ;;  %v10786_v37 = vld [vmem:[%s11335_s3 + $0x1ec] sm:$0xf]  ;;  %v8812_v19 = vld [vmem:[%s11335_s3 + $0x1f8] sm:$0xf0] }
 0x2b1   :  { %v3146_v30 = vpop.f32.mrf.mxu2  ;;  %v3159_v32 = vpop.f32.mrf.mxu3 }
 0x2b2   :  { %3982 = vmatmul.bf16.vlgmr.msra.gmra.mxu0 %v12541_v16  ;;  %4069 = vmatpush.bf16.msrb.mxu3 %v8999_v13  ;;  %v8983_v30 = vor.u32 %v10829_v27, %v8980_v29  ;;  %v8587_v32 = vor.u32 %v10732_v18, %v8586_v22  ;;  %v8906_v13 = vld [vmem:[%s11335_s3 + $0x2a8] sm:$0xf]  ;;  %v8636_v22 = vld [vmem:[%s11335_s3 + $0x98] sm:$0xf0]  ;;  %v10760_v27 = vld [vmem:[%s11335_s3 + $0x114] sm:$0xf0] }
 0x2b3   :  { %4078 = vmatpush.bf16.msra.mxu0 %v8683_v15  ;;  %v8795_v15 = vor.u32 %v10784_v5, %v8794_v4  ;;  %v8652_v4 = vld [vmem:[%s11335_s3 + $0xb8] sm:$0xf0]  ;;  %v8731_v5 = vor.u32 %v10768_v55, %v8730_v31  ;;  %v8890_v29 = vld [vmem:[%s11335_s3 + $0x288] sm:$0xf]  ;;  %v10774_v55 = vld [vmem:[%s11335_s3 + $0x18c] sm:$0xf] }
 0x2b4   :  { %v8655_v7 = vor.u32 %v10746_v2, %v8652_v4  ;;  %v10792_v2 = vld [vmem:[%s11335_s3 + $0x214] sm:$0xf0] }
 0x2b5   :  { %v12553_v53 = vpop.f32.mrf.mxu0  ;;  %v12555_v42 = vpop.f32.mrf.mxu1 }
 0x2b6   :  { %4070 = vmatpush.bf16.msrb.mxu3 %v8983_v30  ;;  %v10808_v30 = vld [vmem:[%s11335_s3 + $0x294] sm:$0xf0] }
 0x2b7   :  { %4079 = vmatpush.bf16.msra.mxu0 %v8667_v38  ;;  %v8762_v38 = vld [vmem:[%s11335_s3 + $0x188] sm:$0xf] }
 0x2b8   :  { %v8763_v58 = vor.u32 %v10776_v8, %v8762_v38  ;;  %v8699_v38 = vor.u32 %v10760_v27, %v8698_v26  ;;  %v8891_v8 = vor.u32 %v10808_v30, %v8890_v29  ;;  %v9050_v27 = vld [vmem:[%s11335_s3 + $0x3c8] sm:$0xf]  ;;  %v10848_v29 = vld [vmem:[%s11335_s3 + $0x3d4] sm:$0xf0]  ;;  %v10766_v30 = vld [vmem:[%s11335_s3 + $0x14c] sm:$0xf] }
 0x2b9   :  { %v3196_v36 = vpop.f32.mrf.mxu2  ;;  %v3209_v23 = vpop.f32.mrf.mxu3 }
 0x2ba   :  { %v3197_v11 = vadd.f32 %v3196_v36, %v3184_v20  ;;  %4071 = vmatpush.bf16.msrb.mxu3 %v8967_v25  ;;  %v10782_v25 = vld [vmem:[%s11335_s3 + $0x1cc] sm:$0xf] }
 0x2bb   :  { %4080 = vmatpush.bf16.msra.mxu0 %v8651_v43  ;;  %v8684_v43 = vld [vmem:[%s11335_s3 + $0xf8] sm:$0xf0] }
 0x2bc   :  { %v3210_v48 = vadd.f32 %v3209_v23, %v3197_v11  ;;  %v8687_v23 = vor.u32 %v10754_v63, %v8684_v43  ;;  %v10821_v11 = vld [vmem:[%s11335_s3 + $0x304] sm:$0xf]  ;;  %v10734_v63 = vld [vmem:[%s11335_s3 + $0x4c] sm:$0xf]  ;;  %v8604_v43 = vld [vmem:[%s11335_s3 + $0x58] sm:$0xf0] }
 0x2bd   :  { %v3276_v52 = vpop.f32.mrf.mxu0  ;;  %v3289_v0 = vpop.f32.mrf.mxu1 }
 0x2be   :  { %v3318_v56 = vmax.f32 %v3210_v48, 0.0  ;;  %v8939_v52 = vor.u32 %v10820_v46, %v8938_v49  ;;  %v8671_v0 = vor.u32 %v10750_v47, %v8668_v35  ;;  %v8588_v49 = vld [vmem:[%s11335_s3 + $0x38] sm:$0xf0]  ;;  %v8842_v47 = vld [vmem:[%s11335_s3 + $0x228] sm:$0xf] }
 0x2bf   :  { %4081 = vmatpush.bf16.msra.mxu0 %v8635_v28  ;;  %v8948_v28 = vld [vmem:[%s11335_s3 + $0x310] sm:$0xf0] }
 0x2c0   :  { %v12572_v45 = vpack.c.bf16 %v3318_v56, %v3318_v56  ;;  %v8951_v48 = vor.u32 %v10821_v11, %v8948_v28  ;;  %v8922_v56 = vld [vmem:[%s11335_s3 + $0x2c8] sm:$0xf]  ;;  %v10778_v11 = vld [vmem:[%s11335_s3 + $0x1ac] sm:$0xf]  ;;  %v8780_v28 = vld [vmem:[%s11335_s3 + $0x1b8] sm:$0xf0] }
 0x2c1   :  { %v3198_v10 = vpop.f32.mrf.mxu2  ;;  %v3211_v12 = vpop.f32.mrf.mxu3  ;;  %v8923_v6 = vor.u32 %v10816_v1, %v8922_v56  ;;  %v8764_v56 = vld [vmem:[%s11335_s3 + $0x198] sm:$0xf0]  ;;  %v8826_v1 = vld [vmem:[%s11335_s3 + $0x208] sm:$0xf] }
 0x2c2   :  { %3995 = vmatmul.bf16.vlgmr.msra.gmra.mxu1 %v12572_v45  ;;  %4034 = vmatmul.bf16.vlgmr.msrb.gmra.mxu0 %v12541_v16  ;;  %v8714_v10 = vld [vmem:[%s11335_s3 + $0x128] sm:$0xf]  ;;  %v10764_v12 = vld [vmem:[%s11335_s3 + $0x134] sm:$0xf0] }
 0x2c3   :  { %4082 = vmatpush.bf16.msra.mxu0 %v8619_v60  ;;  %4091 = vmatpush.bf16.msra.mxu1 %v8811_v62  ;;  %v8715_v18 = vor.u32 %v10764_v12, %v8714_v10  ;;  %v10770_v10 = vld [vmem:[%s11335_s3 + $0x16c] sm:$0xf]  ;;  %v8748_v12 = vld [vmem:[%s11335_s3 + $0x178] sm:$0xf0] }
 0x2c4   :  { %4072 = vmatpush.bf16.msrb.mxu3 %v8951_v48  ;;  %v8783_v48 = vor.u32 %v10778_v11, %v8780_v28 }
 0x2c7   :  { %4083 = vmatpush.bf16.msra.mxu0 %v8603_v14  ;;  %4092 = vmatpush.bf16.msra.mxu1 %v8795_v15  ;;  %v10812_v14 = vld [vmem:[%s11335_s3 + $0x2b4] sm:$0xf0]  ;;  %v10742_v15 = vld [vmem:[%s11335_s3 + $0x8c] sm:$0xf] }
 0x2c8   :  { %v8907_v21 = vor.u32 %v10812_v14, %v8906_v13  ;;  %v8639_v24 = vor.u32 %v10742_v15, %v8636_v22  ;;  %v10818_v13 = vld [vmem:[%s11335_s3 + $0x2ec] sm:$0xf]  ;;  %v8940_v14 = vld [vmem:[%s11335_s3 + $0x2f8] sm:$0xf0]  ;;  %v8827_v22 = vor.u32 %v10792_v2, %v8826_v1 }
 0x2c9   :  { %v3248_v40 = vpop.f32.mrf.mxu2  ;;  %v3261_v59 = vpop.f32.mrf.mxu3  ;;  %v8943_v26 = vor.u32 %v10818_v13, %v8940_v14  ;;  %v8844_v1 = vld [vmem:[%s11335_s3 + $0x238] sm:$0xf0] }
 0x2ca   :  { %v3249_v20 = vadd.f32 %v3248_v40, %v3236_v39  ;;  %v2450_v39 = vperm.slane %v12505_v17, 3  ;;  %v8815_v40 = vor.u32 %v10786_v37, %v8812_v19  ;;  %v8732_v37 = vld [vmem:[%s11335_s3 + $0x158] sm:$0xf0]  ;;  %v10814_v19 = vld [vmem:[%s11335_s3 + $0x2cc] sm:$0xf] }
 0x2cb   :  { %4084 = vmatpush.bf16.msra.mxu0 %v8587_v32  ;;  %4093 = vmatpush.bf16.msra.mxu1 %v8779_v34  ;;  %v10738_v32 = vld [vmem:[%s11335_s3 + $0x6c] sm:$0xf]  ;;  %v8620_v34 = vld [vmem:[%s11335_s3 + $0x78] sm:$0xf0] }
 0x2cc   :  { %v3262_v36 = vadd.f32 %v3261_v59, %v3249_v20  ;;  %v8623_v41 = vor.u32 %v10738_v32, %v8620_v34  ;;  %v10804_v59 = vld [vmem:[%s11335_s3 + $0x274] sm:$0xf0]  ;;  %v8796_v20 = vld [vmem:[%s11335_s3 + $0x1d8] sm:$0xf0]  ;;  %v3275_v54 = vadd.f32 %v12553_v53, %v2450_v39  ;;  %v9051_v39 = vor.u32 %v10848_v29, %v9050_v27 }
 0x2cd   :  { %v8875_v17 = vor.u32 %v10804_v59, %v8874_v57  ;;  %v8799_v44 = vor.u32 %v10782_v25, %v8796_v20  ;;  %v9034_v57 = vld [vmem:[%s11335_s3 + $0x3a8] sm:$0xf]  ;;  %v10762_v59 = vld [vmem:[%s11335_s3 + $0x12c] sm:$0xf]  ;;  %v8908_v25 = vld [vmem:[%s11335_s3 + $0x2b8] sm:$0xf0] }
 0x2ce   :  { %v3319_v33 = vmax.f32 %v3262_v36, 0.0  ;;  %v10800_v36 = vld [vmem:[%s11335_s3 + $0x254] sm:$0xf0]  ;;  %v3288_v35 = vadd.f32 %v12555_v42, %v3275_v54  ;;  %v10758_v54 = vld [vmem:[%s11335_s3 + $0x10c] sm:$0xf] }
 0x2cf   :  { %4085 = vmatpush.bf16.msra.mxu0 %v8571_v9  ;;  %4094 = vmatpush.bf16.msra.mxu1 %v8763_v58  ;;  %v8607_v9 = vor.u32 %v10734_v63, %v8604_v43  ;;  %v8858_v58 = vld [vmem:[%s11335_s3 + $0x248] sm:$0xf]  ;;  %v8716_v63 = vld [vmem:[%s11335_s3 + $0x138] sm:$0xf0]  ;;  %v10810_v43 = vld [vmem:[%s11335_s3 + $0x2ac] sm:$0xf] }
 0x2d0   :  { %v12603_v51 = vpack.c.bf16 %v3319_v33, %v3319_v33  ;;  %v8859_v46 = vor.u32 %v10800_v36, %v8858_v58  ;;  %v10796_v33 = vld [vmem:[%s11335_s3 + $0x234] sm:$0xf0]  ;;  %v8719_v20 = vor.u32 %v10762_v59, %v8716_v63  ;;  %v10806_v36 = vld [vmem:[%s11335_s3 + $0x28c] sm:$0xf]  ;;  %v9036_v27 = vld [vmem:[%s11335_s3 + $0x3b8] sm:$0xf0] }
 0x2d1   :  { %v3250_v60 = vpop.f32.mrf.mxu2  ;;  %v3263_v62 = vpop.f32.mrf.mxu3  ;;  %v8843_v42 = vor.u32 %v10796_v33, %v8842_v47  ;;  %v10840_v58 = vld [vmem:[%s11335_s3 + $0x394] sm:$0xf0]  ;;  %v10802_v47 = vld [vmem:[%s11335_s3 + $0x26c] sm:$0xf]  ;;  %v8956_v63 = vld [vmem:[%s11335_s3 + $0x318] sm:$0xf0] }
 0x2d2   :  { %4008 = vmatmul.bf16.vlgmr.msra.gmra.mxu2 %v12603_v51  ;;  %4047 = vmatmul.bf16.vlgmr.msrb.gmra.mxu1 %v12572_v45  ;;  %v10822_v59 = vld [vmem:[%s11335_s3 + $0x30c] sm:$0xf] }
 0x2d3   :  { %4130 = vmatpush.bf16.msrb.mxu0 %v8687_v23  ;;  %4095 = vmatpush.bf16.msra.mxu1 %v8747_v50  ;;  %v10730_v23 = vld [vmem:[%s11335_s3 + $0x2c] sm:$0xf] }
 0x2d4   :  { %4086 = vmatmul.bf16.vlgmr.msra.gmra.mxu0 %v12541_v16  ;;  %4104 = vmatpush.bf16.msra.mxu2 %v8939_v52  ;;  %v8591_v53 = vor.u32 %v10730_v23, %v8588_v49  ;;  %v10726_v50 = vld [vmem:[%s11335_s3 + $0xc] sm:$0xf]  ;;  %v8572_v52 = vld [vmem:[%s11335_s3 + $0x18] sm:$0xf0] }
 0x2d5   :  { %v8575_v62 = vor.u32 %v10726_v50, %v8572_v52  ;;  %v8892_v23 = vld [vmem:[%s11335_s3 + $0x298] sm:$0xf0]  ;;  %v8986_v50 = vld [vmem:[%s11335_s3 + $0x348] sm:$0xf]  ;;  %v10832_v52 = vld [vmem:[%s11335_s3 + $0x354] sm:$0xf0] }
 0x2d6   :  { %v8895_v28 = vor.u32 %v10806_v36, %v8892_v23  ;;  %v10864_v36 = vld [vmem:[%s11345_s14 + $0x54] sm:$0xf0] }
 0x2d7   :  { %4131 = vmatpush.bf16.msrb.mxu0 %v8671_v0  ;;  %4096 = vmatpush.bf16.msra.mxu1 %v8731_v5  ;;  %v8767_v5 = vor.u32 %v10774_v55, %v8764_v56  ;;  %v8987_v55 = vor.u32 %v10832_v52, %v8986_v50 }
 0x2d8   :  { %4105 = vmatpush.bf16.msra.mxu2 %v8923_v6  ;;  %v9066_v6 = vld [vmem:[%s11335_s3 + $0x3e8] sm:$0xf] }
 0x2db   :  { %4132 = vmatpush.bf16.msrb.mxu0 %v8655_v7  ;;  %4097 = vmatpush.bf16.msra.mxu1 %v8715_v18  ;;  %v10852_v7 = vld [vmem:[%s11335_s3 + $0x3f4] sm:$0xf0] }
 0x2dc   :  { %4106 = vmatpush.bf16.msra.mxu2 %v8907_v21  ;;  %v9067_v18 = vor.u32 %v10852_v7, %v9066_v6  ;;  %v10824_v6 = vld [vmem:[%s11335_s3 + $0x314] sm:$0xf0]  ;;  %v10790_v7 = vld [vmem:[%s11335_s3 + $0x20c] sm:$0xf] }
 0x2df   :  { %4133 = vmatpush.bf16.msrb.mxu0 %v8639_v24  ;;  %4098 = vmatpush.bf16.msra.mxu1 %v8699_v38  ;;  %v8751_v24 = vor.u32 %v10770_v10, %v8748_v12  ;;  %v8924_v38 = vld [vmem:[%s11335_s3 + $0x2d8] sm:$0xf0]  ;;  %v10850_v10 = vld [vmem:[%s11335_s3 + $0x3ec] sm:$0xf] }
 0x2e0   :  { %4107 = vmatpush.bf16.msra.mxu2 %v8891_v8  ;;  %v8735_v8 = vor.u32 %v10766_v30, %v8732_v37  ;;  %v9068_v12 = vld [vmem:[%s11335_s3 + $0x3f8] sm:$0xf0]  ;;  %v10838_v30 = vld [vmem:[%s11335_s3 + $0x38c] sm:$0xf] }
 0x2e1   :  { %v10834_v37 = vld [vmem:[%s11335_s3 + $0x36c] sm:$0xf] }
 0x2e2   :  { %4060 = vmatmul.bf16.vlgmr.msrb.gmra.mxu2 %v12603_v51  ;;  %4099 = vmatmul.bf16.vlgmr.msra.gmra.mxu1 %v12572_v45 }
 0x2e3   :  { %4134 = vmatpush.bf16.msrb.mxu0 %v8623_v41  ;;  %4143 = vmatpush.bf16.msrb.mxu1 %v8815_v40  ;;  %v8927_v41 = vor.u32 %v10814_v19, %v8924_v38  ;;  %v10844_v40 = vld [vmem:[%s11335_s3 + $0x3b4] sm:$0xf0]  ;;  %v9004_v19 = vld [vmem:[%s11335_s3 + $0x378] sm:$0xf0] }
 0x2e4   :  { %4108 = vmatpush.bf16.msra.mxu2 %v8875_v17  ;;  %v8911_v17 = vor.u32 %v10810_v43, %v8908_v25  ;;  %v9007_v38 = vor.u32 %v10834_v37, %v9004_v19  ;;  %v8959_v43 = vor.u32 %v10822_v59, %v8956_v63  ;;  %v9130_v25 = vld [vmem:[%s11345_s14 + $0x70] sm:$0xf]  ;;  %v10865_v37 = vld [vmem:[%s11345_s14 + $0x64] sm:$0xf]  ;;  %v9124_v19 = vld [vmem:[%s11345_s14 + $0x68] sm:$0xf0] }
 0x2e5   :  { %v10898_v63 = vld [vmem:[%s11345_s14 + $0x164] sm:$0xf0] }
 0x2e7   :  { %4135 = vmatpush.bf16.msrb.mxu0 %v8607_v9  ;;  %4144 = vmatpush.bf16.msrb.mxu1 %v8799_v44  ;;  %v9018_v9 = vld [vmem:[%s11335_s3 + $0x388] sm:$0xf]  ;;  %v8700_v44 = vld [vmem:[%s11335_s3 + $0x118] sm:$0xf0] }
 0x2e8   :  { %4109 = vmatpush.bf16.msra.mxu2 %v8859_v46  ;;  %v9019_v49 = vor.u32 %v10840_v58, %v9018_v9  ;;  %v8703_v11 = vor.u32 %v10758_v54, %v8700_v44  ;;  %v9002_v46 = vld [vmem:[%s11335_s3 + $0x368] sm:$0xf]  ;;  %v9122_v9 = vld [vmem:[%s11345_s14 + $0x60] sm:$0xf]  ;;  %v9114_v44 = vld [vmem:[%s11345_s14 + $0x50] sm:$0xf] }
 0x2e9   :  { %v3300_v0 = vpop.f32.mrf.mxu2  ;;  %v3313_v31 = vpop.f32.mrf.mxu3  ;;  %v10866_v58 = vld [vmem:[%s11345_s14 + $0x64] sm:$0xf0]  ;;  %v9115_v23 = vor.u32 %v10864_v36, %v9114_v44  ;;  %v9242_v44 = vld [vmem:[%s11345_s14 + $0x150] sm:$0xf] }
 0x2ea   :  { %v3301_v60 = vadd.f32 %v3300_v0, %v3288_v35  ;;  %v8876_v35 = vld [vmem:[%s11335_s3 + $0x278] sm:$0xf0]  ;;  %v10798_v0 = vld [vmem:[%s11335_s3 + $0x24c] sm:$0xf]  ;;  %v9123_v54 = vor.u32 %v10866_v58, %v9122_v9  ;;  %v9146_v58 = vld [vmem:[%s11345_s14 + $0x90] sm:$0xf] }
 0x2eb   :  { %4136 = vmatpush.bf16.msrb.mxu0 %v8591_v53  ;;  %4145 = vmatpush.bf16.msrb.mxu1 %v8783_v48  ;;  %v10836_v53 = vld [vmem:[%s11335_s3 + $0x374] sm:$0xf0]  ;;  %v8879_v33 = vor.u32 %v10802_v47, %v8876_v35  ;;  %v9194_v47 = vld [vmem:[%s11345_s14 + $0xf0] sm:$0xf] }
 0x2ec   :  { %v3314_v4 = vadd.f32 %v3313_v31, %v3301_v60  ;;  %4110 = vmatpush.bf16.msra.mxu2 %v8843_v42  ;;  %v9003_v48 = vor.u32 %v10836_v53, %v9002_v46  ;;  %v8860_v31 = vld [vmem:[%s11335_s3 + $0x258] sm:$0xf0]  ;;  %v8970_v60 = vld [vmem:[%s11335_s3 + $0x328] sm:$0xf]  ;;  %v10828_v42 = vld [vmem:[%s11335_s3 + $0x334] sm:$0xf0] }
 0x2ed   :  { %v8863_v56 = vor.u32 %v10798_v0, %v8860_v31  ;;  %v8971_v2 = vor.u32 %v10828_v42, %v8970_v60  ;;  %v9098_v46 = vld [vmem:[%s11345_s14 + $0x30] sm:$0xf]  ;;  %v10860_v53 = vld [vmem:[%s11345_s14 + $0x34] sm:$0xf0]  ;;  %v9090_v0 = vld [vmem:[%s11345_s14 + $0x20] sm:$0xf] }
 0x2ee   :  { %v3320_v15 = vmax.f32 %v3314_v4, 0.0  ;;  %v9099_v35 = vor.u32 %v10860_v53, %v9098_v46  ;;  %v10858_v31 = vld [vmem:[%s11345_s14 + $0x24] sm:$0xf0] }
 0x2ef   :  { %4137 = vmatpush.bf16.msrb.mxu0 %v8575_v62  ;;  %4146 = vmatpush.bf16.msrb.mxu1 %v8767_v5  ;;  %v10794_v62 = vld [vmem:[%s11335_s3 + $0x22c] sm:$0xf]  ;;  %v8954_v5 = vld [vmem:[%s11335_s3 + $0x308] sm:$0xf] }
 0x2f0   :  { %v12659_v21 = vpack.c.bf16 %v3320_v15, %v3320_v15  ;;  %4111 = vmatpush.bf16.msra.mxu2 %v8827_v22  ;;  %v8847_v4 = vor.u32 %v10794_v62, %v8844_v1  ;;  %v8955_v13 = vor.u32 %v10824_v6, %v8954_v5  ;;  %v9071_v15 = vor.u32 %v10850_v10, %v9068_v12  ;;  %v10846_v22 = vld [vmem:[%s11335_s3 + $0x3cc] sm:$0xf]  ;;  %v10882_v60 = vld [vmem:[%s11345_s14 + $0xe4] sm:$0xf0]  ;;  %v9082_v62 = vld [vmem:[%s11345_s14 + $0x10] sm:$0xf] }
 0x2f1   :  { %v3302_v32 = vpop.f32.mrf.mxu2  ;;  %v3315_v34 = vpop.f32.mrf.mxu3  ;;  %v10856_v1 = vld [vmem:[%s11345_s14 + $0x14] sm:$0xf0]  ;;  %v9074_v10 = vld [vmem:[%s11345_s14] sm:$0xf]  ;;  %v10854_v12 = vld [vmem:[%s11345_s14 + $0x4] sm:$0xf0] }
 0x2f2   :  { %4021 = vmatmul.bf16.vlgmr.msra.gmra.mxu3 %v12659_v21  ;;  %4138 = vmatmul.bf16.vlgmr.msrb.gmra.mxu0 %v12541_v16  ;;  %v9035_v16 = vor.u32 %v10844_v40, %v9034_v57  ;;  %v9020_v32 = vld [vmem:[%s11335_s3 + $0x398] sm:$0xf0]  ;;  %v10880_v5 = vld [vmem:[%s11345_s14 + $0xd4] sm:$0xf0] }
 0x2f3   :  { %4117 = vmatpush.bf16.msra.mxu3 %v9067_v18  ;;  %4147 = vmatpush.bf16.msrb.mxu1 %v8751_v24  ;;  %v9052_v18 = vld [vmem:[%s11335_s3 + $0x3d8] sm:$0xf0]  ;;  %v9023_v34 = vor.u32 %v10838_v30, %v9020_v32  ;;  %v9258_v30 = vld [vmem:[%s11345_s14 + $0x170] sm:$0xf] }
 0x2f4   :  { %4156 = vmatpush.bf16.msrb.mxu2 %v8943_v26  ;;  %v9055_v24 = vor.u32 %v10846_v22, %v9052_v18  ;;  %v10842_v26 = vld [vmem:[%s11335_s3 + $0x3ac] sm:$0xf]  ;;  %v8972_v57 = vld [vmem:[%s11335_s3 + $0x338] sm:$0xf0]  ;;  %v10867_v18 = vld [vmem:[%s11345_s14 + $0x74] sm:$0xf] }
 0x2f5   :  { %4112 = vmatmul.bf16.vlgmr.msra.gmra.mxu2 %v12603_v51  ;;  %v9039_v29 = vor.u32 %v10842_v26, %v9036_v27  ;;  %v9162_v27 = vld [vmem:[%s11345_s14 + $0xb0] sm:$0xf] }
 0x2f7   :  { %4118 = vmatpush.bf16.msra.mxu3 %v9051_v39  ;;  %4148 = vmatpush.bf16.msrb.mxu1 %v8735_v8  ;;  %v10830_v39 = vld [vmem:[%s11335_s3 + $0x34c] sm:$0xf]  ;;  %v8988_v8 = vld [vmem:[%s11335_s3 + $0x358] sm:$0xf0] }
 0x2f8   :  { %4157 = vmatpush.bf16.msrb.mxu2 %v8927_v41  ;;  %v8991_v41 = vor.u32 %v10830_v39, %v8988_v8  ;;  %v9127_v8 = vor.u32 %v10865_v37, %v9124_v19  ;;  %v12798_v37 = vld [vmem:[%s11340_s8] sm:$0xf]  ;;  %s13449_s8 = sld [smem:[#allocation11_spill]] }
 0x2fb   :  { %4119 = vmatpush.bf16.msra.mxu3 %v9035_v16  ;;  %4149 = vmatpush.bf16.msrb.mxu1 %v8719_v20  ;;  %v10868_v16 = vld [vmem:[%s11345_s14 + $0x74] sm:$0xf0] }
 0x2fc   :  { %4158 = vmatpush.bf16.msrb.mxu2 %v8911_v17  ;;  %v9131_v20 = vor.u32 %v10868_v16, %v9130_v25  ;;  %v9116_v25 = vld [vmem:[%s11345_s14 + $0x58] sm:$0xf0] }
 0x2fe   :  { %4686 = vmatpush.bf16.msra.mxu0 %v9131_v20 }
 0x2ff   :  { %4120 = vmatpush.bf16.msra.mxu3 %v9019_v49  ;;  %4150 = vmatpush.bf16.msrb.mxu1 %v8703_v11  ;;  %v9106_v11 = vld [vmem:[%s11345_s14 + $0x40] sm:$0xf] }
 0x300   :  { %4159 = vmatpush.bf16.msrb.mxu2 %v8895_v28  ;;  %v10862_v28 = vld [vmem:[%s11345_s14 + $0x44] sm:$0xf0] }
 0x302   :  { %4073 = vmatmul.bf16.vlgmr.msrb.gmra.mxu3 %v12659_v21  ;;  %4151 = vmatmul.bf16.vlgmr.msrb.gmra.mxu1 %v12572_v45  ;;  %v8828_v45 = vld [vmem:[%s11335_s3 + $0x218] sm:$0xf0] }
 0x303   :  { %4121 = vmatpush.bf16.msra.mxu3 %v9003_v48  ;;  %v8831_v14 = vor.u32 %v10790_v7, %v8828_v45  ;;  %4687 = vmatpush.bf16.msra.mxu0 %v9123_v54  ;;  %v10884_v48 = vld [vmem:[%s11345_s14 + $0xf4] sm:$0xf0] }
 0x304   :  { %4160 = vmatpush.bf16.msrb.mxu2 %v8879_v33  ;;  %v9195_v52 = vor.u32 %v10884_v48, %v9194_v47  ;;  %v10872_v54 = vld [vmem:[%s11345_s14 + $0x94] sm:$0xf0]  ;;  %v9138_v47 = vld [vmem:[%s11345_s14 + $0x80] sm:$0xf] }
 0x305   :  { %v9147_v36 = vor.u32 %v10872_v54, %v9146_v58  ;;  %v9234_v48 = vld [vmem:[%s11345_s14 + $0x140] sm:$0xf]  ;;  %v10886_v54 = vld [vmem:[%s11345_s14 + $0x104] sm:$0xf0] }
 0x306   :  { %4699 = vmatpush.bf16.msra.mxu1 %v9195_v52  ;;  %v9202_v58 = vld [vmem:[%s11345_s14 + $0x100] sm:$0xf] }
 0x307   :  { %4122 = vmatpush.bf16.msra.mxu3 %v8987_v55  ;;  %4688 = vmatpush.bf16.msra.mxu0 %v9115_v23  ;;  %v9186_v55 = vld [vmem:[%s11345_s14 + $0xe0] sm:$0xf]  ;;  %v10896_v23 = vld [vmem:[%s11345_s14 + $0x154] sm:$0xf0] }
 0x308   :  { %4161 = vmatpush.bf16.msrb.mxu2 %v8863_v56  ;;  %v9091_v56 = vor.u32 %v10858_v31, %v9090_v0  ;;  %v9187_v42 = vor.u32 %v10882_v60, %v9186_v55  ;;  %v10894_v0 = vld [vmem:[%s11345_s14 + $0x144] sm:$0xf0]  ;;  %v10859_v31 = vld [vmem:[%s11345_s14 + $0x34] sm:$0xf]  ;;  %v9100_v55 = vld [vmem:[%s11345_s14 + $0x38] sm:$0xf0] }
 0x309   :  { %v9103_v60 = vor.u32 %v10859_v31, %v9100_v55  ;;  %v9156_v31 = vld [vmem:[%s11345_s14 + $0xa8] sm:$0xf0] }
 0x30a   :  { %4700 = vmatpush.bf16.msra.mxu1 %v9187_v42  ;;  %v10883_v42 = vld [vmem:[%s11345_s14 + $0xf4] sm:$0xf] }
 0x30b   :  { %4123 = vmatpush.bf16.msra.mxu3 %v8971_v2  ;;  %v9178_v2 = vld [vmem:[%s11345_s14 + $0xd0] sm:$0xf] }
 0x30c   :  { %4162 = vmatpush.bf16.msrb.mxu2 %v8847_v4  ;;  %v9083_v4 = vor.u32 %v10856_v1, %v9082_v62  ;;  %v9179_v45 = vor.u32 %v10880_v5, %v9178_v2  ;;  %v9196_v62 = vld [vmem:[%s11345_s14 + $0xf8] sm:$0xf0]  ;;  %v10892_v5 = vld [vmem:[%s11345_s14 + $0x134] sm:$0xf0] }
 0x30d   :  { %v9199_v1 = vor.u32 %v10883_v42, %v9196_v62  ;;  %v10897_v42 = vld [vmem:[%s11345_s14 + $0x164] sm:$0xf]  ;;  %v9252_v62 = vld [vmem:[%s11345_s14 + $0x168] sm:$0xf0] }
 0x30e   :  { %4701 = vmatpush.bf16.msra.mxu1 %v9179_v45  ;;  %v9092_v45 = vld [vmem:[%s11345_s14 + $0x28] sm:$0xf0] }
 0x30f   :  { %4124 = vmatpush.bf16.msra.mxu3 %v8955_v13  ;;  %v9170_v13 = vld [vmem:[%s11345_s14 + $0xc0] sm:$0xf] }
 0x310   :  { %4163 = vmatpush.bf16.msrb.mxu2 %v8831_v14  ;;  %v9075_v14 = vor.u32 %v10854_v12, %v9074_v10  ;;  %v10881_v10 = vld [vmem:[%s11345_s14 + $0xe4] sm:$0xf] }
 0x312   :  { %4125 = vmatmul.bf16.vlgmr.msra.gmra.mxu3 %v12659_v21 }
 0x313   :  { %4169 = vmatpush.bf16.msrb.mxu3 %v9071_v15  ;;  %4164 = vmatmul.bf16.vlgmr.msrb.gmra.mxu2 %v12603_v51  ;;  %v10826_v51 = vld [vmem:[%s11335_s3 + $0x32c] sm:$0xf]  ;;  %v10878_v15 = vld [vmem:[%s11345_s14 + $0xc4] sm:$0xf0]  ;;  %s13448_s3 = sld [smem:[#allocation16_spill]] }
 0x314   :  { %v8975_v40 = vor.u32 %v10826_v51, %v8972_v57  ;;  %v9171_v22 = vor.u32 %v10878_v15, %v9170_v13  ;;  %v9154_v51 = vld [vmem:[%s11345_s14 + $0xa0] sm:$0xf]  ;;  %v10874_v57 = vld [vmem:[%s11345_s14 + $0xa4] sm:$0xf0] }
 0x315   :  { %v9155_v59 = vor.u32 %v10874_v57, %v9154_v51  ;;  %v10853_v57 = vld [vmem:[%s11345_s14 + $0x4] sm:$0xf] }
 0x316   :  { %4702 = vmatpush.bf16.msra.mxu1 %v9171_v22  ;;  %v9218_v22 = vld [vmem:[%s11345_s14 + $0x120] sm:$0xf] }
 0x317   :  { %4170 = vmatpush.bf16.msrb.mxu3 %v9055_v24  ;;  %v9132_v24 = vld [vmem:[%s11345_s14 + $0x78] sm:$0xf0] }
 0x318   :  { %v9135_v26 = vor.u32 %v10867_v18, %v9132_v24  ;;  %v10890_v18 = vld [vmem:[%s11345_s14 + $0x124] sm:$0xf0] }
 0x319   :  { %v9219_v24 = vor.u32 %v10890_v18, %v9218_v22 }
 0x31b   :  { %4171 = vmatpush.bf16.msrb.mxu3 %v9039_v29  ;;  %v10876_v29 = vld [vmem:[%s11345_s14 + $0xb4] sm:$0xf0] }
 0x31c   :  { %v9163_v32 = vor.u32 %v10876_v29, %v9162_v27  ;;  %v9084_v27 = vld [vmem:[%s11345_s14 + $0x18] sm:$0xf0]  ;;  %v10879_v29 = vld [vmem:[%s11345_s14 + $0xd4] sm:$0xf] }
 0x31e   :  { %4703 = vmatpush.bf16.msra.mxu1 %v9163_v32  ;;  %v9180_v32 = vld [vmem:[%s11345_s14 + $0xd8] sm:$0xf0] }
 0x31f   :  { %4172 = vmatpush.bf16.msrb.mxu3 %v9023_v34  ;;  %v10900_v34 = vld [vmem:[%s11345_s14 + $0x174] sm:$0xf0] }
 0x320   :  { %v9259_v39 = vor.u32 %v10900_v34, %v9258_v30  ;;  %v9183_v34 = vor.u32 %v10879_v29, %v9180_v32  ;;  %v10910_v29 = vld [vmem:[%s11345_s14 + $0x1c4] sm:$0xf0] }
 0x322   :  { %4712 = vmatpush.bf16.msra.mxu2 %v9259_v39  ;;  %4704 = vmatpush.bf16.msra.mxu1 %v9155_v59  ;;  %v9210_v39 = vld [vmem:[%s11345_s14 + $0x110] sm:$0xf]  ;;  %v10877_v59 = vld [vmem:[%s11345_s14 + $0xc4] sm:$0xf] }
 0x323   :  { %4173 = vmatpush.bf16.msrb.mxu3 %v9007_v38 }
 0x326   :  { %4705 = vmatpush.bf16.msra.mxu1 %v9147_v36  ;;  %v9203_v36 = vor.u32 %v10886_v54, %v9202_v58  ;;  %v10891_v54 = vld [vmem:[%s11345_s14 + $0x134] sm:$0xf] }
 0x327   :  { %4174 = vmatpush.bf16.msrb.mxu3 %v8991_v41 }
 0x32b   :  { %4175 = vmatpush.bf16.msrb.mxu3 %v8975_v40  ;;  %v9250_v40 = vld [vmem:[%s11345_s14 + $0x160] sm:$0xf] }
 0x32c   :  { %v9251_v16 = vor.u32 %v10898_v63, %v9250_v40  ;;  %v9076_v40 = vld [vmem:[%s11345_s14 + $0x8] sm:$0xf0] }
 0x32e   :  { %4713 = vmatpush.bf16.msra.mxu2 %v9251_v16  ;;  %v3326_v16 = vperm.slane %v12798_v37, 0 }
 0x32f   :  { %4176 = vmatpush.bf16.msrb.mxu3 %v8959_v43  ;;  %v12721_v17 = vpop.f32.mrf.mxu0  ;;  %v10863_v43 = vld [vmem:[%s11345_s14 + $0x54] sm:$0xf] }
 0x330   :  { %v9119_v20 = vor.u32 %v10863_v43, %v9116_v25  ;;  %v9079_v43 = vor.u32 %v10853_v57, %v9076_v40  ;;  %v9172_v25 = vld [vmem:[%s11345_s14 + $0xc8] sm:$0xf0]  ;;  %v3984_v55 = vadd.f32 %v12721_v17, %v3326_v16  ;;  %v9306_v17 = vld [vmem:[%s11345_s14 + $0x1d0] sm:$0xf]  ;;  %v10908_v16 = vld [vmem:[%s11345_s14 + $0x1b4] sm:$0xf0] }
 0x331   :  { %v9236_v40 = vld [vmem:[%s11345_s14 + $0x148] sm:$0xf0] }
 0x332   :  { %4177 = vmatmul.bf16.vlgmr.msrb.gmra.mxu3 %v12659_v21  ;;  %v9107_v21 = vor.u32 %v10862_v28, %v9106_v11  ;;  %v9108_v11 = vld [vmem:[%s11345_s14 + $0x48] sm:$0xf0] }
 0x334   :  { %4689 = vmatpush.bf16.msra.mxu0 %v9107_v21  ;;  %v9243_v21 = vor.u32 %v10896_v23, %v9242_v44  ;;  %v9322_v44 = vld [vmem:[%s11345_s14 + $0x1f0] sm:$0xf]  ;;  %v10916_v23 = vld [vmem:[%s11345_s14 + $0x1f4] sm:$0xf0] }
 0x336   :  { %4714 = vmatpush.bf16.msra.mxu2 %v9243_v21 }
 0x337   :  { %v3985_v49 = vpop.f32.mrf.mxu0 }
 0x338   :  { %4690 = vmatpush.bf16.msra.mxu0 %v9099_v35  ;;  %v10861_v49 = vld [vmem:[%s11345_s14 + $0x44] sm:$0xf]  ;;  %v10870_v35 = vld [vmem:[%s11345_s14 + $0x84] sm:$0xf0] }
 0x339   :  { %v9111_v46 = vor.u32 %v10861_v49, %v9108_v11  ;;  %v9139_v52 = vor.u32 %v10870_v35, %v9138_v47  ;;  %v10875_v49 = vld [vmem:[%s11345_s14 + $0xb4] sm:$0xf]  ;;  %v9164_v11 = vld [vmem:[%s11345_s14 + $0xb8] sm:$0xf0]  ;;  %v9314_v47 = vld [vmem:[%s11345_s14 + $0x1e0] sm:$0xf] }
 0x33a   :  { %v9167_v21 = vor.u32 %v10875_v49, %v9164_v11  ;;  %v10906_v49 = vld [vmem:[%s11345_s14 + $0x1a4] sm:$0xf0]  ;;  %v10889_v11 = vld [vmem:[%s11345_s14 + $0x124] sm:$0xf] }
 0x33b   :  { %4706 = vmatpush.bf16.msra.mxu1 %v9139_v52  ;;  %v10914_v52 = vld [vmem:[%s11345_s14 + $0x1e4] sm:$0xf0] }
 0x33c   :  { %4691 = vmatpush.bf16.msra.mxu0 %v9091_v56  ;;  %v9235_v56 = vor.u32 %v10894_v0, %v9234_v48  ;;  %v10873_v0 = vld [vmem:[%s11345_s14 + $0xa4] sm:$0xf] }
 0x33e   :  { %4715 = vmatpush.bf16.msra.mxu2 %v9235_v56 }
 0x33f   :  { %v12733_v33 = vpop.f32.mrf.mxu1  ;;  %v12735_v50 = vpop.f32.mrf.mxu0  ;;  %4751 = vmatpush.bf16.msrb.mxu1 %v9199_v1  ;;  %v9159_v1 = vor.u32 %v10873_v0, %v9156_v31  ;;  %v10904_v0 = vld [vmem:[%s11345_s14 + $0x194] sm:$0xf0] }
 0x340   :  { %4692 = vmatpush.bf16.msra.mxu0 %v9083_v4  ;;  %v9226_v4 = vld [vmem:[%s11345_s14 + $0x130] sm:$0xf] }
 0x344   :  { %4693 = vmatpush.bf16.msra.mxu0 %v9075_v14  ;;  %v9188_v14 = vld [vmem:[%s11345_s14 + $0xe8] sm:$0xf0] }
 0x345   :  { %v9191_v15 = vor.u32 %v10881_v10, %v9188_v14  ;;  %v10871_v10 = vld [vmem:[%s11345_s14 + $0x94] sm:$0xf] }
 0x346   :  { %v10895_v14 = vld [vmem:[%s11345_s14 + $0x154] sm:$0xf] }
 0x347   :  { %v3998_v6 = vpop.f32.mrf.mxu1  ;;  %v4037_v7 = vpop.f32.mrf.mxu0  ;;  %4752 = vmatpush.bf16.msrb.mxu1 %v9191_v15 }
 0x348   :  { %4738 = vmatpush.bf16.msrb.mxu0 %v9135_v26  ;;  %v9227_v6 = vor.u32 %v10892_v5, %v9226_v4  ;;  %v10857_v7 = vld [vmem:[%s11345_s14 + $0x24] sm:$0xf]  ;;  %v10855_v26 = vld [vmem:[%s11345_s14 + $0x14] sm:$0xf]  ;;  %v3997_v4 = vadd.f32 %v12733_v33, %v3984_v55  ;;  %v4182_v33 = vunpack.c.l.bf16 %v12222_v61 }
 0x349   :  { %v9095_v13 = vor.u32 %v10857_v7, %v9092_v45  ;;  %v9087_v30 = vor.u32 %v10855_v26, %v9084_v27  ;;  %v9298_v27 = vld [vmem:[%s11345_s14 + $0x1c0] sm:$0xf]  ;;  %v10887_v55 = vld [vmem:[%s11345_s14 + $0x114] sm:$0xf] }
 0x34a   :  { %4716 = vmatpush.bf16.msra.mxu2 %v9227_v6  ;;  %v10912_v6 = vld [vmem:[%s11345_s14 + $0x1d4] sm:$0xf0]  ;;  %v9299_v32 = vor.u32 %v10910_v29, %v9298_v27  ;;  %v10911_v27 = vld [vmem:[%s11345_s14 + $0x1d4] sm:$0xf]  ;;  %v9308_v29 = vld [vmem:[%s11345_s14 + $0x1d8] sm:$0xf0] }
 0x34b   :  { %4753 = vmatpush.bf16.msrb.mxu1 %v9183_v34  ;;  %v9307_v45 = vor.u32 %v10912_v6, %v9306_v17  ;;  %v10869_v34 = vld [vmem:[%s11345_s14 + $0x84] sm:$0xf]  ;;  %v4183_v17 = vunpack.c.h.bf16 %v12222_v61  ;;  %v9204_v6 = vld [vmem:[%s11345_s14 + $0x108] sm:$0xf0] }
 0x34c   :  { %4739 = vmatpush.bf16.msrb.mxu0 %v9127_v8  ;;  %v10888_v8 = vld [vmem:[%s11345_s14 + $0x114] sm:$0xf0] }
 0x34d   :  { %v9211_v51 = vor.u32 %v10888_v8, %v9210_v39  ;;  %v9140_v39 = vld [vmem:[%s11345_s14 + $0x88] sm:$0xf0]  ;;  %v10893_v8 = vld [vmem:[%s11345_s14 + $0x144] sm:$0xf] }
 0x34e   :  { %4717 = vmatpush.bf16.msra.mxu2 %v9219_v24  ;;  %v9143_v57 = vor.u32 %v10869_v34, %v9140_v39  ;;  %v9311_v34 = vor.u32 %v10911_v27, %v9308_v29  ;;  %v9364_v27 = vld [vmem:[%s11355_s24 + $0x48] sm:$0xf0] }
 0x34f   :  { %v12757_v38 = vpop.f32.mrf.mxu1 }
 0x350   :  { %4740 = vmatpush.bf16.msrb.mxu0 %v9119_v20  ;;  %v9175_v20 = vor.u32 %v10877_v59, %v9172_v25  ;;  %v9239_v59 = vor.u32 %v10893_v8, %v9236_v40  ;;  %v9290_v25 = vld [vmem:[%s11345_s14 + $0x1b0] sm:$0xf] }
 0x351   :  { %v12759_v41 = vpop.f32.mrf.mxu0  ;;  %v9291_v58 = vor.u32 %v10908_v16, %v9290_v25  ;;  %v10907_v16 = vld [vmem:[%s11345_s14 + $0x1b4] sm:$0xf] }
 0x352   :  { %4718 = vmatpush.bf16.msra.mxu2 %v9211_v51  ;;  %4754 = vmatpush.bf16.msrb.mxu1 %v9175_v20 }
 0x354   :  { %4741 = vmatpush.bf16.msrb.mxu0 %v9111_v46  ;;  %v10899_v46 = vld [vmem:[%s11345_s14 + $0x174] sm:$0xf] }
 0x355   :  { %v12767_v9 = vpop.f32.mrf.mxu2 }
 0x356   :  { %4719 = vmatpush.bf16.msra.mxu2 %v9203_v36  ;;  %4755 = vmatpush.bf16.msrb.mxu1 %v9167_v21  ;;  %v4010_v5 = vadd.f32 %v12767_v9, %v3997_v4  ;;  %v9244_v9 = vld [vmem:[%s11345_s14 + $0x158] sm:$0xf0]  ;;  %v10885_v4 = vld [vmem:[%s11345_s14 + $0x104] sm:$0xf] }
 0x357   :  { %v4050_v28 = vpop.f32.mrf.mxu1  ;;  %v9247_v24 = vor.u32 %v10895_v14, %v9244_v9  ;;  %v10913_v9 = vld [vmem:[%s11345_s14 + $0x1e4] sm:$0xf] }
 0x358   :  { %4742 = vmatpush.bf16.msrb.mxu0 %v9103_v60  ;;  %v9323_v28 = vor.u32 %v10916_v23, %v9322_v44  ;;  %v9315_v60 = vor.u32 %v10914_v52, %v9314_v47  ;;  %v9228_v44 = vld [vmem:[%s11345_s14 + $0x138] sm:$0xf0]  ;;  %v9282_v23 = vld [vmem:[%s11345_s14 + $0x1a0] sm:$0xf]  ;;  %v9274_v52 = vld [vmem:[%s11345_s14 + $0x190] sm:$0xf] }
 0x359   :  { %v4089_v53 = vpop.f32.mrf.mxu0  ;;  %v9231_v36 = vor.u32 %v10891_v54, %v9228_v44  ;;  %v9284_v54 = vld [vmem:[%s11345_s14 + $0x1a8] sm:$0xf0] }
 0x35a   :  { %v9260_v53 = vld [vmem:[%s11345_s14 + $0x178] sm:$0xf0]  ;;  %4725 = vmatpush.bf16.msra.mxu3 %v9323_v28  ;;  %4756 = vmatpush.bf16.msrb.mxu1 %v9159_v1  ;;  %v9220_v28 = vld [vmem:[%s11345_s14 + $0x128] sm:$0xf0]  ;;  %v9266_v1 = vld [vmem:[%s11345_s14 + $0x180] sm:$0xf] }
 0x35b   :  { %v9263_v48 = vor.u32 %v10899_v46, %v9260_v53  ;;  %v9283_v53 = vor.u32 %v10906_v49, %v9282_v23 }
 0x35c   :  { %4743 = vmatpush.bf16.msrb.mxu0 %v9095_v13  ;;  %v9148_v13 = vld [vmem:[%s11345_s14 + $0x98] sm:$0xf0] }
 0x35d   :  { %v4011_v2 = vpop.f32.mrf.mxu2  ;;  %4764 = vmatpush.bf16.msrb.mxu2 %v9263_v48  ;;  %v9151_v22 = vor.u32 %v10871_v10, %v9148_v13  ;;  %v9223_v48 = vor.u32 %v10889_v11, %v9220_v28  ;;  %v9207_v13 = vor.u32 %v10885_v4, %v9204_v6  ;;  %v10903_v11 = vld [vmem:[%s11345_s14 + $0x194] sm:$0xf]  ;;  %v9276_v28 = vld [vmem:[%s11345_s14 + $0x198] sm:$0xf0]  ;;  %v10930_v6 = vld [vmem:[%s11355_s24 + $0x64] sm:$0xf0] }
 0x35e   :  { %v9255_v2 = vor.u32 %v10897_v42, %v9252_v62  ;;  %4726 = vmatpush.bf16.msra.mxu3 %v9315_v60  ;;  %v9275_v60 = vor.u32 %v10904_v0, %v9274_v52  ;;  %v3329_v52 = vperm.slane %v12798_v37, 3 }
 0x35f   :  { %v12788_v12 = vpop.f32.mrf.mxu1  ;;  %4757 = vmatpush.bf16.msrb.mxu1 %v9151_v22 }
 0x360   :  { %4744 = vmatpush.bf16.msrb.mxu0 %v9087_v30 }
 0x361   :  { %4765 = vmatpush.bf16.msrb.mxu2 %v9255_v2  ;;  %v10902_v2 = vld [vmem:[%s11345_s14 + $0x184] sm:$0xf0] }
 0x362   :  { %4727 = vmatpush.bf16.msra.mxu3 %v9307_v45 }
 0x363   :  { %4758 = vmatpush.bf16.msrb.mxu1 %v9143_v57  ;;  %v9300_v57 = vld [vmem:[%s11345_s14 + $0x1c8] sm:$0xf0] }
 0x364   :  { %4745 = vmatpush.bf16.msrb.mxu0 %v9079_v43 }
 0x365   :  { %v12800_v19 = vpop.f32.mrf.mxu2  ;;  %4766 = vmatpush.bf16.msrb.mxu2 %v9247_v24 }
 0x366   :  { %4728 = vmatpush.bf16.msra.mxu3 %v9299_v32 }
 0x367   :  { %v4102_v63 = vpop.f32.mrf.mxu1 }
 0x368   :  { %v3327_v63 = vperm.slane %v12798_v37, 1 }
 0x369   :  { %4767 = vmatpush.bf16.msrb.mxu2 %v9239_v59  ;;  %v4184_v59 = vunpack.c.l.bf16 %v12312_v3 }
 0x36a   :  { %v4036_v21 = vadd.f32 %v12735_v50, %v3327_v63  ;;  %4729 = vmatpush.bf16.msra.mxu3 %v9291_v58  ;;  %v10905_v58 = vld [vmem:[%s11345_s14 + $0x1a4] sm:$0xf] }
 0x36b   :  { %v9287_v23 = vor.u32 %v10905_v58, %v9284_v54  ;;  %v9442_v58 = vld [vmem:[%s11355_s24 + $0xe0] sm:$0xf] }
 0x36c   :  { %v4049_v31 = vadd.f32 %v12757_v38, %v4036_v21  ;;  %v9324_v38 = vld [vmem:[%s11345_s14 + $0x1f8] sm:$0xf0]  ;;  %v9279_v21 = vor.u32 %v10903_v11, %v9276_v28 }
 0x36d   :  { %v4063_v56 = vpop.f32.mrf.mxu2  ;;  %4768 = vmatpush.bf16.msrb.mxu2 %v9231_v36 }
 0x36e   :  { %v9212_v56 = vld [vmem:[%s11345_s14 + $0x118] sm:$0xf0]  ;;  %v4062_v50 = vadd.f32 %v12800_v19, %v4049_v31  ;;  %4730 = vmatpush.bf16.msra.mxu3 %v9283_v53  ;;  %v9267_v19 = vor.u32 %v10902_v2, %v9266_v1  ;;  %v10901_v53 = vld [vmem:[%s11345_s14 + $0x184] sm:$0xf]  ;;  %v10931_v2 = vld [vmem:[%s11355_s24 + $0x74] sm:$0xf] }
 0x36f   :  { %v12818_v35 = vpop.f32.mrf.mxu0  ;;  %v9215_v62 = vor.u32 %v10887_v55, %v9212_v56 }
 0x370   :  { %v4140_v0 = vadd.f32 %v12818_v35, %v3329_v52  ;;  %v9386_v35 = vld [vmem:[%s11355_s24 + $0x70] sm:$0xf]  ;;  %v10920_v52 = vld [vmem:[%s11355_s24 + $0x14] sm:$0xf0] }
 0x371   :  { %4769 = vmatpush.bf16.msrb.mxu2 %v9223_v48 }
 0x372   :  { %4731 = vmatpush.bf16.msra.mxu3 %v9275_v60  ;;  %v4185_v60 = vunpack.c.h.bf16 %v12312_v3 }
 0x375   :  { %v4022_v7 = vpop.f32.mrf.mxu3  ;;  %4770 = vmatpush.bf16.msrb.mxu2 %v9215_v62 }
 0x376   :  { %v4023_v15 = vadd.f32 %v4022_v7, %v4010_v5  ;;  %v10915_v7 = vld [vmem:[%s11345_s14 + $0x1f4] sm:$0xf]  ;;  %4732 = vmatpush.bf16.msra.mxu3 %v9267_v19  ;;  %v9370_v19 = vld [vmem:[%s11355_s24 + $0x50] sm:$0xf] }
 0x377   :  { %v4141_v18 = vpop.f32.mrf.mxu0  ;;  %v9327_v14 = vor.u32 %v10915_v7, %v9324_v38  ;;  %v10929_v7 = vld [vmem:[%s11355_s24 + $0x64] sm:$0xf] }
 0x378   :  { %v4186_v26 = vadd.f32 %v4182_v33, %v4023_v15  ;;  %v12837_v30 = vpop.f32.mrf.mxu2  ;;  %v3328_v33 = vperm.slane %v12798_v37, 2  ;;  %v9316_v18 = vld [vmem:[%s11345_s14 + $0x1e8] sm:$0xf0] }
 0x379   :  { %4771 = vmatpush.bf16.msrb.mxu2 %v9207_v13  ;;  %v9319_v24 = vor.u32 %v10913_v9, %v9316_v18  ;;  %v10928_v13 = vld [vmem:[%s11355_s24 + $0x54] sm:$0xf0]  ;;  %v9362_v9 = vld [vmem:[%s11355_s24 + $0x40] sm:$0xf]  ;;  %v10926_v18 = vld [vmem:[%s11355_s24 + $0x44] sm:$0xf0] }
 0x37a   :  { %v4190_v51 = vmax.f32 %v4186_v26, 0.0  ;;  %4777 = vmatpush.bf16.msrb.mxu3 %v9327_v14  ;;  %v4088_v26 = vadd.f32 %v12759_v41, %v3328_v33  ;;  %v10927_v14 = vld [vmem:[%s11355_s24 + $0x54] sm:$0xf]  ;;  %v9372_v33 = vld [vmem:[%s11355_s24 + $0x58] sm:$0xf0] }
 0x37c   :  { %v12844_v43 = vpack.c.bf16 %v4190_v51, %v4190_v51  ;;  %v4101_v32 = vadd.f32 %v12788_v12, %v4088_v26  ;;  %v10909_v51 = vld [vmem:[%s11345_s14 + $0x1c4] sm:$0xf]  ;;  %v9292_v12 = vld [vmem:[%s11345_s14 + $0x1b8] sm:$0xf0]  ;;  %v9363_v26 = vor.u32 %v10926_v18, %v9362_v9  ;;  %v10996_v9 = vld [vmem:[%s11365_s6 + $0x174] sm:$0xf0] }
 0x37d   :  { %v4024_v20 = vpop.f32.mrf.mxu3  ;;  %v9303_v63 = vor.u32 %v10909_v51, %v9300_v57  ;;  %v10948_v51 = vld [vmem:[%s11355_s24 + $0xf4] sm:$0xf0]  ;;  %v10923_v57 = vld [vmem:[%s11355_s24 + $0x34] sm:$0xf] }
 0x37e   :  { %4694 = vmatmul.bf16.vlgmr.msra.gmra.mxu0 %v12844_v43  ;;  %4778 = vmatpush.bf16.msrb.mxu3 %v9319_v24  ;;  %v4114_v39 = vadd.f32 %v12837_v30, %v4101_v32  ;;  %v9295_v30 = vor.u32 %v10907_v16, %v9292_v12  ;;  %v10925_v24 = vld [vmem:[%s11355_s24 + $0x44] sm:$0xf]  ;;  %v9354_v32 = vld [vmem:[%s11355_s24 + $0x30] sm:$0xf]  ;;  %v9452_v16 = vld [vmem:[%s11355_s24 + $0xf8] sm:$0xf0] }
 0x37f   :  { %v12856_v46 = vpop.f32.mrf.mxu1  ;;  %v9367_v29 = vor.u32 %v10925_v24, %v9364_v27  ;;  %v9418_v24 = vld [vmem:[%s11355_s24 + $0xb0] sm:$0xf]  ;;  %v10939_v27 = vld [vmem:[%s11355_s24 + $0xb4] sm:$0xf] }
 0x380   :  { %v4115_v47 = vpop.f32.mrf.mxu2  ;;  %v4153_v31 = vadd.f32 %v12856_v46, %v4140_v0  ;;  %v10932_v46 = vld [vmem:[%s11355_s24 + $0x74] sm:$0xf0]  ;;  %v9434_v0 = vld [vmem:[%s11355_s24 + $0xd0] sm:$0xf] }
 0x381   :  { %v9268_v47 = vld [vmem:[%s11345_s14 + $0x188] sm:$0xf0]  ;;  %v9387_v4 = vor.u32 %v10932_v46, %v9386_v35  ;;  %v9436_v35 = vld [vmem:[%s11355_s24 + $0xd8] sm:$0xf0]  ;;  %v9330_v46 = vld [vmem:[%s11355_s24] sm:$0xf] }
 0x382   :  { %4779 = vmatpush.bf16.msrb.mxu3 %v9311_v34  ;;  %v9271_v48 = vor.u32 %v10901_v53, %v9268_v47  ;;  %v10924_v34 = vld [vmem:[%s11355_s24 + $0x34] sm:$0xf0]  ;;  %v9444_v53 = vld [vmem:[%s11355_s24 + $0xe8] sm:$0xf0]  ;;  %s13450_s14 = sld [smem:[#allocation15_spill]] }
 0x383   :  { %4959 = vmatpush.bf16.msra.mxu0 %v9387_v4  ;;  %v10918_v4 = vld [vmem:[%s11355_s24 + $0x4] sm:$0xf0] }
 0x385   :  { %v4074_v42 = vpop.f32.mrf.mxu3 }
 0x386   :  { %v4075_v5 = vadd.f32 %v4074_v42, %v4062_v50  ;;  %4780 = vmatpush.bf16.msrb.mxu3 %v9303_v63 }
 0x387   :  { %v4154_v10 = vpop.f32.mrf.mxu1 }
 0x388   :  { %v4187_v45 = vadd.f32 %v4183_v17, %v4075_v5  ;;  %v9388_v5 = vld [vmem:[%s11355_s24 + $0x78] sm:$0xf0]  ;;  %v9378_v17 = vld [vmem:[%s11355_s24 + $0x60] sm:$0xf] }
 0x389   :  { %v9391_v3 = vor.u32 %v10931_v2, %v9388_v5  ;;  %v9379_v38 = vor.u32 %v10930_v6, %v9378_v17  ;;  %v9426_v5 = vld [vmem:[%s11355_s24 + $0xc0] sm:$0xf]  ;;  %v9331_v17 = vor.u32 %v10918_v4, %v9330_v46  ;;  %v10933_v4 = vld [vmem:[%s11355_s24 + $0x84] sm:$0xf] }
 0x38a   :  { %v4191_v15 = vmax.f32 %v4187_v45, 0.0  ;;  %4781 = vmatpush.bf16.msrb.mxu3 %v9295_v30  ;;  %v9380_v45 = vld [vmem:[%s11355_s24 + $0x68] sm:$0xf0]  ;;  %v10922_v30 = vld [vmem:[%s11355_s24 + $0x24] sm:$0xf0] }
 0x38b   :  { %v9383_v10 = vor.u32 %v10929_v7, %v9380_v45  ;;  %4960 = vmatpush.bf16.msra.mxu0 %v9379_v38  ;;  %v10917_v7 = vld [vmem:[%s11355_s24 + $0x4] sm:$0xf]  ;;  %v9332_v38 = vld [vmem:[%s11355_s24 + $0x8] sm:$0xf0] }
 0x38c   :  { %v12872_v22 = vpack.c.bf16 %v4191_v15, %v4191_v15  ;;  %v9371_v15 = vor.u32 %v10928_v13, %v9370_v19  ;;  %v10941_v45 = vld [vmem:[%s11355_s24 + $0xc4] sm:$0xf]  ;;  %v9428_v19 = vld [vmem:[%s11355_s24 + $0xc8] sm:$0xf0]  ;;  %v9514_v13 = vld [vmem:[%s11365_s6 + $0x70] sm:$0xf] }
 0x38d   :  { %v4076_v61 = vpop.f32.mrf.mxu3 }
 0x38e   :  { %4707 = vmatmul.bf16.vlgmr.msra.gmra.mxu1 %v12872_v22  ;;  %4746 = vmatmul.bf16.vlgmr.msrb.gmra.mxu0 %v12844_v43  ;;  %v9375_v61 = vor.u32 %v10927_v14, %v9372_v33  ;;  %v10964_v14 = vld [vmem:[%s11365_s6 + $0x74] sm:$0xf0] }
 0x38f   :  { %4782 = vmatpush.bf16.msrb.mxu3 %v9287_v23  ;;  %4961 = vmatpush.bf16.msra.mxu0 %v9371_v15  ;;  %v10921_v23 = vld [vmem:[%s11355_s24 + $0x24] sm:$0xf]  ;;  %v9431_v15 = vor.u32 %v10941_v45, %v9428_v19  ;;  %v9515_v33 = vor.u32 %v10964_v14, %v9514_v13  ;;  %v9610_v19 = vld [vmem:[%s11365_s6 + $0x130] sm:$0xf]  ;;  %v10988_v13 = vld [vmem:[%s11365_s6 + $0x134] sm:$0xf0] }
 0x393   :  { %4783 = vmatpush.bf16.msrb.mxu3 %v9279_v21  ;;  %4962 = vmatpush.bf16.msra.mxu0 %v9363_v26  ;;  %v10945_v21 = vld [vmem:[%s11355_s24 + $0xe4] sm:$0xf]  ;;  %v10940_v26 = vld [vmem:[%s11355_s24 + $0xb4] sm:$0xf0] }
 0x394   :  { %v9447_v47 = vor.u32 %v10945_v21, %v9444_v53  ;;  %v9402_v53 = vld [vmem:[%s11355_s24 + $0x90] sm:$0xf] }
 0x395   :  { %v4126_v8 = vpop.f32.mrf.mxu3 }
 0x396   :  { %v4127_v40 = vadd.f32 %v4126_v8, %v4114_v39  ;;  %v4165_v41 = vpop.f32.mrf.mxu2  ;;  %v9450_v39 = vld [vmem:[%s11355_s24 + $0xf0] sm:$0xf]  ;;  %v9355_v8 = vor.u32 %v10924_v34, %v9354_v32  ;;  %v9420_v32 = vld [vmem:[%s11355_s24 + $0xb8] sm:$0xf0]  ;;  %v9506_v34 = vld [vmem:[%s11365_s6 + $0x60] sm:$0xf] }
 0x397   :  { %4784 = vmatpush.bf16.msrb.mxu3 %v9271_v48  ;;  %v4166_v55 = vadd.f32 %v4165_v41, %v4153_v31  ;;  %v9451_v41 = vor.u32 %v10948_v51, %v9450_v39  ;;  %v9338_v48 = vld [vmem:[%s11355_s24 + $0x10] sm:$0xf]  ;;  %v10962_v39 = vld [vmem:[%s11365_s6 + $0x64] sm:$0xf0] }
 0x398   :  { %v4188_v25 = vadd.f32 %v4184_v59, %v4127_v40  ;;  %v9356_v40 = vld [vmem:[%s11355_s24 + $0x38] sm:$0xf0]  ;;  %4963 = vmatpush.bf16.msra.mxu0 %v9355_v8  ;;  %v9339_v31 = vor.u32 %v10920_v52, %v9338_v48  ;;  %v10935_v48 = vld [vmem:[%s11355_s24 + $0x94] sm:$0xf] }
 0x399   :  { %v9359_v63 = vor.u32 %v10923_v57, %v9356_v40  ;;  %4972 = vmatpush.bf16.msra.mxu1 %v9451_v41  ;;  %v9423_v57 = vor.u32 %v10939_v27, %v9420_v32  ;;  %v9507_v40 = vor.u32 %v10962_v39, %v9506_v34  ;;  %v9634_v41 = vld [vmem:[%s11365_s6 + $0x160] sm:$0xf]  ;;  %v10986_v34 = vld [vmem:[%s11365_s6 + $0x124] sm:$0xf0] }
 0x39a   :  { %v4192_v20 = vmax.f32 %v4188_v25, 0.0  ;;  %v10947_v25 = vld [vmem:[%s11355_s24 + $0xf4] sm:$0xf]  ;;  %v9602_v32 = vld [vmem:[%s11365_s6 + $0x120] sm:$0xf] }
 0x39b   :  { %v9455_v12 = vor.u32 %v10947_v25, %v9452_v16  ;;  %v9410_v25 = vld [vmem:[%s11355_s24 + $0xa0] sm:$0xf] }
 0x39c   :  { %v12890_v44 = vpack.c.bf16 %v4192_v20, %v4192_v20  ;;  %v9346_v20 = vld [vmem:[%s11355_s24 + $0x20] sm:$0xf] }
 0x39d   :  { %v4128_v36 = vpop.f32.mrf.mxu3  ;;  %v9347_v54 = vor.u32 %v10922_v30, %v9346_v20  ;;  %v10937_v20 = vld [vmem:[%s11355_s24 + $0xa4] sm:$0xf]  ;;  %v9412_v30 = vld [vmem:[%s11355_s24 + $0xa8] sm:$0xf0] }
 0x39e   :  { %v4167_v49 = vpop.f32.mrf.mxu2  ;;  %4720 = vmatmul.bf16.vlgmr.msra.gmra.mxu2 %v12890_v44  ;;  %4759 = vmatmul.bf16.vlgmr.msrb.gmra.mxu1 %v12872_v22  ;;  %v10946_v36 = vld [vmem:[%s11355_s24 + $0xe4] sm:$0xf0] }
 0x39f   :  { %4985 = vmatpush.bf16.msra.mxu2 %v9391_v3  ;;  %v9348_v49 = vld [vmem:[%s11355_s24 + $0x28] sm:$0xf0]  ;;  %v9443_v11 = vor.u32 %v10946_v36, %v9442_v58  ;;  %4964 = vmatpush.bf16.msra.mxu0 %v9347_v54  ;;  %v10942_v3 = vld [vmem:[%s11355_s24 + $0xc4] sm:$0xf0]  ;;  %v9498_v54 = vld [vmem:[%s11365_s6 + $0x50] sm:$0xf] }
 0x3a0   :  { %v9351_v28 = vor.u32 %v10921_v23, %v9348_v49  ;;  %v9427_v6 = vor.u32 %v10942_v3, %v9426_v5  ;;  %v10960_v36 = vld [vmem:[%s11365_s6 + $0x54] sm:$0xf0]  ;;  %v9626_v23 = vld [vmem:[%s11365_s6 + $0x150] sm:$0xf]  ;;  %v9415_v49 = vor.u32 %v10937_v20, %v9412_v30  ;;  %v9396_v5 = vld [vmem:[%s11355_s24 + $0x88] sm:$0xf0] }
 0x3a1   :  { %4973 = vmatpush.bf16.msra.mxu1 %v9443_v11  ;;  %v9499_v11 = vor.u32 %v10960_v36, %v9498_v54  ;;  %v9562_v20 = vld [vmem:[%s11365_s6 + $0xd0] sm:$0xf]  ;;  %v10984_v36 = vld [vmem:[%s11365_s6 + $0x114] sm:$0xf0] }
 0x3a2   :  { %v9594_v54 = vld [vmem:[%s11365_s6 + $0x110] sm:$0xf] }
 0x3a3   :  { %4986 = vmatpush.bf16.msra.mxu2 %v9383_v10  ;;  %4965 = vmatpush.bf16.msra.mxu0 %v9339_v31  ;;  %v9335_v10 = vor.u32 %v10917_v7, %v9332_v38  ;;  %v9490_v31 = vld [vmem:[%s11365_s6 + $0x40] sm:$0xf]  ;;  %v9578_v7 = vld [vmem:[%s11365_s6 + $0xf0] sm:$0xf]  ;;  %v9399_v38 = vor.u32 %v10933_v4, %v9396_v5 }
 0x3a4   :  { %v9674_v4 = vld [vmem:[%s11365_s6 + $0x1b0] sm:$0xf] }
 0x3a7   :  { %4987 = vmatpush.bf16.msra.mxu2 %v9375_v61  ;;  %v9642_v61 = vld [vmem:[%s11365_s6 + $0x170] sm:$0xf]  ;;  %4966 = vmatpush.bf16.msra.mxu0 %v9331_v17 }
 0x3a8   :  { %v9643_v18 = vor.u32 %v10996_v9, %v9642_v61  ;;  %v9482_v17 = vld [vmem:[%s11365_s6 + $0x30] sm:$0xf]  ;;  %v11012_v61 = vld [vmem:[%s11365_s6 + $0x1f4] sm:$0xf0] }
 0x3ab   :  { %4988 = vmatpush.bf16.msra.mxu2 %v9367_v29  ;;  %5336 = vmatpush.bf16.msrb.mxu0 %v9515_v33  ;;  %v9419_v29 = vor.u32 %v10940_v26, %v9418_v24  ;;  %v9706_v33 = vld [vmem:[%s11365_s6 + $0x1f0] sm:$0xf]  ;;  %v10954_v24 = vld [vmem:[%s11365_s6 + $0x24] sm:$0xf0]  ;;  %v9570_v26 = vld [vmem:[%s11365_s6 + $0xe0] sm:$0xf] }
 0x3ac   :  { %v9707_v9 = vor.u32 %v11012_v61, %v9706_v33  ;;  %v9658_v33 = vld [vmem:[%s11365_s6 + $0x190] sm:$0xf] }
 0x3ae   :  { %4772 = vmatmul.bf16.vlgmr.msrb.gmra.mxu2 %v12890_v44 }
 0x3af   :  { %4989 = vmatpush.bf16.msra.mxu2 %v9359_v63  ;;  %v10994_v63 = vld [vmem:[%s11365_s6 + $0x164] sm:$0xf0]  ;;  %5337 = vmatpush.bf16.msrb.mxu0 %v9507_v40  ;;  %v9603_v40 = vor.u32 %v10986_v34, %v9602_v32  ;;  %v9650_v32 = vld [vmem:[%s11365_s6 + $0x180] sm:$0xf] }
 0x3b0   :  { %v9635_v16 = vor.u32 %v10994_v63, %v9634_v41  ;;  %v9698_v41 = vld [vmem:[%s11365_s6 + $0x1e0] sm:$0xf]  ;;  %v11010_v63 = vld [vmem:[%s11365_s6 + $0x1e4] sm:$0xf0] }
 0x3b3   :  { %4990 = vmatpush.bf16.msra.mxu2 %v9351_v28  ;;  %v10992_v28 = vld [vmem:[%s11365_s6 + $0x154] sm:$0xf0]  ;;  %5338 = vmatpush.bf16.msrb.mxu0 %v9499_v11  ;;  %v9690_v11 = vld [vmem:[%s11365_s6 + $0x1d0] sm:$0xf] }
 0x3b4   :  { %v9627_v21 = vor.u32 %v10992_v28, %v9626_v23  ;;  %v11008_v28 = vld [vmem:[%s11365_s6 + $0x1d4] sm:$0xf0] }
 0x3b5   :  { %v4178_v56 = vpop.f32.mrf.mxu3 }
 0x3b6   :  { %v4179_v50 = vadd.f32 %v4178_v56, %v4166_v55  ;;  %v10944_v55 = vld [vmem:[%s11355_s24 + $0xd4] sm:$0xf0]  ;;  %v10919_v56 = vld [vmem:[%s11355_s24 + $0x14] sm:$0xf] }
 0x3b8   :  { %v4189_v42 = vadd.f32 %v4185_v60, %v4179_v50  ;;  %v9340_v50 = vld [vmem:[%s11355_s24 + $0x18] sm:$0xf0] }
 0x3ba   :  { %v4193_v37 = vmax.f32 %v4189_v42, 0.0  ;;  %v9435_v42 = vor.u32 %v10944_v55, %v9434_v0  ;;  %v9404_v0 = vld [vmem:[%s11355_s24 + $0x98] sm:$0xf0]  ;;  %v10958_v55 = vld [vmem:[%s11365_s6 + $0x44] sm:$0xf0] }
 0x3bc   :  { %v12903_v62 = vpack.c.bf16 %v4193_v37, %v4193_v37  ;;  %v9343_v37 = vor.u32 %v10919_v56, %v9340_v50  ;;  %4974 = vmatpush.bf16.msra.mxu1 %v9435_v42  ;;  %v9491_v42 = vor.u32 %v10958_v55, %v9490_v31  ;;  %v10974_v55 = vld [vmem:[%s11365_s6 + $0xc4] sm:$0xf0] }
 0x3bd   :  { %v4180_v1 = vpop.f32.mrf.mxu3 }
 0x3be   :  { %4733 = vmatmul.bf16.vlgmr.msra.gmra.mxu3 %v12903_v62  ;;  %v10943_v1 = vld [vmem:[%s11355_s24 + $0xd4] sm:$0xf]  ;;  %4991 = vmatpush.bf16.msra.mxu2 %v9343_v37  ;;  %v9618_v37 = vld [vmem:[%s11365_s6 + $0x140] sm:$0xf] }
 0x3bf   :  { %4998 = vmatpush.bf16.msra.mxu3 %v9455_v12  ;;  %v9439_v2 = vor.u32 %v10943_v1, %v9436_v35  ;;  %v10938_v12 = vld [vmem:[%s11355_s24 + $0xa4] sm:$0xf0]  ;;  %v9394_v35 = vld [vmem:[%s11355_s24 + $0x80] sm:$0xf]  ;;  %5339 = vmatpush.bf16.msrb.mxu0 %v9491_v42 }
 0x3c0   :  { %4975 = vmatpush.bf16.msra.mxu1 %v9427_v6  ;;  %v9411_v58 = vor.u32 %v10938_v12, %v9410_v25  ;;  %v10990_v1 = vld [vmem:[%s11365_s6 + $0x144] sm:$0xf0]  ;;  %v10956_v6 = vld [vmem:[%s11365_s6 + $0x34] sm:$0xf0]  ;;  %v9699_v25 = vor.u32 %v11010_v63, %v9698_v41 }
 0x3c1   :  { %v9619_v46 = vor.u32 %v10990_v1, %v9618_v37  ;;  %v9483_v45 = vor.u32 %v10956_v6, %v9482_v17  ;;  %v10952_v12 = vld [vmem:[%s11365_s6 + $0x14] sm:$0xf0]  ;;  %v9682_v37 = vld [vmem:[%s11365_s6 + $0x1c0] sm:$0xf]  ;;  %v11006_v1 = vld [vmem:[%s11365_s6 + $0x1c4] sm:$0xf0] }
 0x3c2   :  { %4992 = vmatpush.bf16.msra.mxu2 %v9335_v10  ;;  %v10980_v10 = vld [vmem:[%s11365_s6 + $0xf4] sm:$0xf0] }
 0x3c3   :  { %4999 = vmatpush.bf16.msra.mxu3 %v9447_v47  ;;  %v10936_v47 = vld [vmem:[%s11355_s24 + $0x94] sm:$0xf0]  ;;  %v9579_v14 = vor.u32 %v10980_v10, %v9578_v7  ;;  %5340 = vmatpush.bf16.msrb.mxu0 %v9483_v45  ;;  %v9538_v7 = vld [vmem:[%s11365_s6 + $0xa0] sm:$0xf] }
 0x3c4   :  { %4976 = vmatpush.bf16.msra.mxu1 %v9419_v29  ;;  %v9403_v52 = vor.u32 %v10936_v47, %v9402_v53  ;;  %v10978_v29 = vld [vmem:[%s11365_s6 + $0xe4] sm:$0xf0]  ;;  %v9691_v53 = vor.u32 %v11008_v28, %v9690_v11  ;;  %v9458_v47 = vld [vmem:[%s11365_s6] sm:$0xf] }
 0x3c5   :  { %v9666_v45 = vld [vmem:[%s11365_s6 + $0x1a0] sm:$0xf] }
 0x3c6   :  { %5362 = vmatpush.bf16.msrb.mxu2 %v9643_v18  ;;  %v9474_v18 = vld [vmem:[%s11365_s6 + $0x20] sm:$0xf] }
 0x3c7   :  { %5000 = vmatpush.bf16.msra.mxu3 %v9439_v2  ;;  %v10934_v2 = vld [vmem:[%s11355_s24 + $0x84] sm:$0xf0]  ;;  %v9475_v27 = vor.u32 %v10954_v24, %v9474_v18  ;;  %s13452_s24 = sld [smem:[#allocation13_spill]] }
 0x3c8   :  { %4977 = vmatpush.bf16.msra.mxu1 %v9411_v58  ;;  %v9395_v3 = vor.u32 %v10934_v2, %v9394_v35  ;;  %v10976_v58 = vld [vmem:[%s11365_s6 + $0xd4] sm:$0xf0]  ;;  %v9683_v35 = vor.u32 %v11006_v1, %v9682_v37 }
 0x3c9   :  { %5341 = vmatpush.bf16.msrb.mxu0 %v9475_v27  ;;  %v9563_v23 = vor.u32 %v10976_v58, %v9562_v20  ;;  %v10972_v2 = vld [vmem:[%s11365_s6 + $0xb4] sm:$0xf0]  ;;  %v9522_v27 = vld [vmem:[%s11365_s6 + $0x80] sm:$0xf] }
 0x3ca   :  { %5363 = vmatpush.bf16.msrb.mxu2 %v9635_v16  ;;  %v9466_v16 = vld [vmem:[%s11365_s6 + $0x10] sm:$0xf] }
 0x3cb   :  { %5001 = vmatpush.bf16.msra.mxu3 %v9431_v15  ;;  %v9611_v15 = vor.u32 %v10988_v13, %v9610_v19  ;;  %v9467_v30 = vor.u32 %v10952_v12, %v9466_v16  ;;  %v11002_v19 = vld [vmem:[%s11365_s6 + $0x1a4] sm:$0xf0] }
 0x3cc   :  { %4978 = vmatpush.bf16.msra.mxu1 %v9403_v52  ;;  %v9554_v52 = vld [vmem:[%s11365_s6 + $0xc0] sm:$0xf]  ;;  %v9667_v13 = vor.u32 %v11002_v19, %v9666_v45  ;;  %v9484_v45 = vld [vmem:[%s11365_s6 + $0x38] sm:$0xf0]  ;;  %v10987_v19 = vld [vmem:[%s11365_s6 + $0x134] sm:$0xf] }
 0x3cd   :  { %5342 = vmatpush.bf16.msrb.mxu0 %v9467_v30  ;;  %v10963_v30 = vld [vmem:[%s11365_s6 + $0x74] sm:$0xf] }
 0x3ce   :  { %4785 = vmatmul.bf16.vlgmr.msrb.gmra.mxu3 %v12903_v62  ;;  %5364 = vmatpush.bf16.msrb.mxu2 %v9627_v21 }
 0x3cf   :  { %5002 = vmatpush.bf16.msra.mxu3 %v9423_v57  ;;  %v9571_v57 = vor.u32 %v10978_v29, %v9570_v26  ;;  %v4262_v26 = vld [vmem:[%s11350_s19] sm:$0x3]  ;;  %v10966_v29 = vld [vmem:[%s11365_s6 + $0x84] sm:$0xf0]  ;;  %s13451_s19 = sld [smem:[#allocation18_spill]] }
 0x3d0   :  { %4979 = vmatpush.bf16.msra.mxu1 %v9395_v3  ;;  %v11004_v3 = vld [vmem:[%s11365_s6 + $0x1b4] sm:$0xf0]  ;;  %v9523_v34 = vor.u32 %v10966_v29, %v9522_v27 }
 0x3d1   :  { %v9675_v17 = vor.u32 %v11004_v3, %v9674_v4  ;;  %v10989_v4 = vld [vmem:[%s11365_s6 + $0x144] sm:$0xf] }
 0x3d2   :  { %5365 = vmatpush.bf16.msrb.mxu2 %v9619_v46  ;;  %v9546_v46 = vld [vmem:[%s11365_s6 + $0xb0] sm:$0xf] }
 0x3d3   :  { %5003 = vmatpush.bf16.msra.mxu3 %v9415_v49  ;;  %v9595_v49 = vor.u32 %v10984_v36, %v9594_v54  ;;  %v9547_v5 = vor.u32 %v10972_v2, %v9546_v46  ;;  %v9516_v54 = vld [vmem:[%s11365_s6 + $0x78] sm:$0xf0]  ;;  %v10995_v36 = vld [vmem:[%s11365_s6 + $0x174] sm:$0xf]  ;;  %v9492_v2 = vld [vmem:[%s11365_s6 + $0x48] sm:$0xf0] }
 0x3d4   :  { %5349 = vmatpush.bf16.msrb.mxu1 %v9579_v14  ;;  %v9530_v14 = vld [vmem:[%s11365_s6 + $0x90] sm:$0xf]  ;;  %v9519_v11 = vor.u32 %v10963_v30, %v9516_v54  ;;  %v9468_v30 = vld [vmem:[%s11365_s6 + $0x18] sm:$0xf0] }
 0x3d6   :  { %5366 = vmatpush.bf16.msrb.mxu2 %v9611_v15  ;;  %v10968_v15 = vld [vmem:[%s11365_s6 + $0x94] sm:$0xf0] }
 0x3d7   :  { %v9531_v61 = vor.u32 %v10968_v15, %v9530_v14  ;;  %v11011_v15 = vld [vmem:[%s11365_s6 + $0x1f4] sm:$0xf] }
 0x3d8   :  { %5350 = vmatpush.bf16.msrb.mxu1 %v9571_v57  ;;  %v10998_v57 = vld [vmem:[%s11365_s6 + $0x184] sm:$0xf0] }
 0x3d9   :  { %v9651_v41 = vor.u32 %v10998_v57, %v9650_v32  ;;  %v10977_v32 = vld [vmem:[%s11365_s6 + $0xe4] sm:$0xf] }
 0x3da   :  { %5367 = vmatpush.bf16.msrb.mxu2 %v9603_v40  ;;  %v4362_v40 = vperm.slane %v4262_v26, 0  ;;  %v10985_v57 = vld [vmem:[%s11365_s6 + $0x124] sm:$0xf] }
 0x3dc   :  { %5351 = vmatpush.bf16.msrb.mxu1 %v9563_v23  ;;  %v9644_v23 = vld [vmem:[%s11365_s6 + $0x178] sm:$0xf0] }
 0x3dd   :  { %v9647_v28 = vor.u32 %v10995_v36, %v9644_v23  ;;  %v10975_v36 = vld [vmem:[%s11365_s6 + $0xd4] sm:$0xf]  ;;  %v9564_v23 = vld [vmem:[%s11365_s6 + $0xd8] sm:$0xf0] }
 0x3de   :  { %5368 = vmatpush.bf16.msrb.mxu2 %v9595_v49 }
 0x3fb   :  { %v12929_v59 = vpop.f32.mrf.mxu0 }
 0x3fc   :  { %v4696_v63 = vadd.f32 %v12929_v59, %v4362_v40  ;;  %v9604_v40 = vld [vmem:[%s11365_s6 + $0x128] sm:$0xf0] }
 0x403   :  { %v4697_v60 = vpop.f32.mrf.mxu0 }
 0x404   :  { %v9407_v60 = vor.u32 %v10935_v48, %v9404_v0  ;;  %v10950_v48 = vld [vmem:[%s11365_s6 + $0x4] sm:$0xf0] }
 0x405   :  { %v9459_v31 = vor.u32 %v10950_v48, %v9458_v47  ;;  %v9508_v47 = vld [vmem:[%s11365_s6 + $0x68] sm:$0xf0]  ;;  %v10993_v48 = vld [vmem:[%s11365_s6 + $0x164] sm:$0xf] }
 0x406   :  { %5004 = vmatpush.bf16.msra.mxu3 %v9407_v60  ;;  %v9555_v60 = vor.u32 %v10974_v55, %v9554_v52  ;;  %v9636_v52 = vld [vmem:[%s11365_s6 + $0x168] sm:$0xf0]  ;;  %v10959_v55 = vld [vmem:[%s11365_s6 + $0x54] sm:$0xf] }
 0x407   :  { %5343 = vmatpush.bf16.msrb.mxu0 %v9459_v31  ;;  %v9639_v31 = vor.u32 %v10993_v48, %v9636_v52  ;;  %v10949_v48 = vld [vmem:[%s11365_s6 + $0x4] sm:$0xf]  ;;  %v9460_v52 = vld [vmem:[%s11365_s6 + $0x8] sm:$0xf0] }
 0x408   :  { %5352 = vmatpush.bf16.msrb.mxu1 %v9555_v60  ;;  %v9628_v60 = vld [vmem:[%s11365_s6 + $0x158] sm:$0xf0] }
 0x40a   :  { %5005 = vmatpush.bf16.msra.mxu3 %v9399_v38  ;;  %v10970_v38 = vld [vmem:[%s11365_s6 + $0xa4] sm:$0xf0] }
 0x40b   :  { %v12967_v8 = vpop.f32.mrf.mxu1  ;;  %v12969_v51 = vpop.f32.mrf.mxu0  ;;  %v9539_v10 = vor.u32 %v10970_v38, %v9538_v7  ;;  %v10955_v38 = vld [vmem:[%s11365_s6 + $0x34] sm:$0xf] }
 0x40c   :  { %5353 = vmatpush.bf16.msrb.mxu1 %v9547_v5  ;;  %v4709_v16 = vadd.f32 %v12967_v8, %v4696_v63  ;;  %v4363_v8 = vperm.slane %v4262_v26, 1  ;;  %v9620_v5 = vld [vmem:[%s11365_s6 + $0x148] sm:$0xf0] }
 0x40d   :  { %v9476_v26 = vld [vmem:[%s11365_s6 + $0x28] sm:$0xf0] }
 0x40e   :  { %5375 = vmatpush.bf16.msrb.mxu3 %v9707_v9  ;;  %v11000_v9 = vld [vmem:[%s11365_s6 + $0x194] sm:$0xf0]  ;;  %v9700_v63 = vld [vmem:[%s11365_s6 + $0x1e8] sm:$0xf0] }
 0x40f   :  { %v9659_v18 = vor.u32 %v11000_v9, %v9658_v33  ;;  %v9708_v33 = vld [vmem:[%s11365_s6 + $0x1f8] sm:$0xf0]  ;;  %v9487_v9 = vor.u32 %v10955_v38, %v9484_v45  ;;  %v9668_v38 = vld [vmem:[%s11365_s6 + $0x1a8] sm:$0xf0] }
 0x410   :  { %5354 = vmatpush.bf16.msrb.mxu1 %v9539_v10  ;;  %v10979_v10 = vld [vmem:[%s11365_s6 + $0xf4] sm:$0xf]  ;;  %v9711_v29 = vor.u32 %v11011_v15, %v9708_v33 }
 0x412   :  { %5376 = vmatpush.bf16.msrb.mxu3 %v9699_v25 }
 0x413   :  { %v4710_v56 = vpop.f32.mrf.mxu1  ;;  %v4749_v50 = vpop.f32.mrf.mxu0 }
 0x414   :  { %v9586_v56 = vld [vmem:[%s11365_s6 + $0x100] sm:$0xf]  ;;  %v10982_v50 = vld [vmem:[%s11365_s6 + $0x104] sm:$0xf0]  ;;  %5355 = vmatpush.bf16.msrb.mxu1 %v9531_v61 }
 0x415   :  { %v9587_v42 = vor.u32 %v10982_v50, %v9586_v56  ;;  %v9500_v56 = vld [vmem:[%s11365_s6 + $0x58] sm:$0xf0]  ;;  %v10991_v50 = vld [vmem:[%s11365_s6 + $0x154] sm:$0xf] }
 0x416   :  { %5377 = vmatpush.bf16.msrb.mxu3 %v9691_v53  ;;  %v10961_v53 = vld [vmem:[%s11365_s6 + $0x64] sm:$0xf]  ;;  %v9503_v37 = vor.u32 %v10959_v55, %v9500_v56  ;;  %v9631_v1 = vor.u32 %v10991_v50, %v9628_v60  ;;  %v9588_v56 = vld [vmem:[%s11365_s6 + $0x108] sm:$0xf0] }
 0x417   :  { %5369 = vmatpush.bf16.msrb.mxu2 %v9587_v42  ;;  %v4748_v42 = vadd.f32 %v12969_v51, %v4363_v8  ;;  %v10981_v55 = vld [vmem:[%s11365_s6 + $0x104] sm:$0xf]  ;;  %v9684_v60 = vld [vmem:[%s11365_s6 + $0x1c8] sm:$0xf0] }
 0x418   :  { %5356 = vmatpush.bf16.msrb.mxu1 %v9523_v34  ;;  %v9572_v34 = vld [vmem:[%s11365_s6 + $0xe8] sm:$0xf0]  ;;  %v11005_v50 = vld [vmem:[%s11365_s6 + $0x1c4] sm:$0xf] }
 0x41a   :  { %5378 = vmatpush.bf16.msrb.mxu3 %v9683_v35  ;;  %v10957_v35 = vld [vmem:[%s11365_s6 + $0x44] sm:$0xf] }
 0x41b   :  { %v13007_v39 = vpop.f32.mrf.mxu1 }
 0x41c   :  { %v4761_v46 = vadd.f32 %v13007_v39, %v4748_v42  ;;  %v9580_v39 = vld [vmem:[%s11365_s6 + $0xf8] sm:$0xf0]  ;;  %v9463_v42 = vor.u32 %v10949_v48, %v9460_v52  ;;  %v9754_v52 = vld [vmem:[%s11375_s20 + $0x50] sm:$0xf] }
 0x41e   :  { %5379 = vmatpush.bf16.msrb.mxu3 %v9675_v17  ;;  %v9495_v17 = vor.u32 %v10957_v35, %v9492_v2  ;;  %v9687_v35 = vor.u32 %v11005_v50, %v9684_v60  ;;  %v9548_v2 = vld [vmem:[%s11365_s6 + $0xb8] sm:$0xf0] }
 0x421   :  { %v4721_v21 = vpop.f32.mrf.mxu2 }
 0x422   :  { %5380 = vmatpush.bf16.msrb.mxu3 %v9667_v13  ;;  %v4722_v12 = vadd.f32 %v4721_v21, %v4709_v16  ;;  %v9612_v13 = vld [vmem:[%s11365_s6 + $0x138] sm:$0xf0] }
 0x423   :  { %v4762_v0 = vpop.f32.mrf.mxu1  ;;  %v9615_v27 = vor.u32 %v10987_v19, %v9612_v13  ;;  %v9532_v19 = vld [vmem:[%s11365_s6 + $0x98] sm:$0xf0]  ;;  %v10999_v13 = vld [vmem:[%s11365_s6 + $0x194] sm:$0xf] }
 0x424   :  { %v9511_v0 = vor.u32 %v10961_v53, %v9508_v47  ;;  %v9692_v53 = vld [vmem:[%s11365_s6 + $0x1d8] sm:$0xf0]  ;;  %v9567_v47 = vor.u32 %v10975_v36, %v9564_v23  ;;  %v11042_v23 = vld [vmem:[%s11375_s20 + $0xe4] sm:$0xf0] }
 0x426   :  { %5381 = vmatpush.bf16.msrb.mxu3 %v9659_v18  ;;  %v9583_v18 = vor.u32 %v10979_v10, %v9580_v39  ;;  %v10967_v39 = vld [vmem:[%s11365_s6 + $0x94] sm:$0xf] }
 0x427   :  { %v9535_v15 = vor.u32 %v10967_v39, %v9532_v19  ;;  %v9812_v39 = vld [vmem:[%s11375_s20 + $0xc8] sm:$0xf0] }
 0x429   :  { %v4723_v6 = vpop.f32.mrf.mxu2 }
 0x42a   :  { %5382 = vmatpush.bf16.msrb.mxu3 %v9651_v41  ;;  %v9623_v6 = vor.u32 %v10989_v4, %v9620_v5  ;;  %v11009_v41 = vld [vmem:[%s11365_s6 + $0x1e4] sm:$0xf]  ;;  %v11003_v4 = vld [vmem:[%s11365_s6 + $0x1b4] sm:$0xf]  ;;  %v9676_v5 = vld [vmem:[%s11365_s6 + $0x1b8] sm:$0xf0] }
 0x42b   :  { %v9703_v54 = vor.u32 %v11009_v41, %v9700_v63  ;;  %v9772_v41 = vld [vmem:[%s11375_s20 + $0x78] sm:$0xf0] }
 0x431   :  { %v4773_v24 = vpop.f32.mrf.mxu2 }
 0x432   :  { %v4774_v3 = vadd.f32 %v4773_v24, %v4761_v46  ;;  %v10953_v24 = vld [vmem:[%s11365_s6 + $0x24] sm:$0xf]  ;;  %v10971_v46 = vld [vmem:[%s11365_s6 + $0xb4] sm:$0xf] }
 0x433   :  { %v9479_v16 = vor.u32 %v10953_v24, %v9476_v26 }
 0x439   :  { %v4775_v25 = vpop.f32.mrf.mxu2 }
 0x441   :  { %v4734_v20 = vpop.f32.mrf.mxu3 }
 0x442   :  { %v4735_v58 = vadd.f32 %v4734_v20, %v4722_v12  ;;  %v9575_v12 = vor.u32 %v10977_v32, %v9572_v34  ;;  %v10951_v20 = vld [vmem:[%s11365_s6 + $0x14] sm:$0xf]  ;;  %v9834_v32 = vld [vmem:[%s11375_s20 + $0xf0] sm:$0xf] }
 0x444   :  { %v4790_v49 = vmax.f32 %v4735_v58, 0.0  ;;  %v9607_v58 = vor.u32 %v10985_v57, %v9604_v40  ;;  %v11044_v57 = vld [vmem:[%s11375_s20 + $0xf4] sm:$0xf0]  ;;  %v11027_v40 = vld [vmem:[%s11375_s20 + $0x74] sm:$0xf] }
 0x445   :  { %v9835_v63 = vor.u32 %v11044_v57, %v9834_v32  ;;  %v9730_v57 = vld [vmem:[%s11375_s20 + $0x20] sm:$0xf] }
 0x446   :  { %v4792_v59 = vpack.c.bf16 %v4790_v49, %v4790_v49  ;;  %v10983_v49 = vld [vmem:[%s11365_s6 + $0x114] sm:$0xf] }
 0x448   :  { %4967 = vmatmul.bf16.vlgmr.msra.gmra.mxu0 %v4792_v59  ;;  %4993 = vmatmul.bf16.vlgmr.msra.gmra.mxu2 %v4792_v59  ;;  %v9471_v59 = vor.u32 %v10951_v20, %v9468_v30  ;;  %v9762_v20 = vld [vmem:[%s11375_s20 + $0x60] sm:$0xf]  ;;  %v11026_v30 = vld [vmem:[%s11375_s20 + $0x64] sm:$0xf0] }
 0x449   :  { %v4736_v21 = vpop.f32.mrf.mxu3  ;;  %5388 = vmatpush.bf16.msra.mxu0 %v9519_v11  ;;  %5414 = vmatpush.bf16.msra.mxu2 %v9647_v28  ;;  %v9596_v11 = vld [vmem:[%s11365_s6 + $0x118] sm:$0xf0]  ;;  %v11007_v28 = vld [vmem:[%s11365_s6 + $0x1d4] sm:$0xf]  ;;  %v9763_v36 = vor.u32 %v11026_v30, %v9762_v20 }
 0x44a   :  { %v9599_v8 = vor.u32 %v10983_v49, %v9596_v11  ;;  %v9695_v21 = vor.u32 %v11007_v28, %v9692_v53  ;;  %v11025_v49 = vld [vmem:[%s11375_s20 + $0x64] sm:$0xf]  ;;  %v9764_v11 = vld [vmem:[%s11375_s20 + $0x68] sm:$0xf0] }
 0x44b   :  { %v9767_v53 = vor.u32 %v11025_v49, %v9764_v11  ;;  %v9722_v49 = vld [vmem:[%s11375_s20 + $0x10] sm:$0xf]  ;;  %v11016_v11 = vld [vmem:[%s11375_s20 + $0x14] sm:$0xf0] }
 0x44d   :  { %5389 = vmatpush.bf16.msra.mxu0 %v9511_v0  ;;  %5415 = vmatpush.bf16.msra.mxu2 %v9639_v31  ;;  %v10973_v0 = vld [vmem:[%s11365_s6 + $0xc4] sm:$0xf]  ;;  %v9556_v31 = vld [vmem:[%s11365_s6 + $0xc8] sm:$0xf0] }
 0x451   :  { %v4786_v51 = vpop.f32.mrf.mxu3  ;;  %5390 = vmatpush.bf16.msra.mxu0 %v9503_v37  ;;  %5416 = vmatpush.bf16.msra.mxu2 %v9631_v1  ;;  %v9559_v37 = vor.u32 %v10973_v0, %v9556_v31  ;;  %v9591_v1 = vor.u32 %v10981_v55, %v9588_v56  ;;  %v11040_v31 = vld [vmem:[%s11375_s20 + $0xd4] sm:$0xf0]  ;;  %v11023_v55 = vld [vmem:[%s11375_s20 + $0x54] sm:$0xf]  ;;  %v9756_v56 = vld [vmem:[%s11375_s20 + $0x58] sm:$0xf0] }
 0x452   :  { %v4787_v7 = vadd.f32 %v4786_v51, %v4774_v3  ;;  %v9551_v3 = vor.u32 %v10971_v46, %v9548_v2  ;;  %v9679_v51 = vor.u32 %v11003_v4, %v9676_v5  ;;  %v9759_v60 = vor.u32 %v11023_v55, %v9756_v56  ;;  %v9746_v46 = vld [vmem:[%s11375_s20 + $0x40] sm:$0xf]  ;;  %v11022_v2 = vld [vmem:[%s11375_s20 + $0x44] sm:$0xf0] }
 0x453   :  { %v9810_v4 = vld [vmem:[%s11375_s20 + $0xc0] sm:$0xf] }
 0x454   :  { %v4791_v14 = vmax.f32 %v4787_v7, 0.0  ;;  %v11001_v7 = vld [vmem:[%s11365_s6 + $0x1a4] sm:$0xf] }
 0x455   :  { %5391 = vmatpush.bf16.msra.mxu0 %v9495_v17  ;;  %5417 = vmatpush.bf16.msra.mxu2 %v9623_v6  ;;  %v10969_v17 = vld [vmem:[%s11365_s6 + $0xa4] sm:$0xf]  ;;  %v9540_v6 = vld [vmem:[%s11365_s6 + $0xa8] sm:$0xf0]  ;;  %v9671_v10 = vor.u32 %v11001_v7, %v9668_v38 }
 0x456   :  { %v4793_v61 = vpack.c.bf16 %v4791_v14, %v4791_v14  ;;  %v9543_v45 = vor.u32 %v10969_v17, %v9540_v6  ;;  %v9660_v14 = vld [vmem:[%s11365_s6 + $0x198] sm:$0xf0]  ;;  %v11021_v17 = vld [vmem:[%s11375_s20 + $0x44] sm:$0xf]  ;;  %v9748_v6 = vld [vmem:[%s11375_s20 + $0x48] sm:$0xf0] }
 0x457   :  { %v9663_v33 = vor.u32 %v10999_v13, %v9660_v14  ;;  %v9738_v13 = vld [vmem:[%s11375_s20 + $0x30] sm:$0xf]  ;;  %v11020_v14 = vld [vmem:[%s11375_s20 + $0x34] sm:$0xf0] }
 0x458   :  { %4980 = vmatmul.bf16.vlgmr.msra.gmra.mxu1 %v4793_v61  ;;  %5006 = vmatmul.bf16.vlgmr.msra.gmra.mxu3 %v4793_v61  ;;  %v9524_v61 = vld [vmem:[%s11365_s6 + $0x88] sm:$0xf0] }
 0x459   :  { %5344 = vmatmul.bf16.vlgmr.msrb.gmra.mxu0 %v12844_v43  ;;  %5370 = vmatmul.bf16.vlgmr.msrb.gmra.mxu2 %v12890_v44  ;;  %v4788_v25 = vpop.f32.mrf.mxu3 }
 0x45a   :  { %5392 = vmatpush.bf16.msra.mxu0 %v9487_v9  ;;  %5401 = vmatpush.bf16.msra.mxu1 %v9583_v18  ;;  %v9652_v9 = vld [vmem:[%s11365_s6 + $0x188] sm:$0xf0]  ;;  %v9775_v25 = vor.u32 %v11027_v40, %v9772_v41  ;;  %v11018_v40 = vld [vmem:[%s11375_s20 + $0x24] sm:$0xf0]  ;;  %v9794_v41 = vld [vmem:[%s11375_s20 + $0xa0] sm:$0xf] }
 0x45b   :  { %5418 = vmatpush.bf16.msra.mxu2 %v9615_v27  ;;  %5427 = vmatpush.bf16.msra.mxu3 %v9711_v29  ;;  %v9770_v27 = vld [vmem:[%s11375_s20 + $0x70] sm:$0xf]  ;;  %v11028_v29 = vld [vmem:[%s11375_s20 + $0x74] sm:$0xf0] }
 0x45c   :  { %v9771_v34 = vor.u32 %v11028_v29, %v9770_v27  ;;  %v9804_v27 = vld [vmem:[%s11375_s20 + $0xb8] sm:$0xf0] }
 0x45e   :  { %5393 = vmatpush.bf16.msra.mxu0 %v9479_v16  ;;  %5402 = vmatpush.bf16.msra.mxu1 %v9575_v12  ;;  %v9836_v16 = vld [vmem:[%s11375_s20 + $0xf8] sm:$0xf0] }
 0x45f   :  { %5419 = vmatpush.bf16.msra.mxu2 %v9607_v58  ;;  %5428 = vmatpush.bf16.msra.mxu3 %v9703_v54  ;;  %v9826_v58 = vld [vmem:[%s11375_s20 + $0xe0] sm:$0xf] }
 0x460   :  { %v9827_v28 = vor.u32 %v11042_v23, %v9826_v58 }
 0x462   :  { %5394 = vmatpush.bf16.msra.mxu0 %v9471_v59  ;;  %5403 = vmatpush.bf16.msra.mxu1 %v9567_v47  ;;  %v11041_v59 = vld [vmem:[%s11375_s20 + $0xe4] sm:$0xf]  ;;  %v9828_v47 = vld [vmem:[%s11375_s20 + $0xe8] sm:$0xf0] }
 0x463   :  { %5420 = vmatpush.bf16.msra.mxu2 %v9599_v8  ;;  %5429 = vmatpush.bf16.msra.mxu3 %v9695_v21  ;;  %v9831_v48 = vor.u32 %v11041_v59, %v9828_v47  ;;  %v11024_v8 = vld [vmem:[%s11375_s20 + $0x54] sm:$0xf0]  ;;  %v9818_v21 = vld [vmem:[%s11375_s20 + $0xd0] sm:$0xf]  ;;  %v11015_v47 = vld [vmem:[%s11375_s20 + $0x14] sm:$0xf] }
 0x464   :  { %v9755_v0 = vor.u32 %v11024_v8, %v9754_v52  ;;  %v9819_v50 = vor.u32 %v11040_v31, %v9818_v21  ;;  %v11032_v59 = vld [vmem:[%s11375_s20 + $0x94] sm:$0xf0]  ;;  %v11031_v21 = vld [vmem:[%s11375_s20 + $0x94] sm:$0xf] }
 0x466   :  { %5395 = vmatpush.bf16.msra.mxu0 %v9463_v42  ;;  %5404 = vmatpush.bf16.msra.mxu1 %v9559_v37  ;;  %v11039_v42 = vld [vmem:[%s11375_s20 + $0xd4] sm:$0xf]  ;;  %v9820_v37 = vld [vmem:[%s11375_s20 + $0xd8] sm:$0xf0] }
 0x467   :  { %5421 = vmatpush.bf16.msra.mxu2 %v9591_v1  ;;  %5430 = vmatpush.bf16.msra.mxu3 %v9687_v35  ;;  %v9823_v35 = vor.u32 %v11039_v42, %v9820_v37  ;;  %v9778_v42 = vld [vmem:[%s11375_s20 + $0x80] sm:$0xf] }
 0x468   :  { %5357 = vmatmul.bf16.vlgmr.msrb.gmra.mxu1 %v12872_v22  ;;  %5383 = vmatmul.bf16.vlgmr.msrb.gmra.mxu3 %v12903_v62 }
 0x469   :  { %5396 = vmatmul.bf16.vlgmr.msra.gmra.mxu0 %v12844_v43  ;;  %v10965_v43 = vld [vmem:[%s11365_s6 + $0x84] sm:$0xf] }
 0x46a   :  { %5422 = vmatmul.bf16.vlgmr.msra.gmra.mxu2 %v12890_v44  ;;  %5405 = vmatpush.bf16.msra.mxu1 %v9551_v3  ;;  %v10997_v44 = vld [vmem:[%s11365_s6 + $0x184] sm:$0xf]  ;;  %v9527_v18 = vor.u32 %v10965_v43, %v9524_v61  ;;  %v9747_v3 = vor.u32 %v11022_v2, %v9746_v46  ;;  %v11036_v43 = vld [vmem:[%s11375_s20 + $0xb4] sm:$0xf0]  ;;  %v11019_v61 = vld [vmem:[%s11375_s20 + $0x34] sm:$0xf] }
 0x46b   :  { %5431 = vmatpush.bf16.msra.mxu3 %v9679_v51  ;;  %v9655_v24 = vor.u32 %v10997_v44, %v9652_v9  ;;  %5683 = vmatpush.bf16.msrb.mxu0 %v9771_v34  ;;  %v11038_v51 = vld [vmem:[%s11375_s20 + $0xc4] sm:$0xf0]  ;;  %v9740_v44 = vld [vmem:[%s11375_s20 + $0x38] sm:$0xf0]  ;;  %v11013_v46 = vld [vmem:[%s11375_s20 + $0x4] sm:$0xf] }
 0x46c   :  { %5709 = vmatpush.bf16.msrb.mxu2 %v9775_v25  ;;  %v9811_v38 = vor.u32 %v11038_v51, %v9810_v4  ;;  %v9731_v25 = vor.u32 %v11018_v40, %v9730_v57  ;;  %v9716_v2 = vld [vmem:[%s11375_s20 + $0x8] sm:$0xf0]  ;;  %s13453_s6 = sld [smem:[#allocation20_spill]] }
 0x46d   :  { %v9719_v51 = vor.u32 %v11013_v46, %v9716_v2 }
 0x46e   :  { %5406 = vmatpush.bf16.msra.mxu1 %v9543_v45  ;;  %v9751_v45 = vor.u32 %v11021_v17, %v9748_v6  ;;  %v11029_v17 = vld [vmem:[%s11375_s20 + $0x84] sm:$0xf]  ;;  %v9780_v6 = vld [vmem:[%s11375_s20 + $0x88] sm:$0xf0] }
 0x46f   :  { %5432 = vmatpush.bf16.msra.mxu3 %v9671_v10  ;;  %5684 = vmatpush.bf16.msrb.mxu0 %v9763_v36  ;;  %v11037_v10 = vld [vmem:[%s11375_s20 + $0xc4] sm:$0xf]  ;;  %v9796_v36 = vld [vmem:[%s11375_s20 + $0xa8] sm:$0xf0] }
 0x470   :  { %5710 = vmatpush.bf16.msrb.mxu2 %v9767_v53  ;;  %v9815_v19 = vor.u32 %v11037_v10, %v9812_v39  ;;  %v9723_v53 = vor.u32 %v11016_v11, %v9722_v49  ;;  %v11074_v49 = vld [vmem:[%s13441_s5 + $0xe4] sm:$0xf0]  ;;  %v11073_v11 = vld [vmem:[%s13441_s5 + $0xe4] sm:$0xf] }
 0x472   :  { %5407 = vmatpush.bf16.msra.mxu1 %v9535_v15  ;;  %v9802_v15 = vld [vmem:[%s11375_s20 + $0xb0] sm:$0xf] }
 0x473   :  { %5433 = vmatpush.bf16.msra.mxu3 %v9663_v33  ;;  %5685 = vmatpush.bf16.msrb.mxu0 %v9755_v0  ;;  %v9739_v33 = vor.u32 %v11020_v14, %v9738_v13  ;;  %v9803_v9 = vor.u32 %v11036_v43, %v9802_v15  ;;  %v9788_v0 = vld [vmem:[%s11375_s20 + $0x98] sm:$0xf0]  ;;  %v11060_v13 = vld [vmem:[%s13441_s5 + $0x74] sm:$0xf0]  ;;  %v11059_v14 = vld [vmem:[%s13441_s5 + $0x74] sm:$0xf] }
 0x474   :  { %5711 = vmatpush.bf16.msrb.mxu2 %v9759_v60  ;;  %v9791_v55 = vor.u32 %v11031_v21, %v9788_v0  ;;  %v11014_v60 = vld [vmem:[%s11375_s20 + $0x4] sm:$0xf0]  ;;  %v9890_v43 = vld [vmem:[%s13441_s5 + $0x60] sm:$0xf] }
 0x475   :  { %v11054_v21 = vld [vmem:[%s13441_s5 + $0x44] sm:$0xf0] }
 0x476   :  { %5408 = vmatpush.bf16.msra.mxu1 %v9527_v18  ;;  %v9743_v18 = vor.u32 %v11019_v61, %v9740_v44  ;;  %v11058_v61 = vld [vmem:[%s13441_s5 + $0x64] sm:$0xf0] }
 0x477   :  { %5434 = vmatpush.bf16.msra.mxu3 %v9655_v24  ;;  %5686 = vmatpush.bf16.msrb.mxu0 %v9747_v3  ;;  %v11035_v24 = vld [vmem:[%s11375_s20 + $0xb4] sm:$0xf]  ;;  %v9891_v40 = vor.u32 %v11058_v61, %v9890_v43 }
 0x478   :  { %5712 = vmatpush.bf16.msrb.mxu2 %v9751_v45  ;;  %v9807_v29 = vor.u32 %v11035_v24, %v9804_v27  ;;  %v9783_v45 = vor.u32 %v11029_v17, %v9780_v6  ;;  %v11057_v24 = vld [vmem:[%s13441_s5 + $0x64] sm:$0xf]  ;;  %v9892_v27 = vld [vmem:[%s13441_s5 + $0x68] sm:$0xf0]  ;;  %v9938_v6 = vld [vmem:[%s13441_s5 + $0xc0] sm:$0xf] }
 0x479   :  { %5409 = vmatmul.bf16.vlgmr.msra.gmra.mxu1 %v12872_v22  ;;  %v11043_v22 = vld [vmem:[%s11375_s20 + $0xf4] sm:$0xf] }
 0x47a   :  { %5435 = vmatmul.bf16.vlgmr.msra.gmra.mxu3 %v12903_v62  ;;  %v9839_v62 = vor.u32 %v11043_v22, %v9836_v16  ;;  %5696 = vmatpush.bf16.msrb.mxu1 %v9835_v63  ;;  %v11034_v22 = vld [vmem:[%s11375_s20 + $0xa4] sm:$0xf0]  ;;  %v11017_v16 = vld [vmem:[%s11375_s20 + $0x24] sm:$0xf]  ;;  %v11051_v61 = vld [vmem:[%s13441_s5 + $0x34] sm:$0xf] }
 0x47b   :  { %5687 = vmatpush.bf16.msrb.mxu0 %v9739_v33  ;;  %v9795_v30 = vor.u32 %v11034_v22, %v9794_v41  ;;  %v9900_v33 = vld [vmem:[%s13441_s5 + $0x78] sm:$0xf0]  ;;  %v11076_v41 = vld [vmem:[%s13441_s5 + $0xf4] sm:$0xf0] }
 0x47c   :  { %5722 = vmatpush.bf16.msrb.mxu3 %v9839_v62  ;;  %5713 = vmatpush.bf16.msrb.mxu2 %v9743_v18  ;;  %v9732_v62 = vld [vmem:[%s11375_s20 + $0x28] sm:$0xf0]  ;;  %v9903_v18 = vor.u32 %v11059_v14, %v9900_v33 }
 0x47d   :  { %v9735_v58 = vor.u32 %v11017_v16, %v9732_v62  ;;  %v9895_v16 = vor.u32 %v11057_v24, %v9892_v27  ;;  %v9940_v14 = vld [vmem:[%s13441_s5 + $0xc8] sm:$0xf0] }
 0x47e   :  { %5697 = vmatpush.bf16.msrb.mxu1 %v9827_v28  ;;  %v9786_v28 = vld [vmem:[%s11375_s20 + $0x90] sm:$0xf] }
 0x47f   :  { %5688 = vmatpush.bf16.msrb.mxu0 %v9731_v25  ;;  %v9787_v52 = vor.u32 %v11032_v59, %v9786_v28  ;;  %v9964_v25 = vld [vmem:[%s13441_s5 + $0xf8] sm:$0xf0]  ;;  %v9956_v28 = vld [vmem:[%s13441_s5 + $0xe8] sm:$0xf0] }
 0x480   :  { %5723 = vmatpush.bf16.msrb.mxu3 %v9831_v48  ;;  %5714 = vmatpush.bf16.msrb.mxu2 %v9735_v58  ;;  %v9724_v48 = vld [vmem:[%s11375_s20 + $0x18] sm:$0xf0]  ;;  %v11056_v58 = vld [vmem:[%s13441_s5 + $0x54] sm:$0xf0] }
 0x481   :  { %v9727_v8 = vor.u32 %v11015_v47, %v9724_v48 }
 0x482   :  { %5698 = vmatpush.bf16.msrb.mxu1 %v9819_v50  ;;  %v9714_v50 = vld [vmem:[%s11375_s20] sm:$0xf] }
 0x483   :  { %5689 = vmatpush.bf16.msrb.mxu0 %v9723_v53  ;;  %v4295_v53 = vld [vmem:[%s13442_s9] sm:$0x3] }
 0x484   :  { %5724 = vmatpush.bf16.msrb.mxu3 %v9823_v35  ;;  %5715 = vmatpush.bf16.msrb.mxu2 %v9727_v8  ;;  %v11030_v35 = vld [vmem:[%s11375_s20 + $0x84] sm:$0xf0]  ;;  %v9874_v8 = vld [vmem:[%s13441_s5 + $0x40] sm:$0xf] }
 0x485   :  { %v9779_v3 = vor.u32 %v11030_v35, %v9778_v42  ;;  %v9876_v42 = vld [vmem:[%s13441_s5 + $0x48] sm:$0xf0]  ;;  %v4795_v35 = vperm.slane %v4295_v53, 0 }
 0x486   :  { %5699 = vmatpush.bf16.msrb.mxu1 %v9811_v38  ;;  %v13201_v38 = vld [vmem:[%s13440_s0] sm:$0x3]  ;;  %s11237_s0 = scalar_lea.hbm %s11236_s11, 2 }
 0x487   :  { %v5012_v10 = vperm.slane %v13201_v38, 0  ;;  %v5013_v22 = vperm.slane %v13201_v38, 1  ;;  %v11070_v38 = vld [vmem:[%s13441_s5 + $0xc4] sm:$0xf0]  ;;  %p11238_p0 = scmp.ne.s32.totalorder %s11236_s11, %s11237_s0 }
 0x488   :  { %5725 = vmatpush.bf16.msrb.mxu3 %v9815_v19  ;;  %5716 = vmatpush.bf16.msrb.mxu2 %v9719_v51  ;;  %v9898_v19 = vld [vmem:[%s13441_s5 + $0x70] sm:$0xf] }
 0x489   :  { %v9899_v15 = vor.u32 %v11060_v13, %v9898_v19  ;;  %v9866_v19 = vld [vmem:[%s13441_s5 + $0x30] sm:$0xf]  ;;  %v11052_v13 = vld [vmem:[%s13441_s5 + $0x34] sm:$0xf0] }
 0x48a   :  { %5700 = vmatpush.bf16.msrb.mxu1 %v9803_v9 }
 0x48c   :  { %5726 = vmatpush.bf16.msrb.mxu3 %v9807_v29  ;;  %v9962_v29 = vld [vmem:[%s13441_s5 + $0xf0] sm:$0xf]  ;;  %5930 = vmatpush.bf16.msra.mxu2 %v9903_v18 }
 0x48d   :  { %v9963_v62 = vor.u32 %v11076_v41, %v9962_v29  ;;  %v9867_v29 = vor.u32 %v11052_v13, %v9866_v19  ;;  %v11050_v41 = vld [vmem:[%s13441_s5 + $0x24] sm:$0xf0]  ;;  %v11063_v19 = vld [vmem:[%s13441_s5 + $0x94] sm:$0xf]  ;;  %v9916_v13 = vld [vmem:[%s13441_s5 + $0x98] sm:$0xf0] }
 0x48e   :  { %5701 = vmatpush.bf16.msrb.mxu1 %v9795_v30  ;;  %v9882_v30 = vld [vmem:[%s13441_s5 + $0x50] sm:$0xf] }
 0x48f   :  { %v9883_v47 = vor.u32 %v11056_v58, %v9882_v30 }
 0x490   :  { %5931 = vmatpush.bf16.msra.mxu2 %v9895_v16  ;;  %v9860_v16 = vld [vmem:[%s13441_s5 + $0x28] sm:$0xf0] }
 0x492   :  { %5702 = vmatpush.bf16.msrb.mxu1 %v9787_v52  ;;  %v9959_v52 = vor.u32 %v11073_v11, %v9956_v28 }
 0x496   :  { %5703 = vmatpush.bf16.msrb.mxu1 %v9779_v3 }
 0x49a   :  { %5917 = vmatpush.bf16.msra.mxu1 %v9963_v62 }
 0x4c5   :  { %v13120_v26 = vpop.f32.mrf.mxu0 }
 0x4c6   :  { %v4969_v24 = vadd.f32 %v13120_v26, %v4795_v35  ;;  %v9924_v35 = vld [vmem:[%s13441_s5 + $0xa8] sm:$0xf0] }
 0x4cb   :  { %v13130_v12 = vpop.f32.mrf.mxu2 }
 0x4cd   :  { %v4970_v54 = vpop.f32.mrf.mxu0 }
 0x4ce   :  { %v11033_v54 = vld [vmem:[%s11375_s20 + $0xa4] sm:$0xf]  ;;  %s13454_s20 = sld [smem:[#allocation24_spill]] }
 0x4cf   :  { %v9799_v23 = vor.u32 %v11033_v54, %v9796_v36  ;;  %v11055_v54 = vld [vmem:[%s13441_s5 + $0x54] sm:$0xf]  ;;  %v9884_v36 = vld [vmem:[%s13441_s5 + $0x58] sm:$0xf0] }
 0x4d1   :  { %5727 = vmatpush.bf16.msrb.mxu3 %v9799_v23  ;;  %v9954_v23 = vld [vmem:[%s13441_s5 + $0xe0] sm:$0xf] }
 0x4d2   :  { %v9955_v48 = vor.u32 %v11074_v49, %v9954_v23 }
 0x4d3   :  { %v4996_v1 = vpop.f32.mrf.mxu2 }
 0x4d4   :  { %v9715_v1 = vor.u32 %v11014_v60, %v9714_v50  ;;  %v11072_v50 = vld [vmem:[%s13441_s5 + $0xd4] sm:$0xf0]  ;;  %5918 = vmatpush.bf16.msra.mxu1 %v9955_v48 }
 0x4d5   :  { %v13151_v5 = vpop.f32.mrf.mxu1  ;;  %5728 = vmatpush.bf16.msrb.mxu3 %v9791_v55  ;;  %v11053_v55 = vld [vmem:[%s13441_s5 + $0x44] sm:$0xf] }
 0x4d6   :  { %v13156_v7 = vpop.f32.mrf.mxu0  ;;  %5690 = vmatpush.bf16.msrb.mxu0 %v9715_v1  ;;  %v9948_v1 = vld [vmem:[%s13441_s5 + $0xd8] sm:$0xf0] }
 0x4d7   :  { %v5346_v59 = vadd.f32 %v13156_v7, %v5012_v10  ;;  %v11071_v7 = vld [vmem:[%s13441_s5 + $0xd4] sm:$0xf]  ;;  %v9879_v10 = vor.u32 %v11053_v55, %v9876_v42  ;;  %v11066_v42 = vld [vmem:[%s13441_s5 + $0xa4] sm:$0xf0] }
 0x4d8   :  { %v9951_v3 = vor.u32 %v11071_v7, %v9948_v1  ;;  %v11065_v7 = vld [vmem:[%s13441_s5 + $0xa4] sm:$0xf] }
 0x4d9   :  { %5729 = vmatpush.bf16.msrb.mxu3 %v9783_v45  ;;  %v11069_v45 = vld [vmem:[%s13441_s5 + $0xc4] sm:$0xf] }
 0x4da   :  { %5904 = vmatpush.bf16.msra.mxu0 %v9899_v15  ;;  %v4796_v15 = vperm.slane %v4295_v53, 1  ;;  %v9943_v18 = vor.u32 %v11069_v45, %v9940_v14  ;;  %v9930_v53 = vld [vmem:[%s13441_s5 + $0xb0] sm:$0xf]  ;;  %v11064_v45 = vld [vmem:[%s13441_s5 + $0x94] sm:$0xf0]  ;;  %v9919_v14 = vor.u32 %v11063_v19, %v9916_v13 }
 0x4db   :  { %v13168_v32 = vpop.f32.mrf.mxu3  ;;  %v11099_v13 = vld [vmem:[%s13447_s29 + $0x30] sm:$0xff] }
 0x4dc   :  { %v13170_v34 = vpop.f32.mrf.mxu2 }
 0x4dd   :  { %v4983_v63 = vpop.f32.mrf.mxu1 }
 0x4de   :  { %v5347_v20 = vpop.f32.mrf.mxu0  ;;  %v11075_v63 = vld [vmem:[%s13441_s5 + $0xf4] sm:$0xf]  ;;  %5905 = vmatpush.bf16.msra.mxu0 %v9891_v40  ;;  %v9858_v40 = vld [vmem:[%s13441_s5 + $0x20] sm:$0xf] }
 0x4df   :  { %v9967_v20 = vor.u32 %v11075_v63, %v9964_v25  ;;  %v4982_v63 = vadd.f32 %v13151_v5, %v4969_v24  ;;  %v9859_v58 = vor.u32 %v11050_v41, %v9858_v40  ;;  %v11108_v24 = vld [vmem:[%s13444_s17 + $0x38] sm:$0xff]  ;;  %v11091_v40 = vld [vmem:[%s13443_s13 + $0x70] sm:$0xff]  ;;  %v11082_v41 = vld [vmem:[%s13443_s13 + $0x28] sm:$0xff] }
 0x4e1   :  { %5943 = vmatpush.bf16.msra.mxu3 %v9967_v20 }
 0x4e2   :  { %5906 = vmatpush.bf16.msra.mxu0 %v9883_v47  ;;  %v11067_v47 = vld [vmem:[%s13441_s5 + $0xb4] sm:$0xf] }
 0x4e3   :  { %v5009_v31 = vpop.f32.mrf.mxu3 }
 0x4e4   :  { %v5373_v56 = vpop.f32.mrf.mxu2  ;;  %v9887_v31 = vor.u32 %v11055_v54, %v9884_v36 }
 0x4e5   :  { %v13191_v37 = vpop.f32.mrf.mxu1  ;;  %v9946_v56 = vld [vmem:[%s13441_s5 + $0xd0] sm:$0xf]  ;;  %5944 = vmatpush.bf16.msra.mxu3 %v9959_v52  ;;  %v9932_v52 = vld [vmem:[%s13441_s5 + $0xb8] sm:$0xf0] }
 0x4e6   :  { %v13196_v4 = vpop.f32.mrf.mxu0  ;;  %v5359_v60 = vadd.f32 %v13191_v37, %v5346_v59  ;;  %v9947_v2 = vor.u32 %v11072_v50, %v9946_v56  ;;  %v9875_v37 = vor.u32 %v11054_v21, %v9874_v8  ;;  %5932 = vmatpush.bf16.msra.mxu2 %v9887_v31  ;;  %v11068_v59 = vld [vmem:[%s13441_s5 + $0xb4] sm:$0xf0]  ;;  %v9935_v8 = vor.u32 %v11067_v47, %v9932_v52  ;;  %v9850_v21 = vld [vmem:[%s13441_s5 + $0x10] sm:$0xf]  ;;  %v11047_v31 = vld [vmem:[%s13441_s5 + $0x14] sm:$0xf] }
 0x4e7   :  { %v5398_v51 = vadd.f32 %v13196_v4, %v5013_v22  ;;  %v9868_v4 = vld [vmem:[%s13441_s5 + $0x38] sm:$0xf0]  ;;  %v11049_v22 = vld [vmem:[%s13441_s5 + $0x24] sm:$0xf]  ;;  %v9931_v48 = vor.u32 %v11068_v59, %v9930_v53 }
 0x4e8   :  { %v5372_v33 = vadd.f32 %v13170_v34, %v5359_v60  ;;  %5919 = vmatpush.bf16.msra.mxu1 %v9947_v2  ;;  %5907 = vmatpush.bf16.msra.mxu0 %v9875_v37  ;;  %v4995_v34 = vadd.f32 %v13130_v12, %v4796_v15  ;;  %v9863_v54 = vor.u32 %v11049_v22, %v9860_v16  ;;  %v9852_v56 = vld [vmem:[%s13441_s5 + $0x18] sm:$0xf0]  ;;  %v9922_v60 = vld [vmem:[%s13441_s5 + $0xa0] sm:$0xf]  ;;  %v9844_v37 = vld [vmem:[%s13441_s5 + $0x8] sm:$0xf0] }
 0x4e9   :  { %5945 = vmatpush.bf16.msra.mxu3 %v9951_v3  ;;  %v9855_v50 = vor.u32 %v11047_v31, %v9852_v56  ;;  %v9923_v1 = vor.u32 %v11066_v42, %v9922_v60  ;;  %v9842_v2 = vld [vmem:[%s13441_s5] sm:$0xf]  ;;  %v11046_v3 = vld [vmem:[%s13441_s5 + $0x4] sm:$0xf0]  ;;  %v11116_v31 = vld [vmem:[%s13444_s17 + $0x78] sm:$0xff] }
 0x4ea   :  { %5933 = vmatpush.bf16.msra.mxu2 %v9879_v10  ;;  %v5008_v26 = vadd.f32 %v13168_v32, %v4995_v34  ;;  %v9906_v15 = vld [vmem:[%s13441_s5 + $0x80] sm:$0xf]  ;;  %v11106_v34 = vld [vmem:[%s13444_s17 + $0x28] sm:$0xff]  ;;  %v11103_v56 = vld [vmem:[%s13444_s17 + $0x10] sm:$0xff] }
 0x4eb   :  { %v13204_v39 = vpop.f32.mrf.mxu3  ;;  %v11081_v22 = vld [vmem:[%s13443_s13 + $0x20] sm:$0xff]  ;;  %v11088_v60 = vld [vmem:[%s13443_s13 + $0x58] sm:$0xff]  ;;  %v11102_v42 = vld [vmem:[%s13444_s17 + $0x8] sm:$0xff] }
 0x4ec   :  { %v5385_v27 = vadd.f32 %v13204_v39, %v5372_v33  ;;  %5908 = vmatpush.bf16.msra.mxu0 %v9867_v29  ;;  %v11062_v33 = vld [vmem:[%s13441_s5 + $0x84] sm:$0xf0]  ;;  %v11092_v29 = vld [vmem:[%s13443_s13 + $0x78] sm:$0xff]  ;;  %v11105_v16 = vld [vmem:[%s13444_s17 + $0x20] sm:$0xff] }
 0x4ed   :  { %v13212_v44 = vpop.f32.mrf.mxu2  ;;  %v5360_v9 = vpop.f32.mrf.mxu1  ;;  %5946 = vmatpush.bf16.msra.mxu3 %v9943_v18  ;;  %v11084_v18 = vld [vmem:[%s13443_s13 + $0x38] sm:$0xff]  ;;  %v11077_v47 = vld [vmem:[%s13443_s13] sm:$0xff] }
 0x4ee   :  { %v5399_v57 = vpop.f32.mrf.mxu0  ;;  %v9939_v9 = vor.u32 %v11070_v38, %v9938_v6  ;;  %v5440_v39 = vadd.f32 %v5385_v27, %v4982_v63  ;;  %v9914_v38 = vld [vmem:[%s13441_s5 + $0x90] sm:$0xf]  ;;  %v11090_v63 = vld [vmem:[%s13443_s13 + $0x68] sm:$0xff] }
 0x4ef   :  { %v9871_v57 = vor.u32 %v11051_v61, %v9868_v4  ;;  %v9915_v10 = vor.u32 %v11064_v45, %v9914_v38  ;;  %v9907_v61 = vor.u32 %v11062_v33, %v9906_v15  ;;  %v9908_v4 = vld [vmem:[%s13441_s5 + $0x88] sm:$0xf0]  ;;  %v11083_v27 = vld [vmem:[%s13443_s13 + $0x30] sm:$0xff]  ;;  %v5510_v38 = vld [vmem:[%s13446_s25] sm:$0x3] }
 0x4f0   :  { %5920 = vmatpush.bf16.msra.mxu1 %v9939_v9  ;;  %v5442_v5 = vmax.f32 %v5440_v39, 0.0  ;;  %5909 = vmatpush.bf16.msra.mxu0 %v9859_v58  ;;  %v11079_v58 = vld [vmem:[%s13443_s13 + $0x10] sm:$0xff]  ;;  %v5740_v19 = vperm.slane %v5510_v38, 0  ;;  %v11098_v33 = vld [vmem:[%s13447_s29 + $0x28] sm:$0xff] }
 0x4f1   :  { %5934 = vmatpush.bf16.msra.mxu2 %v9871_v57  ;;  %5947 = vmatpush.bf16.msra.mxu3 %v9935_v8  ;;  %v11107_v57 = vld [vmem:[%s13444_s17 + $0x30] sm:$0xff] }
 0x4f3   :  { %v5386_v0 = vpop.f32.mrf.mxu3 }
 0x4f4   :  { %v11048_v0 = vld [vmem:[%s13441_s5 + $0x14] sm:$0xf0]  ;;  %5921 = vmatpush.bf16.msra.mxu1 %v9931_v48 }
 0x4f5   :  { %v5425_v46 = vpop.f32.mrf.mxu2  ;;  %5935 = vmatpush.bf16.msra.mxu2 %v9863_v54  ;;  %v9851_v55 = vor.u32 %v11048_v0, %v9850_v21  ;;  %v11104_v0 = vld [vmem:[%s13444_s17 + $0x18] sm:$0xff] }
 0x4f6   :  { %v5410_v17 = vpop.f32.mrf.mxu1  ;;  %v9927_v46 = vor.u32 %v11065_v7, %v9924_v35  ;;  %v11114_v7 = vld [vmem:[%s13444_s17 + $0x68] sm:$0xff]  ;;  %v11101_v35 = vld [vmem:[%s13444_s17] sm:$0xff] }
 0x4f7   :  { %v5411_v43 = vadd.f32 %v5410_v17, %v5398_v51  ;;  %5910 = vmatpush.bf16.msra.mxu0 %v9851_v55  ;;  %v11045_v51 = vld [vmem:[%s13441_s5 + $0x4] sm:$0xf]  ;;  %v9843_v17 = vor.u32 %v11046_v3, %v9842_v2  ;;  %v11086_v2 = vld [vmem:[%s13443_s13 + $0x48] sm:$0xff]  ;;  %v11112_v3 = vld [vmem:[%s13444_s17 + $0x58] sm:$0xff] }
 0x4f8   :  { %5922 = vmatpush.bf16.msra.mxu1 %v9923_v1  ;;  %5948 = vmatpush.bf16.msra.mxu3 %v9927_v46  ;;  %v9847_v6 = vor.u32 %v11045_v51, %v9844_v37  ;;  %v11089_v55 = vld [vmem:[%s13443_s13 + $0x60] sm:$0xff]  ;;  %v11087_v1 = vld [vmem:[%s13443_s13 + $0x50] sm:$0xff]  ;;  %v11110_v37 = vld [vmem:[%s13444_s17 + $0x48] sm:$0xff] }
 0x4f9   :  { %v5424_v25 = vadd.f32 %v13212_v44, %v5411_v43  ;;  %5936 = vmatpush.bf16.msra.mxu2 %v9855_v50  ;;  %v11061_v43 = vld [vmem:[%s13441_s5 + $0x84] sm:$0xf]  ;;  %v11115_v50 = vld [vmem:[%s13444_s17 + $0x70] sm:$0xff]  ;;  %s11239_s5 = scalar_lea.hbm %s11510_s30, 2 }
 0x4fa   :  { %v9911_v9 = vor.u32 %v11061_v43, %v9908_v4  ;;  %v11113_v46 = vld [vmem:[%s13444_s17 + $0x60] sm:$0xff]  ;;  %p11241_p2 = scmp.lt.s32.totalorder %s11239_s5, %s11237_s0 }
 0x4fb   :  { %5911 = vmatpush.bf16.msra.mxu0 %v9843_v17  ;;  %v11085_v51 = vld [vmem:[%s13443_s13 + $0x40] sm:$0xff]  ;;  %v11111_v17 = vld [vmem:[%s13444_s17 + $0x50] sm:$0xff] }
 0x4fc   :  { %5923 = vmatpush.bf16.msra.mxu1 %v9915_v10  ;;  %5949 = vmatpush.bf16.msra.mxu3 %v9919_v14  ;;  %v11100_v10 = vld [vmem:[%s13447_s29 + $0x38] sm:$0xff]  ;;  %p11242_p3 = por %p11241_p2, %p11240_p1 }
 0x4fd   :  { %v5436_v62 = vpop.f32.mrf.mxu3  ;;  %5937 = vmatpush.bf16.msra.mxu2 %v9847_v6  ;;  %v11109_v6 = vld [vmem:[%s13444_s17 + $0x40] sm:$0xff] }
 0x4fe   :  { %v5437_v20 = vadd.f32 %v5436_v62, %v5424_v25  ;;  %v5412_v30 = vpop.f32.mrf.mxu1  ;;  %v5477_v25 = vld [vmem:[%s13445_s21] sm:$0x3]  ;;  %p11243_p4 = pnand %p11242_p3, %p11238_p0 }
 0x4ff   :  { %v5512_v62 = vperm.slane %v5477_v25, 0 }
 0x500   :  { %v5441_v12 = vadd.f32 %v5437_v20, %v5008_v26  ;;  %5924 = vmatpush.bf16.msra.mxu1 %v9907_v61  ;;  %5950 = vmatpush.bf16.msra.mxu3 %v9911_v9  ;;  %v11080_v26 = vld [vmem:[%s13443_s13 + $0x18] sm:$0xff]  ;;  %v5741_v9 = vperm.slane %v5510_v38, 1 }
 0x502   :  { %v5443_v44 = vmax.f32 %v5441_v12, 0.0  ;;  %v5513_v12 = vperm.slane %v5477_v25, 1 }
 0x504   :  { %v13260_v36 = vpack.c.bf16 %v5443_v44, %v5442_v5  ;;  %v11078_v44 = vld [vmem:[%s13443_s13 + $0x8] sm:$0xff] }
 0x505   :  { %v5438_v32 = vpop.f32.mrf.mxu3 }
 0x506   :  { %v5517_v23 = vunpack.c.l.b16 %v13260_v36  ;;  %v5518_v49 = vunpack.c.h.b16 %v13260_v36  ;;  %v5956_v4 = vunpack.c.l.bf16 %v13260_v36 }
 0x508   :  { %v5519_v11 = vpack.c.b16 %v5517_v23, %v5517_v23  ;;  %v5520_v28 = vpack.c.b16 %v5518_v49, %v5518_v49 }
 0x50a   :  { %5691 = vmatmul.bf16.vlgmr.msrb.gmra.mxu0 %v5519_v11  ;;  %5704 = vmatmul.bf16.vlgmr.msrb.gmra.mxu1 %v5520_v28 }
 0x50b   :  { %5717 = vmatmul.bf16.vlgmr.msrb.gmra.mxu2 %v5519_v11  ;;  %5730 = vmatmul.bf16.vlgmr.msrb.gmra.mxu3 %v5520_v28 }
 0x50c   :  { %6146 = vmatpush.bf16.msrb.mxu0 %v11084_v18  ;;  %6337 = vmatpush.bf16.msrb.mxu3 %v11108_v24 }
 0x50d   :  { %6159 = vmatpush.bf16.msrb.mxu1 %v11092_v29  ;;  %6225 = vmatpush.bf16.msrb.mxu2 %v11100_v10 }
 0x510   :  { %6147 = vmatpush.bf16.msrb.mxu0 %v11083_v27  ;;  %6338 = vmatpush.bf16.msrb.mxu3 %v11107_v57  ;;  %v11097_v27 = vld [vmem:[%s13447_s29 + $0x20] sm:$0xff] }
 0x511   :  { %6160 = vmatpush.bf16.msrb.mxu1 %v11091_v40  ;;  %6226 = vmatpush.bf16.msrb.mxu2 %v11099_v13  ;;  %v11126_v13 = vld [vmem:[%s13451_s19 + $0x8] sm:$0xff] }
 0x514   :  { %6148 = vmatpush.bf16.msrb.mxu0 %v11082_v41  ;;  %6339 = vmatpush.bf16.msrb.mxu3 %v11106_v34 }
 0x515   :  { %6161 = vmatpush.bf16.msrb.mxu1 %v11090_v63  ;;  %6227 = vmatpush.bf16.msrb.mxu2 %v11098_v33  ;;  %v5957_v63 = vunpack.c.h.bf16 %v13260_v36  ;;  %v11095_v36 = vld [vmem:[%s13447_s29 + $0x10] sm:$0xff]  ;;  %v11152_v33 = vld [vmem:[%s13454_s20 + $0x38] sm:$0xff] }
 0x518   :  { %6149 = vmatpush.bf16.msrb.mxu0 %v11081_v22  ;;  %6340 = vmatpush.bf16.msrb.mxu3 %v11105_v16  ;;  %v11096_v22 = vld [vmem:[%s13447_s29 + $0x18] sm:$0xff] }
 0x519   :  { %6162 = vmatpush.bf16.msrb.mxu1 %v11089_v55  ;;  %6228 = vmatpush.bf16.msrb.mxu2 %v11097_v27  ;;  %v11136_v27 = vld [vmem:[%s13453_s6 + $0x18] sm:$0xff] }
 0x51c   :  { %6150 = vmatpush.bf16.msrb.mxu0 %v11080_v26  ;;  %6341 = vmatpush.bf16.msrb.mxu3 %v11104_v0 }
 0x51d   :  { %6163 = vmatpush.bf16.msrb.mxu1 %v11088_v60  ;;  %6229 = vmatpush.bf16.msrb.mxu2 %v11096_v22 }
 0x520   :  { %6151 = vmatpush.bf16.msrb.mxu0 %v11079_v58  ;;  %6342 = vmatpush.bf16.msrb.mxu3 %v11103_v56  ;;  %v11093_v58 = vld [vmem:[%s13447_s29] sm:$0xff] }
 0x521   :  { %6164 = vmatpush.bf16.msrb.mxu1 %v11087_v1  ;;  %6230 = vmatpush.bf16.msrb.mxu2 %v11095_v36  ;;  %v11132_v1 = vld [vmem:[%s13451_s19 + $0x38] sm:$0xff] }
 0x522   :  { %v11144_v36 = vld [vmem:[%s13456_s16 + $0x18] sm:$0xff] }
 0x524   :  { %6152 = vmatpush.bf16.msrb.mxu0 %v11078_v44  ;;  %6343 = vmatpush.bf16.msrb.mxu3 %v11102_v42  ;;  %v11118_v42 = vld [vmem:[%s13448_s3 + $0x8] sm:$0xff] }
 0x525   :  { %6165 = vmatpush.bf16.msrb.mxu1 %v11086_v2  ;;  %v11129_v2 = vld [vmem:[%s13451_s19 + $0x20] sm:$0xff] }
 0x528   :  { %6153 = vmatpush.bf16.msrb.mxu0 %v11077_v47  ;;  %6344 = vmatpush.bf16.msrb.mxu3 %v11101_v35  ;;  %v11131_v35 = vld [vmem:[%s13451_s19 + $0x30] sm:$0xff] }
 0x529   :  { %6166 = vmatpush.bf16.msrb.mxu1 %v11085_v51  ;;  %v11127_v51 = vld [vmem:[%s13451_s19 + $0x10] sm:$0xff] }
 0x587   :  { %v5692_v39 = vpop.f32.mrf.mxu0  ;;  %v5705_v20 = vpop.f32.mrf.mxu1 }
 0x588   :  { %v5693_v30 = vadd.f32 %v5692_v39, %v5512_v62 }
 0x58a   :  { %v5706_v54 = vadd.f32 %v5705_v20, %v5693_v30  ;;  %v11094_v30 = vld [vmem:[%s13447_s29 + $0x8] sm:$0xff] }
 0x58b   :  { %6231 = vmatpush.bf16.msrb.mxu2 %v11094_v30  ;;  %v11216_v30 = vld [vmem:[%s13457_s18] ss:$0 sm:$0xff] }
 0x58c   :  { %v5735_v5 = vmax.f32 %v5706_v54, 0.0  ;;  %v11124_v54 = vld [vmem:[%s13448_s3 + $0x38] sm:$0xff] }
 0x58e   :  { %v5737_v32 = vpack.c.bf16 %v5735_v5, %v5735_v5  ;;  %v5718_v23 = vpop.f32.mrf.mxu2  ;;  %v5731_v49 = vpop.f32.mrf.mxu3  ;;  %v11122_v5 = vld [vmem:[%s13448_s3 + $0x28] sm:$0xff] }
 0x58f   :  { %v5719_v11 = vadd.f32 %v5718_v23, %v5513_v12  ;;  %v5694_v28 = vpop.f32.mrf.mxu0  ;;  %v5707_v53 = vpop.f32.mrf.mxu1  ;;  %6232 = vmatpush.bf16.msrb.mxu2 %v11093_v58  ;;  %v11123_v12 = vld [vmem:[%s13448_s3 + $0x30] sm:$0xff]  ;;  %v11121_v23 = vld [vmem:[%s13448_s3 + $0x20] sm:$0xff] }
 0x590   :  { %5912 = vmatmul.bf16.vlgmr.msra.gmra.mxu0 %v5737_v32  ;;  %5938 = vmatmul.bf16.vlgmr.msra.gmra.mxu2 %v5737_v32  ;;  %v11212_v32 = vld [vmem:[%s13449_s8] ss:$0 sm:$0xff]  ;;  %v11120_v53 = vld [vmem:[%s13448_s3 + $0x18] sm:$0xff] }
 0x591   :  { %v5732_v59 = vadd.f32 %v5731_v49, %v5719_v11  ;;  %6350 = vmatpush.bf16.msra.mxu0 %v11116_v31 }
 0x593   :  { %v5736_v48 = vmax.f32 %v5732_v59, 0.0  ;;  %6517 = vmatpush.bf16.msra.mxu2 %v11132_v1  ;;  %v11217_v1 = vld [vmem:[%s13461_s28] ss:$0 sm:$0xff] }
 0x595   :  { %v5738_v52 = vpack.c.bf16 %v5736_v48, %v5736_v48  ;;  %6351 = vmatpush.bf16.msra.mxu0 %v11115_v50 }
 0x596   :  { %v5720_v8 = vpop.f32.mrf.mxu2  ;;  %v5733_v21 = vpop.f32.mrf.mxu3 }
 0x597   :  { %5925 = vmatmul.bf16.vlgmr.msra.gmra.mxu1 %v5738_v52  ;;  %5951 = vmatmul.bf16.vlgmr.msra.gmra.mxu3 %v5738_v52  ;;  %v11119_v52 = vld [vmem:[%s13448_s3 + $0x10] sm:$0xff]  ;;  %v11213_v21 = vld [vmem:[%s13450_s14] ss:$0 sm:$0xff] }
 0x598   :  { %6451 = vmatpush.bf16.msra.mxu1 %v11124_v54  ;;  %6518 = vmatpush.bf16.msra.mxu2 %v11131_v35  ;;  %v11219_v35 = vld [vmem:[%s13462_s1] ss:$0 sm:$0xff] }
 0x599   :  { %6352 = vmatpush.bf16.msra.mxu0 %v11114_v7  ;;  %v11117_v7 = vld [vmem:[%s13448_s3] sm:$0xff] }
 0x59c   :  { %6452 = vmatpush.bf16.msra.mxu1 %v11123_v12 }
 0x59d   :  { %6353 = vmatpush.bf16.msra.mxu0 %v11113_v46  ;;  %v11130_v46 = vld [vmem:[%s13451_s19 + $0x28] sm:$0xff] }
 0x59e   :  { %6519 = vmatpush.bf16.msra.mxu2 %v11130_v46 }
 0x5a0   :  { %6453 = vmatpush.bf16.msra.mxu1 %v11122_v5 }
 0x5a1   :  { %6354 = vmatpush.bf16.msra.mxu0 %v11112_v3  ;;  %v11128_v3 = vld [vmem:[%s13451_s19 + $0x18] sm:$0xff] }
 0x5a2   :  { %6520 = vmatpush.bf16.msra.mxu2 %v11129_v2 }
 0x5a4   :  { %6454 = vmatpush.bf16.msra.mxu1 %v11121_v23 }
 0x5a5   :  { %6355 = vmatpush.bf16.msra.mxu0 %v11111_v17  ;;  %v11214_v17 = vld [vmem:[%s13452_s24] ss:$0 sm:$0xff] }
 0x5a6   :  { %6521 = vmatpush.bf16.msra.mxu2 %v11128_v3 }
 0x5a8   :  { %6455 = vmatpush.bf16.msra.mxu1 %v11120_v53  ;;  %v11156_v53 = vld [vmem:[%s13458_s22 + $0x18] sm:$0xff] }
 0x5a9   :  { %6356 = vmatpush.bf16.msra.mxu0 %v11110_v37 }
 0x5aa   :  { %6522 = vmatpush.bf16.msra.mxu2 %v11127_v51 }
 0x5ac   :  { %6456 = vmatpush.bf16.msra.mxu1 %v11119_v52 }
 0x5ad   :  { %6357 = vmatpush.bf16.msra.mxu0 %v11109_v6 }
 0x5ae   :  { %6523 = vmatpush.bf16.msra.mxu2 %v11126_v13 }
 0x5b0   :  { %6457 = vmatpush.bf16.msra.mxu1 %v11118_v42  ;;  %v11159_v42 = vld [vmem:[%s13460_s26 + $0x10] sm:$0xff] }
 0x5b4   :  { %6458 = vmatpush.bf16.msra.mxu1 %v11117_v7  ;;  %v11158_v7 = vld [vmem:[%s13460_s26 + $0x8] sm:$0xff] }
 0x60d   :  { %v5913_v45 = vpop.f32.mrf.mxu0 }
 0x60e   :  { %v5914_v14 = vadd.f32 %v5913_v45, %v5740_v19 }
 0x613   :  { %v5939_v15 = vpop.f32.mrf.mxu2 }
 0x614   :  { %v5926_v43 = vpop.f32.mrf.mxu1  ;;  %v5940_v57 = vadd.f32 %v5939_v15, %v5741_v9  ;;  %v11140_v15 = vld [vmem:[%s13453_s6 + $0x38] sm:$0xff]  ;;  %v11150_v9 = vld [vmem:[%s13454_s20 + $0x28] sm:$0xff] }
 0x615   :  { %v5927_v61 = vadd.f32 %v5926_v43, %v5914_v14  ;;  %v5915_v18 = vpop.f32.mrf.mxu0  ;;  %v11125_v14 = vld [vmem:[%s13451_s19] sm:$0xff]  ;;  %6628 = vmatpush.bf16.msra.mxu3 %v11140_v15  ;;  %v11139_v43 = vld [vmem:[%s13453_s6 + $0x30] sm:$0xff] }
 0x616   :  { %6524 = vmatpush.bf16.msra.mxu2 %v11125_v14  ;;  %v11137_v18 = vld [vmem:[%s13453_s6 + $0x20] sm:$0xff] }
 0x617   :  { %v5958_v24 = vadd.f32 %v5956_v4, %v5927_v61  ;;  %v11151_v61 = vld [vmem:[%s13454_s20 + $0x30] sm:$0xff]  ;;  %v11138_v4 = vld [vmem:[%s13453_s6 + $0x28] sm:$0xff] }
 0x619   :  { %v5960_v29 = vmax.f32 %v5958_v24, 0.0  ;;  %6629 = vmatpush.bf16.msra.mxu3 %v11139_v43  ;;  %v11149_v24 = vld [vmem:[%s13454_s20 + $0x20] sm:$0xff] }
 0x61a   :  { %v5952_v40 = vpop.f32.mrf.mxu3 }
 0x61b   :  { %v5962_v41 = vpack.c.bf16 %v5960_v29, %v5960_v29  ;;  %v5953_v34 = vadd.f32 %v5952_v40, %v5940_v57  ;;  %v5941_v25 = vpop.f32.mrf.mxu2  ;;  %v11148_v29 = vld [vmem:[%s13454_s20 + $0x18] sm:$0xff]  ;;  %v11135_v57 = vld [vmem:[%s13453_s6 + $0x10] sm:$0xff] }
 0x61c   :  { %v5928_v16 = vpop.f32.mrf.mxu1  ;;  %v11147_v40 = vld [vmem:[%s13454_s20 + $0x10] sm:$0xff] }
 0x61d   :  { %v5959_v62 = vadd.f32 %v5957_v63, %v5953_v34  ;;  %6154 = vmatmul.bf16.vlgmr.msrb.gmra.mxu0 %v5962_v41  ;;  %6345 = vmatmul.bf16.vlgmr.msrb.gmra.mxu3 %v5962_v41  ;;  %v11215_v41 = vld [vmem:[%s13455_s15] ss:$0 sm:$0xff] }
 0x61e   :  { %6630 = vmatpush.bf16.msra.mxu3 %v11138_v4  ;;  %6678 = vmatpush.bf16.msrb.mxu0 %v11144_v36  ;;  %v11161_v4 = vld [vmem:[%s11495_s12] sm:$0xff] }
 0x61f   :  { %v5961_v26 = vmax.f32 %v5959_v62, 0.0  ;;  %v11134_v62 = vld [vmem:[%s13453_s6 + $0x8] sm:$0xff] }
 0x621   :  { %v5963_v39 = vpack.c.bf16 %v5961_v26, %v5961_v26  ;;  %v11146_v26 = vld [vmem:[%s13454_s20 + $0x8] sm:$0xff] }
 0x622   :  { %v5954_v20 = vpop.f32.mrf.mxu3  ;;  %6631 = vmatpush.bf16.msra.mxu3 %v11137_v18  ;;  %v11167_v18 = vld [vmem:[%s11500_s27 + $0x10] sm:$0xff] }
 0x623   :  { %6167 = vmatmul.bf16.vlgmr.msrb.gmra.mxu1 %v5963_v39  ;;  %v11145_v20 = vld [vmem:[%s13454_s20] sm:$0xff] }
 0x624   :  { %6738 = vmatpush.bf16.msrb.mxu1 %v11152_v33 }
 0x626   :  { %6632 = vmatpush.bf16.msra.mxu3 %v11136_v27  ;;  %v11165_v27 = vld [vmem:[%s11500_s27] sm:$0xff] }
 0x628   :  { %6739 = vmatpush.bf16.msrb.mxu1 %v11151_v61  ;;  %v11162_v61 = vld [vmem:[%s11495_s12 + $0x8] sm:$0xff] }
 0x62a   :  { %6633 = vmatpush.bf16.msra.mxu3 %v11135_v57 }
 0x62c   :  { %6740 = vmatpush.bf16.msrb.mxu1 %v11150_v9  ;;  %v11168_v9 = vld [vmem:[%s11500_s27 + $0x18] sm:$0xff] }
 0x62d   :  { %6358 = vmatmul.bf16.vlgmr.msra.gmra.mxu0 %v5963_v39  ;;  %v11133_v39 = vld [vmem:[%s13453_s6] sm:$0xff] }
 0x62e   :  { %6634 = vmatpush.bf16.msra.mxu3 %v11134_v62 }
 0x630   :  { %6741 = vmatpush.bf16.msrb.mxu1 %v11149_v24  ;;  %v11166_v24 = vld [vmem:[%s11500_s27 + $0x8] sm:$0xff] }
 0x632   :  { %6635 = vmatpush.bf16.msra.mxu3 %v11133_v39  ;;  %v11222_v39 = vld [vmem:[%s11505_s4] ss:$0 sm:$0xff] }
 0x634   :  { %6742 = vmatpush.bf16.msrb.mxu1 %v11148_v29  ;;  %v11221_v29 = vld [vmem:[%s13464_s7] ss:$0 sm:$0xff] }
 0x638   :  { %6743 = vmatpush.bf16.msrb.mxu1 %v11147_v40 }
 0x63c   :  { %6744 = vmatpush.bf16.msrb.mxu1 %v11146_v26 }
 0x640   :  { %6745 = vmatpush.bf16.msrb.mxu1 %v11145_v20 }
 0x69a   :  { %v6155_v44 = vpop.f32.mrf.mxu0 }
 0x69b   :  { %v6156_v49 = vadd.f32 %v11212_v32, %v6155_v44 }
 0x6a0   :  { %v6168_v11 = vpop.f32.mrf.mxu1  ;;  %v6346_v28 = vpop.f32.mrf.mxu3 }
 0x6a1   :  { %v6169_v59 = vadd.f32 %v6168_v11, %v6156_v49  ;;  %v6347_v55 = vadd.f32 %v11213_v21, %v6346_v28  ;;  %v11143_v49 = vld [vmem:[%s13456_s16 + $0x10] sm:$0xff]  ;;  %v11142_v11 = vld [vmem:[%s13456_s16 + $0x8] sm:$0xff]  ;;  %v11141_v28 = vld [vmem:[%s13456_s16] sm:$0xff] }
 0x6a2   :  { %v6157_v47 = vpop.f32.mrf.mxu0  ;;  %6679 = vmatpush.bf16.msrb.mxu0 %v11143_v49 }
 0x6a3   :  { %v6172_v48 = vmax.f32 %v6169_v59, 0.0  ;;  %v11155_v59 = vld [vmem:[%s13458_s22 + $0x10] sm:$0xff] }
 0x6a5   :  { %v6173_v8 = vpack.c.bf16 %v6172_v48, %v6172_v48  ;;  %v11218_v48 = vld [vmem:[%s13459_s23] ss:$0 sm:$0xff] }
 0x6a6   :  { %6680 = vmatpush.bf16.msrb.mxu0 %v11142_v11 }
 0x6a7   :  { %6233 = vmatmul.bf16.vlgmr.msrb.gmra.mxu2 %v6173_v8 }
 0x6a8   :  { %v6170_v0 = vpop.f32.mrf.mxu1  ;;  %v6348_v31 = vpop.f32.mrf.mxu3  ;;  %6806 = vmatpush.bf16.msrb.mxu2 %v11156_v53 }
 0x6aa   :  { %v6359_v56 = vpop.f32.mrf.mxu0  ;;  %6681 = vmatpush.bf16.msrb.mxu0 %v11141_v28 }
 0x6ab   :  { %v6360_v50 = vadd.f32 %v6359_v56, %v6347_v55  ;;  %v11154_v56 = vld [vmem:[%s13458_s22 + $0x8] sm:$0xff] }
 0x6ac   :  { %6807 = vmatpush.bf16.msrb.mxu2 %v11155_v59 }
 0x6b0   :  { %6808 = vmatpush.bf16.msrb.mxu2 %v11154_v56 }
 0x6b2   :  { %v6361_v60 = vpop.f32.mrf.mxu0 }
 0x6b3   :  { %v11160_v60 = vld [vmem:[%s13460_s26 + $0x18] sm:$0xff] }
 0x6b4   :  { %6851 = vmatpush.bf16.msrb.mxu3 %v11160_v60 }
 0x6b8   :  { %6852 = vmatpush.bf16.msrb.mxu3 %v11159_v42 }
 0x6bc   :  { %6853 = vmatpush.bf16.msrb.mxu3 %v11158_v7 }
 0x72a   :  { %v6234_v37 = vpop.f32.mrf.mxu2 }
 0x72b   :  { %v6235_v6 = vadd.f32 %v11214_v17, %v6234_v37 }
 0x72d   :  { %v6363_v38 = vadd.f32 %v6360_v50, %v6235_v6  ;;  %v11153_v50 = vld [vmem:[%s13458_s22] sm:$0xff] }
 0x72e   :  { %6809 = vmatpush.bf16.msrb.mxu2 %v11153_v50 }
 0x72f   :  { %v6364_v45 = vmax.f32 %v6363_v38, 0.0  ;;  %v11157_v38 = vld [vmem:[%s13460_s26] sm:$0xff] }
 0x730   :  { %6854 = vmatpush.bf16.msrb.mxu3 %v11157_v38 }
 0x731   :  { %v6365_v10 = vpack.c.bf16 %v6364_v45, %v6364_v45  ;;  %v11164_v45 = vld [vmem:[%s11495_s12 + $0x18] sm:$0xff] }
 0x732   :  { %v6236_v19 = vpop.f32.mrf.mxu2  ;;  %6912 = vmatpush.bf16.msra.mxu0 %v11164_v45 }
 0x733   :  { %6459 = vmatmul.bf16.vlgmr.msra.gmra.mxu1 %v6365_v10  ;;  %v6530_v12 = vunpack.c.l.bf16 %v6365_v10  ;;  %v11163_v10 = vld [vmem:[%s11495_s12 + $0x10] sm:$0xff]  ;;  %v11220_v19 = vld [vmem:[%s13463_s2] ss:$0 sm:$0xff]  ;;  %s11291_s12 = smov [#allocation2]  }
 0x734   :  { %s6971_s27 = sshll.u32 %s11291_s12, 4  ;;  %s6972_s27 = int_to_ptr.vmem [resolvable:$true] %s6971_s27 }
 0x736   :  { %6913 = vmatpush.bf16.msra.mxu0 %v11163_v10 }
 0x73a   :  { %6914 = vmatpush.bf16.msra.mxu0 %v11162_v61 }
 0x73e   :  { %6915 = vmatpush.bf16.msra.mxu0 %v11161_v4 }
 0x7b0   :  { %v6460_v34 = vpop.f32.mrf.mxu1 }
 0x7b1   :  { %v6461_v63 = vadd.f32 %v11215_v41, %v6460_v34 }
 0x7b3   :  { %v6464_v25 = vmax.f32 %v6461_v63, 0.0 }
 0x7b5   :  { %v6465_v22 = vpack.c.bf16 %v6464_v25, %v6464_v25 }
 0x7b7   :  { %6525 = vmatmul.bf16.vlgmr.msra.gmra.mxu2 %v6465_v22 }
 0x7b8   :  { %v6462_v16 = vpop.f32.mrf.mxu1  ;;  %6956 = vmatpush.bf16.msra.mxu2 %v11168_v9 }
 0x7bc   :  { %6957 = vmatpush.bf16.msra.mxu2 %v11167_v18 }
 0x7c0   :  { %6958 = vmatpush.bf16.msra.mxu2 %v11166_v24 }
 0x7c4   :  { %6959 = vmatpush.bf16.msra.mxu2 %v11165_v27 }
 0x83a   :  { %v6526_v58 = vpop.f32.mrf.mxu2 }
 0x83b   :  { %v6527_v54 = vadd.f32 %v11216_v30, %v6526_v58 }
 0x83d   :  { %v6531_v5 = vadd.f32 %v6530_v12, %v6527_v54 }
 0x83f   :  { %v6532_v44 = vmax.f32 %v6531_v5, 0.0 }
 0x841   :  { %v6533_v32 = vpack.c.bf16 %v6532_v44, %v6532_v44 }
 0x842   :  { %v6528_v23 = vpop.f32.mrf.mxu2 }
 0x843   :  { %6636 = vmatmul.bf16.vlgmr.msra.gmra.mxu3 %v6533_v32  ;;  %6746 = vmatmul.bf16.vlgmr.msrb.gmra.mxu1 %v6533_v32 }
 0x8c0   :  { %v6747_v47 = vpop.f32.mrf.mxu1 }
 0x8c1   :  { %v6748_v2 = vadd.f32 %v11217_v1, %v6747_v47 }
 0x8c6   :  { %v6637_v52 = vpop.f32.mrf.mxu3 }
 0x8c7   :  { %v6638_v8 = vadd.f32 %v11218_v48, %v6637_v52 }
 0x8c8   :  { %v6749_v21 = vpop.f32.mrf.mxu1 }
 0x8c9   :  { %v6641_v0 = vmax.f32 %v6638_v8, 0.0 }
 0x8cb   :  { %v6642_v31 = vpack.c.bf16 %v6641_v0, %v6641_v0 }
 0x8cd   :  { %10240 = vmatmul.msk.bf16.vlgmr.msrb.gmra.mxu0 %vm6670_vm0, %v6642_v31 }
 0x8ce   :  { %v6639_v55 = vpop.f32.mrf.mxu3 }
 0x94a   :  { %v6683_v46 = vpop.f32.mrf.mxu0 }
 0x94b   :  { %v6684_v3 = vadd.f32 %v11219_v35, %v6683_v46 }
 0x94d   :  { %v6751_v51 = vadd.f32 %v6748_v2, %v6684_v3 }
 0x94f   :  { %v6752_v17 = vmax.f32 %v6751_v51, 0.0 }
 0x951   :  { %v6753_v37 = vpack.c.bf16 %v6752_v17, %v6752_v17 }
 0x952   :  { %v6685_v6 = vpop.f32.mrf.mxu0 }
 0x953   :  { %10289 = vmatmul.msk.bf16.vlgmr.msrb.gmra.mxu2 %vm6670_vm0, %v6753_v37  ;;  %v6860_v41 = vunpack.c.l.bf16 %v6753_v37 }
 0x9d6   :  { %v6811_v13 = vpop.f32.mrf.mxu2 }
 0x9d7   :  { %v6812_v14 = vadd.f32 %v11220_v19, %v6811_v13 }
 0x9d9   :  { %v6815_v15 = vmax.f32 %v6812_v14, 0.0 }
 0x9db   :  { %v6816_v33 = vpack.c.bf16 %v6815_v15, %v6815_v15 }
 0x9dd   :  { %10306 = vmatmul.msk.bf16.vlgmr.msrb.gmra.mxu3 %vm6670_vm0, %v6816_v33 }
 0x9de   :  { %v6813_v43 = vpop.f32.mrf.mxu2 }
 0xa60   :  { %v6856_v57 = vpop.f32.mrf.mxu3 }
 0xa61   :  { %v6857_v40 = vadd.f32 %v11221_v29, %v6856_v57 }
 0xa63   :  { %v6861_v34 = vadd.f32 %v6860_v41, %v6857_v40 }
 0xa65   :  { %v6862_v63 = vmax.f32 %v6861_v34, 0.0 }
 0xa67   :  { %v6863_v25 = vpack.c.bf16 %v6862_v63, %v6862_v63 }
 0xa68   :  { %v6858_v22 = vpop.f32.mrf.mxu3 }
 0xa69   :  { %10323 = vmatmul.msk.bf16.vlgmr.msra.gmra.mxu0 %vm6670_vm0, %v6863_v25 }
 0xae6   :  { %v6917_v16 = vpop.f32.mrf.mxu0 }
 0xae7   :  { %v6921_v62 = vpack.c.bf16 %v6917_v16, %v6917_v16 }
 0xae9   :  { %10340 = vmatmul.msk.bf16.vlgmr.msra.gmra.mxu2 %vm6670_vm0, %v6921_v62 }
 0xaee   :  { %v6919_v26 = vpop.f32.mrf.mxu0 }
 0xb6c   :  { %v6961_v20 = vpop.f32.mrf.mxu2 }
 0xb6d   :  { %v6962_v36 = vadd.f32 %v11222_v39, %v6961_v20 }
 0xb6f   :  { %6965 = vst [vmem:[#allocation2] sm:$0x3] %v6962_v36 }
 0xb70   :  { %11246 = shalt.err (!%p11243_p4)
}
 0xb71   :  { %6976 = dma.vmem_to_hbm [thread:$0]  %s6972_s27, 32, %s6974_s10, [#allocation3]  }
 0xb74   :  { %v6963_v30 = vpop.f32.mrf.mxu2 }
 0xb75   :  { %11247 = dma.done.wait [#allocation3], 32  }
 0xb76   :  { %11248 = vsyncadd [#allocation3], 4294967264 }
 0xb77   :  { %6981 = vsyncpa [#allocation3], 1 }

</bundles_post_ra>
